<compile_context>
chip_gen: v5e
topology: v5e:2x2
jax: 0.10.0
libtpu: 0.0.40
codegen_flags: <defaults>
</compile_context>

<pallas_src>
import math

import jax
import jax.numpy as jnp
from jax import lax
from jax.experimental import pallas as pl
from jax.experimental.pallas import tpu as pltpu


def _erf_f32(x):
    # Abramowitz & Stegun 7.1.26 rational approximation, |err| <= 1.5e-7
    # (f32-exact for our purposes). Uses only exp/div/mul/add so it lowers on
    # every TPU generation without relying on an erf primitive in Mosaic; the
    # exp lands on the EUP (its own bundle slot), so it overlaps VPU work.
    a1, a2, a3, a4, a5 = (0.254829592, -0.284496736, 1.421413741,
                          -1.453152027, 1.061405429)
    p = 0.3275911
    sgn = jnp.where(x >= 0.0, 1.0, -1.0)
    ax = jnp.abs(x)
    t = 1.0 / (1.0 + p * ax)
    poly = ((((a5 * t + a4) * t + a3) * t + a2) * t + a1) * t
    return sgn * (1.0 - poly * jnp.exp(-ax * ax))


def _gelu_exact(x):
    # torch.nn.functional.gelu default ("exact", erf-based) GELU.
    return 0.5 * x * (1.0 + _erf_f32(x * (1.0 / math.sqrt(2.0))))


def _ffn_kernel(x_ref, w_in_ref, b_in_ref, w_dw_ref, b_dw_ref,
                w_out_ref, b_out_ref, o_ref):
    # x_ref    : (H, W, C)   one image, channels-last
    # w_in_ref : (C, 2F)     project_in weight (transposed torch 1x1 conv)
    # b_in_ref : (1, 2F)
    # w_dw_ref : (9, 2F)     depthwise 3x3 taps, tap (ky, kx) at row ky*3+kx
    # b_dw_ref : (1, 2F)
    # w_out_ref: (F, C)      project_out weight
    # b_out_ref: (1, C)
    # o_ref    : (H, W, C)
    H, W, C = x_ref.shape
    F2 = w_in_ref.shape[1]          # 2 * hidden
    Fh = F2 // 2                    # hidden

    x = x_ref[...].astype(jnp.float32)

    # ---- project_in: 1x1 conv == per-pixel channel matmul (MXU, lane-dense 2F) ----
    t = jnp.dot(x.reshape(H * W, C), w_in_ref[...].astype(jnp.float32),
                preferred_element_type=jnp.float32,
                precision=lax.Precision.HIGHEST)
    t = t + b_in_ref[...].astype(jnp.float32)         # (H*W, 2F)
    t = t.reshape(H, W, F2)                            # free: minor dim unchanged

    # ---- 3x3 depthwise conv, padding=1: zero-pad H/W, 9 shifted broadcast MACs ----
    zrow = jnp.zeros((1, W, F2), jnp.float32)
    tp = jnp.concatenate([zrow, t, zrow], axis=0)      # (H+2, W,   2F)
    zcol = jnp.zeros((H + 2, 1, F2), jnp.float32)
    tp = jnp.concatenate([zcol, tp, zcol], axis=1)     # (H+2, W+2, 2F)

    w_dw = w_dw_ref[...].astype(jnp.float32)           # (9, 2F)
    b_dw = b_dw_ref[...].astype(jnp.float32)           # (1, 2F)

    # Seed the accumulator with the center tap (no shifted slice needed) + bias.
    acc = t * w_dw[4:5, :] + b_dw                      # (H, W, 2F)
    for ky in range(3):                                # statically unrolled (8 taps)
        for kx in range(3):
            if ky == 1 and kx == 1:
                continue
            tap = w_dw[ky * 3 + kx:ky * 3 + kx + 1, :]          # (1, 2F) broadcast
            acc = acc + tp[ky:ky + H, kx:kx + W, :] * tap

    # ---- gating: GELU(x1) * x2 (chunk over the channel/lane dim) ----
    x1 = acc[:, :, :Fh]
    x2 = acc[:, :, Fh:]
    g = _gelu_exact(x1) * x2                           # (H, W, F)

    # ---- project_out: 1x1 conv hidden -> dim (MXU) ----
    y = jnp.dot(g.reshape(H * W, Fh), w_out_ref[...].astype(jnp.float32),
                preferred_element_type=jnp.float32,
                precision=lax.Precision.HIGHEST)
    y = y + b_out_ref[...].astype(jnp.float32)         # (H*W, C)
    o_ref[...] = y.reshape(H, W, C).astype(o_ref.dtype)


def feed_forward(x_nchw, params):
    """Restormer FeedForward. x_nchw: (B, C, H, W), as in the PyTorch module."""
    w_in, b_in, w_dw, b_dw, w_out, b_out = params
    B, C, H, W = x_nchw.shape

    # NCHW -> NHWC so channels land on the lane dimension inside the kernel.
    x = jnp.transpose(x_nchw, (0, 2, 3, 1))            # (B, H, W, C)

    out = pl.pallas_call(
        _ffn_kernel,
        out_shape=jax.ShapeDtypeStruct((B, H, W, C), x.dtype),
        grid_spec=pltpu.PrefetchScalarGridSpec(
            num_scalar_prefetch=0,
            grid=(B,),
            in_specs=[
                pl.BlockSpec((None, H, W, C), lambda b: (b, 0, 0, 0)),
                pl.BlockSpec(w_in.shape, lambda b: (0, 0)),
                pl.BlockSpec(b_in.shape, lambda b: (0, 0)),
                pl.BlockSpec(w_dw.shape, lambda b: (0, 0)),
                pl.BlockSpec(b_dw.shape, lambda b: (0, 0)),
                pl.BlockSpec(w_out.shape, lambda b: (0, 0)),
                pl.BlockSpec(b_out.shape, lambda b: (0, 0)),
            ],
            out_specs=pl.BlockSpec((None, H, W, C), lambda b: (b, 0, 0, 0)),
        ),
        compiler_params=pltpu.CompilerParams(
            # batch axis is independent -> megacore / multi-TC split
            dimension_semantics=("parallel",),
            vmem_limit_bytes=32 * 1024 * 1024,
        ),
    )(x, w_in, b_in, w_dw, b_dw, w_out, b_out)

    return jnp.transpose(out, (0, 3, 1, 2))            # back to NCHW


def _reference_nchw(x, params):
    """Pure-XLA reference mirroring the PyTorch module (NCHW convs)."""
    w_in, b_in, w_dw, b_dw, w_out, b_out = params
    C = x.shape[1]
    F2 = w_in.shape[1]
    hid = F2 // 2
    dn = ("NCHW", "OIHW", "NCHW")

    wi = jnp.transpose(w_in, (1, 0))[:, :, None, None]            # (2F, C, 1, 1)
    y = lax.conv_general_dilated(x, wi, (1, 1), "VALID",
                                 dimension_numbers=dn,
                                 precision=lax.Precision.HIGHEST)
    y = y + b_in.reshape(1, F2, 1, 1)

    wd = jnp.transpose(w_dw, (1, 0)).reshape(F2, 1, 3, 3)          # (2F, 1, 3, 3)
    y = lax.conv_general_dilated(y, wd, (1, 1), ((1, 1), (1, 1)),
                                 dimension_numbers=dn,
                                 feature_group_count=F2,
                                 precision=lax.Precision.HIGHEST)
    y = y + b_dw.reshape(1, F2, 1, 1)

    x1, x2 = y[:, :hid], y[:, hid:]
    g = jax.nn.gelu(x1, approximate=False) * x2

    wo = jnp.transpose(w_out, (1, 0))[:, :, None, None]            # (C, F, 1, 1)
    out = lax.conv_general_dilated(g, wo, (1, 1), "VALID",
                                   dimension_numbers=dn,
                                   precision=lax.Precision.HIGHEST)
    return out + b_out.reshape(1, C, 1, 1)


if __name__ == "__main__":
    # Small shapes consistent with the module:
    #   dim=32, ffn_expansion_factor=2 -> hidden=64, 2*hidden=128 (lane-dense),
    #   bias=True, input (B, C, H, W) = (2, 32, 16, 16).
    B, C, H, W = 2, 32, 16, 16
    expansion = 2.0
    hidden = int(C * expansion)      # 64
    F2 = 2 * hidden                  # 128

    key = jax.random.PRNGKey(0)
    ks = jax.random.split(key, 7)
    x_nchw = jax.random.normal(ks[0], (B, C, H, W), dtype=jnp.float32)

    # Parameters with torch-style fan-in scaling, stored in kernel layout:
    #   project_in : (C, 2*hidden)   == torch (2h, C, 1, 1) transposed
    #   dwconv     : (9, 2*hidden)   == torch (2h, 1, 3, 3), tap-major
    #   project_out: (hidden, C)     == torch (C, hidden, 1, 1) transposed
    s_in, s_dw, s_out = 1.0 / math.sqrt(C), 1.0 / 3.0, 1.0 / math.sqrt(hidden)
    w_in = jax.random.uniform(ks[1], (C, F2), jnp.float32, -s_in, s_in)
    b_in = jax.random.uniform(ks[2], (1, F2), jnp.float32, -s_in, s_in)
    w_dw = jax.random.uniform(ks[3], (9, F2), jnp.float32, -s_dw, s_dw)
    b_dw = jax.random.uniform(ks[4], (1, F2), jnp.float32, -s_dw, s_dw)
    w_out = jax.random.uniform(ks[5], (hidden, C), jnp.float32, -s_out, s_out)
    b_out = jax.random.uniform(ks[6], (1, C), jnp.float32, -s_out, s_out)
    params = (w_in, b_in, w_dw, b_dw, w_out, b_out)

    out = feed_forward(x_nchw, params)
    out = jax.block_until_ready(out)

    ref = _reference_nchw(x_nchw, params)
    assert out.shape == x_nchw.shape and out.dtype == x_nchw.dtype
    max_err = float(jnp.max(jnp.abs(out - ref)))
    assert jnp.allclose(out, ref, atol=1e-4, rtol=1e-4), f"max abs err {max_err}"

    print("KERNEL_OK")
</pallas_src>

<mosaic_0001>
module attributes {stable_mosaic.version = 11 : i64} {
  func.func @_ffn_kernel(%arg0: i32, %arg1: memref<1x16x16x32xf32, #tpu.memory_space<vmem>>, %arg2: memref<32x128xf32, #tpu.memory_space<vmem>>, %arg3: memref<1x128xf32, #tpu.memory_space<vmem>>, %arg4: memref<9x128xf32, #tpu.memory_space<vmem>>, %arg5: memref<1x128xf32, #tpu.memory_space<vmem>>, %arg6: memref<64x32xf32, #tpu.memory_space<vmem>>, %arg7: memref<1x32xf32, #tpu.memory_space<vmem>>, %arg8: memref<1x16x16x32xf32, #tpu.memory_space<vmem>>) attributes {dimension_semantics = [#tpu.dimension_semantics<parallel>], iteration_bounds = array<i64: 2>, scalar_prefetch = 0 : i64, scratch_operands = 0 : i64, tpu.core_type = #tpu.core_type<tc>, window_params = [{transform_indices = @transform_0, window_bounds = array<i64: 1, 16, 16, 32>}, {pipeline_mode = #tpu.pipeline_mode<synchronous>, transform_indices = @transform_1, window_bounds = array<i64: 32, 128>}, {pipeline_mode = #tpu.pipeline_mode<synchronous>, transform_indices = @transform_2, window_bounds = array<i64: 1, 128>}, {pipeline_mode = #tpu.pipeline_mode<synchronous>, transform_indices = @transform_3, window_bounds = array<i64: 9, 128>}, {pipeline_mode = #tpu.pipeline_mode<synchronous>, transform_indices = @transform_4, window_bounds = array<i64: 1, 128>}, {pipeline_mode = #tpu.pipeline_mode<synchronous>, transform_indices = @transform_5, window_bounds = array<i64: 64, 32>}, {pipeline_mode = #tpu.pipeline_mode<synchronous>, transform_indices = @transform_6, window_bounds = array<i64: 1, 32>}, {transform_indices = @transform_7, window_bounds = array<i64: 1, 16, 16, 32>}]} {
    %c0 = arith.constant 0 : index
    %c0_0 = arith.constant 0 : index
    %c0_1 = arith.constant 0 : index
    %c0_2 = arith.constant 0 : index
    %0 = vector.load %arg1[%c0, %c0_0, %c0_1, %c0_2] : memref<1x16x16x32xf32, #tpu.memory_space<vmem>>, vector<1x16x16x32xf32>
    %1 = vector.shape_cast %0 : vector<1x16x16x32xf32> to vector<16x16x32xf32>
    %2 = vector.shape_cast %1 : vector<16x16x32xf32> to vector<256x32xf32>
    %c0_3 = arith.constant 0 : index
    %c0_4 = arith.constant 0 : index
    %3 = vector.load %arg2[%c0_3, %c0_4] : memref<32x128xf32, #tpu.memory_space<vmem>>, vector<32x128xf32>
    %cst = arith.constant dense<0.000000e+00> : vector<256x128xf32>
    %4 = tpu.matmul %2, %3, %cst {dimension_numbers = #tpu.dot_dimension_numbers<[1], [0], [0], [1], [0, 0, 1, 1], [], []>, precision = #tpu.contract_precision<fp32>} : vector<256x32xf32>, vector<32x128xf32>, vector<256x128xf32> -> vector<256x128xf32>
    %c0_5 = arith.constant 0 : index
    %c0_6 = arith.constant 0 : index
    %5 = vector.load %arg3[%c0_5, %c0_6] : memref<1x128xf32, #tpu.memory_space<vmem>>, vector<1x128xf32>
    %6 = vector.broadcast %5 : vector<1x128xf32> to vector<256x128xf32>
    %7 = arith.addf %4, %6 : vector<256x128xf32>
    %8 = vector.shape_cast %7 : vector<256x128xf32> to vector<16x16x128xf32>
    %cst_7 = arith.constant 0.000000e+00 : f32
    %9 = vector.broadcast %cst_7 : f32 to vector<1x16x128xf32>
    %10 = tpu.concatenate %9, %8, %9 in 0 : vector<1x16x128xf32>, vector<16x16x128xf32>, vector<1x16x128xf32> -> vector<18x16x128xf32>
    %cst_8 = arith.constant 0.000000e+00 : f32
    %11 = vector.broadcast %cst_8 : f32 to vector<18x1x128xf32>
    %12 = tpu.concatenate %11, %10, %11 in 1 : vector<18x1x128xf32>, vector<18x16x128xf32>, vector<18x1x128xf32> -> vector<18x18x128xf32>
    %c0_9 = arith.constant 0 : index
    %c0_10 = arith.constant 0 : index
    %13 = vector.load %arg4[%c0_9, %c0_10] : memref<9x128xf32, #tpu.memory_space<vmem>>, vector<9x128xf32>
    %c0_11 = arith.constant 0 : index
    %c0_12 = arith.constant 0 : index
    %14 = vector.load %arg5[%c0_11, %c0_12] : memref<1x128xf32, #tpu.memory_space<vmem>>, vector<1x128xf32>
    %15 = vector.extract_strided_slice %13 {offsets = [4, 0], sizes = [1, 128], strides = [1, 1]} : vector<9x128xf32> to vector<1x128xf32>
    %16 = vector.shape_cast %15 : vector<1x128xf32> to vector<1x1x128xf32>
    %17 = vector.broadcast %16 : vector<1x1x128xf32> to vector<16x16x128xf32>
    %18 = arith.mulf %8, %17 : vector<16x16x128xf32>
    %19 = vector.shape_cast %14 : vector<1x128xf32> to vector<1x1x128xf32>
    %20 = vector.broadcast %19 : vector<1x1x128xf32> to vector<16x16x128xf32>
    %21 = arith.addf %18, %20 : vector<16x16x128xf32>
    %22 = vector.extract_strided_slice %13 {offsets = [0, 0], sizes = [1, 128], strides = [1, 1]} : vector<9x128xf32> to vector<1x128xf32>
    %23 = vector.extract_strided_slice %12 {offsets = [0, 0, 0], sizes = [16, 16, 128], strides = [1, 1, 1]} : vector<18x18x128xf32> to vector<16x16x128xf32>
    %24 = vector.shape_cast %22 : vector<1x128xf32> to vector<1x1x128xf32>
    %25 = vector.broadcast %24 : vector<1x1x128xf32> to vector<16x16x128xf32>
    %26 = arith.mulf %23, %25 : vector<16x16x128xf32>
    %27 = arith.addf %21, %26 : vector<16x16x128xf32>
    %28 = vector.extract_strided_slice %13 {offsets = [1, 0], sizes = [1, 128], strides = [1, 1]} : vector<9x128xf32> to vector<1x128xf32>
    %29 = vector.extract_strided_slice %12 {offsets = [0, 1, 0], sizes = [16, 16, 128], strides = [1, 1, 1]} : vector<18x18x128xf32> to vector<16x16x128xf32>
    %30 = vector.shape_cast %28 : vector<1x128xf32> to vector<1x1x128xf32>
    %31 = vector.broadcast %30 : vector<1x1x128xf32> to vector<16x16x128xf32>
    %32 = arith.mulf %29, %31 : vector<16x16x128xf32>
    %33 = arith.addf %27, %32 : vector<16x16x128xf32>
    %34 = vector.extract_strided_slice %13 {offsets = [2, 0], sizes = [1, 128], strides = [1, 1]} : vector<9x128xf32> to vector<1x128xf32>
    %35 = vector.extract_strided_slice %12 {offsets = [0, 2, 0], sizes = [16, 16, 128], strides = [1, 1, 1]} : vector<18x18x128xf32> to vector<16x16x128xf32>
    %36 = vector.shape_cast %34 : vector<1x128xf32> to vector<1x1x128xf32>
    %37 = vector.broadcast %36 : vector<1x1x128xf32> to vector<16x16x128xf32>
    %38 = arith.mulf %35, %37 : vector<16x16x128xf32>
    %39 = arith.addf %33, %38 : vector<16x16x128xf32>
    %40 = vector.extract_strided_slice %13 {offsets = [3, 0], sizes = [1, 128], strides = [1, 1]} : vector<9x128xf32> to vector<1x128xf32>
    %41 = vector.extract_strided_slice %12 {offsets = [1, 0, 0], sizes = [16, 16, 128], strides = [1, 1, 1]} : vector<18x18x128xf32> to vector<16x16x128xf32>
    %42 = vector.shape_cast %40 : vector<1x128xf32> to vector<1x1x128xf32>
    %43 = vector.broadcast %42 : vector<1x1x128xf32> to vector<16x16x128xf32>
    %44 = arith.mulf %41, %43 : vector<16x16x128xf32>
    %45 = arith.addf %39, %44 : vector<16x16x128xf32>
    %46 = vector.extract_strided_slice %13 {offsets = [5, 0], sizes = [1, 128], strides = [1, 1]} : vector<9x128xf32> to vector<1x128xf32>
    %47 = vector.extract_strided_slice %12 {offsets = [1, 2, 0], sizes = [16, 16, 128], strides = [1, 1, 1]} : vector<18x18x128xf32> to vector<16x16x128xf32>
    %48 = vector.shape_cast %46 : vector<1x128xf32> to vector<1x1x128xf32>
    %49 = vector.broadcast %48 : vector<1x1x128xf32> to vector<16x16x128xf32>
    %50 = arith.mulf %47, %49 : vector<16x16x128xf32>
    %51 = arith.addf %45, %50 : vector<16x16x128xf32>
    %52 = vector.extract_strided_slice %13 {offsets = [6, 0], sizes = [1, 128], strides = [1, 1]} : vector<9x128xf32> to vector<1x128xf32>
    %53 = vector.extract_strided_slice %12 {offsets = [2, 0, 0], sizes = [16, 16, 128], strides = [1, 1, 1]} : vector<18x18x128xf32> to vector<16x16x128xf32>
    %54 = vector.shape_cast %52 : vector<1x128xf32> to vector<1x1x128xf32>
    %55 = vector.broadcast %54 : vector<1x1x128xf32> to vector<16x16x128xf32>
    %56 = arith.mulf %53, %55 : vector<16x16x128xf32>
    %57 = arith.addf %51, %56 : vector<16x16x128xf32>
    %58 = vector.extract_strided_slice %13 {offsets = [7, 0], sizes = [1, 128], strides = [1, 1]} : vector<9x128xf32> to vector<1x128xf32>
    %59 = vector.extract_strided_slice %12 {offsets = [2, 1, 0], sizes = [16, 16, 128], strides = [1, 1, 1]} : vector<18x18x128xf32> to vector<16x16x128xf32>
    %60 = vector.shape_cast %58 : vector<1x128xf32> to vector<1x1x128xf32>
    %61 = vector.broadcast %60 : vector<1x1x128xf32> to vector<16x16x128xf32>
    %62 = arith.mulf %59, %61 : vector<16x16x128xf32>
    %63 = arith.addf %57, %62 : vector<16x16x128xf32>
    %64 = vector.extract_strided_slice %13 {offsets = [8, 0], sizes = [1, 128], strides = [1, 1]} : vector<9x128xf32> to vector<1x128xf32>
    %65 = vector.extract_strided_slice %12 {offsets = [2, 2, 0], sizes = [16, 16, 128], strides = [1, 1, 1]} : vector<18x18x128xf32> to vector<16x16x128xf32>
    %66 = vector.shape_cast %64 : vector<1x128xf32> to vector<1x1x128xf32>
    %67 = vector.broadcast %66 : vector<1x1x128xf32> to vector<16x16x128xf32>
    %68 = arith.mulf %65, %67 : vector<16x16x128xf32>
    %69 = arith.addf %63, %68 : vector<16x16x128xf32>
    %70 = vector.extract_strided_slice %69 {offsets = [0, 0, 0], sizes = [16, 16, 64], strides = [1, 1, 1]} : vector<16x16x128xf32> to vector<16x16x64xf32>
    %71 = vector.extract_strided_slice %69 {offsets = [0, 0, 64], sizes = [16, 16, 64], strides = [1, 1, 1]} : vector<16x16x128xf32> to vector<16x16x64xf32>
    %cst_13 = arith.constant 5.000000e-01 : f32
    %72 = vector.broadcast %cst_13 : f32 to vector<16x16x64xf32>
    %73 = arith.mulf %72, %70 : vector<16x16x64xf32>
    %cst_14 = arith.constant 0.707106769 : f32
    %74 = vector.broadcast %cst_14 : f32 to vector<16x16x64xf32>
    %75 = arith.mulf %70, %74 : vector<16x16x64xf32>
    %cst_15 = arith.constant 0.000000e+00 : f32
    %76 = vector.broadcast %cst_15 : f32 to vector<16x16x64xf32>
    %77 = arith.cmpf oge, %75, %76 : vector<16x16x64xf32>
    %cst_16 = arith.constant 1.000000e+00 : f32
    %cst_17 = arith.constant -1.000000e+00 : f32
    %78 = vector.broadcast %cst_16 : f32 to vector<16x16x64xf32>
    %79 = vector.broadcast %cst_17 : f32 to vector<16x16x64xf32>
    %80 = arith.select %77, %78, %79 : vector<16x16x64xi1>, vector<16x16x64xf32>
    %81 = math.absf %75 : vector<16x16x64xf32>
    %cst_18 = arith.constant 0.327591091 : f32
    %82 = vector.broadcast %cst_18 : f32 to vector<16x16x64xf32>
    %83 = arith.mulf %82, %81 : vector<16x16x64xf32>
    %cst_19 = arith.constant 1.000000e+00 : f32
    %84 = vector.broadcast %cst_19 : f32 to vector<16x16x64xf32>
    %85 = arith.addf %84, %83 : vector<16x16x64xf32>
    %cst_20 = arith.constant 1.000000e+00 : f32
    %86 = vector.broadcast %cst_20 : f32 to vector<16x16x64xf32>
    %87 = arith.divf %86, %85 : vector<16x16x64xf32>
    %cst_21 = arith.constant 1.06140542 : f32
    %88 = vector.broadcast %cst_21 : f32 to vector<16x16x64xf32>
    %89 = arith.mulf %88, %87 : vector<16x16x64xf32>
    %cst_22 = arith.constant -1.45315206 : f32
    %90 = vector.broadcast %cst_22 : f32 to vector<16x16x64xf32>
    %91 = arith.addf %89, %90 : vector<16x16x64xf32>
    %92 = arith.mulf %91, %87 : vector<16x16x64xf32>
    %cst_23 = arith.constant 1.42141378 : f32
    %93 = vector.broadcast %cst_23 : f32 to vector<16x16x64xf32>
    %94 = arith.addf %92, %93 : vector<16x16x64xf32>
    %95 = arith.mulf %94, %87 : vector<16x16x64xf32>
    %cst_24 = arith.constant -0.284496725 : f32
    %96 = vector.broadcast %cst_24 : f32 to vector<16x16x64xf32>
    %97 = arith.addf %95, %96 : vector<16x16x64xf32>
    %98 = arith.mulf %97, %87 : vector<16x16x64xf32>
    %cst_25 = arith.constant 0.254829586 : f32
    %99 = vector.broadcast %cst_25 : f32 to vector<16x16x64xf32>
    %100 = arith.addf %98, %99 : vector<16x16x64xf32>
    %101 = arith.mulf %100, %87 : vector<16x16x64xf32>
    %cst_26 = arith.constant 0.000000e+00 : f32
    %102 = vector.broadcast %cst_26 : f32 to vector<16x16x64xf32>
    %103 = arith.subf %102, %81 : vector<16x16x64xf32>
    %104 = arith.mulf %103, %81 : vector<16x16x64xf32>
    %105 = math.exp %104 : vector<16x16x64xf32>
    %106 = arith.mulf %101, %105 : vector<16x16x64xf32>
    %cst_27 = arith.constant 1.000000e+00 : f32
    %107 = vector.broadcast %cst_27 : f32 to vector<16x16x64xf32>
    %108 = arith.subf %107, %106 : vector<16x16x64xf32>
    %109 = arith.mulf %80, %108 : vector<16x16x64xf32>
    %cst_28 = arith.constant 1.000000e+00 : f32
    %110 = vector.broadcast %cst_28 : f32 to vector<16x16x64xf32>
    %111 = arith.addf %110, %109 : vector<16x16x64xf32>
    %112 = arith.mulf %73, %111 : vector<16x16x64xf32>
    %113 = arith.mulf %112, %71 : vector<16x16x64xf32>
    %114 = vector.shape_cast %113 : vector<16x16x64xf32> to vector<256x64xf32>
    %c0_29 = arith.constant 0 : index
    %c0_30 = arith.constant 0 : index
    %115 = vector.load %arg6[%c0_29, %c0_30] : memref<64x32xf32, #tpu.memory_space<vmem>>, vector<64x32xf32>
    %cst_31 = arith.constant dense<0.000000e+00> : vector<256x32xf32>
    %116 = tpu.matmul %114, %115, %cst_31 {dimension_numbers = #tpu.dot_dimension_numbers<[1], [0], [0], [1], [0, 0, 1, 1], [], []>, precision = #tpu.contract_precision<fp32>} : vector<256x64xf32>, vector<64x32xf32>, vector<256x32xf32> -> vector<256x32xf32>
    %c0_32 = arith.constant 0 : index
    %c0_33 = arith.constant 0 : index
    %117 = vector.load %arg7[%c0_32, %c0_33] : memref<1x32xf32, #tpu.memory_space<vmem>>, vector<1x32xf32>
    %118 = vector.broadcast %117 : vector<1x32xf32> to vector<256x32xf32>
    %119 = arith.addf %116, %118 : vector<256x32xf32>
    %120 = vector.shape_cast %119 : vector<256x32xf32> to vector<16x16x32xf32>
    %c0_34 = arith.constant 0 : index
    %c0_35 = arith.constant 0 : index
    %c0_36 = arith.constant 0 : index
    %c0_37 = arith.constant 0 : index
    %121 = vector.load %arg8[%c0_34, %c0_35, %c0_36, %c0_37] : memref<1x16x16x32xf32, #tpu.memory_space<vmem>>, vector<1x16x16x32xf32>
    %122 = vector.shape_cast %121 : vector<1x16x16x32xf32> to vector<16x16x32xf32>
    %123 = vector.shape_cast %120 : vector<16x16x32xf32> to vector<1x16x16x32xf32>
    tpu.vector_store %arg8[%c0_34, %c0_35, %c0_36, %c0_37], %123 {strides = array<i32>} : memref<1x16x16x32xf32, #tpu.memory_space<vmem>>, vector<1x16x16x32xf32>,
    return
  }
  func.func @transform_0(%arg0: i32) -> (i32, i32, i32, i32) {
    %c0_i32 = arith.constant 0 : i32
    %c0_i32_0 = arith.constant 0 : i32
    %c0_i32_1 = arith.constant 0 : i32
    %c0_i32_2 = arith.constant 0 : i32
    return %arg0, %c0_i32, %c0_i32_0, %c0_i32_1 : i32, i32, i32, i32
  }
  func.func @transform_1(%arg0: i32) -> (i32, i32) {
    %c0_i32 = arith.constant 0 : i32
    %c0_i32_0 = arith.constant 0 : i32
    %c0_i32_1 = arith.constant 0 : i32
    return %c0_i32, %c0_i32_0 : i32, i32
  }
  func.func @transform_2(%arg0: i32) -> (i32, i32) {
    %c0_i32 = arith.constant 0 : i32
    %c0_i32_0 = arith.constant 0 : i32
    %c0_i32_1 = arith.constant 0 : i32
    return %c0_i32, %c0_i32_0 : i32, i32
  }
  func.func @transform_3(%arg0: i32) -> (i32, i32) {
    %c0_i32 = arith.constant 0 : i32
    %c0_i32_0 = arith.constant 0 : i32
    %c0_i32_1 = arith.constant 0 : i32
    return %c0_i32, %c0_i32_0 : i32, i32
  }
  func.func @transform_4(%arg0: i32) -> (i32, i32) {
    %c0_i32 = arith.constant 0 : i32
    %c0_i32_0 = arith.constant 0 : i32
    %c0_i32_1 = arith.constant 0 : i32
    return %c0_i32, %c0_i32_0 : i32, i32
  }
  func.func @transform_5(%arg0: i32) -> (i32, i32) {
    %c0_i32 = arith.constant 0 : i32
    %c0_i32_0 = arith.constant 0 : i32
    %c0_i32_1 = arith.constant 0 : i32
    return %c0_i32, %c0_i32_0 : i32, i32
  }
  func.func @transform_6(%arg0: i32) -> (i32, i32) {
    %c0_i32 = arith.constant 0 : i32
    %c0_i32_0 = arith.constant 0 : i32
    %c0_i32_1 = arith.constant 0 : i32
    return %c0_i32, %c0_i32_0 : i32, i32
  }
  func.func @transform_7(%arg0: i32) -> (i32, i32, i32, i32) {
    %c0_i32 = arith.constant 0 : i32
    %c0_i32_0 = arith.constant 0 : i32
    %c0_i32_1 = arith.constant 0 : i32
    %c0_i32_2 = arith.constant 0 : i32
    return %arg0, %c0_i32, %c0_i32_0, %c0_i32_1 : i32, i32, i32, i32
  }
}

</mosaic_0001>

<bundles_post_ra>
// kernel: tpu_custom_call.1
= control target key start
LH: loop header
LB: loop body
LE: loop exit
PB: predicated region body
PF: predicated region fallthrough
CT: control target
= control target key end

     0   :  { %12 = vsyncpa [#allocation3], 0  ;;  %s11132_s0 = inlined_call_operand.hbm [shape: f32[2,16,16,32], index: 0, kind: input, shape index: {}]   ;;  %s11133_s1 = inlined_call_operand.vmem [shape: f32[32,128], index: 1, kind: input, shape index: {}]   ;;  %s11134_s2 = inlined_call_operand.vmem [shape: f32[1,128], index: 2, kind: input, shape index: {}]   ;;  %s11135_s3 = inlined_call_operand.vmem [shape: f32[9,128], index: 3, kind: input, shape index: {}]   ;;  %s11136_s4 = inlined_call_operand.vmem [shape: f32[1,128], index: 4, kind: input, shape index: {}]   ;;  %s11137_s5 = inlined_call_operand.vmem [shape: f32[64,32], index: 5, kind: input, shape index: {}]   ;;  %s11138_s6 = inlined_call_operand.vmem [shape: f32[1,32], index: 6, kind: input, shape index: {}]   ;;  %s11139_s7 = inlined_call_operand.hbm [shape: f32[2,16,16,32], index: 7, kind: output, shape index: {}]  }
   0x1   :  { %14 = vsyncpa [#allocation3 + $0x1], 0 }
   0x2   :  { %15 = vsyncpa [#allocation4], 0 }
   0x3   :  { %17 = vsyncpa [#allocation4 + $0x1], 0  ;;  %s6445_s24 = smov 0   ;;  %s6447_s25 = smov 0  }
   0x4   :  { %s6449_s26 = smov 0   ;;  %s6451_s27 = smov 0  }
   0x5 LB: > { %s6466_s28 = sadd.s32 4294967295, %s6396_s27   ;;  %s6091_s29 = sadd.s32 4294967294, %s6396_s27   ;;  %s6396_s27 = sphi %s6451_s27, %s12009_s27   ;;  %s6392_s26 = sphi %s6449_s26, %s12008_s26   ;;  %s6388_s25 = sphi %s6447_s25, %s12007_s25   ;;  %s6384_s24 = sphi %s6445_s24, %s12006_s24  }
   0x6   : > { %s6470_s30 = sadd.s32 1, %s6396_s27   ;;  %s30_s8 = sadd.s32 1, %s6392_s26 }
   0x7   : > { %s27_s9 = ssub.s32 %s6396_s27, %s6470_s30  ;;  %p37_p0 = scmp.ne.s32.totalorder %s6392_s26, %s6388_s25 }
   0x8   : > { %p28_p1 = scmp.eq.s32.totalorder %s27_s9, 0  ;;  %p38_p2 = scmp.eq.s32.totalorder %s6396_s27, 0 }
   0x9   : > { %p43_p3 = scmp.ne.s32.totalorder %s6388_s25, %s6384_s24  ;;  %p44_p4 = scmp.eq.s32.totalorder %s6466_s28, 0 }
   0xa   : > { %s6482_s10 = scalar_select %p28_p1, %s6392_s26, %s30_s8  }
   0xb   : > { %p6484_p5 = por %p38_p2, %p37_p0  ;;  %p6488_p6 = por %p44_p4, %p43_p3 }
   0xc   : > { %11385 = sst [smem:[#allocation8_spill]] %s6482_s10  ;;  %p193_p7 = scmp.eq.s32.totalorder %s6466_s28, 1 }
   0xd   : > { %p199_p8 = scmp.eq.s32.totalorder %s6091_s29, 1  ;;  %p6119_p10 = scmp.lt.s32.totalorder %s6396_s27, 2 }
   0xe   : > { %p6495_p11 = por %p193_p7, %p37_p0  ;;  %s237_s15 = sand.u32 1, %s6392_s26  }
   0xf   : > { %p6499_p12 = por %p199_p8, %p43_p3  ;;  %s6105_s16 = sshll.u32 %s6396_s27, 8 }
  0x10   : > { %s6094_s17 = sshll.u32 %s237_s15, 8  ;;  %s246_s20 = scalar_lea.hbm %s11132_s0, %s6105_s16 }
  0x11   : > { %s247_s21 = sshll.u32 %s246_s20, 4  ;;  %s241_s22 = scalar_lea.vmem [#allocation2], %s6094_s17  ;;  %s248_s21 = int_to_ptr.hbm [resolvable:$true] %s247_s21 }
  0x12   : > { %s249_s23 = sshll.u32 %s241_s22, 4  ;;  %p6510_p13 = pnand %p6119_p10, %p6484_p5  ;;  %s250_s23 = int_to_ptr.vmem [resolvable:$true] %s249_s23 }
  0x13   : > { %p6097_p0 = scmp.ge.s32.totalorder %s6396_s27, 1  ;;  %p257_p1 = scmp.lt.s32.totalorder %s6396_s27, 3 }
  0x14   : > { %s238_s8 = scalar_lea.sflag [#allocation3], %s237_s15  ;;  %s6300_s9 = sshra.s32 %s248_s21, 4  ;;  %s6301_s9 = int_to_ptr.hbm [resolvable:$true] %s6300_s9 }
  0x15   : > { %s6302_s10 = scalar_lea.hbm %s6301_s9, 256  ;;  %p6304_p3 = pneg %p6510_p13 }
  0x16   : > { %p6303_p2 = scmp.ne.s32.totalorder %s6301_s9, %s6302_s10  ;;  %s6307_s11 = scalar_lea.hbm %s11132_s0, 512 }
  0x17   : > { %p6308_p5 = scmp.lt.s32.totalorder %s6301_s9, %s11132_s0  ;;  %p6309_p8 = scmp.lt.s32.totalorder %s6307_s11, %s6302_s10 }
  0x18   : > { %p6305_p4 = pnand %p6304_p3, %p6303_p2 }
  0x19   : > { %p6310_p10 = por %p6309_p8, %p6308_p5 }
  0x1a   : > { %p6306_p7 = pneg %p6305_p4 }
  0x1c   : > { %p6311_p9 = pnand %p6310_p10, %p6306_p7 }
  0x1e   : > { %6314 = shalt.err (!%p6311_p9)
}
  0x1f   : > { %s6398_s15 = smov 128   ;;  %s6399_s20 = smov 8  }
  0x20   : > { %6114 = dma.hbm_to_vmem [thread:$0]  (!%p6510_p13), %s248_s21, 4096, %s250_s23, %s238_s8, %s6398_s15, %s6398_s15, %s6399_s20  }
  0x21   : > { %p258_p2 = pnand %p6097_p0, %p257_p1 }
  0x23   : > { %261 = sbr.rel (%p258_p2) target bundleno = 1554 (0x612), region = 48 }
  0x28   : > { %s6531_s22 = sand.u32 1, %s6388_s25  }
  0x29   : > { %s6098_s10 = sshll.u32 %s6531_s22, 8  ;;  %s264_s9 = scalar_lea.sflag [#allocation3], %s6531_s22 }
  0x2a   : > { %s6537_s16 = scalar_lea.vmem [#allocation2], %s6098_s10 }
  0x2b   : > { %6375 = dma.done.wait (%p6488_p6), %s264_s9, 4096  }
  0x2c   : > { %6377 = vsyncadd (%p6488_p6), %s264_s9, 4294963200  ;;  %vm339_vm0 = vcmask 261120   ;;  %v334_v0 = vld [vmem:[%s11133_s1 + $0x18] sm:$0xff]  ;;  %v333_v1 = vld [vmem:[%s11133_s1 + $0x10] sm:$0xff]  ;;  %vm1615_vm1 = vcmask 1040384   ;;  %vm1983_vm2 = vcmask 1046528  }
  0x2d   : > { %v332_v2 = vld [vmem:[%s11133_s1 + $0x8] sm:$0xff]  ;;  %v6552_v3 = vand.u32 4294901760, %v334_v0  ;;  %v6554_v4 = vand.u32 4294901760, %v333_v1  ;;  %v331_v6 = vld [vmem:[%s11133_s1] sm:$0xff]  ;;  %v301_v12 = vld [vmem:[%s6537_s16 + $0x10] sm:$0xff]  ;;  %vm2225_vm3 = vcmask 1045504  }
  0x2e   : > { %v6556_v5 = vand.u32 4294901760, %v332_v2  ;;  %v299_v7 = vld [vmem:[%s6537_s16] sm:$0xff]  ;;  %v300_v8 = vld [vmem:[%s6537_s16 + $0x8] sm:$0xff]  ;;  %v6563_v9 = vand.u32 4294901760, %v331_v6  ;;  %v347_v19 = vsel %vm339_vm0, %v301_v12, 0  ;;  %v302_v38 = vld [vmem:[%s6537_s16 + $0x18] sm:$0xff] }
  0x2f   : > { %v341_v10 = vsel %vm339_vm0, %v299_v7, 0  ;;  %v344_v11 = vsel %vm339_vm0, %v300_v8, 0  ;;  %449 = vmatpush.msra.mxu0 %v6552_v3  ;;  %v726_v13 = vsub.f32 %v334_v0, %v6552_v3  ;;  %v732_v14 = vsub.f32 %v333_v1, %v6554_v4  ;;  %1076 = vmatpush.msra.mxu3 %v6552_v3  ;;  %v303_v46 = vld [vmem:[%s6537_s16 + $0x20] sm:$0xff]  ;;  %v304_v53 = vld [vmem:[%s6537_s16 + $0x28] sm:$0xff]  ;;  %v305_v60 = vld [vmem:[%s6537_s16 + $0x30] sm:$0xff]  ;;  %s6401_s29 = smov 64  }
  0x30   : > { %v738_v15 = vsub.f32 %v332_v2, %v6556_v5  ;;  %v6573_v16 = vand.u32 4294901760, %v341_v10  ;;  %v744_v17 = vsub.f32 %v331_v6, %v6563_v9  ;;  %v6576_v18 = vand.u32 4294901760, %v344_v11  ;;  %s6350_s20 = scalar_lea.hbm %s11139_s7, 512 }
  0x31   : > { %451 = vmatpush.msra.mxu0 %v6554_v4  ;;  %892 = vmatpush.msra.mxu2 %v726_v13  ;;  %v727_v20 = vand.u32 4294901760, %v726_v13  ;;  %v733_v22 = vand.u32 4294901760, %v732_v14  ;;  %v6585_v31 = vand.u32 4294901760, %v347_v19  ;;  %v350_v42 = vsel %vm339_vm0, %v302_v38, 0 }
  0x32   : > { %v457_v21 = vsub.f32 %v341_v10, %v6573_v16  ;;  %v739_v23 = vand.u32 4294901760, %v738_v15  ;;  %1078 = vmatpush.msra.mxu3 %v6554_v4  ;;  %v745_v24 = vand.u32 4294901760, %v744_v17  ;;  %v465_v25 = vsub.f32 %v344_v11, %v6576_v18  ;;  %v307_v10 = vld [vmem:[%s6537_s16 + $0x40] sm:$0xff] }
  0x33   : > { %453 = vmatpush.msra.mxu0 %v6556_v5  ;;  %895 = vmatpush.msra.mxu2 %v732_v14  ;;  %v728_v26 = vsub.f32 %v726_v13, %v727_v20  ;;  %v734_v28 = vsub.f32 %v732_v14, %v733_v22  ;;  %v473_v41 = vsub.f32 %v347_v19, %v6585_v31  ;;  %v6592_v45 = vand.u32 4294901760, %v350_v42  ;;  %v308_v19 = vld [vmem:[%s6537_s16 + $0x48] sm:$0xff] }
  0x34   : > { %v458_v27 = vand.u32 4294901760, %v457_v21  ;;  %v740_v29 = vsub.f32 %v738_v15, %v739_v23  ;;  %1080 = vmatpush.msra.mxu3 %v6556_v5  ;;  %v746_v30 = vsub.f32 %v744_v17, %v745_v24  ;;  %v466_v35 = vand.u32 4294901760, %v465_v25 }
  0x35   : > { %455 = vmatpush.msra.mxu0 %v6563_v9  ;;  %v729_v32 = vand.u32 4294901760, %v728_v26  ;;  %898 = vmatpush.msra.mxu2 %v738_v15  ;;  %v735_v34 = vand.u32 4294901760, %v734_v28  ;;  %v474_v44 = vand.u32 4294901760, %v473_v41  ;;  %v481_v48 = vsub.f32 %v350_v42, %v6592_v45  ;;  %v309_v26 = vld [vmem:[%s6537_s16 + $0x50] sm:$0xff] }
  0x36   : > { %v459_v33 = vsub.f32 %v457_v21, %v458_v27  ;;  %1082 = vmatpush.msra.mxu3 %v6563_v9  ;;  %v741_v37 = vand.u32 4294901760, %v740_v29  ;;  %v747_v39 = vand.u32 4294901760, %v746_v30  ;;  %v467_v40 = vsub.f32 %v465_v25, %v466_v35 }
  0x37   : > { %1291 = vmatpush.msrb.mxu0 %v727_v20  ;;  %730 = vmatpush.msra.mxu1 %v729_v32  ;;  %v475_v47 = vsub.f32 %v473_v41, %v474_v44  ;;  %v353_v49 = vsel %vm339_vm0, %v303_v46, 0  ;;  %v482_v51 = vand.u32 4294901760, %v481_v48  ;;  %v356_v56 = vsel %vm339_vm0, %v304_v53, 0 }
  0x38   : > { %v460_v36 = vand.u32 4294901760, %v459_v33  ;;  %901 = vmatpush.msra.mxu2 %v744_v17  ;;  %1086 = vmatmul.f32.vlgmr.msra.gmra.mxu3 %v458_v27  ;;  %v468_v43 = vand.u32 4294901760, %v467_v40  ;;  %v6601_v52 = vand.u32 4294901760, %v353_v49  ;;  %v6608_v59 = vand.u32 4294901760, %v356_v56 }
  0x39   : > { %904 = vmatmul.f32.vlgmr.msra.gmra.mxu2 %v457_v21  ;;  %736 = vmatpush.msra.mxu1 %v735_v34  ;;  %v476_v50 = vand.u32 4294901760, %v475_v47  ;;  %v483_v54 = vsub.f32 %v481_v48, %v482_v51  ;;  %v359_v63 = vsel %vm339_vm0, %v305_v60, 0  ;;  %v365_v13 = vsel %vm339_vm0, %v307_v10, 0  ;;  %v310_v34 = vld [vmem:[%s6537_s16 + $0x58] sm:$0xff]  ;;  %v315_v10 = vld [vmem:[%s6537_s16 + $0x80] sm:$0xff] }
  0x3a   : > { %461 = vmatmul.f32.vlgmr.msra.gmra.mxu0 %v460_v36  ;;  %v489_v55 = vsub.f32 %v353_v49, %v6601_v52  ;;  %v497_v62 = vsub.f32 %v356_v56, %v6608_v59  ;;  %v6614_v2 = vand.u32 4294901760, %v359_v63  ;;  %v6626_v17 = vand.u32 4294901760, %v365_v13  ;;  %v312_v49 = vld [vmem:[%s6537_s16 + $0x68] sm:$0xff] }
  0x3b   : > { %1295 = vmatpush.msrb.mxu0 %v733_v22  ;;  %742 = vmatpush.msra.mxu1 %v741_v37  ;;  %v484_v57 = vand.u32 4294901760, %v483_v54  ;;  %v368_v22 = vsel %vm339_vm0, %v308_v19, 0  ;;  %v371_v29 = vsel %vm339_vm0, %v309_v26, 0  ;;  %v374_v37 = vsel %vm339_vm0, %v310_v34, 0  ;;  %v6689_v34 = vld [vmem:[%s11134_s2] ss:$0 sm:$0xff] }
  0x3c   : > { %v490_v58 = vand.u32 4294901760, %v489_v55  ;;  %v498_v1 = vand.u32 4294901760, %v497_v62  ;;  %v521_v21 = vsub.f32 %v365_v13, %v6626_v17  ;;  %v6638_v33 = vand.u32 4294901760, %v371_v29 }
  0x3d   : > { %1299 = vmatpush.msrb.mxu0 %v739_v23  ;;  %748 = vmatpush.msra.mxu1 %v747_v39  ;;  %v6644_v40 = vand.u32 4294901760, %v374_v37  ;;  %v380_v53 = vsel %vm339_vm0, %v312_v49, 0  ;;  %v389_v13 = vsel %vm339_vm0, %v315_v10, 0 }
  0x3e   : > { %750 = vmatmul.f32.vlgmr.msra.gmra.mxu1 %v6573_v16  ;;  %v491_v61 = vsub.f32 %v489_v55, %v490_v58  ;;  %v537_v36 = vsub.f32 %v371_v29, %v6638_v33  ;;  %v6656_v56 = vand.u32 4294901760, %v380_v53  ;;  %v6674_v19 = vand.u32 4294901760, %v389_v13 }
  0x3f   : > { %1303 = vmatpush.msrb.mxu0 %v745_v24  ;;  %1446 = vmatpush.msrb.mxu1 %v6552_v3  ;;  %v306_v3 = vld [vmem:[%s6537_s16 + $0x38] sm:$0xff]  ;;  %v522_v24 = vand.u32 4294901760, %v521_v21 }
  0x40   : > { %1092 = vmatmul.f32.gmra.mxu3 %v466_v35  ;;  %v492_v0 = vand.u32 4294901760, %v491_v61  ;;  %v362_v6 = vsel %vm339_vm0, %v306_v3, 0  ;;  %v538_v39 = vand.u32 4294901760, %v537_v36  ;;  %v561_v60 = vsub.f32 %v380_v53, %v6656_v56 }
  0x41   : > { %909 = vmatmul.f32.gmra.mxu2 %v465_v25  ;;  %1448 = vmatpush.msrb.mxu1 %v6554_v4  ;;  %v499_v4 = vsub.f32 %v497_v62, %v498_v1  ;;  %v6632_v25 = vand.u32 4294901760, %v368_v22  ;;  %v523_v27 = vsub.f32 %v521_v21, %v522_v24 }
  0x42   : > { %469 = vmatmul.f32.gmra.mxu0 %v468_v43  ;;  %v539_v42 = vsub.f32 %v537_v36, %v538_v39  ;;  %v545_v43 = vsub.f32 %v374_v37, %v6644_v40 }
  0x43   : > { %1450 = vmatpush.msrb.mxu1 %v6556_v5  ;;  %v505_v5 = vsub.f32 %v359_v63, %v6614_v2  ;;  %v500_v7 = vand.u32 4294901760, %v499_v4  ;;  %v529_v28 = vsub.f32 %v368_v22, %v6632_v25  ;;  %v524_v30 = vand.u32 4294901760, %v523_v27 }
  0x44   : > { %v540_v46 = vand.u32 4294901760, %v539_v42  ;;  %v546_v47 = vand.u32 4294901760, %v545_v43  ;;  %v562_v63 = vand.u32 4294901760, %v561_v60  ;;  %v585_v22 = vsub.f32 %v389_v13, %v6674_v19 }
  0x45   : > { %1452 = vmatpush.msrb.mxu1 %v6563_v9  ;;  %v506_v8 = vand.u32 4294901760, %v505_v5  ;;  %v6620_v9 = vand.u32 4294901760, %v362_v6  ;;  %v530_v32 = vand.u32 4294901760, %v529_v28 }
  0x46   : > { %754 = vmatmul.f32.gmra.mxu1 %v6576_v18  ;;  %v563_v3 = vsub.f32 %v561_v60, %v562_v63  ;;  %v586_v26 = vand.u32 4294901760, %v585_v22 }
  0x47   : > { %v507_v11 = vsub.f32 %v505_v5, %v506_v8  ;;  %v513_v12 = vsub.f32 %v362_v6, %v6620_v9  ;;  %v531_v35 = vsub.f32 %v529_v28, %v530_v32 }
  0x48   : > { %1098 = vmatmul.f32.gmra.mxu3 %v474_v44  ;;  %v564_v6 = vand.u32 4294901760, %v563_v3  ;;  %v587_v29 = vsub.f32 %v585_v22, %v586_v26 }
  0x49   : > { %914 = vmatmul.f32.gmra.mxu2 %v473_v41  ;;  %v508_v14 = vand.u32 4294901760, %v507_v11  ;;  %v514_v15 = vand.u32 4294901760, %v513_v12  ;;  %v532_v38 = vand.u32 4294901760, %v531_v35  ;;  %v311_v41 = vld [vmem:[%s6537_s16 + $0x60] sm:$0xff] }
  0x4a   : > { %477 = vmatmul.f32.gmra.mxu0 %v476_v50  ;;  %v377_v44 = vsel %vm339_vm0, %v311_v41, 0  ;;  %v547_v50 = vsub.f32 %v545_v43, %v546_v47  ;;  %v588_v35 = vand.u32 4294901760, %v587_v29 }
  0x4b   : > { %v515_v20 = vsub.f32 %v513_v12, %v514_v15 }
  0x4c   : > { %v548_v54 = vand.u32 4294901760, %v547_v50 }
  0x4d   : > { %v516_v23 = vand.u32 4294901760, %v515_v20  ;;  %v316_v20 = vld [vmem:[%s6537_s16 + $0x88] sm:$0xff] }
  0x4e   : > { %758 = vmatmul.f32.gmra.mxu1 %v6585_v31 }
  0x50   : > { %1104 = vmatmul.f32.gmra.mxu3 %v482_v51 }
  0x51   : > { %919 = vmatmul.f32.gmra.mxu2 %v481_v48  ;;  %v6650_v48 = vand.u32 4294901760, %v377_v44 }
  0x52   : > { %485 = vmatmul.f32.gmra.mxu0 %v484_v57  ;;  %v313_v57 = vld [vmem:[%s6537_s16 + $0x70] sm:$0xff] }
  0x53   : > { %v553_v51 = vsub.f32 %v377_v44, %v6650_v48  ;;  %v383_v61 = vsel %vm339_vm0, %v313_v57, 0 }
  0x56   : > { %762 = vmatmul.f32.gmra.mxu1 %v6592_v45 }
  0x58   : > { %1110 = vmatmul.f32.gmra.mxu3 %v490_v58 }
  0x59   : > { %924 = vmatmul.f32.gmra.mxu2 %v489_v55  ;;  %v554_v55 = vand.u32 4294901760, %v553_v51 }
  0x5a   : > { %493 = vmatmul.f32.gmra.mxu0 %v492_v0  ;;  %v6662_v0 = vand.u32 4294901760, %v383_v61 }
  0x5b   : > { %v555_v58 = vsub.f32 %v553_v51, %v554_v55 }
  0x5c   : > { %v569_v4 = vsub.f32 %v383_v61, %v6662_v0 }
  0x5e   : > { %766 = vmatmul.f32.gmra.mxu1 %v6601_v52 }
  0x60   : > { %1116 = vmatmul.f32.gmra.mxu3 %v498_v1  ;;  %v314_v1 = vld [vmem:[%s6537_s16 + $0x78] sm:$0xff] }
  0x61   : > { %929 = vmatmul.f32.gmra.mxu2 %v497_v62  ;;  %v556_v62 = vand.u32 4294901760, %v555_v58  ;;  %v319_v58 = vld [vmem:[%s6537_s16 + $0xa0] sm:$0xff] }
  0x62   : > { %501 = vmatmul.f32.gmra.mxu0 %v500_v7  ;;  %v570_v7 = vand.u32 4294901760, %v569_v4 }
  0x64   : > { %v571_v11 = vsub.f32 %v569_v4, %v570_v7 }
  0x66   : > { %770 = vmatmul.f32.gmra.mxu1 %v6608_v59 }
  0x68   : > { %1122 = vmatmul.f32.gmra.mxu3 %v506_v8 }
  0x69   : > { %934 = vmatmul.f32.gmra.mxu2 %v505_v5  ;;  %v386_v5 = vsel %vm339_vm0, %v314_v1, 0  ;;  %v401_v1 = vsel %vm339_vm0, %v319_v58, 0 }
  0x6a   : > { %509 = vmatmul.f32.gmra.mxu0 %v508_v14  ;;  %v6668_v8 = vand.u32 4294901760, %v386_v5  ;;  %v572_v14 = vand.u32 4294901760, %v571_v11  ;;  %v6707_v11 = vand.u32 4294901760, %v401_v1 }
  0x6c   : > { %11393 = vst [vmem:[#allocation11_spill] sm:$0xff] %v6707_v11 }
  0x6e   : > { %774 = vmatmul.f32.gmra.mxu1 %v6614_v2 }
  0x70   : > { %1128 = vmatmul.f32.gmra.mxu3 %v514_v15 }
  0x71   : > { %939 = vmatmul.f32.gmra.mxu2 %v513_v12  ;;  %v577_v12 = vsub.f32 %v386_v5, %v6668_v8 }
  0x72   : > { %517 = vmatmul.f32.gmra.mxu0 %v516_v23  ;;  %v392_v23 = vsel %vm339_vm0, %v316_v20, 0 }
  0x73   : > { %v578_v15 = vand.u32 4294901760, %v577_v12  ;;  %v6680_v27 = vand.u32 4294901760, %v392_v23 }
  0x76   : > { %778 = vmatmul.f32.gmra.mxu1 %v6620_v9 }
  0x78   : > { %1134 = vmatmul.f32.gmra.mxu3 %v522_v24 }
  0x79   : > { %944 = vmatmul.f32.gmra.mxu2 %v521_v21  ;;  %v579_v21 = vsub.f32 %v577_v12, %v578_v15 }
  0x7a   : > { %525 = vmatmul.f32.gmra.mxu0 %v524_v30  ;;  %v593_v30 = vsub.f32 %v392_v23, %v6680_v27 }
  0x7b   : > { %v580_v24 = vand.u32 4294901760, %v579_v21 }
  0x7e   : > { %782 = vmatmul.f32.gmra.mxu1 %v6626_v17 }
  0x80   : > { %1140 = vmatmul.f32.gmra.mxu3 %v530_v32 }
  0x81   : > { %949 = vmatmul.f32.gmra.mxu2 %v529_v28  ;;  %v317_v28 = vld [vmem:[%s6537_s16 + $0x90] sm:$0xff] }
  0x82   : > { %533 = vmatmul.f32.gmra.mxu0 %v532_v38  ;;  %v395_v32 = vsel %vm339_vm0, %v317_v28, 0 }
  0x83   : > { %v6691_v37 = vand.u32 4294901760, %v395_v32 }
  0x85   : > { %11391 = vst [vmem:[#allocation9_spill] sm:$0xff] %v6691_v37 }
  0x86   : > { %786 = vmatmul.f32.gmra.mxu1 %v6632_v25 }
  0x88   : > { %1146 = vmatmul.f32.gmra.mxu3 %v538_v39  ;;  %v318_v39 = vld [vmem:[%s6537_s16 + $0x98] sm:$0xff] }
  0x89   : > { %954 = vmatmul.f32.gmra.mxu2 %v537_v36  ;;  %v594_v36 = vand.u32 4294901760, %v593_v30  ;;  %v398_v44 = vsel %vm339_vm0, %v318_v39, 0  ;;  %v321_v39 = vld [vmem:[%s6537_s16 + $0xb0] sm:$0xff] }
  0x8a   : > { %541 = vmatmul.f32.gmra.mxu0 %v540_v46 }
  0x8b   : > { %v595_v42 = vsub.f32 %v593_v30, %v594_v36 }
  0x8e   : > { %790 = vmatmul.f32.gmra.mxu1 %v6638_v33 }
  0x90   : > { %1152 = vmatmul.f32.gmra.mxu3 %v546_v47 }
  0x91   : > { %959 = vmatmul.f32.gmra.mxu2 %v545_v43  ;;  %v601_v43 = vsub.f32 %v395_v32, %v6691_v37 }
  0x92   : > { %549 = vmatmul.f32.gmra.mxu0 %v548_v54  ;;  %v6698_v54 = vand.u32 4294901760, %v398_v44 }
  0x93   : > { %v602_v53 = vand.u32 4294901760, %v601_v43 }
  0x94   : > { %11392 = vst [vmem:[#allocation10_spill] sm:$0xff] %v6698_v54 }
  0x96   : > { %794 = vmatmul.f32.gmra.mxu1 %v6644_v40 }
  0x98   : > { %1158 = vmatmul.f32.gmra.mxu3 %v554_v55 }
  0x99   : > { %964 = vmatmul.f32.gmra.mxu2 %v553_v51  ;;  %v596_v51 = vand.u32 4294901760, %v595_v42 }
  0x9a   : > { %557 = vmatmul.f32.gmra.mxu0 %v556_v62  ;;  %v603_v62 = vsub.f32 %v601_v43, %v602_v53 }
  0x9e   : > { %798 = vmatmul.f32.gmra.mxu1 %v6650_v48 }
  0xa0   : > { %1164 = vmatmul.f32.gmra.mxu3 %v562_v63  ;;  %v609_v63 = vsub.f32 %v398_v44, %v6698_v54 }
  0xa1   : > { %969 = vmatmul.f32.gmra.mxu2 %v561_v60 }
  0xa2   : > { %565 = vmatmul.f32.gmra.mxu0 %v564_v6  ;;  %v610_v10 = vand.u32 4294901760, %v609_v63 }
  0xa4   : > { %v611_v21 = vsub.f32 %v609_v63, %v610_v10 }
  0xa6   : > { %802 = vmatmul.f32.gmra.mxu1 %v6656_v56 }
  0xa8   : > { %1170 = vmatmul.f32.gmra.mxu3 %v570_v7  ;;  %v604_v7 = vand.u32 4294901760, %v603_v62  ;;  %v322_v62 = vld [vmem:[%s6537_s16 + $0xb8] sm:$0xff] }
  0xa9   : > { %974 = vmatmul.f32.gmra.mxu2 %v569_v4 }
  0xaa   : > { %573 = vmatmul.f32.gmra.mxu0 %v572_v14  ;;  %v320_v14 = vld [vmem:[%s6537_s16 + $0xa8] sm:$0xff] }
  0xab   : > { %v404_v23 = vsel %vm339_vm0, %v320_v14, 0 }
  0xae   : > { %806 = vmatmul.f32.gmra.mxu1 %v6662_v0 }
  0xb0   : > { %1176 = vmatmul.f32.gmra.mxu3 %v578_v15 }
  0xb1   : > { %979 = vmatmul.f32.gmra.mxu2 %v577_v12 }
  0xb2   : > { %581 = vmatmul.f32.gmra.mxu0 %v580_v24 }
  0xb6   : > { %810 = vmatmul.f32.gmra.mxu1 %v6668_v8 }
  0xb7   : > { %v462_v38 = vpop.f32.mrf.mxu0 }
  0xb8   : > { %v463_v41 = vadd.f32 %v6689_v34, %v462_v38  ;;  %1182 = vmatmul.f32.gmra.mxu3 %v586_v26 }
  0xb9   : > { %984 = vmatmul.f32.gmra.mxu2 %v585_v22  ;;  %v617_v22 = vsub.f32 %v401_v1, %v6707_v11 }
  0xba   : > { %589 = vmatmul.f32.gmra.mxu0 %v588_v35  ;;  %v6716_v35 = vand.u32 4294901760, %v404_v23 }
  0xbb   : > { %v751_v46 = vpop.f32.mrf.mxu1  ;;  %v1087_v50 = vpop.f32.mrf.mxu3  ;;  %v618_v32 = vand.u32 4294901760, %v617_v22 }
  0xbc   : > { %v905_v47 = vpop.f32.mrf.mxu2  ;;  %v752_v49 = vadd.f32 %v751_v46, %v463_v41  ;;  %11394 = vst [vmem:[#allocation12_spill] sm:$0xff] %v6716_v35  ;;  %v625_v44 = vsub.f32 %v404_v23, %v6716_v35  ;;  %v407_v46 = vsel %vm339_vm0, %v321_v39, 0 }
  0xbe   : > { %v906_v57 = vadd.f32 %v905_v47, %v752_v49  ;;  %814 = vmatmul.f32.gmra.mxu1 %v6674_v19 }
  0xbf   : > { %v470_v55 = vpop.f32.mrf.mxu0 }
  0xc0   : > { %v471_v60 = vadd.f32 %v6689_v34, %v470_v55  ;;  %v6703_v61 = vadd.f32 %v1087_v50, %v906_v57  ;;  %1188 = vmatmul.f32.gmra.mxu3 %v594_v36  ;;  %v626_v55 = vand.u32 4294901760, %v625_v44  ;;  %v6725_v57 = vand.u32 4294901760, %v407_v46 }
  0xc1   : > { %989 = vmatmul.f32.gmra.mxu2 %v593_v30  ;;  %v612_v30 = vand.u32 4294901760, %v611_v21 }
  0xc2   : > { %597 = vmatmul.f32.gmra.mxu0 %v596_v51  ;;  %11396 = vst [vmem:[#allocation14_spill] sm:$0xff] %v6725_v57 }
  0xc3   : > { %v755_v3 = vpop.f32.mrf.mxu1  ;;  %v1093_v6 = vpop.f32.mrf.mxu3 }
  0xc4   : > { %v910_v4 = vpop.f32.mrf.mxu2  ;;  %v756_v5 = vadd.f32 %v755_v3, %v471_v60  ;;  %v627_v3 = vsub.f32 %v625_v44, %v626_v55 }
  0xc6   : > { %v911_v13 = vadd.f32 %v910_v4, %v756_v5  ;;  %818 = vmatmul.f32.gmra.mxu1 %v6680_v27  ;;  %v633_v4 = vsub.f32 %v407_v46, %v6725_v57  ;;  %v410_v5 = vsel %vm339_vm0, %v322_v62, 0 }
  0xc7   : > { %v478_v12 = vpop.f32.mrf.mxu0 }
  0xc8   : > { %v479_v15 = vadd.f32 %v6689_v34, %v478_v12  ;;  %v6712_v20 = vadd.f32 %v1093_v6, %v911_v13  ;;  %1194 = vmatmul.f32.gmra.mxu3 %v602_v53  ;;  %v628_v13 = vand.u32 4294901760, %v627_v3  ;;  %v634_v14 = vand.u32 4294901760, %v633_v4 }
  0xc9   : > { %994 = vmatmul.f32.gmra.mxu2 %v601_v43  ;;  %v619_v43 = vsub.f32 %v617_v22, %v618_v32 }
  0xca   : > { %605 = vmatmul.f32.gmra.mxu0 %v604_v7 }
  0xcb   : > { %v759_v24 = vpop.f32.mrf.mxu1  ;;  %v1099_v29 = vpop.f32.mrf.mxu3  ;;  %v620_v53 = vand.u32 4294901760, %v619_v43 }
  0xcc   : > { %v915_v26 = vpop.f32.mrf.mxu2  ;;  %v760_v28 = vadd.f32 %v759_v24, %v479_v15  ;;  %v6734_v15 = vand.u32 4294901760, %v410_v5 }
  0xce   : > { %v916_v38 = vadd.f32 %v915_v26, %v760_v28  ;;  %822 = vmatmul.f32.gmra.mxu1 %v6691_v37  ;;  %11398 = vst [vmem:[#allocation16_spill] sm:$0xff] %v6734_v15  ;;  %v635_v28 = vsub.f32 %v633_v4, %v634_v14 }
  0xcf   : > { %v486_v36 = vpop.f32.mrf.mxu0 }
  0xd0   : > { %v487_v41 = vadd.f32 %v6689_v34, %v486_v36  ;;  %v6721_v42 = vadd.f32 %v1099_v29, %v916_v38  ;;  %1200 = vmatmul.f32.gmra.mxu3 %v610_v10  ;;  %v641_v29 = vsub.f32 %v410_v5, %v6734_v15 }
  0xd1   : > { %999 = vmatmul.f32.gmra.mxu2 %v609_v63 }
  0xd2   : > { %11395 = vst [vmem:[#allocation13_spill] sm:$0xff] %v6721_v42  ;;  %613 = vmatmul.f32.gmra.mxu0 %v612_v30  ;;  %v642_v43 = vand.u32 4294901760, %v641_v29 }
  0xd3   : > { %v763_v47 = vpop.f32.mrf.mxu1  ;;  %v1105_v51 = vpop.f32.mrf.mxu3 }
  0xd4   : > { %v920_v49 = vpop.f32.mrf.mxu2  ;;  %v764_v50 = vadd.f32 %v763_v47, %v487_v41  ;;  %v636_v41 = vand.u32 4294901760, %v635_v28 }
  0xd6   : > { %v921_v60 = vadd.f32 %v920_v49, %v764_v50  ;;  %826 = vmatmul.f32.gmra.mxu1 %v6698_v54 }
  0xd7   : > { %v494_v58 = vpop.f32.mrf.mxu0 }
  0xd8   : > { %v495_v63 = vadd.f32 %v6689_v34, %v494_v58  ;;  %v6730_v1 = vadd.f32 %v1105_v51, %v921_v60  ;;  %1206 = vmatmul.f32.gmra.mxu3 %v618_v32 }
  0xd9   : > { %1004 = vmatmul.f32.gmra.mxu2 %v617_v22  ;;  %v323_v22 = vld [vmem:[%s6537_s16 + $0xc0] sm:$0xff] }
  0xda   : > { %11397 = vst [vmem:[#allocation15_spill] sm:$0xff] %v6730_v1  ;;  %621 = vmatmul.f32.gmra.mxu0 %v620_v53  ;;  %v413_v30 = vsel %vm339_vm0, %v323_v22, 0  ;;  %v643_v53 = vsub.f32 %v641_v29, %v642_v43 }
  0xdb   : > { %v767_v6 = vpop.f32.mrf.mxu1  ;;  %v1111_v12 = vpop.f32.mrf.mxu3  ;;  %v6743_v46 = vand.u32 4294901760, %v413_v30 }
  0xdc   : > { %v925_v7 = vpop.f32.mrf.mxu2  ;;  %v768_v10 = vadd.f32 %v767_v6, %v495_v63  ;;  %v644_v5 = vand.u32 4294901760, %v643_v53 }
  0xdd   : > { %11400 = vst [vmem:[#allocation18_spill] sm:$0xff] %v6743_v46 }
  0xde   : > { %v926_v23 = vadd.f32 %v925_v7, %v768_v10  ;;  %830 = vmatmul.f32.gmra.mxu1 %v6707_v11 }
  0xdf   : > { %v502_v21 = vpop.f32.mrf.mxu0 }
  0xe0   : > { %v503_v24 = vadd.f32 %v6689_v34, %v502_v21  ;;  %v6739_v26 = vadd.f32 %v1111_v12, %v926_v23  ;;  %1212 = vmatmul.f32.gmra.mxu3 %v626_v55  ;;  %v649_v55 = vsub.f32 %v413_v30, %v6743_v46 }
  0xe1   : > { %1009 = vmatmul.f32.gmra.mxu2 %v625_v44  ;;  %v324_v44 = vld [vmem:[%s6537_s16 + $0xc8] sm:$0xff] }
  0xe2   : > { %11399 = vst [vmem:[#allocation17_spill] sm:$0xff] %v6739_v26  ;;  %629 = vmatmul.f32.gmra.mxu0 %v628_v13  ;;  %v416_v58 = vsel %vm339_vm0, %v324_v44, 0  ;;  %v650_v6 = vand.u32 4294901760, %v649_v55 }
  0xe3   : > { %v771_v32 = vpop.f32.mrf.mxu1  ;;  %v1117_v39 = vpop.f32.mrf.mxu3  ;;  %v6752_v7 = vand.u32 4294901760, %v416_v58 }
  0xe4   : > { %v930_v36 = vpop.f32.mrf.mxu2  ;;  %v772_v38 = vadd.f32 %v771_v32, %v503_v24  ;;  %v651_v21 = vsub.f32 %v649_v55, %v650_v6 }
  0xe5   : > { %11402 = vst [vmem:[#allocation20_spill] sm:$0xff] %v6752_v7  ;;  %v657_v23 = vsub.f32 %v416_v58, %v6752_v7 }
  0xe6   : > { %v931_v49 = vadd.f32 %v930_v36, %v772_v38  ;;  %834 = vmatmul.f32.gmra.mxu1 %v6716_v35  ;;  %v652_v36 = vand.u32 4294901760, %v651_v21 }
  0xe7   : > { %v510_v47 = vpop.f32.mrf.mxu0  ;;  %v658_v38 = vand.u32 4294901760, %v657_v23 }
  0xe8   : > { %v511_v50 = vadd.f32 %v6689_v34, %v510_v47  ;;  %v6748_v51 = vadd.f32 %v1117_v39, %v931_v49  ;;  %1218 = vmatmul.f32.gmra.mxu3 %v634_v14 }
  0xe9   : > { %1014 = vmatmul.f32.gmra.mxu2 %v633_v4  ;;  %v325_v4 = vld [vmem:[%s6537_s16 + $0xd0] sm:$0xff]  ;;  %v659_v49 = vsub.f32 %v657_v23, %v658_v38 }
  0xea   : > { %11401 = vst [vmem:[#allocation19_spill] sm:$0xff] %v6748_v51  ;;  %637 = vmatmul.f32.gmra.mxu0 %v636_v41  ;;  %v419_v22 = vsel %vm339_vm0, %v325_v4, 0  ;;  %v4669_v51 = vld [vmem:[%s11137_s5 + $0x30] sm:$0xff] }
  0xeb   : > { %v775_v60 = vpop.f32.mrf.mxu1  ;;  %v1123_v3 = vpop.f32.mrf.mxu3  ;;  %v6761_v39 = vand.u32 4294901760, %v419_v22  ;;  %v660_v58 = vand.u32 4294901760, %v659_v49  ;;  %v6905_v35 = vand.u32 4294901760, %v4669_v51 }
  0xec   : > { %v935_v62 = vpop.f32.mrf.mxu2  ;;  %v776_v63 = vadd.f32 %v775_v60, %v511_v50 }
  0xed   : > { %11404 = vst [vmem:[#allocation22_spill] sm:$0xff] %v6761_v39  ;;  %v665_v44 = vsub.f32 %v419_v22, %v6761_v39  ;;  %v328_v22 = vld [vmem:[%s6537_s16 + $0xe8] sm:$0xff] }
  0xee   : > { %v936_v12 = vadd.f32 %v935_v62, %v776_v63  ;;  %838 = vmatmul.f32.gmra.mxu1 %v6725_v57  ;;  %11416 = vst [vmem:[#allocation34_spill] sm:$0xff] %v6905_v35 }
  0xef   : > { %v518_v10 = vpop.f32.mrf.mxu0  ;;  %v666_v60 = vand.u32 4294901760, %v665_v44 }
  0xf0   : > { %v519_v13 = vadd.f32 %v6689_v34, %v518_v10  ;;  %v6757_v14 = vadd.f32 %v1123_v3, %v936_v12  ;;  %1224 = vmatmul.f32.gmra.mxu3 %v642_v43  ;;  %v327_v3 = vld [vmem:[%s6537_s16 + $0xe0] sm:$0xff] }
  0xf1   : > { %1019 = vmatmul.f32.gmra.mxu2 %v641_v29  ;;  %v326_v29 = vld [vmem:[%s6537_s16 + $0xd8] sm:$0xff] }
  0xf2   : > { %11403 = vst [vmem:[#allocation21_spill] sm:$0xff] %v6757_v14  ;;  %645 = vmatmul.f32.gmra.mxu0 %v644_v5  ;;  %v422_v50 = vsel %vm339_vm0, %v326_v29, 0  ;;  %v329_v29 = vld [vmem:[%s6537_s16 + $0xf0] sm:$0xff] }
  0xf3   : > { %v779_v24 = vpop.f32.mrf.mxu1  ;;  %v1129_v32 = vpop.f32.mrf.mxu3  ;;  %v6773_v62 = vand.u32 4294901760, %v422_v50 }
  0xf4   : > { %v940_v28 = vpop.f32.mrf.mxu2  ;;  %v780_v30 = vadd.f32 %v779_v24, %v519_v13 }
  0xf5   : > { %11406 = vst [vmem:[#allocation24_spill] sm:$0xff] %v6773_v62  ;;  %v673_v5 = vsub.f32 %v422_v50, %v6773_v62  ;;  %v431_v50 = vsel %vm339_vm0, %v329_v29, 0 }
  0xf6   : > { %v941_v47 = vadd.f32 %v940_v28, %v780_v30  ;;  %842 = vmatmul.f32.gmra.mxu1 %v6734_v15  ;;  %v428_v28 = vsel %vm339_vm0, %v328_v22, 0 }
  0xf7   : > { %v6763_v41 = vpop.f32.mrf.mxu0  ;;  %v674_v4 = vand.u32 4294901760, %v673_v5 }
  0xf8   : > { %v6767_v43 = vadd.f32 %v1129_v32, %v941_v47  ;;  %1230 = vmatmul.f32.gmra.mxu3 %v650_v6  ;;  %v425_v6 = vsel %vm339_vm0, %v327_v3, 0 }
  0xf9   : > { %1024 = vmatmul.f32.gmra.mxu2 %v649_v55  ;;  %v667_v55 = vsub.f32 %v665_v44, %v666_v60  ;;  %v6783_v13 = vand.u32 4294901760, %v425_v6 }
  0xfa   : > { %11405 = vst [vmem:[#allocation23_spill] sm:$0xff] %v6767_v43  ;;  %653 = vmatmul.f32.gmra.mxu0 %v652_v36 }
  0xfb   : > { %v6771_v53 = vpop.f32.mrf.mxu1  ;;  %v668_v12 = vand.u32 4294901760, %v667_v55  ;;  %11407 = vst [vmem:[#allocation25_spill] sm:$0xff] %v6783_v13  ;;  %v681_v24 = vsub.f32 %v425_v6, %v6783_v13  ;;  %v6803_v55 = vand.u32 4294901760, %v431_v50 }
  0xfd   : > { %v682_v36 = vand.u32 4294901760, %v681_v24  ;;  %11409 = vst [vmem:[#allocation27_spill] sm:$0xff] %v6803_v55 }
  0xfe   : > { %846 = vmatmul.f32.gmra.mxu1 %v6743_v46 }
  0xff   : > { %v6775_v63 = vpop.f32.mrf.mxu0  ;;  %v683_v49 = vsub.f32 %v681_v24, %v682_v36 }
 0x100   : > { %1236 = vmatmul.f32.gmra.mxu3 %v658_v38  ;;  %v6793_v38 = vand.u32 4294901760, %v428_v28 }
 0x101   : > { %1029 = vmatmul.f32.gmra.mxu2 %v657_v23  ;;  %v675_v23 = vsub.f32 %v673_v5, %v674_v4 }
 0x102   : > { %661 = vmatmul.f32.gmra.mxu0 %v660_v58  ;;  %11408 = vst [vmem:[#allocation26_spill] sm:$0xff] %v6793_v38 }
 0x103   : > { %v6781_v10 = vpop.f32.mrf.mxu1  ;;  %v676_v32 = vand.u32 4294901760, %v675_v23 }
 0x106   : > { %850 = vmatmul.f32.gmra.mxu1 %v6752_v7 }
 0x107   : > { %v6785_v21 = vpop.f32.mrf.mxu0 }
 0x108   : > { %1242 = vmatmul.f32.gmra.mxu3 %v666_v60  ;;  %v684_v60 = vand.u32 4294901760, %v683_v49 }
 0x109   : > { %1034 = vmatmul.f32.gmra.mxu2 %v665_v44  ;;  %v689_v44 = vsub.f32 %v428_v28, %v6793_v38 }
 0x10a   : > { %669 = vmatmul.f32.gmra.mxu0 %v668_v12  ;;  %v330_v12 = vld [vmem:[%s6537_s16 + $0xf8] sm:$0xff]  ;;  %s10882_s16 = scalar_lea.vmem [#allocation5], %s6098_s10  ;;  %s6106_s10 = sshll.u32 %s6466_s28, 8 }
 0x10b   : > { %v6791_v30 = vpop.f32.mrf.mxu1  ;;  %v690_v3 = vand.u32 4294901760, %v689_v44  ;;  %v434_v22 = vsel %vm339_vm0, %v330_v12, 0  ;;  %s6014_s8 = scalar_lea.hbm %s11139_s7, %s6106_s10  ;;  %s6015_s17 = sshll.u32 %s10882_s16, 4  ;;  %s6016_s17 = int_to_ptr.vmem [resolvable:$true] %s6015_s17 }
 0x10c   : > { %v6813_v29 = vand.u32 4294901760, %v434_v22  ;;  %s6017_s11 = sshll.u32 %s6014_s8, 4  ;;  %s6003_s28 = scalar_lea.sflag [#allocation4], %s6531_s22  ;;  %s6018_s11 = int_to_ptr.hbm [resolvable:$true] %s6017_s11 }
 0x10d   : > { %s6344_s12 = sshra.s32 %s6018_s11, 4  ;;  %s6345_s12 = int_to_ptr.hbm [resolvable:$true] %s6344_s12 }
 0x10e   : > { %854 = vmatmul.f32.gmra.mxu1 %v6761_v39  ;;  %11410 = vst [vmem:[#allocation28_spill] sm:$0xff] %v6813_v29  ;;  %s6346_s18 = scalar_lea.hbm %s6345_s12, 256  ;;  %p6351_p0 = scmp.lt.s32.totalorder %s6345_s12, %s11139_s7 }
 0x10f   : > { %v6795_v47 = vpop.f32.mrf.mxu0  ;;  %p6347_p6 = scmp.ne.s32.totalorder %s6345_s12, %s6346_s18  ;;  %p6352_p1 = scmp.lt.s32.totalorder %s6350_s20, %s6346_s18 }
 0x110   : > { %1248 = vmatmul.f32.gmra.mxu3 %v674_v4  ;;  %v697_v4 = vsub.f32 %v431_v50, %v6803_v55 }
 0x111   : > { %1039 = vmatmul.f32.gmra.mxu2 %v673_v5  ;;  %v691_v5 = vsub.f32 %v689_v44, %v690_v3  ;;  %p6348_p9 = pnand %p6347_p6, %p6495_p11  ;;  %p6353_p3 = por %p6352_p1, %p6351_p0 }
 0x112   : > { %677 = vmatmul.f32.gmra.mxu0 %v676_v32  ;;  %v698_v32 = vand.u32 4294901760, %v697_v4 }
 0x113   : > { %v6801_v58 = vpop.f32.mrf.mxu1  ;;  %v692_v28 = vand.u32 4294901760, %v691_v5  ;;  %p6349_p13 = pneg %p6348_p9 }
 0x115   : > { %p6354_p4 = pnand %p6353_p3, %p6349_p13 }
 0x116   : > { %858 = vmatmul.f32.gmra.mxu1 %v6773_v62 }
 0x117   : > { %v6805_v6 = vpop.f32.mrf.mxu0 }
 0x118   : > { %1254 = vmatmul.f32.gmra.mxu3 %v682_v36  ;;  %v705_v36 = vsub.f32 %v434_v22, %v6813_v29  ;;  %v6831_v22 = vpop.f32.mrf.mxu3 }
 0x119   : > { %1044 = vmatmul.f32.gmra.mxu2 %v681_v24  ;;  %v699_v24 = vsub.f32 %v697_v4, %v698_v32 }
 0x11a   : > { %685 = vmatmul.f32.gmra.mxu0 %v684_v60  ;;  %v706_v12 = vand.u32 4294901760, %v705_v36 }
 0x11b   : > { %v6811_v23 = vpop.f32.mrf.mxu1  ;;  %v700_v50 = vand.u32 4294901760, %v699_v24 }
 0x11c   : > { %v707_v5 = vsub.f32 %v705_v36, %v706_v12 }
 0x11e   : > { %862 = vmatmul.f32.gmra.mxu1 %v6783_v13 }
 0x11f   : > { %v6815_v49 = vpop.f32.mrf.mxu0 }
 0x120   : > { %1260 = vmatmul.f32.gmra.mxu3 %v690_v3  ;;  %v708_v3 = vand.u32 4294901760, %v707_v5 }
 0x121   : > { %1049 = vmatmul.f32.gmra.mxu2 %v689_v44  ;;  %v6826_v44 = vpop.f32.mrf.mxu2 }
 0x122   : > { %693 = vmatmul.f32.gmra.mxu0 %v692_v28 }
 0x123   : > { %v6819_v60 = vpop.f32.mrf.mxu1 }
 0x126   : > { %866 = vmatmul.f32.gmra.mxu1 %v6793_v38 }
 0x127   : > { %v6821_v62 = vpop.f32.mrf.mxu0 }
 0x128   : > { %1266 = vmatmul.f32.gmra.mxu3 %v698_v32 }
 0x129   : > { %1054 = vmatmul.f32.gmra.mxu2 %v697_v4  ;;  %v6835_v4 = vpop.f32.mrf.mxu2 }
 0x12a   : > { %701 = vmatmul.f32.gmra.mxu0 %v700_v50  ;;  %v6841_v50 = vpop.f32.mrf.mxu3 }
 0x12b   : > { %v6824_v39 = vpop.f32.mrf.mxu1 }
 0x12e   : > { %870 = vmatmul.f32.gmra.mxu1 %v6803_v55 }
 0x12f   : > { %v6828_v28 = vpop.f32.mrf.mxu0 }
 0x130   : > { %1272 = vmatmul.f32.gmra.mxu3 %v706_v12  ;;  %v4670_v12 = vld [vmem:[%s11137_s5 + $0x38] sm:$0xff] }
 0x131   : > { %1059 = vmatmul.f32.gmra.mxu2 %v705_v36  ;;  %v6848_v36 = vpop.f32.mrf.mxu2 }
 0x132   : > { %709 = vmatmul.f32.gmra.mxu0 %v708_v3  ;;  %v6854_v3 = vand.u32 4294901760, %v4670_v12 }
 0x133   : > { %v6833_v24 = vpop.f32.mrf.mxu1 }
 0x134   : > { %11411 = vst [vmem:[#allocation29_spill] sm:$0xff] %v6854_v3  ;;  %4781 = vmatpush.msrb.mxu2 %v6854_v3  ;;  %v6860_v38 = vsub.f32 %v4670_v12, %v6854_v3  ;;  %5440 = vmatpush.msra.mxu1 %v6854_v3 }
 0x136   : > { %874 = vmatmul.f32.gmra.mxu1 %v6813_v29  ;;  %11412 = vst [vmem:[#allocation30_spill] sm:$0xff] %v6860_v38  ;;  %v11161_v7 = vand.u32 4294901760, %v6860_v38  ;;  %5248 = vmatpush.msra.mxu0 %v6860_v38 }
 0x137   : > { %v6837_v32 = vpop.f32.mrf.mxu0  ;;  %4783 = vmatpush.msrb.mxu2 %v6905_v35  ;;  %5442 = vmatpush.msra.mxu1 %v6905_v35 }
 0x138   : > { %v5064_v46 = vsub.f32 %v6860_v38, %v11161_v7 }
 0x139   : > { %v6874_v12 = vpop.f32.mrf.mxu2 }
 0x13a   : > { %1305 = vmatmul.f32.vlgmr.msrb.gmra.mxu0 %v6573_v16  ;;  %v5065_v43 = vand.u32 4294901760, %v5064_v46 }
 0x13b   : > { %v6843_v5 = vpop.f32.mrf.mxu1 }
 0x13c   : > { %5066 = vmatpush.msrb.mxu3 %v5065_v43 }
 0x13e   : > { %1454 = vmatmul.f32.vlgmr.msrb.gmra.mxu1 %v6573_v16  ;;  %v6863_v16 = vpop.f32.mrf.mxu3 }
 0x13f   : > { %v6845_v55 = vpop.f32.mrf.mxu0 }
 0x141   : > { %v6886_v57 = vpop.f32.mrf.mxu2 }
 0x142   : > { %1309 = vmatmul.f32.gmra.mxu0 %v6576_v18 }
 0x143   : > { %v6856_v29 = vpop.f32.mrf.mxu1 }
 0x146   : > { %1458 = vmatmul.f32.gmra.mxu1 %v6576_v18  ;;  %v6881_v18 = vpop.f32.mrf.mxu3 }
 0x147   : > { %v6865_v13 = vpop.f32.mrf.mxu0 }
 0x149   : > { %v6896_v38 = vpop.f32.mrf.mxu2 }
 0x14a   : > { %1313 = vmatmul.f32.gmra.mxu0 %v6585_v31 }
 0x14b   : > { %v6876_v3 = vpop.f32.mrf.mxu1 }
 0x14e   : > { %1462 = vmatmul.f32.gmra.mxu1 %v6585_v31  ;;  %v6891_v46 = vpop.f32.mrf.mxu3 }
 0x14f   : > { %v6878_v15 = vpop.f32.mrf.mxu0 }
 0x152   : > { %1317 = vmatmul.f32.gmra.mxu0 %v6592_v45 }
 0x153   : > { %v6884_v14 = vpop.f32.mrf.mxu1 }
 0x156   : > { %1466 = vmatmul.f32.gmra.mxu1 %v6592_v45  ;;  %v6907_v45 = vpop.f32.mrf.mxu3 }
 0x157   : > { %v6888_v7 = vpop.f32.mrf.mxu0 }
 0x158   : > { %11413 = vst [vmem:[#allocation31_spill] sm:$0xff] %v6888_v7 }
 0x15a   : > { %1321 = vmatmul.f32.gmra.mxu0 %v6601_v52 }
 0x15b   : > { %v6894_v43 = vpop.f32.mrf.mxu1 }
 0x15c   : > { %11414 = vst [vmem:[#allocation32_spill] sm:$0xff] %v6894_v43  ;;  %v6913_v43 = vsub.f32 %v4669_v51, %v6905_v35 }
 0x15e   : > { %1470 = vmatmul.f32.gmra.mxu1 %v6601_v52  ;;  %11418 = vst [vmem:[#allocation36_spill] sm:$0xff] %v6913_v43  ;;  %v11170_v26 = vand.u32 4294901760, %v6913_v43  ;;  %5251 = vmatpush.msra.mxu0 %v6913_v43  ;;  %v6929_v35 = vpop.f32.mrf.mxu3 }
 0x15f   : > { %v6898_v31 = vpop.f32.mrf.mxu0 }
 0x160   : > { %11415 = vst [vmem:[#allocation33_spill] sm:$0xff] %v6898_v31  ;;  %v6921_v31 = vpop.f32.mrf.mxu2 }
 0x162   : > { %1325 = vmatmul.f32.gmra.mxu0 %v6608_v59 }
 0x163   : > { %v6909_v11 = vpop.f32.mrf.mxu1 }
 0x164   : > { %11417 = vst [vmem:[#allocation35_spill] sm:$0xff] %v6909_v11  ;;  %v5070_v11 = vsub.f32 %v6913_v43, %v11170_v26 }
 0x166   : > { %1474 = vmatmul.f32.gmra.mxu1 %v6608_v59  ;;  %v5071_v51 = vand.u32 4294901760, %v5070_v11  ;;  %v6942_v11 = vpop.f32.mrf.mxu3 }
 0x167   : > { %v6916_v52 = vpop.f32.mrf.mxu0 }
 0x168   : > { %11419 = vst [vmem:[#allocation37_spill] sm:$0xff] %v6916_v52  ;;  %5072 = vmatpush.msrb.mxu3 %v5071_v51  ;;  %v6935_v59 = vpop.f32.mrf.mxu2 }
 0x16a   : > { %1329 = vmatmul.f32.gmra.mxu0 %v6614_v2 }
 0x16b   : > { %v6927_v1 = vpop.f32.mrf.mxu1 }
 0x16c   : > { %11420 = vst [vmem:[#allocation38_spill] sm:$0xff] %v6927_v1 }
 0x16e   : > { %1478 = vmatmul.f32.gmra.mxu1 %v6614_v2  ;;  %v6952_v2 = vpop.f32.mrf.mxu3 }
 0x16f   : > { %v6931_v52 = vpop.f32.mrf.mxu0 }
 0x170   : > { %11421 = vst [vmem:[#allocation39_spill] sm:$0xff] %v6931_v52  ;;  %v6947_v26 = vpop.f32.mrf.mxu2 }
 0x172   : > { %1333 = vmatmul.f32.gmra.mxu0 %v6620_v9 }
 0x173   : > { %v6937_v7 = vpop.f32.mrf.mxu1 }
 0x174   : > { %11422 = vst [vmem:[#allocation40_spill] sm:$0xff] %v6937_v7 }
 0x176   : > { %1482 = vmatmul.f32.gmra.mxu1 %v6620_v9  ;;  %v4668_v9 = vld [vmem:[%s11137_s5 + $0x28] sm:$0xff]  ;;  %v6978_v52 = vpop.f32.mrf.mxu3 }
 0x177   : > { %v6939_v54 = vpop.f32.mrf.mxu0 }
 0x178   : > { %11423 = vst [vmem:[#allocation41_spill] sm:$0xff] %v6939_v54  ;;  %v6958_v54 = vand.u32 4294901760, %v4668_v9 }
 0x17a   : > { %1337 = vmatmul.f32.gmra.mxu0 %v6626_v17  ;;  %11426 = vst [vmem:[#allocation44_spill] sm:$0xff] %v6958_v54  ;;  %4785 = vmatpush.msrb.mxu2 %v6958_v54 }
 0x17b   : > { %v6945_v51 = vpop.f32.mrf.mxu1  ;;  %5444 = vmatpush.msra.mxu1 %v6958_v54 }
 0x17c   : > { %11424 = vst [vmem:[#allocation42_spill] sm:$0xff] %v6945_v51  ;;  %v6964_v51 = vsub.f32 %v4668_v9, %v6958_v54 }
 0x17e   : > { %1486 = vmatmul.f32.gmra.mxu1 %v6626_v17  ;;  %11428 = vst [vmem:[#allocation46_spill] sm:$0xff] %v6964_v51  ;;  %v6967_v17 = vpop.f32.mrf.mxu2  ;;  %v11175_v1 = vand.u32 4294901760, %v6964_v51  ;;  %5254 = vmatpush.msra.mxu0 %v6964_v51  ;;  %v6990_v42 = vpop.f32.mrf.mxu3 }
 0x17f   : > { %v6949_v43 = vpop.f32.mrf.mxu0  ;;  %11433 = vst [vmem:[#allocation51_spill] sm:$0xff] %v6990_v42 }
 0x180   : > { %11425 = vst [vmem:[#allocation43_spill] sm:$0xff] %v6949_v43 }
 0x182   : > { %1341 = vmatmul.f32.gmra.mxu0 %v6632_v25 }
 0x183   : > { %v6960_v7 = vpop.f32.mrf.mxu1 }
 0x184   : > { %11427 = vst [vmem:[#allocation45_spill] sm:$0xff] %v6960_v7  ;;  %v5076_v7 = vsub.f32 %v6964_v51, %v11175_v1 }
 0x186   : > { %1490 = vmatmul.f32.gmra.mxu1 %v6632_v25  ;;  %v5077_v9 = vand.u32 4294901760, %v5076_v7  ;;  %v6985_v25 = vpop.f32.mrf.mxu2 }
 0x187   : > { %v6969_v43 = vpop.f32.mrf.mxu0 }
 0x188   : > { %11429 = vst [vmem:[#allocation47_spill] sm:$0xff] %v6969_v43  ;;  %5078 = vmatpush.msrb.mxu3 %v5077_v9 }
 0x18a   : > { %1345 = vmatmul.f32.gmra.mxu0 %v6638_v33 }
 0x18b   : > { %v6980_v54 = vpop.f32.mrf.mxu1 }
 0x18c   : > { %11430 = vst [vmem:[#allocation48_spill] sm:$0xff] %v6980_v54  ;;  %v551_v54 = vadd.f32 %v6689_v34, %v6795_v47 }
 0x18e   : > { %1494 = vmatmul.f32.gmra.mxu1 %v6638_v33  ;;  %v6996_v7 = vpop.f32.mrf.mxu2  ;;  %v7003_v33 = vpop.f32.mrf.mxu3 }
 0x18f   : > { %v6982_v37 = vpop.f32.mrf.mxu0  ;;  %11437 = vst [vmem:[#allocation55_spill] sm:$0xff] %v7003_v33 }
 0x190   : > { %11431 = vst [vmem:[#allocation49_spill] sm:$0xff] %v6982_v37 }
 0x192   : > { %1349 = vmatmul.f32.gmra.mxu0 %v6644_v40 }
 0x193   : > { %v6988_v43 = vpop.f32.mrf.mxu1 }
 0x194   : > { %11432 = vst [vmem:[#allocation50_spill] sm:$0xff] %v6988_v43 }
 0x196   : > { %1498 = vmatmul.f32.gmra.mxu1 %v6644_v40  ;;  %v7008_v37 = vpop.f32.mrf.mxu2  ;;  %v4667_v40 = vld [vmem:[%s11137_s5 + $0x20] sm:$0xff] }
 0x197   : > { %v6992_v1 = vpop.f32.mrf.mxu0  ;;  %11439 = vst [vmem:[#allocation57_spill] sm:$0xff] %v7008_v37  ;;  %v567_v37 = vadd.f32 %v6689_v34, %v6815_v49  ;;  %v796_v49 = vadd.f32 %v6801_v58, %v551_v54  ;;  %v7064_v54 = vld [vmem:[%s11135_s3] sm:$0xff] }
 0x198   : > { %11434 = vst [vmem:[#allocation52_spill] sm:$0xff] %v6992_v1 }
 0x19a   : > { %1353 = vmatmul.f32.gmra.mxu0 %v6650_v48 }
 0x19b   : > { %v6998_v9 = vpop.f32.mrf.mxu1 }
 0x19c   : > { %11435 = vst [vmem:[#allocation53_spill] sm:$0xff] %v6998_v9  ;;  %v7016_v9 = vand.u32 4294901760, %v4667_v40 }
 0x19e   : > { %1502 = vmatmul.f32.gmra.mxu1 %v6650_v48  ;;  %11441 = vst [vmem:[#allocation59_spill] sm:$0xff] %v7016_v9  ;;  %4787 = vmatpush.msrb.mxu2 %v7016_v9  ;;  %v527_v48 = vadd.f32 %v6689_v34, %v6763_v41  ;;  %v7038_v33 = vpop.f32.mrf.mxu2 }
 0x19f   : > { %v7000_v51 = vpop.f32.mrf.mxu0  ;;  %5446 = vmatpush.msra.mxu1 %v7016_v9 }
 0x1a0   : > { %11436 = vst [vmem:[#allocation54_spill] sm:$0xff] %v7000_v51  ;;  %v7018_v51 = vpop.f32.mrf.mxu3  ;;  %v784_v41 = vadd.f32 %v6771_v53, %v527_v48  ;;  %v583_v53 = vadd.f32 %v6689_v34, %v6828_v28  ;;  %v961_v28 = vadd.f32 %v6874_v12, %v796_v49  ;;  %v7101_v12 = vperm.slane %v7064_v54, 2 }
 0x1a1   : > { %11442 = vst [vmem:[#allocation60_spill] sm:$0xff] %v7018_v51  ;;  %v559_v51 = vadd.f32 %v6689_v34, %v6805_v6  ;;  %v575_v6 = vadd.f32 %v6689_v34, %v6821_v62  ;;  %v7128_v49 = vperm.slane %v7064_v54, 0 }
 0x1a2   : > { %1357 = vmatmul.f32.gmra.mxu0 %v6656_v56 }
 0x1a3   : > { %v7006_v43 = vpop.f32.mrf.mxu1 }
 0x1a4   : > { %11438 = vst [vmem:[#allocation56_spill] sm:$0xff] %v7006_v43  ;;  %v543_v43 = vadd.f32 %v6689_v34, %v6785_v21 }
 0x1a6   : > { %1506 = vmatmul.f32.gmra.mxu1 %v6656_v56  ;;  %v535_v56 = vadd.f32 %v6689_v34, %v6775_v63  ;;  %v7044_v63 = vsub.f32 %v4667_v40, %v7016_v9  ;;  %v792_v47 = vadd.f32 %v6791_v30, %v543_v43  ;;  %v804_v40 = vadd.f32 %v6819_v60, %v567_v37 }
 0x1a7   : > { %v7010_v1 = vpop.f32.mrf.mxu0  ;;  %v6400_v30 = vmov 0.0  }
 0x1a8   : > { %11440 = vst [vmem:[#allocation58_spill] sm:$0xff] %v7010_v1  ;;  %v788_v21 = vadd.f32 %v6781_v10, %v535_v56  ;;  %v11177_v48 = vand.u32 4294901760, %v7044_v63  ;;  %5257 = vmatpush.msra.mxu0 %v7044_v63  ;;  %v946_v10 = vadd.f32 %v6826_v44, %v784_v41  ;;  %v7059_v43 = vrot.slane %v6400_v30, 7  ;;  %v7072_v60 = vpop.f32.mrf.mxu3 }
 0x1a9   : > { %11444 = vst [vmem:[#allocation62_spill] sm:$0xff] %v7044_v63  ;;  %v956_v37 = vadd.f32 %v6848_v36, %v792_v47  ;;  %v591_v56 = vadd.f32 %v6689_v34, %v6837_v32  ;;  %v7083_v36 = vperm.slane %v7064_v54, 1 }
 0x1aa   : > { %1361 = vmatmul.f32.gmra.mxu0 %v6662_v0  ;;  %11445 = vst [vmem:[#allocation63_spill] sm:$0xff] %v7059_v43  ;;  %v5082_v62 = vsub.f32 %v7044_v63, %v11177_v48  ;;  %v951_v58 = vadd.f32 %v6835_v4, %v788_v21  ;;  %v971_v4 = vadd.f32 %v6896_v38, %v804_v40 }
 0x1ab   : > { %v7029_v1 = vpop.f32.mrf.mxu1  ;;  %11447 = vst [vmem:[#allocation65_spill] sm:$0xff] %v7083_v36  ;;  %v816_v47 = vadd.f32 %v6843_v5, %v591_v56  ;;  %v2130_v40 = vmul.f32 %v7101_v12, %v7059_v43 }
 0x1ac   : > { %11443 = vst [vmem:[#allocation61_spill] sm:$0xff] %v7029_v1  ;;  %v5083_v41 = vand.u32 4294901760, %v5082_v62  ;;  %v7094_v32 = vadd.f32 %v6841_v50, %v951_v58  ;;  %v7110_v50 = vpop.f32.mrf.mxu2 }
 0x1ad   : > { %v986_v62 = vadd.f32 %v6947_v26, %v816_v47 }
 0x1ae   : > { %1510 = vmatmul.f32.gmra.mxu1 %v6662_v0  ;;  %v800_v0 = vadd.f32 %v6811_v23, %v559_v51  ;;  %v808_v23 = vadd.f32 %v6824_v39, %v575_v6  ;;  %v812_v51 = vadd.f32 %v6833_v24, %v583_v53  ;;  %v7086_v39 = vadd.f32 %v6831_v22, %v946_v10 }
 0x1af   : > { %v7040_v42 = vpop.f32.mrf.mxu0  ;;  %v7091_v24 = vsel %vm1615_vm1, 0.0, %v7059_v43  ;;  %5084 = vmatpush.msrb.mxu3 %v5083_v41  ;;  %v7104_v22 = vadd.f32 %v6881_v18, %v961_v28  ;;  %v599_v6 = vadd.f32 %v6689_v34, %v6845_v55  ;;  %v7125_v55 = vperm.slane %v7064_v54, 4 }
 0x1b0   : > { %v966_v30 = vadd.f32 %v6886_v57, %v800_v0  ;;  %11448 = vst [vmem:[#allocation66_spill] sm:$0xff] %v7091_v24  ;;  %v7097_v57 = vadd.f32 %v6863_v16, %v956_v37  ;;  %v976_v38 = vadd.f32 %v6921_v31, %v808_v23  ;;  %v7116_v31 = vadd.f32 %v6907_v45, %v971_v4 }
 0x1b1   : > { %11450 = vst [vmem:[#allocation68_spill] sm:$0xff] %v7104_v22  ;;  %v1887_v18 = vmul.f32 %v7083_v36, %v7091_v24  ;;  %v607_v53 = vadd.f32 %v6689_v34, %v6865_v13  ;;  %v820_v58 = vadd.f32 %v6856_v29, %v599_v6  ;;  %v7153_v13 = vpop.f32.mrf.mxu3  ;;  %v1822_v29 = vmul.f32 %v7128_v49, %v7091_v24 }
 0x1b2   : > { %1365 = vmatmul.f32.gmra.mxu0 %v6668_v8  ;;  %11449 = vst [vmem:[#allocation67_spill] sm:$0xff] %v7097_v57  ;;  %v7113_v16 = vadd.f32 %v6891_v46, %v966_v30  ;;  %v7132_v46 = vsel %vm1615_vm1, %v7059_v43, 0.0  ;;  %v7135_v45 = vadd.f32 %v6929_v35, %v976_v38  ;;  %v7151_v35 = vld [vmem:[%s11136_s4] ss:$0 sm:$0xff]  ;;  %v7165_v38 = vperm.slane %v7064_v54, 5 }
 0x1b3   : > { %v7074_v44 = vpop.f32.mrf.mxu1  ;;  %11452 = vst [vmem:[#allocation70_spill] sm:$0xff] %v7116_v31  ;;  %v1984_v23 = vrot.slane %v1887_v18, 1  ;;  %v824_v30 = vadd.f32 %v6876_v3, %v607_v53  ;;  %v7174_v18 = vadd.f32 %v6952_v2, %v986_v62 }
 0x1b4   : > { %11446 = vst [vmem:[#allocation64_spill] sm:$0xff] %v7074_v44  ;;  %v7179_v53 = vpop.f32.mrf.mxu2 }
 0x1b5   : > { %11451 = vst [vmem:[#allocation69_spill] sm:$0xff] %v7113_v16 }
 0x1b6   : > { %1514 = vmatmul.f32.gmra.mxu1 %v6668_v8  ;;  %v981_v8 = vadd.f32 %v6935_v59, %v812_v51  ;;  %v1888_v59 = vmul.f32 %v7083_v36, %v7059_v43  ;;  %11453 = vst [vmem:[#allocation71_spill] sm:$0xff] %v7132_v46  ;;  %v1889_v51 = vmul.f32 %v7083_v36, %v7132_v46 }
 0x1b7   : > { %v1306_v21 = vpop.f32.mrf.mxu0  ;;  %11454 = vst [vmem:[#allocation72_spill] sm:$0xff] %v7135_v45 }
 0x1b8   : > { %v1307_v5 = vadd.f32 %v1306_v21, %v6703_v61  ;;  %v2129_v61 = vmul.f32 %v7101_v12, %v7091_v24  ;;  %v7144_v10 = vadd.f32 %v6942_v11, %v981_v8  ;;  %v1985_v28 = vrot.slane %v1888_v59, 1  ;;  %11456 = vst [vmem:[#allocation74_spill] sm:$0xff] %v7165_v38 }
 0x1b9   : > { %v2131_v11 = vmul.f32 %v7101_v12, %v7132_v46  ;;  %v2227_v21 = vrot.slane %v2130_v40, 2  ;;  %v615_v8 = vadd.f32 %v6689_v34, %v6878_v15  ;;  %11457 = vst [vmem:[#allocation75_spill] sm:$0xff] %v7174_v18  ;;  %v1987_v3 = vrot.slane %v1889_v51, 1 }
 0x1ba   : > { %1369 = vmatmul.f32.gmra.mxu0 %v6674_v19  ;;  %11455 = vst [vmem:[#allocation73_spill] sm:$0xff] %v7144_v10  ;;  %v2226_v4 = vrot.slane %v2129_v61, 2  ;;  %v7182_v15 = vperm.slane %v7064_v54, 3 }
 0x1bb   : > { %v1455_v0 = vpop.f32.mrf.mxu1  ;;  %v2229_v59 = vrot.slane %v2131_v11, 2  ;;  %v1988_v11 = vsel %vm1983_vm2, %v1985_v28, %v1987_v3  ;;  %v11459_v3 = vld [vmem:[#allocation13_spill] sm:$0xff] }
 0x1bc   : > { %v1456_v37 = vadd.f32 %v1455_v0, %v1307_v5  ;;  %v991_v5 = vadd.f32 %v6967_v17, %v820_v58  ;;  %v2228_v40 = vsel %vm2225_vm3, %v2226_v4, %v2227_v21  ;;  %v7193_v58 = vadd.f32 %v6985_v25, %v824_v30  ;;  %v7232_v24 = vpop.f32.mrf.mxu2 }
 0x1be   : > { %v1618_v56 = vrot.slane %v1456_v37, 7  ;;  %v1754_v26 = vmul.f32 %v7125_v55, %v1456_v37  ;;  %1518 = vmatmul.f32.gmra.mxu1 %v6674_v19  ;;  %v1986_v19 = vsel %vm1983_vm2, %v1984_v23, %v1985_v28  ;;  %v828_v37 = vadd.f32 %v6884_v14, %v615_v8  ;;  %v4666_v8 = vld [vmem:[%s11137_s5 + $0x18] sm:$0xff]  ;;  %v7210_v28 = vpop.f32.mrf.mxu3 }
 0x1bf   : > { %v1310_v41 = vpop.f32.mrf.mxu0 }
 0x1c0   : > { %v7170_v47 = vsel %vm1615_vm1, 0.0, %v1618_v56  ;;  %v1789_v6 = vadd.f32 %v7151_v35, %v1754_v26  ;;  %v1311_v0 = vadd.f32 %v1310_v41, %v6712_v20  ;;  %v1823_v20 = vmul.f32 %v7128_v49, %v7059_v43 }
 0x1c1   : > { %v1890_v2 = vmul.f32 %v7083_v36, %v7170_v47  ;;  %v2132_v61 = vmul.f32 %v7101_v12, %v7170_v47  ;;  %v2436_v62 = vmul.f32 %v7165_v38, %v7170_v47  ;;  %v2230_v26 = vsel %vm2225_vm3, %v2227_v21, %v2229_v59 }
 0x1c2   : > { %1373 = vmatmul.f32.gmra.mxu0 %v6680_v27  ;;  %v1854_v34 = vadd.f32 %v1822_v29, %v1789_v6  ;;  %v7201_v29 = vperm.slane %v7064_v54, 6  ;;  %v2371_v4 = vmul.f32 %v7182_v15, %v7170_v47 }
 0x1c3   : > { %v1459_v17 = vpop.f32.mrf.mxu1  ;;  %v1989_v21 = vrot.slane %v1890_v2, 1  ;;  %v2231_v6 = vrot.slane %v2132_v61, 2 }
 0x1c4   : > { %v2096_v23 = vadd.f32 %v1986_v19, %v1854_v34  ;;  %v1460_v51 = vadd.f32 %v1459_v17, %v1311_v0  ;;  %11458 = vst [vmem:[#allocation76_spill] sm:$0xff] %v7201_v29  ;;  %v2532_v19 = vrot.slane %v2436_v62, 2  ;;  %v7218_v17 = vand.u32 4294901760, %v4666_v8  ;;  %v11461_v62 = vld [vmem:[#allocation9_spill] sm:$0xff] }
 0x1c6   : > { %v2338_v41 = vadd.f32 %v2228_v40, %v2096_v23  ;;  %v1619_v25 = vrot.slane %v1460_v51, 7  ;;  %v1755_v30 = vmul.f32 %v7125_v55, %v1460_v51  ;;  %1522 = vmatmul.f32.gmra.mxu1 %v6680_v27  ;;  %11460 = vst [vmem:[#allocation13_spill] sm:$0xff] %v7218_v17  ;;  %4789 = vmatpush.msrb.mxu2 %v7218_v17 }
 0x1c7   : > { %v1314_v14 = vpop.f32.mrf.mxu0  ;;  %5448 = vmatpush.msra.mxu1 %v7218_v17 }
 0x1c8   : > { %v1315_v59 = vadd.f32 %v1314_v14, %v11459_v3  ;;  %v7214_v34 = vsel %vm1615_vm1, %v1618_v56, %v1619_v25  ;;  %v1734_v0 = vsel %vm1615_vm1, %v1619_v25, 0.0  ;;  %v1790_v40 = vadd.f32 %v7151_v35, %v1755_v30 }
 0x1c9   : > { %v1891_v27 = vmul.f32 %v7083_v36, %v7214_v34  ;;  %v1892_v23 = vmul.f32 %v7083_v36, %v1734_v0  ;;  %v2133_v2 = vmul.f32 %v7101_v12, %v7214_v34  ;;  %v2134_v61 = vmul.f32 %v7101_v12, %v1734_v0 }
 0x1ca   : > { %1377 = vmatmul.f32.gmra.mxu0 %v11461_v62  ;;  %v1855_v56 = vadd.f32 %v1823_v20, %v1790_v40  ;;  %v2437_v51 = vmul.f32 %v7165_v38, %v7214_v34  ;;  %v2438_v25 = vmul.f32 %v7165_v38, %v1734_v0  ;;  %v2403_v30 = vadd.f32 %v2371_v4, %v2338_v41 }
 0x1cb   : > { %v1990_v14 = vrot.slane %v1891_v27, 1  ;;  %v1992_v3 = vrot.slane %v1892_v23, 1  ;;  %v2232_v48 = vrot.slane %v2133_v2, 2  ;;  %v2234_v46 = vrot.slane %v2134_v61, 2  ;;  %v1463_v43 = vpop.f32.mrf.mxu1  ;;  %v11464_v61 = vld [vmem:[#allocation51_spill] sm:$0xff] }
 0x1cc   : > { %v2097_v9 = vadd.f32 %v1988_v11, %v1855_v56  ;;  %v2533_v63 = vrot.slane %v2437_v51, 2  ;;  %v2535_v20 = vrot.slane %v2438_v25, 2  ;;  %v1464_v40 = vadd.f32 %v1463_v43, %v1315_v59  ;;  %v11468_v56 = vld [vmem:[#allocation15_spill] sm:$0xff] }
 0x1cd   : > { %v1991_v18 = vsel %vm1983_vm2, %v1989_v21, %v1990_v14  ;;  %v2233_v0 = vsel %vm2225_vm3, %v2231_v6, %v2232_v48  ;;  %v7237_v10 = vsel %vm1983_vm2, %v1990_v14, %v1992_v3  ;;  %v7240_v41 = vsel %vm2225_vm3, %v2232_v48, %v2234_v46 }
 0x1ce   : > { %v7243_v4 = vadd.f32 %v6978_v52, %v991_v5  ;;  %v1621_v27 = vrot.slane %v1464_v40, 7  ;;  %v1756_v23 = vmul.f32 %v7125_v55, %v1464_v40  ;;  %1526 = vmatmul.f32.gmra.mxu1 %v11461_v62  ;;  %v2534_v43 = vsel %vm2225_vm3, %v2532_v19, %v2533_v63 }
 0x1cf   : > { %v1318_v11 = vpop.f32.mrf.mxu0  ;;  %v1001_v21 = vadd.f32 %v6996_v7, %v828_v37  ;;  %v2339_v6 = vadd.f32 %v2230_v26, %v2097_v9  ;;  %v2644_v59 = vadd.f32 %v2534_v43, %v2403_v30  ;;  %v7250_v2 = vsub.f32 %v4666_v8, %v7218_v17  ;;  %v7263_v7 = vpop.f32.mrf.mxu3  ;;  %v11466_v9 = vld [vmem:[#allocation10_spill] sm:$0xff]  ;;  %v11471_v43 = vld [vmem:[#allocation33_spill] sm:$0xff] }
 0x1d0   : > { %11462 = vst [vmem:[#allocation9_spill] sm:$0xff] %v7243_v4  ;;  %v7253_v48 = vsel %vm1615_vm1, 0.0, %v1621_v27  ;;  %v1791_v52 = vadd.f32 %v7151_v35, %v1756_v23  ;;  %v1824_v46 = vmul.f32 %v7128_v49, %v7170_v47  ;;  %v2536_v5 = vsel %vm2225_vm3, %v2533_v63, %v2535_v20  ;;  %v7276_v63 = vld [vmem:[%s11134_s2] ss:$0 sm:$0xff]  ;;  %v11467_v47 = vld [vmem:[#allocation31_spill] sm:$0xff] }
 0x1d1   : > { %11463 = vst [vmem:[#allocation77_spill] sm:$0xff] %v7250_v2  ;;  %v7261_v19 = vadd.f32 %v11464_v61, %v7193_v58  ;;  %v2677_v37 = vmul.f32 %v7201_v29, %v7253_v48  ;;  %v7269_v26 = vperm.slane %v7064_v54, 7  ;;  %v2372_v8 = vmul.f32 %v7182_v15, %v7214_v34  ;;  %5260 = vmatpush.msra.mxu0 %v7250_v2  ;;  %v7292_v20 = vld [vmem:[%s11135_s3 + $0x8] ss:$0 sm:$0xff]  ;;  %v11469_v23 = vld [vmem:[#allocation55_spill] sm:$0xff] }
 0x1d2   : > { %1381 = vmatmul.f32.gmra.mxu0 %v11466_v9  ;;  %v623_v58 = vadd.f32 %v7276_v63, %v11467_v47  ;;  %v1856_v62 = vadd.f32 %v1824_v46, %v1791_v52  ;;  %v1319_v51 = vadd.f32 %v1318_v11, %v11468_v56  ;;  %v11186_v25 = vand.u32 4294901760, %v7250_v2 }
 0x1d3   : > { %11465 = vst [vmem:[#allocation51_spill] sm:$0xff] %v7261_v19  ;;  %v1467_v54 = vpop.f32.mrf.mxu1  ;;  %v1893_v30 = vmul.f32 %v7083_v36, %v7253_v48  ;;  %v2135_v14 = vmul.f32 %v7101_v12, %v7253_v48  ;;  %v7287_v3 = vadd.f32 %v2677_v37, %v2644_v59  ;;  %v2404_v40 = vadd.f32 %v2372_v8, %v2339_v6  ;;  %v7308_v6 = vpop.f32.mrf.mxu2 }
 0x1d4   : > { %v7295_v11 = vadd.f32 %v11469_v23, %v1001_v21  ;;  %v631_v52 = vadd.f32 %v7276_v63, %v11471_v43  ;;  %v2098_v46 = vadd.f32 %v1991_v18, %v1856_v62  ;;  %v1468_v61 = vadd.f32 %v1467_v54, %v1319_v51 }
 0x1d5   : > { %v1825_v47 = vmul.f32 %v7128_v49, %v7214_v34  ;;  %v2742_v59 = vmul.f32 %v7269_v26, %v7253_v48  ;;  %v5088_v37 = vsub.f32 %v7250_v2, %v11186_v25  ;;  %v7306_v56 = vadd.f32 %v2536_v5, %v2404_v40  ;;  %v11473_v25 = vld [vmem:[#allocation11_spill] sm:$0xff] }
 0x1d6   : > { %11470 = vst [vmem:[#allocation10_spill] sm:$0xff] %v7295_v11  ;;  %v2340_v21 = vadd.f32 %v2233_v0, %v2098_v46  ;;  %v1622_v8 = vrot.slane %v1468_v61, 7  ;;  %v1757_v23 = vmul.f32 %v7125_v55, %v1468_v61  ;;  %1530 = vmatmul.f32.gmra.mxu1 %v11466_v9  ;;  %v2373_v34 = vmul.f32 %v7182_v15, %v7253_v48 }
 0x1d7   : > { %v1322_v18 = vpop.f32.mrf.mxu0  ;;  %v1994_v62 = vrot.slane %v1893_v30, 1  ;;  %v2236_v51 = vrot.slane %v2135_v14, 2  ;;  %v2983_v54 = vmul.f32 %v7292_v20, %v7253_v48  ;;  %v5089_v43 = vand.u32 4294901760, %v5088_v37  ;;  %v11472_v14 = vld [vmem:[#allocation17_spill] sm:$0xff] }
 0x1d8   : > { %v7317_v5 = vsel %vm1615_vm1, %v1621_v27, %v1622_v8  ;;  %v7320_v0 = vsel %vm1615_vm1, %v1622_v8, 0.0  ;;  %v1792_v40 = vadd.f32 %v7151_v35, %v1757_v23  ;;  %v7323_v46 = vadd.f32 %v2373_v34, %v2340_v21  ;;  %v7339_v34 = vpop.f32.mrf.mxu3 }
 0x1d9   : > { %v1895_v9 = vmul.f32 %v7083_v36, %v7320_v0  ;;  %v2137_v30 = vmul.f32 %v7101_v12, %v7320_v0  ;;  %v1323_v61 = vadd.f32 %v1322_v18, %v11472_v14  ;;  %v1894_v27 = vmul.f32 %v7083_v36, %v7317_v5  ;;  %5090 = vmatpush.msrb.mxu3 %v5089_v43  ;;  %v11475_v43 = vld [vmem:[#allocation32_spill] sm:$0xff] }
 0x1da   : > { %1385 = vmatmul.f32.gmra.mxu0 %v11473_v25  ;;  %v1857_v37 = vadd.f32 %v1825_v47, %v1792_v40  ;;  %v2136_v8 = vmul.f32 %v7101_v12, %v7317_v5  ;;  %v2743_v21 = vmul.f32 %v7269_v26, %v7317_v5  ;;  %v2984_v23 = vmul.f32 %v7292_v20, %v7317_v5 }
 0x1db   : > { %11474 = vst [vmem:[#allocation31_spill] sm:$0xff] %v7339_v34  ;;  %v1997_v17 = vrot.slane %v1895_v9, 1  ;;  %v2239_v18 = vrot.slane %v2137_v30, 2  ;;  %v1471_v14 = vpop.f32.mrf.mxu1  ;;  %v1995_v11 = vrot.slane %v1894_v27, 1  ;;  %v2838_v19 = vrot.slane %v2742_v59, 1 }
 0x1dc   : > { %v2099_v2 = vadd.f32 %v7237_v10, %v1857_v37  ;;  %v1472_v47 = vadd.f32 %v1471_v14, %v1323_v61  ;;  %v2237_v40 = vrot.slane %v2136_v8, 2  ;;  %v2839_v4 = vrot.slane %v2743_v21, 1  ;;  %v11476_v61 = vld [vmem:[#allocation35_spill] sm:$0xff]  ;;  %v11477_v37 = vld [vmem:[#allocation12_spill] sm:$0xff] }
 0x1dd   : > { %v1996_v45 = vsel %vm1983_vm2, %v1994_v62, %v1995_v11  ;;  %v3079_v31 = vrot.slane %v2983_v54, 2  ;;  %v3080_v16 = vrot.slane %v2984_v23, 2  ;;  %v7344_v22 = vsel %vm1983_vm2, %v1995_v11, %v1997_v17  ;;  %v11478_v23 = vld [vmem:[#allocation19_spill] sm:$0xff] }
 0x1de   : > { %v832_v57 = vadd.f32 %v11475_v43, %v623_v58  ;;  %v7348_v9 = vadd.f32 %v7240_v41, %v2099_v2  ;;  %v1758_v30 = vmul.f32 %v7125_v55, %v1472_v47  ;;  %v2238_v59 = vsel %vm2225_vm3, %v2236_v51, %v2237_v40  ;;  %1534 = vmatmul.f32.gmra.mxu1 %v11473_v25  ;;  %v7360_v58 = vpop.f32.mrf.mxu2 }
 0x1df   : > { %v1326_v10 = vpop.f32.mrf.mxu0  ;;  %v1826_v62 = vmul.f32 %v7128_v49, %v7253_v48  ;;  %v2840_v54 = vsel %vm1983_vm2, %v2838_v19, %v2839_v4  ;;  %v3081_v17 = vsel %vm2225_vm3, %v3079_v31, %v3080_v16  ;;  %v7358_v11 = vsel %vm2225_vm3, %v2237_v40, %v2239_v18 }
 0x1e0   : > { %v1624_v41 = vrot.slane %v1472_v47, 7  ;;  %v1793_v2 = vadd.f32 %v7151_v35, %v1758_v30  ;;  %v2950_v51 = vadd.f32 %v2840_v54, %v7287_v3  ;;  %v2678_v25 = vmul.f32 %v7201_v29, %v7317_v5  ;;  %v11480_v47 = vld [vmem:[#allocation37_spill] sm:$0xff] }
 0x1e1   : > { %v836_v27 = vadd.f32 %v11476_v61, %v631_v52  ;;  %v2744_v31 = vmul.f32 %v7269_v26, %v7320_v0  ;;  %v2985_v19 = vmul.f32 %v7292_v20, %v7320_v0  ;;  %v2439_v8 = vmul.f32 %v7165_v38, %v7253_v48  ;;  %v11481_v61 = vld [vmem:[#allocation39_spill] sm:$0xff] }
 0x1e2   : > { %1389 = vmatmul.f32.gmra.mxu0 %v11477_v37  ;;  %v1858_v21 = vadd.f32 %v1826_v62, %v1793_v2  ;;  %v1327_v18 = vadd.f32 %v1326_v10, %v11478_v23  ;;  %v7375_v3 = vadd.f32 %v3081_v17, %v2950_v51  ;;  %v2710_v14 = vadd.f32 %v2678_v25, %v7306_v56  ;;  %v7391_v17 = vpop.f32.mrf.mxu3 }
 0x1e3   : > { %v639_v52 = vadd.f32 %v7276_v63, %v11480_v47  ;;  %v1475_v40 = vpop.f32.mrf.mxu1  ;;  %v2841_v43 = vrot.slane %v2744_v31, 1  ;;  %v3082_v30 = vrot.slane %v2985_v19, 2  ;;  %v7382_v54 = vmul.f32 %v7165_v38, %v7317_v5  ;;  %11482 = vst [vmem:[#allocation55_spill] sm:$0xff] %v7391_v17  ;;  %v11483_v19 = vld [vmem:[#allocation57_spill] sm:$0xff]  ;;  %v11491_v17 = vld [vmem:[#allocation42_spill] sm:$0xff] }
 0x1e4   : > { %11479 = vst [vmem:[#allocation15_spill] sm:$0xff] %v7375_v3  ;;  %v647_v48 = vadd.f32 %v7276_v63, %v11481_v61  ;;  %v7387_v62 = vsel %vm1615_vm1, 0.0, %v1624_v41  ;;  %v2100_v10 = vadd.f32 %v1996_v45, %v1858_v21  ;;  %4535 = vrot.lane.b32.xlu0 %v7375_v3, %s6401_s29  ;;  %v1476_v56 = vadd.f32 %v1475_v40, %v1327_v18  ;;  %v11485_v40 = vld [vmem:[#allocation40_spill] sm:$0xff] }
 0x1e5   : > { %v2842_v2 = vsel %vm1983_vm2, %v2839_v4, %v2841_v43  ;;  %v3083_v51 = vsel %vm2225_vm3, %v3080_v16, %v3082_v30  ;;  %v2537_v25 = vrot.slane %v2439_v8, 2  ;;  %v11189_v31 = vrot.slane %v7382_v54, 2  ;;  %v11484_v8 = vld [vmem:[#allocation38_spill] sm:$0xff] }
 0x1e6   : > { %v7397_v23 = vadd.f32 %v11483_v19, %v832_v57  ;;  %v7399_v47 = vadd.f32 %v2238_v59, %v2100_v10  ;;  %v1625_v45 = vrot.slane %v1476_v56, 7  ;;  %v1759_v21 = vmul.f32 %v7125_v55, %v1476_v56  ;;  %1538 = vmatmul.f32.gmra.mxu1 %v11477_v37 }
 0x1e7   : > { %v1330_v61 = vpop.f32.mrf.mxu0  ;;  %v7404_v18 = vadd.f32 %v7038_v33, %v836_v27  ;;  %v2951_v4 = vadd.f32 %v2842_v2, %v2710_v14  ;;  %v1896_v16 = vmul.f32 %v7083_v36, %v7387_v62  ;;  %v2539_v57 = vsel %vm2225_vm3, %v2537_v25, %v11189_v31  ;;  %v11486_v33 = vld [vmem:[#allocation41_spill] sm:$0xff] }
 0x1e8   : > { %v840_v59 = vadd.f32 %v11484_v8, %v639_v52  ;;  %v844_v43 = vadd.f32 %v11485_v40, %v647_v48  ;;  %v7414_v30 = vsel %vm1615_vm1, %v1624_v41, %v1625_v45  ;;  %v7417_v37 = vsel %vm1615_vm1, %v1625_v45, 0.0  ;;  %v11487_v52 = vld [vmem:[#allocation14_spill] sm:$0xff]  ;;  %v7427_v48 = vpop.f32.mrf.mxu2  ;;  %v11489_v41 = vld [vmem:[#allocation21_spill] sm:$0xff] }
 0x1e9   : > { %v655_v27 = vadd.f32 %v7276_v63, %v11486_v33  ;;  %v2441_v14 = vmul.f32 %v7165_v38, %v7320_v0  ;;  %v1794_v10 = vadd.f32 %v7151_v35, %v1759_v21  ;;  %v1827_v56 = vmul.f32 %v7128_v49, %v7317_v5  ;;  %11488 = vst [vmem:[#allocation33_spill] sm:$0xff] %v7427_v48 }
 0x1ea   : > { %1393 = vmatmul.f32.gmra.mxu0 %v11487_v52  ;;  %v1331_v2 = vadd.f32 %v1330_v61, %v11489_v41  ;;  %v7430_v25 = vadd.f32 %v3083_v51, %v2951_v4  ;;  %v1897_v19 = vmul.f32 %v7083_v36, %v7414_v30  ;;  %v2138_v45 = vmul.f32 %v7101_v12, %v7387_v62 }
 0x1eb   : > { %v1859_v0 = vadd.f32 %v1827_v56, %v1794_v10  ;;  %v1898_v21 = vmul.f32 %v7083_v36, %v7417_v37  ;;  %v1479_v8 = vpop.f32.mrf.mxu1  ;;  %v1999_v40 = vrot.slane %v1896_v16, 1  ;;  %v2679_v33 = vmul.f32 %v7201_v29, %v7387_v62 }
 0x1ec   : > { %11490 = vst [vmem:[#allocation17_spill] sm:$0xff] %v7430_v25  ;;  %v2140_v61 = vmul.f32 %v7101_v12, %v7417_v37  ;;  %4537 = vrot.lane.b32.xlu0 %v7430_v25, %s6401_s29  ;;  %v7444_v51 = vadd.f32 %v1479_v8, %v1331_v2  ;;  %v2000_v4 = vrot.slane %v1897_v19, 1  ;;  %v2745_v10 = vmul.f32 %v7269_v26, %v7387_v62 }
 0x1ed   : > { %v2101_v56 = vadd.f32 %v7344_v22, %v1859_v0  ;;  %v2139_v16 = vmul.f32 %v7101_v12, %v7414_v30  ;;  %v2646_v41 = vadd.f32 %v2539_v57, %v7323_v46  ;;  %v7454_v31 = vmul.f32 %v7269_v26, %v7414_v30  ;;  %v7461_v22 = vpop.f32.mrf.mxu3 }
 0x1ee   : > { %v848_v34 = vadd.f32 %v11491_v17, %v655_v27  ;;  %v1760_v2 = vmul.f32 %v7125_v55, %v7444_v51  ;;  %v2001_v19 = vsel %vm1983_vm2, %v1999_v40, %v2000_v4  ;;  %v2241_v8 = vrot.slane %v2138_v45, 2  ;;  %1542 = vmatmul.f32.gmra.mxu1 %v11487_v52  ;;  %11492 = vst [vmem:[#allocation11_spill] sm:$0xff] %v7461_v22  ;;  %v11494_v40 = vld [vmem:[#allocation16_spill] sm:$0xff] }
 0x1ef   : > { %v2002_v0 = vrot.slane %v1898_v21, 1  ;;  %v7464_v25 = vadd.f32 %v7358_v11, %v2101_v56  ;;  %v2242_v46 = vrot.slane %v2139_v16, 2  ;;  %v1334_v57 = vpop.f32.mrf.mxu0  ;;  %v2711_v48 = vadd.f32 %v2679_v33, %v2646_v41  ;;  %v11495_v41 = vld [vmem:[#allocation23_spill] sm:$0xff] }
 0x1f0   : > { %v2540_v44 = vrot.slane %v2441_v14, 2  ;;  %v2244_v1 = vrot.slane %v2140_v61, 2  ;;  %v1795_v17 = vadd.f32 %v7151_v35, %v1760_v2  ;;  %v1828_v27 = vmul.f32 %v7128_v49, %v7387_v62  ;;  %v7482_v22 = vpop.f32.mrf.mxu2 }
 0x1f1   : > { %11493 = vst [vmem:[#allocation32_spill] sm:$0xff] %v7464_v25  ;;  %v2243_v45 = vsel %vm2225_vm3, %v2241_v8, %v2242_v46  ;;  %v2843_v52 = vrot.slane %v2745_v10, 1  ;;  %v2844_v21 = vrot.slane %v7454_v31, 1  ;;  %v2986_v11 = vmul.f32 %v7292_v20, %v7387_v62 }
 0x1f2   : > { %1397 = vmatmul.f32.gmra.mxu0 %v11494_v40  ;;  %v1016_v56 = vadd.f32 %v7110_v50, %v840_v59  ;;  %v1021_v14 = vadd.f32 %v7179_v53, %v844_v43  ;;  %v1860_v33 = vadd.f32 %v1828_v27, %v1795_v17  ;;  %v2987_v61 = vmul.f32 %v7292_v20, %v7414_v30  ;;  %v11496_v53 = vld [vmem:[#allocation43_spill] sm:$0xff] }
 0x1f3   : > { %v1026_v16 = vadd.f32 %v7232_v24, %v848_v34  ;;  %v1335_v2 = vadd.f32 %v1334_v57, %v11495_v41  ;;  %v2845_v8 = vsel %vm1983_vm2, %v2843_v52, %v2844_v21  ;;  %v1483_v10 = vpop.f32.mrf.mxu1  ;;  %v2003_v31 = vsel %vm1983_vm2, %v2000_v4, %v2002_v0 }
 0x1f4   : > { %v2102_v25 = vadd.f32 %v2001_v19, %v1860_v33  ;;  %v2952_v3 = vadd.f32 %v2845_v8, %v2711_v48  ;;  %v3084_v50 = vrot.slane %v2986_v11, 2  ;;  %v3085_v59 = vrot.slane %v2987_v61, 2  ;;  %v11499_v11 = vld [vmem:[#allocation18_spill] sm:$0xff]  ;;  %v11500_v33 = vld [vmem:[#allocation60_spill] sm:$0xff] }
 0x1f5   : > { %v663_v43 = vadd.f32 %v7276_v63, %v11496_v53  ;;  %v1484_v17 = vadd.f32 %v1483_v10, %v1335_v2  ;;  %v2245_v27 = vsel %vm2225_vm3, %v2242_v46, %v2244_v1  ;;  %v11497_v24 = vrot.slane %v7382_v54, 2  ;;  %v11503_v2 = vld [vmem:[#allocation47_spill] sm:$0xff] }
 0x1f6   : > { %v7490_v57 = vadd.f32 %v2243_v45, %v2102_v25  ;;  %v3086_v4 = vsel %vm2225_vm3, %v3084_v50, %v3085_v59  ;;  %1546 = vmatmul.f32.gmra.mxu1 %v11494_v40  ;;  %v2374_v48 = vmul.f32 %v7182_v15, %v7317_v5  ;;  %v2747_v19 = vmul.f32 %v7269_v26, %v7417_v37  ;;  %v7507_v5 = vpop.f32.mrf.mxu3 }
 0x1f7   : > { %v2541_v34 = vsel %vm2225_vm3, %v11497_v24, %v2540_v44  ;;  %v1627_v0 = vrot.slane %v7444_v51, 7  ;;  %v7499_v52 = vadd.f32 %v3086_v4, %v2952_v3  ;;  %v1628_v1 = vrot.slane %v1484_v17, 7  ;;  %v1338_v40 = vpop.f32.mrf.mxu0 }
 0x1f8   : > { %v1761_v54 = vmul.f32 %v7125_v55, %v1484_v17  ;;  %v2406_v44 = vadd.f32 %v2374_v48, %v7348_v9  ;;  %v2680_v25 = vmul.f32 %v7201_v29, %v7414_v30  ;;  %v2846_v46 = vrot.slane %v2747_v19, 1 }
 0x1f9   : > { %11498 = vst [vmem:[#allocation35_spill] sm:$0xff] %v7499_v52  ;;  %v2988_v45 = vmul.f32 %v7292_v20, %v7417_v37  ;;  %4539 = vrot.lane.b32.xlu1 %v7499_v52, %s6401_s29  ;;  %v7512_v3 = vsel %vm1615_vm1, %v1627_v0, %v1628_v1  ;;  %v1829_v9 = vmul.f32 %v7128_v49, %v7414_v30  ;;  %v7529_v50 = vsel %vm1615_vm1, 0.0, %v1627_v0 }
 0x1fa   : > { %v1796_v51 = vadd.f32 %v7151_v35, %v1761_v54  ;;  %1401 = vmatmul.f32.gmra.mxu0 %v11499_v11  ;;  %v7520_v61 = vadd.f32 %v11500_v33, %v7397_v23  ;;  %v7524_v41 = vadd.f32 %v7072_v60, %v7404_v18  ;;  %v671_v8 = vadd.f32 %v7276_v63, %v11503_v2 }
 0x1fb   : > { %v2647_v10 = vadd.f32 %v2541_v34, %v2406_v44  ;;  %v2847_v17 = vsel %vm1983_vm2, %v2844_v21, %v2846_v46  ;;  %v3087_v24 = vrot.slane %v2988_v45, 2  ;;  %v1487_v4 = vpop.f32.mrf.mxu1  ;;  %v7533_v48 = vadd.f32 %v7153_v13, %v1016_v56  ;;  %v11507_v34 = vld [vmem:[#allocation45_spill] sm:$0xff]  ;;  %v7546_v44 = vpop.f32.mrf.mxu2 }
 0x1fc   : > { %11501 = vst [vmem:[#allocation12_spill] sm:$0xff] %v7520_v61  ;;  %v1861_v53 = vadd.f32 %v1829_v9, %v1796_v51  ;;  %v7536_v23 = vadd.f32 %v7210_v28, %v1021_v14  ;;  %v1339_v60 = vadd.f32 %v1338_v40, %v7086_v39  ;;  %v7540_v19 = vadd.f32 %v7263_v7, %v1026_v16  ;;  %v11508_v7 = vld [vmem:[#allocation48_spill] sm:$0xff] }
 0x1fd   : > { %11502 = vst [vmem:[#allocation19_spill] sm:$0xff] %v7524_v41  ;;  %v2712_v18 = vadd.f32 %v2680_v25, %v2647_v10  ;;  %v7543_v0 = vadd.f32 %v11507_v34, %v663_v43  ;;  %v3088_v21 = vsel %vm2225_vm3, %v3085_v59, %v3087_v24  ;;  %v1899_v28 = vmul.f32 %v7083_v36, %v7529_v50  ;;  %v11509_v59 = vld [vmem:[#allocation49_spill] sm:$0xff]  ;;  %v11510_v25 = vld [vmem:[#allocation52_spill] sm:$0xff] }
 0x1fe   : > { %11504 = vst [vmem:[#allocation37_spill] sm:$0xff] %v7533_v48  ;;  %v2103_v54 = vadd.f32 %v2003_v31, %v1861_v53  ;;  %v7548_v13 = vadd.f32 %v1487_v4, %v1339_v60  ;;  %v7554_v39 = vmul.f32 %v7083_v36, %v7512_v3  ;;  %1550 = vmatmul.f32.gmra.mxu1 %v11499_v11  ;;  %v7561_v14 = vsel %vm1615_vm1, %v1628_v1, 0.0  ;;  %v11512_v1 = vld [vmem:[#allocation54_spill] sm:$0xff]  ;;  %v7597_v4 = vpop.f32.mrf.mxu3 }
 0x1ff   : > { %11505 = vst [vmem:[#allocation39_spill] sm:$0xff] %v7536_v23  ;;  %v2953_v46 = vadd.f32 %v2847_v17, %v2712_v18  ;;  %v7558_v56 = vadd.f32 %v11508_v7, %v671_v8  ;;  %v2141_v31 = vmul.f32 %v7101_v12, %v7529_v50  ;;  %v7569_v43 = vadd.f32 %v7276_v63, %v11509_v59  ;;  %v11513_v8 = vld [vmem:[#allocation20_spill] sm:$0xff]  ;;  %v1342_v34 = vpop.f32.mrf.mxu0 }
 0x200   : > { %11506 = vst [vmem:[#allocation57_spill] sm:$0xff] %v7540_v19  ;;  %v7563_v16 = vadd.f32 %v2245_v27, %v2103_v54  ;;  %v7573_v45 = vadd.f32 %v7276_v63, %v11510_v25  ;;  %v1762_v9 = vmul.f32 %v7125_v55, %v7548_v13  ;;  %v4665_v27 = vld [vmem:[%s11137_s5 + $0x10] sm:$0xff]  ;;  %v7584_v40 = vadd.f32 %v7276_v63, %v11512_v1 }
 0x201   : > { %v7575_v51 = vadd.f32 %v3088_v21, %v2953_v46  ;;  %v2004_v11 = vrot.slane %v1899_v28, 1  ;;  %v2005_v33 = vrot.slane %v7554_v39, 1  ;;  %v2142_v2 = vmul.f32 %v7101_v12, %v7512_v3 }
 0x202   : > { %1405 = vmatmul.f32.gmra.mxu0 %v11513_v8  ;;  %v1901_v10 = vmul.f32 %v7083_v36, %v7561_v14  ;;  %v1797_v53 = vadd.f32 %v7151_v35, %v1762_v9  ;;  %v1830_v17 = vmul.f32 %v7128_v49, %v7529_v50  ;;  %v2246_v24 = vrot.slane %v2141_v31, 2  ;;  %v11514_v31 = vld [vmem:[#allocation58_spill] sm:$0xff] }
 0x203   : > { %11511 = vst [vmem:[#allocation38_spill] sm:$0xff] %v7575_v51  ;;  %4541 = vrot.lane.b32.xlu1 %v7575_v51, %s6401_s29  ;;  %v2006_v60 = vsel %vm1983_vm2, %v2004_v11, %v2005_v33  ;;  %v2247_v18 = vrot.slane %v2142_v2, 2  ;;  %v7600_v54 = vand.u32 4294901760, %v4665_v27  ;;  %v2375_v21 = vmul.f32 %v7182_v15, %v7387_v62 }
 0x204   : > { %v2143_v46 = vmul.f32 %v7101_v12, %v7561_v14  ;;  %v1862_v28 = vadd.f32 %v1830_v17, %v1797_v53  ;;  %v2442_v39 = vmul.f32 %v7165_v38, %v7387_v62  ;;  %v2443_v7 = vmul.f32 %v7165_v38, %v7414_v30  ;;  %v1491_v17 = vpop.f32.mrf.mxu1 }
 0x205   : > { %v703_v59 = vadd.f32 %v7276_v63, %v11514_v31  ;;  %v2248_v25 = vsel %vm2225_vm3, %v2246_v24, %v2247_v18  ;;  %4791 = vmatpush.msrb.mxu2 %v7600_v54  ;;  %v2407_v9 = vadd.f32 %v2375_v21, %v7399_v47  ;;  %v2748_v1 = vmul.f32 %v7269_v26, %v7529_v50  ;;  %v1055_v21 = vpop.f32.mrf.mxu2 }
 0x206   : > { %v2444_v11 = vmul.f32 %v7165_v38, %v7417_v37  ;;  %v2007_v2 = vrot.slane %v1901_v10, 1  ;;  %v2104_v62 = vadd.f32 %v2006_v60, %v1862_v28  ;;  %v1343_v53 = vadd.f32 %v1342_v34, %v7094_v32  ;;  %1554 = vmatmul.f32.gmra.mxu1 %v11513_v8 }
 0x207   : > { %v2542_v31 = vrot.slane %v2442_v39, 2  ;;  %v2543_v19 = vrot.slane %v2443_v7, 2  ;;  %v7623_v24 = vmul.f32 %v7269_v26, %v7512_v3  ;;  %v2989_v47 = vmul.f32 %v7292_v20, %v7529_v50  ;;  %5450 = vmatpush.msra.mxu1 %v7600_v54  ;;  %v11515_v7 = vld [vmem:[#allocation22_spill] sm:$0xff] }
 0x208   : > { %v2249_v37 = vrot.slane %v2143_v46, 2  ;;  %v7628_v10 = vadd.f32 %v2248_v25, %v2104_v62  ;;  %v2681_v32 = vmul.f32 %v7201_v29, %v7529_v50  ;;  %v7634_v8 = vmul.f32 %v7292_v20, %v7512_v3 }
 0x209   : > { %v2544_v60 = vsel %vm2225_vm3, %v2542_v31, %v2543_v19  ;;  %v2848_v34 = vrot.slane %v2748_v1, 1  ;;  %v2849_v28 = vrot.slane %v7623_v24, 1  ;;  %v7638_v39 = vadd.f32 %v1491_v17, %v1343_v53 }
 0x20a   : > { %1409 = vmatmul.f32.gmra.mxu0 %v11515_v7  ;;  %v711_v46 = vadd.f32 %v7276_v63, %v7040_v42  ;;  %v2648_v25 = vadd.f32 %v2544_v60, %v2407_v9  ;;  %v3089_v62 = vrot.slane %v2989_v47, 2  ;;  %v3090_v23 = vrot.slane %v7634_v8, 2  ;;  %v1267_v9 = vpop.f32.mrf.mxu3 }
 0x20b   : > { %v2545_v48 = vrot.slane %v2444_v11, 2  ;;  %v2850_v41 = vsel %vm1983_vm2, %v2848_v34, %v2849_v28  ;;  %v1763_v31 = vmul.f32 %v7125_v55, %v7638_v39  ;;  %v2008_v1 = vsel %vm1983_vm2, %v2005_v33, %v2007_v2  ;;  %v11516_v2 = vld [vmem:[#allocation50_spill] sm:$0xff]  ;;  %v11522_v34 = vld [vmem:[#allocation64_spill] sm:$0xff] }
 0x20c   : > { %v2713_v24 = vadd.f32 %v2681_v32, %v2648_v25  ;;  %v3091_v53 = vsel %vm2225_vm3, %v3089_v62, %v3090_v23  ;;  %v2250_v17 = vsel %vm2225_vm3, %v2247_v18, %v2249_v37  ;;  %v7651_v61 = vsub.f32 %v4665_v27, %v7600_v54  ;;  %v11517_v18 = vld [vmem:[#allocation53_spill] sm:$0xff]  ;;  %v11518_v27 = vld [vmem:[#allocation15_spill] sm:$0xff] }
 0x20d   : > { %v1031_v42 = vadd.f32 %v7308_v6, %v7543_v0  ;;  %v1036_v63 = vadd.f32 %v7360_v58, %v7558_v56  ;;  %v1798_v11 = vadd.f32 %v7151_v35, %v1763_v31  ;;  %v1831_v33 = vmul.f32 %v7128_v49, %v7512_v3  ;;  %v11520_v56 = vld [vmem:[#allocation56_spill] sm:$0xff] }
 0x20e   : > { %v860_v47 = vadd.f32 %v11516_v2, %v7569_v43  ;;  %v864_v37 = vadd.f32 %v11517_v18, %v7573_v45  ;;  %v7665_v32 = vmul.f32 0.70710677, %v11518_v27  ;;  %v2954_v8 = vadd.f32 %v2850_v41, %v2713_v24  ;;  %1558 = vmatmul.f32.gmra.mxu1 %v11515_v7  ;;  %5263 = vmatpush.msra.mxu0 %v7651_v61  ;;  %v11521_v45 = vld [vmem:[#allocation61_spill] sm:$0xff]  ;;  %v11524_v31 = vld [vmem:[#allocation32_spill] sm:$0xff] }
 0x20f   : > { %v1863_v6 = vadd.f32 %v1831_v33, %v1798_v11  ;;  %v11194_v58 = vand.u32 4294901760, %v7651_v61  ;;  %v2376_v35 = vmul.f32 %v7182_v15, %v7414_v30  ;;  %v2546_v0 = vsel %vm2225_vm3, %v2543_v19, %v2545_v48  ;;  %v11525_v19 = vld [vmem:[#allocation24_spill] sm:$0xff]  ;;  %v11526_v24 = vld [vmem:[#allocation33_spill] sm:$0xff]  ;;  %v1060_v11 = vpop.f32.mrf.mxu2 }
 0x210   : > { %11519 = vst [vmem:[#allocation40_spill] sm:$0xff] %v7665_v32  ;;  %v868_v43 = vadd.f32 %v11520_v56, %v7584_v40  ;;  %v872_v60 = vadd.f32 %v11521_v45, %v703_v59  ;;  %v876_v25 = vadd.f32 %v11522_v34, %v711_v46  ;;  %v7677_v41 = vadd.f32 %v3091_v53, %v2954_v8  ;;  %v11527_v53 = vld [vmem:[#allocation17_spill] sm:$0xff] }
 0x211   : > { %v2105_v7 = vadd.f32 %v2008_v1, %v1863_v6  ;;  %v5094_v62 = vsub.f32 %v7651_v61, %v11194_v58  ;;  %v2408_v30 = vadd.f32 %v2376_v35, %v11524_v31  ;;  %v2682_v48 = vmul.f32 %v7201_v29, %v7512_v3 }
 0x212   : > { %11523 = vst [vmem:[#allocation41_spill] sm:$0xff] %v7677_v41  ;;  %1413 = vmatmul.f32.gmra.mxu0 %v11525_v19  ;;  %v1041_v40 = vadd.f32 %v11526_v24, %v860_v47  ;;  %v3351_v59 = vand.u32 2147483647, %v7665_v32  ;;  %4543 = vrot.lane.b32.xlu2 %v7677_v41, %s6401_s29  ;;  %v2750_v46 = vmul.f32 %v7269_v26, %v7561_v14  ;;  %v7695_v33 = vmul.f32 0.70710677, %v11527_v53 }
 0x213   : > { %v2991_v1 = vmul.f32 %v7292_v20, %v7561_v14  ;;  %v7697_v2 = vadd.f32 %v2250_v17, %v2105_v7  ;;  %v5095_v18 = vand.u32 4294901760, %v5094_v62  ;;  %v2649_v8 = vadd.f32 %v2546_v0, %v2408_v30  ;;  %v11529_v0 = vld [vmem:[#allocation31_spill] sm:$0xff] }
 0x214   : > { %11528 = vst [vmem:[#allocation14_spill] sm:$0xff] %v7695_v33  ;;  %v1046_v47 = vadd.f32 %v7482_v22, %v864_v37  ;;  %v1051_v6 = vadd.f32 %v7546_v44, %v868_v43  ;;  %v2851_v35 = vrot.slane %v2750_v46, 1  ;;  %v1056_v45 = vadd.f32 %v1055_v21, %v872_v60  ;;  %v1273_v22 = vpop.f32.mrf.mxu3  ;;  %v11531_v60 = vld [vmem:[#allocation55_spill] sm:$0xff] }
 0x215   : > { %v3092_v56 = vrot.slane %v2991_v1, 2  ;;  %v1061_v34 = vadd.f32 %v1060_v11, %v876_v25  ;;  %v1630_v31 = vrot.slane %v7548_v13, 7  ;;  %5096 = vmatpush.msrb.mxu3 %v5095_v18  ;;  %v2714_v24 = vadd.f32 %v2682_v48, %v2649_v8  ;;  %v1346_v48 = vpop.f32.mrf.mxu0  ;;  %v1495_v1 = vpop.f32.mrf.mxu1 }
 0x216   : > { %v3383_v58 = vmul.f32 0.3275911, %v3351_v59  ;;  %v1631_v53 = vrot.slane %v7638_v39, 7  ;;  %v2852_v17 = vsel %vm1983_vm2, %v2849_v28, %v2851_v35  ;;  %1562 = vmatmul.f32.gmra.mxu1 %v11525_v19  ;;  %v4215_v37 = vsub.f32 0.0, %v3351_v59  ;;  %v11533_v28 = vld [vmem:[#allocation11_spill] sm:$0xff]  ;;  %v11539_v19 = vld [vmem:[#allocation25_spill] sm:$0xff] }
 0x217   : > { %v3093_v7 = vsel %vm2225_vm3, %v3090_v23, %v3092_v56  ;;  %v7707_v44 = vand.u32 2147483647, %v7695_v33  ;;  %v2447_v21 = vmul.f32 %v7165_v38, %v7561_v14  ;;  %v2955_v13 = vadd.f32 %v2852_v17, %v2714_v24 }
 0x218   : > { %v7712_v43 = vadd.f32 %v11529_v0, %v1031_v42  ;;  %v7715_v39 = vadd.f32 %v11531_v60, %v1036_v63  ;;  %v7718_v25 = vadd.f32 %v11533_v28, %v1041_v40  ;;  %v7721_v23 = vadd.f32 %v7507_v5, %v1046_v47 }
 0x219   : > { %v7724_v62 = vadd.f32 %v7597_v4, %v1051_v6  ;;  %v7726_v30 = vadd.f32 %v1267_v9, %v1056_v45  ;;  %v7729_v14 = vsel %vm1615_vm1, 0.0, %v1630_v31  ;;  %v7731_v42 = vadd.f32 %v3093_v7, %v2955_v13 }
 0x21a   : > { %11530 = vst [vmem:[#allocation21_spill] sm:$0xff] %v7712_v43  ;;  %1417 = vmatmul.f32.gmra.mxu0 %v11539_v19  ;;  %v7734_v63 = vadd.f32 %v1273_v22, %v1061_v34  ;;  %v7736_v40 = vadd.f32 1.0, %v3383_v58  ;;  %v7739_v5 = vsel %vm1615_vm1, %v1630_v31, %v1631_v53  ;;  %v2377_v4 = vmul.f32 %v7182_v15, %v7529_v50  ;;  %v11542_v58 = vld [vmem:[#allocation67_spill] sm:$0xff] }
 0x21b   : > { %11532 = vst [vmem:[#allocation42_spill] sm:$0xff] %v7715_v39  ;;  %v7743_v9 = vmul.f32 %v4215_v37, %v3351_v59  ;;  %v3384_v11 = vmul.f32 0.3275911, %v7707_v44  ;;  %v2550_v46 = vrot.slane %v2447_v21, 2  ;;  %4545 = vrot.lane.b32.xlu2 %v7731_v42, %s6401_s29  ;;  %v2445_v18 = vmul.f32 %v7165_v38, %v7529_v50 }
 0x21c   : > { %11534 = vst [vmem:[#allocation16_spill] sm:$0xff] %v7718_v25  ;;  %v1347_v8 = vadd.f32 %v1346_v48, %v11542_v58  ;;  %v2409_v47 = vadd.f32 %v2377_v4, %v7490_v57  ;;  %v2446_v6 = vmul.f32 %v7165_v38, %v7512_v3  ;;  %v2751_v59 = vmul.f32 %v7269_v26, %v7729_v14  ;;  %v11546_v4 = vld [vmem:[#allocation26_spill] sm:$0xff]  ;;  %v11560_v25 = vld [vmem:[#allocation28_spill] sm:$0xff] }
 0x21d   : > { %11535 = vst [vmem:[#allocation23_spill] sm:$0xff] %v7721_v23  ;;  %v4216_v35 = vsub.f32 0.0, %v7707_v44  ;;  %v7758_v56 = vmul.f32 0.70710677, %v7499_v52  ;;  %v7761_v45 = vmul.f32 0.70710677, %v7575_v51  ;;  %v2752_v50 = vmul.f32 %v7269_v26, %v7739_v5 }
 0x21e   : > { %11536 = vst [vmem:[#allocation43_spill] sm:$0xff] %v7724_v62  ;;  %v7766_v34 = vsel %vm1615_vm1, %v1631_v53, 0.0  ;;  %v7768_v57 = vadd.f32 %v1495_v1, %v1347_v8  ;;  %v2547_v31 = vrot.slane %v2445_v18, 2  ;;  %v2548_v24 = vrot.slane %v2446_v6, 2  ;;  %1566 = vmatmul.f32.gmra.mxu1 %v11539_v19  ;;  %v1350_v8 = vpop.f32.mrf.mxu0 }
 0x21f   : > { %11537 = vst [vmem:[#allocation18_spill] sm:$0xff] %v7726_v30  ;;  %v2683_v17 = vmul.f32 %v7201_v29, %v7729_v14  ;;  %v2853_v7 = vrot.slane %v2751_v59, 1  ;;  %v2854_v22 = vrot.slane %v2752_v50, 1  ;;  %v2993_v37 = vmul.f32 %v7292_v20, %v7739_v5 }
 0x220   : > { %11538 = vst [vmem:[#allocation60_spill] sm:$0xff] %v7731_v42  ;;  %v2549_v21 = vsel %vm2225_vm3, %v2547_v31, %v2548_v24  ;;  %v2992_v53 = vmul.f32 %v7292_v20, %v7729_v14  ;;  %v2378_v13 = vmul.f32 %v7182_v15, %v7512_v3  ;;  %v2551_v0 = vsel %vm2225_vm3, %v2548_v24, %v2550_v46 }
 0x221   : > { %11540 = vst [vmem:[#allocation47_spill] sm:$0xff] %v7734_v63  ;;  %v7781_v60 = vadd.f32 1.0, %v3384_v11  ;;  %v7784_v28 = vmul.f32 0.70710677, %v7677_v41  ;;  %v2650_v48 = vadd.f32 %v2549_v21, %v2409_v47  ;;  %v2855_v19 = vsel %vm1983_vm2, %v2853_v7, %v2854_v22  ;;  %v1499_v63 = vpop.f32.mrf.mxu1 }
 0x222   : > { %11541 = vst [vmem:[#allocation45_spill] sm:$0xff] %v7743_v9  ;;  %1421 = vmatmul.f32.gmra.mxu0 %v11546_v4  ;;  %v3095_v1 = vrot.slane %v2993_v37, 2  ;;  %v2410_v18 = vadd.f32 %v2378_v13, %v7563_v16  ;;  %v2684_v58 = vmul.f32 %v7201_v29, %v7739_v5  ;;  %v2753_v3 = vmul.f32 %v7269_v26, %v7766_v34 }
 0x223   : > { %11543 = vst [vmem:[#allocation48_spill] sm:$0xff] %v7758_v56  ;;  %v3353_v11 = vand.u32 2147483647, %v7758_v56  ;;  %v1764_v46 = vmul.f32 %v7125_v55, %v7768_v57  ;;  %v2715_v47 = vadd.f32 %v2683_v17, %v2650_v48  ;;  %v2994_v6 = vmul.f32 %v7292_v20, %v7766_v34 }
 0x224   : > { %11544 = vst [vmem:[#allocation49_spill] sm:$0xff] %v7761_v45  ;;  %v3354_v59 = vand.u32 2147483647, %v7761_v45  ;;  %v3094_v50 = vrot.slane %v2992_v53, 2  ;;  %v2651_v16 = vadd.f32 %v2551_v0, %v2410_v18  ;;  %v2856_v31 = vrot.slane %v2753_v3, 1 }
 0x225   : > { %11545 = vst [vmem:[#allocation52_spill] sm:$0xff] %v7784_v28  ;;  %6164 = vrcp.f32 %v7736_v40  ;;  %v7801_v24 = vand.u32 2147483647, %v7784_v28  ;;  %v2956_v7 = vadd.f32 %v2855_v19, %v2715_v47  ;;  %v3097_v37 = vrot.slane %v2994_v6, 2  ;;  %v7816_v19 = vld [vmem:[%s11136_s4] ss:$0 sm:$0xff] }
 0x226   : > { %v7805_v21 = vmul.f32 %v7083_v36, %v7739_v5  ;;  %v3096_v17 = vsel %vm2225_vm3, %v3094_v50, %v3095_v1  ;;  %v2716_v13 = vadd.f32 %v2684_v58, %v2651_v16  ;;  %v2857_v48 = vsel %vm1983_vm2, %v2854_v22, %v2856_v31  ;;  %1570 = vmatmul.f32.gmra.mxu1 %v11546_v4  ;;  %v11550_v50 = vld [vmem:[#allocation27_spill] sm:$0xff] }
 0x227   : > { %v7811_v53 = vmul.f32 %v4216_v35, %v7707_v44  ;;  %v3385_v0 = vmul.f32 0.3275911, %v3353_v11  ;;  %v1799_v18 = vadd.f32 %v7816_v19, %v1764_v46  ;;  %v7819_v3 = vadd.f32 %v3096_v17, %v2956_v7  ;;  %v11549_v35 = vld [vmem:[#allocation68_spill] sm:$0xff] }
 0x228   : > { %6166 = vrcp.f32 %v7781_v60  ;;  %v3386_v58 = vmul.f32 0.3275911, %v3354_v59  ;;  %v1902_v22 = vmul.f32 %v7083_v36, %v7729_v14  ;;  %v2957_v4 = vadd.f32 %v2857_v48, %v2716_v13 }
 0x229   : > { %11547 = vst [vmem:[#allocation54_spill] sm:$0xff] %v7811_v53  ;;  %v4217_v47 = vsub.f32 0.0, %v3353_v11  ;;  %v1832_v44 = vmul.f32 %v7128_v49, %v7729_v14  ;;  %v1351_v6 = vadd.f32 %v1350_v8, %v11549_v35  ;;  %4547 = vrot.lane.b32.xlu0 %v7819_v3, %s6401_s29  ;;  %v3098_v46 = vsel %vm2225_vm3, %v3095_v1, %v3097_v37  ;;  %v11568_v53 = vld [vmem:[#allocation69_spill] sm:$0xff] }
 0x22a   : > { %11548 = vst [vmem:[#allocation20_spill] sm:$0xff] %v7819_v3  ;;  %1425 = vmatmul.f32.gmra.mxu0 %v11550_v50  ;;  %v3387_v16 = vmul.f32 0.3275911, %v7801_v24  ;;  %v7835_v7 = vmul.f32 %v7101_v12, %v7739_v5  ;;  %v7837_v17 = vadd.f32 %v3098_v46, %v2957_v4  ;;  %v7841_v8 = vadd.f32 1.0, %v3385_v0 }
 0x22b   : > { %v7839_v13 = vpop.eup %6164  ;;  %v4218_v48 = vsub.f32 0.0, %v3354_v59  ;;  %v1864_v35 = vadd.f32 %v1832_v44, %v1799_v18  ;;  %v1500_v30 = vadd.f32 %v1499_v63, %v1351_v6  ;;  %v7843_v1 = vadd.f32 1.0, %v3386_v58  ;;  %v7865_v58 = vpop.f32.mrf.mxu0 }
 0x22c   : > { %11551 = vst [vmem:[#allocation58_spill] sm:$0xff] %v7837_v17  ;;  %v7846_v37 = vmul.f32 0.70710677, %v7731_v42  ;;  %v2009_v62 = vrot.slane %v1902_v22, 1  ;;  %v2144_v31 = vmul.f32 %v7101_v12, %v7729_v14  ;;  %4549 = vrot.lane.b32.xlu1 %v7837_v17, %s6401_s29  ;;  %v7854_v4 = vmul.f32 %v7083_v36, %v7766_v34 }
 0x22d   : > { %11552 = vst [vmem:[#allocation22_spill] sm:$0xff] %v7841_v8  ;;  %v7858_v0 = vmul.f32 %v7101_v12, %v7766_v34  ;;  %v7862_v63 = vmul.f32 %v7165_v38, %v7766_v34  ;;  %v1633_v18 = vrot.slane %v7768_v57, 7  ;;  %v7869_v44 = vadd.f32 1.0, %v3387_v16  ;;  %v7883_v16 = vld [vmem:[%s11137_s5 + $0x8] sm:$0xff] }
 0x22e   : > { %11553 = vst [vmem:[#allocation50_spill] sm:$0xff] %v7843_v1  ;;  %v7867_v22 = vpop.eup %6166  ;;  %v4219_v6 = vsub.f32 0.0, %v7801_v24  ;;  %v11557_v46 = vrot.slane %v7805_v21, 1  ;;  %1574 = vmatmul.f32.gmra.mxu1 %v11550_v50  ;;  %6168 = vrcp.f32 %v7841_v8  ;;  %v7878_v34 = vmul.f32 %v4217_v47, %v3353_v11  ;;  %v7891_v50 = vpop.f32.mrf.mxu1 }
 0x22f   : > { %11554 = vst [vmem:[#allocation53_spill] sm:$0xff] %v7846_v37  ;;  %v1634_v39 = vrot.slane %v1500_v30, 7  ;;  %6170 = vrcp.f32 %v7843_v1  ;;  %v7886_v43 = vmul.f32 %v4218_v48, %v3354_v59  ;;  %v2555_v47 = vrot.slane %v7862_v63, 2 }
 0x230   : > { %11555 = vst [vmem:[#allocation56_spill] sm:$0xff] %v7867_v22  ;;  %v2011_v23 = vsel %vm1983_vm2, %v2009_v62, %v11557_v46  ;;  %v7889_v62 = vand.u32 2147483647, %v7846_v37  ;;  %v2251_v46 = vrot.slane %v2144_v31, 2  ;;  %6172 = vrcp.f32 %v7869_v44 }
 0x231   : > { %11556 = vst [vmem:[#allocation61_spill] sm:$0xff] %v7869_v44  ;;  %v2106_v57 = vadd.f32 %v2011_v23, %v1864_v35  ;;  %v7897_v35 = vsel %vm1615_vm1, 0.0, %v1633_v18  ;;  %v7902_v59 = vmul.f32 %v4219_v6, %v7801_v24  ;;  %v11562_v31 = vrot.slane %v7835_v7, 2 }
 0x232   : > { %11558 = vst [vmem:[#allocation64_spill] sm:$0xff] %v7878_v34  ;;  %1429 = vmatmul.f32.gmra.mxu0 %v11560_v25  ;;  %v7908_v11 = vand.u32 4294901760, %v7883_v16  ;;  %v7913_v63 = vsel %vm1615_vm1, %v1633_v18, %v1634_v39  ;;  %v2448_v51 = vmul.f32 %v7165_v38, %v7729_v14  ;;  %v2449_v45 = vmul.f32 %v7165_v38, %v7739_v5 }
 0x233   : > { %11559 = vst [vmem:[#allocation32_spill] sm:$0xff] %v7886_v43  ;;  %v2253_v48 = vsel %vm2225_vm3, %v2251_v46, %v11562_v31  ;;  %v3388_v24 = vmul.f32 0.3275911, %v7889_v62  ;;  %v4220_v6 = vsub.f32 0.0, %v7889_v62  ;;  %v2379_v46 = vmul.f32 %v7182_v15, %v7729_v14 }
 0x234   : > { %11561 = vst [vmem:[#allocation24_spill] sm:$0xff] %v7902_v59  ;;  %v7910_v23 = vadd.f32 %v2253_v48, %v2106_v57  ;;  %4793 = vmatpush.msrb.mxu2 %v7908_v11  ;;  %v2754_v57 = vmul.f32 %v7269_v26, %v7897_v35  ;;  %5452 = vmatpush.msra.mxu1 %v7908_v11  ;;  %v7927_v18 = vpop.eup %6168  ;;  %v7930_v31 = vsel %vm1615_vm1, %v1634_v39, 0.0  ;;  %v2552_v43 = vrot.slane %v2448_v51, 2  ;;  %v1358_v51 = vpop.f32.mrf.mxu0 }
 0x235   : > { %11563 = vst [vmem:[#allocation33_spill] sm:$0xff] %v7927_v18  ;;  %v1765_v48 = vmul.f32 %v7125_v55, %v1500_v30  ;;  %v2553_v56 = vrot.slane %v2449_v45, 2  ;;  %v7933_v34 = vpop.eup %6170  ;;  %v2411_v1 = vadd.f32 %v2379_v46, %v7628_v10  ;;  %v2685_v14 = vmul.f32 %v7201_v29, %v7897_v35 }
 0x236   : > { %11564 = vst [vmem:[#allocation31_spill] sm:$0xff] %v7933_v34  ;;  %v2755_v52 = vmul.f32 %v7269_v26, %v7913_v63  ;;  %v2996_v18 = vmul.f32 %v7292_v20, %v7913_v63  ;;  %1578 = vmatmul.f32.gmra.mxu1 %v11560_v25  ;;  %v7944_v39 = vmul.f32 0.70710677, %v7819_v3  ;;  %v2995_v10 = vmul.f32 %v7292_v20, %v7897_v35  ;;  %v7951_v46 = vpop.eup %6172 }
 0x237   : > { %v2554_v30 = vsel %vm2225_vm3, %v2552_v43, %v2553_v56  ;;  %v2380_v45 = vmul.f32 %v7182_v15, %v7739_v5  ;;  %11566 = vst [vmem:[#allocation11_spill] sm:$0xff] %v7951_v46  ;;  %v2858_v8 = vrot.slane %v2754_v57, 1  ;;  %v2686_v25 = vmul.f32 %v7201_v29, %v7913_v63 }
 0x238   : > { %11565 = vst [vmem:[#allocation55_spill] sm:$0xff] %v7944_v39  ;;  %v2652_v34 = vadd.f32 %v2554_v30, %v2411_v1  ;;  %v2859_v37 = vrot.slane %v2755_v52, 1  ;;  %v3100_v42 = vrot.slane %v2996_v18, 2  ;;  %v2756_v43 = vmul.f32 %v7269_v26, %v7930_v31  ;;  %v1507_v52 = vpop.f32.mrf.mxu1 }
 0x239   : > { %v2412_v3 = vadd.f32 %v2380_v45, %v7697_v2  ;;  %v2997_v59 = vmul.f32 %v7292_v20, %v7930_v31  ;;  %v7960_v33 = vadd.f32 1.0, %v3388_v24  ;;  %v2556_v1 = vsel %vm2225_vm3, %v2553_v56, %v2555_v47 }
 0x23a   : > { %v2717_v28 = vadd.f32 %v2685_v14, %v2652_v34  ;;  %v2860_v41 = vsel %vm1983_vm2, %v2858_v8, %v2859_v37  ;;  %v1833_v57 = vmul.f32 %v7128_v49, %v7739_v5  ;;  %v3099_v18 = vrot.slane %v2995_v10, 2  ;;  %v11569_v5 = vld [vmem:[#allocation70_spill] sm:$0xff] }
 0x23b   : > { %11567 = vst [vmem:[#allocation25_spill] sm:$0xff] %v7960_v33  ;;  %v2653_v30 = vadd.f32 %v2556_v1, %v2412_v3  ;;  %v2861_v2 = vrot.slane %v2756_v43, 1  ;;  %v1800_v45 = vadd.f32 %v7816_v19, %v1765_v48  ;;  %v1355_v32 = vadd.f32 %v7865_v58, %v11568_v53 }
 0x23c   : > { %v2958_v20 = vadd.f32 %v2860_v41, %v2717_v28  ;;  %v3102_v24 = vrot.slane %v2997_v59, 2  ;;  %v3357_v34 = vand.u32 2147483647, %v7944_v39  ;;  %v3101_v8 = vsel %vm2225_vm3, %v3099_v18, %v3100_v42 }
 0x23d   : > { %v2718_v14 = vadd.f32 %v2686_v25, %v2653_v30  ;;  %v2862_v56 = vsel %vm1983_vm2, %v2859_v37, %v2861_v2  ;;  %v1504_v47 = vadd.f32 %v7891_v50, %v1355_v32  ;;  %v1359_v10 = vadd.f32 %v1358_v51, %v11569_v5 }
 0x23e   : > { %v7974_v3 = vadd.f32 %v3101_v8, %v2958_v20  ;;  %v7978_v48 = vsub.f32 %v7883_v16, %v7908_v11  ;;  %6174 = vrcp.f32 %v7960_v33  ;;  %v7982_v41 = vmul.f32 %v4220_v6, %v7889_v62 }
 0x23f   : > { %v7985_v28 = vmul.f32 0.70710677, %v7837_v17  ;;  %v2959_v53 = vadd.f32 %v2862_v56, %v2718_v14  ;;  %v1865_v37 = vadd.f32 %v1833_v57, %v1800_v45  ;;  %v3103_v32 = vsel %vm2225_vm3, %v3100_v42, %v3102_v24  ;;  %v8005_v42 = vpop.f32.mrf.mxu0 }
 0x240   : > { %11570 = vst [vmem:[#allocation67_spill] sm:$0xff] %v7974_v3  ;;  %4551 = vrot.lane.b32.xlu2 %v7974_v3, %s6401_s29  ;;  %v7990_v58 = vadd.f32 %v1507_v52, %v1359_v10  ;;  %v11216_v16 = vand.u32 4294901760, %v7978_v48  ;;  %5266 = vmatpush.msra.mxu0 %v7978_v48  ;;  %v3389_v50 = vmul.f32 0.3275911, %v3357_v34  ;;  %v11573_v62 = vrot.slane %v7854_v4, 1  ;;  %v8034_v14 = vpop.f32.mrf.mxu1 }
 0x241   : > { %11571 = vst [vmem:[#allocation26_spill] sm:$0xff] %v7982_v41  ;;  %v11574_v59 = vrot.slane %v7805_v21, 1  ;;  %v8001_v51 = vmul.f32 %v7083_v36, %v7913_v63  ;;  %v8003_v25 = vadd.f32 %v3103_v32, %v2959_v53  ;;  %v8009_v43 = vmul.f32 %v7083_v36, %v7930_v31 }
 0x242   : > { %11572 = vst [vmem:[#allocation68_spill] sm:$0xff] %v7985_v28  ;;  %v8013_v1 = vmul.f32 %v7101_v12, %v7930_v31  ;;  %v1766_v21 = vmul.f32 %v7125_v55, %v1504_v47  ;;  %v5100_v4 = vsub.f32 %v7978_v48, %v11216_v16  ;;  %v3358_v52 = vand.u32 2147483647, %v7985_v28 }
 0x243   : > { %v2013_v6 = vsel %vm1983_vm2, %v11574_v59, %v11573_v62  ;;  %11575 = vst [vmem:[#allocation27_spill] sm:$0xff] %v8003_v25  ;;  %v11576_v57 = vrot.slane %v7858_v0, 2  ;;  %v11577_v18 = vrot.slane %v7835_v7, 2  ;;  %v2453_v2 = vmul.f32 %v7165_v38, %v7930_v31  ;;  %4553 = vrot.lane.b32.xlu0 %v8003_v25, %s6401_s29 }
 0x244   : > { %v1905_v45 = vmul.f32 %v7083_v36, %v7897_v35  ;;  %v2107_v20 = vadd.f32 %v2013_v6, %v1865_v37  ;;  %v1834_v24 = vmul.f32 %v7128_v49, %v7897_v35  ;;  %v1637_v8 = vrot.slane %v7990_v58, 7  ;;  %v8036_v7 = vpop.eup %6174 }
 0x245   : > { %v2255_v30 = vsel %vm2225_vm3, %v11577_v18, %v11576_v57  ;;  %v5101_v0 = vand.u32 4294901760, %v5100_v4  ;;  %11578 = vst [vmem:[#allocation28_spill] sm:$0xff] %v8036_v7  ;;  %v8038_v56 = vadd.f32 1.0, %v3389_v50  ;;  %v4221_v31 = vsub.f32 0.0, %v3357_v34 }
 0x246   : > { %v1636_v5 = vrot.slane %v1504_v47, 7  ;;  %v11217_v10 = vrot.slane %v8001_v51, 1  ;;  %v1801_v32 = vadd.f32 %v7816_v19, %v1766_v21  ;;  %v2147_v62 = vmul.f32 %v7101_v12, %v7897_v35 }
 0x247   : > { %11579 = vst [vmem:[#allocation69_spill] sm:$0xff] %v8038_v56  ;;  %5102 = vmatpush.msrb.mxu3 %v5101_v0  ;;  %v3390_v59 = vmul.f32 0.3275911, %v3358_v52  ;;  %v4222_v6 = vsub.f32 0.0, %v3358_v52  ;;  %v2560_v4 = vrot.slane %v2453_v2, 2  ;;  %v2014_v57 = vrot.slane %v1905_v45, 1 }
 0x248   : > { %v2349_v50 = vadd.f32 %v2255_v30, %v2107_v20  ;;  %v8048_v47 = vmul.f32 %v7101_v12, %v7913_v63  ;;  %v8051_v18 = vsel %vm1615_vm1, %v1636_v5, %v1637_v8  ;;  %v8054_v16 = vsel %vm1615_vm1, %v1637_v8, 0.0 }
 0x249   : > { %6176 = vrcp.f32 %v8038_v56  ;;  %v8057_v21 = vmul.f32 %v4221_v31, %v3357_v34  ;;  %v8060_v0 = vsel %vm1615_vm1, 0.0, %v1636_v5  ;;  %v2016_v30 = vsel %vm1983_vm2, %v2014_v57, %v11217_v10  ;;  %v1366_v34 = vpop.f32.mrf.mxu0  ;;  %v8081_v57 = vld [vmem:[%s11135_s3 + $0x8] ss:$0 sm:$0xff] }
 0x24a   : > { %v1866_v2 = vadd.f32 %v1834_v24, %v1801_v32  ;;  %v2256_v45 = vrot.slane %v2147_v62, 2  ;;  %v2382_v20 = vmul.f32 %v7182_v15, %v7913_v63  ;;  %v2452_v8 = vmul.f32 %v7165_v38, %v7913_v63  ;;  %v1515_v24 = vpop.f32.mrf.mxu1 }
 0x24b   : > { %11580 = vst [vmem:[#allocation70_spill] sm:$0xff] %v8057_v21  ;;  %v8069_v37 = vadd.f32 1.0, %v3390_v59  ;;  %v8071_v53 = vmul.f32 %v4222_v6, %v3358_v52  ;;  %v2758_v31 = vmul.f32 %v7269_v26, %v8051_v18  ;;  %v2759_v5 = vmul.f32 %v7269_v26, %v8054_v16 }
 0x24c   : > { %v2414_v32 = vadd.f32 %v2382_v20, %v2349_v50  ;;  %v2558_v62 = vrot.slane %v2452_v8, 2  ;;  %v2999_v52 = vmul.f32 %v8081_v57, %v8051_v18  ;;  %v2688_v59 = vmul.f32 %v7201_v29, %v8051_v18 }
 0x24d   : > { %11581 = vst [vmem:[#allocation78_spill] sm:$0xff] %v8069_v37  ;;  %v2864_v6 = vrot.slane %v2758_v31, 1  ;;  %v2866_v10 = vrot.slane %v2759_v5, 1  ;;  %v3000_v17 = vmul.f32 %v8081_v57, %v8054_v16  ;;  %v1767_v50 = vmul.f32 %v7125_v55, %v7990_v58 }
 0x24e   : > { %11582 = vst [vmem:[#allocation79_spill] sm:$0xff] %v8071_v53  ;;  %v2108_v53 = vadd.f32 %v2016_v30, %v1866_v2  ;;  %v2561_v20 = vsel %vm2225_vm3, %v2558_v62, %v2560_v4  ;;  %v2451_v8 = vmul.f32 %v7165_v38, %v7897_v35  ;;  %v8097_v21 = vmul.f32 0.70710677, %v7974_v3 }
 0x24f   : > { %v8094_v28 = vpop.eup %6176  ;;  %v2655_v31 = vadd.f32 %v2561_v20, %v2414_v32  ;;  %v3105_v5 = vrot.slane %v2999_v52, 2  ;;  %v2381_v39 = vmul.f32 %v7182_v15, %v7897_v35  ;;  %v2867_v30 = vsel %vm1983_vm2, %v2864_v6, %v2866_v10  ;;  %v11585_v20 = vld [vmem:[#allocation72_spill] sm:$0xff] }
 0x250   : > { %11583 = vst [vmem:[#allocation80_spill] sm:$0xff] %v8094_v28  ;;  %v3107_v2 = vrot.slane %v3000_v17, 2  ;;  %v2557_v58 = vrot.slane %v2451_v8, 2  ;;  %v2757_v4 = vmul.f32 %v7269_v26, %v8060_v0  ;;  %6178 = vrcp.f32 %v8069_v37 }
 0x251   : > { %11584 = vst [vmem:[#allocation81_spill] sm:$0xff] %v8097_v21  ;;  %v2720_v56 = vadd.f32 %v2688_v59, %v2655_v31  ;;  %v2413_v28 = vadd.f32 %v2381_v39, %v7910_v23  ;;  %v2687_v3 = vmul.f32 %v7201_v29, %v8060_v0  ;;  %v1802_v32 = vadd.f32 %v7816_v19, %v1767_v50 }
 0x252   : > { %v2559_v52 = vsel %vm2225_vm3, %v2557_v58, %v2558_v62  ;;  %v2863_v35 = vrot.slane %v2757_v4, 1  ;;  %v2998_v17 = vmul.f32 %v8081_v57, %v8060_v0  ;;  %v3359_v10 = vand.u32 2147483647, %v8097_v21 }
 0x253   : > { %v1363_v8 = vadd.f32 %v8005_v42, %v11585_v20  ;;  %v2961_v37 = vadd.f32 %v2867_v30, %v2720_v56  ;;  %v2654_v59 = vadd.f32 %v2559_v52, %v2413_v28  ;;  %v11586_v23 = vrot.slane %v8048_v47, 2  ;;  %v1370_v28 = vpop.f32.mrf.mxu0  ;;  %v11591_v52 = vld [vmem:[#allocation73_spill] sm:$0xff] }
 0x254   : > { %v1835_v50 = vmul.f32 %v7128_v49, %v7913_v63  ;;  %v3108_v62 = vsel %vm2225_vm3, %v3105_v5, %v3107_v2  ;;  %v2865_v31 = vsel %vm1983_vm2, %v2863_v35, %v2864_v6  ;;  %v8123_v58 = vmul.f32 0.70710677, %v8003_v25 }
 0x255   : > { %v2258_v39 = vsel %vm2225_vm3, %v2256_v45, %v11586_v23  ;;  %v1512_v4 = vadd.f32 %v8034_v14, %v1363_v8  ;;  %v8126_v21 = vadd.f32 %v3108_v62, %v2961_v37  ;;  %v2719_v42 = vadd.f32 %v2687_v3, %v2654_v59 }
 0x256   : > { %11587 = vst [vmem:[#allocation72_spill] sm:$0xff] %v8123_v58  ;;  %v1867_v56 = vadd.f32 %v1835_v50, %v1802_v32  ;;  %v11589_v30 = vrot.slane %v8009_v43, 1  ;;  %v11590_v45 = vrot.slane %v8001_v51, 1  ;;  %v1367_v2 = vadd.f32 %v1366_v34, %v11591_v52  ;;  %v8134_v6 = vpop.eup %6178 }
 0x257   : > { %11588 = vst [vmem:[#allocation82_spill] sm:$0xff] %v8126_v21  ;;  %v3104_v20 = vrot.slane %v2998_v17, 2  ;;  %v3391_v35 = vmul.f32 0.3275911, %v3359_v10  ;;  %v8138_v14 = vmul.f32 %v7083_v36, %v8054_v16  ;;  %v8142_v3 = vmul.f32 %v7083_v36, %v8051_v18  ;;  %4557 = vrot.lane.b32.xlu2 %v8126_v21, %s6401_s29  ;;  %v1519_v17 = vpop.f32.mrf.mxu1 }
 0x258   : > { %v2018_v63 = vsel %vm1983_vm2, %v11590_v45, %v11589_v30  ;;  %11592 = vst [vmem:[#allocation73_spill] sm:$0xff] %v8134_v6  ;;  %v2960_v51 = vadd.f32 %v2865_v31, %v2719_v42  ;;  %v8148_v43 = vmul.f32 %v7101_v12, %v8054_v16  ;;  %v8152_v37 = vmul.f32 %v7165_v38, %v8054_v16 }
 0x259   : > { %v3106_v34 = vsel %vm2225_vm3, %v3104_v20, %v3105_v5  ;;  %v1516_v32 = vadd.f32 %v1515_v24, %v1367_v2  ;;  %v8156_v8 = vand.u32 2147483647, %v8123_v58  ;;  %v1768_v59 = vmul.f32 %v7125_v55, %v1512_v4 }
 0x25a   : > { %v1908_v23 = vmul.f32 %v7083_v36, %v8060_v0  ;;  %v8161_v50 = vadd.f32 %v3106_v34, %v2960_v51  ;;  %v2350_v62 = vadd.f32 %v2258_v39, %v2108_v53  ;;  %v4223_v31 = vsub.f32 0.0, %v3359_v10 }
 0x25b   : > { %v2109_v42 = vadd.f32 %v2018_v63, %v1867_v56  ;;  %v1639_v30 = vrot.slane %v1512_v4, 7  ;;  %v8163_v16 = vadd.f32 1.0, %v3391_v35  ;;  %v11595_v5 = vrot.slane %v8013_v1, 2  ;;  %v8187_v35 = vld [vmem:[%s11137_s5] sm:$0xff] }
 0x25c   : > { %11593 = vst [vmem:[#allocation83_spill] sm:$0xff] %v8161_v50  ;;  %v11596_v24 = vrot.slane %v8048_v47, 2  ;;  %v11231_v52 = vrot.slane %v8142_v3, 1  ;;  %v8173_v2 = vmul.f32 %v7101_v12, %v8060_v0  ;;  %4555 = vrot.lane.b32.xlu1 %v8161_v50, %s6401_s29  ;;  %v2565_v4 = vrot.slane %v8152_v37, 2 }
 0x25d   : > { %11594 = vst [vmem:[#allocation84_spill] sm:$0xff] %v8163_v16  ;;  %v1640_v1 = vrot.slane %v1516_v32, 7  ;;  %v3392_v47 = vmul.f32 0.3275911, %v8156_v8  ;;  %v1803_v56 = vadd.f32 %v7816_v19, %v1768_v59  ;;  %v1836_v63 = vmul.f32 %v7128_v49, %v8060_v0 }
 0x25e   : > { %v2260_v45 = vsel %vm2225_vm3, %v11596_v24, %v11595_v5  ;;  %v2019_v20 = vrot.slane %v1908_v23, 1  ;;  %v8189_v51 = vmul.f32 %v4223_v31, %v3359_v10  ;;  %v4224_v34 = vsub.f32 0.0, %v8156_v8  ;;  %v1374_v10 = vpop.f32.mrf.mxu0 }
 0x25f   : > { %v2351_v5 = vadd.f32 %v2260_v45, %v2109_v42  ;;  %v8193_v37 = vsel %vm1615_vm1, 0.0, %v1639_v30  ;;  %6180 = vrcp.f32 %v8163_v16  ;;  %v8201_v23 = vmul.f32 %v7101_v12, %v8051_v18  ;;  %v11598_v42 = vld [vmem:[#allocation75_spill] sm:$0xff] }
 0x260   : > { %11597 = vst [vmem:[#allocation85_spill] sm:$0xff] %v8189_v51  ;;  %v2021_v59 = vsel %vm1983_vm2, %v2019_v20, %v11231_v52  ;;  %v8205_v31 = vsel %vm1615_vm1, %v1639_v30, %v1640_v1  ;;  %v1371_v45 = vadd.f32 %v1370_v28, %v11598_v42  ;;  %v8209_v39 = vand.u32 4294901760, %v8187_v35  ;;  %v11600_v28 = vld [vmem:[#allocation9_spill] sm:$0xff] }
 0x261   : > { %v2454_v53 = vmul.f32 %v7165_v38, %v8060_v0  ;;  %v8213_v25 = vadd.f32 1.0, %v3392_v47  ;;  %v1868_v20 = vadd.f32 %v1836_v63, %v1803_v56  ;;  %v1769_v52 = vmul.f32 %v7125_v55, %v1516_v32  ;;  %v1523_v47 = vpop.f32.mrf.mxu1 }
 0x262   : > { %v2455_v24 = vmul.f32 %v7165_v38, %v8051_v18  ;;  %v8219_v58 = vsel %vm1615_vm1, %v1640_v1, 0.0  ;;  %v8221_v30 = vadd.f32 %v1519_v17, %v1371_v45  ;;  %v1375_v42 = vadd.f32 %v1374_v10, %v11600_v28  ;;  %4795 = vmatpush.msrb.mxu2 %v8209_v39  ;;  %5454 = vmatpush.msra.mxu1 %v8209_v39  ;;  %v11601_v17 = vld [vmem:[#allocation30_spill] sm:$0xff] }
 0x263   : > { %11599 = vst [vmem:[#allocation75_spill] sm:$0xff] %v8213_v25  ;;  %v2383_v6 = vmul.f32 %v7182_v15, %v8060_v0  ;;  %v2562_v56 = vrot.slane %v2454_v53, 2  ;;  %v2760_v63 = vmul.f32 %v7269_v26, %v8193_v37  ;;  %v2761_v1 = vmul.f32 %v7269_v26, %v8205_v31 }
 0x264   : > { %v2563_v32 = vrot.slane %v2455_v24, 2  ;;  %v11602_v45 = vand.u32 4294901760, %v11601_v17  ;;  %v2689_v28 = vmul.f32 %v7201_v29, %v8193_v37  ;;  %v3002_v0 = vmul.f32 %v8081_v57, %v8205_v31 }
 0x265   : > { %v2415_v10 = vadd.f32 %v2383_v6, %v2350_v62  ;;  %v2384_v53 = vmul.f32 %v7182_v15, %v8051_v18  ;;  %v8240_v24 = vpop.eup %6180  ;;  %v2868_v16 = vrot.slane %v2760_v63, 1  ;;  %v2869_v41 = vrot.slane %v2761_v1, 1  ;;  %v11606_v1 = vld [vmem:[#allocation46_spill] sm:$0xff] }
 0x266   : > { %5659 = vmatpush.msra.mxu2 %v11602_v45  ;;  %11603 = vst [vmem:[#allocation9_spill] sm:$0xff] %v8240_v24  ;;  %v2564_v51 = vsel %vm2225_vm3, %v2562_v56, %v2563_v32  ;;  %v3001_v17 = vmul.f32 %v8081_v57, %v8193_v37  ;;  %v11604_v45 = vld [vmem:[#allocation36_spill] sm:$0xff]  ;;  %v2566_v33 = vsel %vm2225_vm3, %v2563_v32, %v2565_v4  ;;  %v3110_v24 = vrot.slane %v3002_v0, 2 }
 0x267   : > { %v11605_v6 = vand.u32 4294901760, %v11604_v45  ;;  %v2656_v62 = vadd.f32 %v2564_v51, %v2415_v10  ;;  %v2416_v7 = vadd.f32 %v2384_v53, %v2351_v5  ;;  %v2690_v9 = vmul.f32 %v7201_v29, %v8205_v31  ;;  %v11609_v45 = vld [vmem:[#allocation62_spill] sm:$0xff] }
 0x268   : > { %v2870_v27 = vsel %vm1983_vm2, %v2868_v16, %v2869_v41  ;;  %v2762_v56 = vmul.f32 %v7269_v26, %v8219_v58  ;;  %v3003_v63 = vmul.f32 %v8081_v57, %v8219_v58  ;;  %v11607_v46 = vand.u32 4294901760, %v11606_v1 }
 0x269   : > { %5663 = vmatpush.msra.mxu2 %v11605_v6  ;;  %v8258_v51 = vmul.f32 %v4224_v34, %v8156_v8  ;;  %v2721_v5 = vadd.f32 %v2689_v28, %v2656_v62  ;;  %v2657_v4 = vadd.f32 %v2566_v33, %v2416_v7  ;;  %v8260_v32 = vadd.f32 %v1523_v47, %v1375_v42  ;;  %v1378_v8 = vpop.f32.mrf.mxu0  ;;  %v11615_v62 = vld [vmem:[#allocation51_spill] sm:$0xff] }
 0x26a   : > { %v2262_v10 = vrot.slane %v8201_v23, 2  ;;  %v3109_v16 = vrot.slane %v3001_v17, 2  ;;  %v2871_v0 = vrot.slane %v2762_v56, 1  ;;  %v3112_v53 = vrot.slane %v3003_v63, 2  ;;  %v11611_v23 = vld [vmem:[#allocation77_spill] sm:$0xff] }
 0x26b   : > { %5667 = vmatpush.msra.mxu2 %v11607_v46  ;;  %11608 = vst [vmem:[#allocation30_spill] sm:$0xff] %v8258_v51  ;;  %v11610_v6 = vand.u32 4294901760, %v11609_v45  ;;  %v1804_v44 = vadd.f32 %v7816_v19, %v1769_v52  ;;  %v1642_v1 = vrot.slane %v8221_v30, 7  ;;  %v2962_v46 = vadd.f32 %v2870_v27, %v2721_v5 }
 0x26c   : > { %v2722_v22 = vadd.f32 %v2690_v9, %v2657_v4  ;;  %6182 = vrcp.f32 %v8213_v25  ;;  %v2110_v33 = vadd.f32 %v2021_v59, %v1868_v20  ;;  %v3111_v7 = vsel %vm2225_vm3, %v3109_v16, %v3110_v24  ;;  %v1527_v9 = vpop.f32.mrf.mxu1 }
 0x26d   : > { %5671 = vmatpush.msra.mxu2 %v11610_v6  ;;  %v2872_v34 = vsel %vm1983_vm2, %v2869_v41, %v2871_v0  ;;  %v11612_v42 = vand.u32 4294901760, %v11611_v23  ;;  %v1837_v47 = vmul.f32 %v7128_v49, %v8051_v18  ;;  %v8274_v28 = vadd.f32 %v3111_v7, %v2962_v46 }
 0x26e   : > { %v2963_v52 = vadd.f32 %v2872_v34, %v2722_v22  ;;  %v1643_v27 = vrot.slane %v8260_v32, 7  ;;  %v11614_v17 = vrot.slane %v8173_v2, 2  ;;  %v3113_v20 = vsel %vm2225_vm3, %v3110_v24, %v3112_v53 }
 0x26f   : > { %5675 = vmatpush.msra.mxu2 %v11612_v42  ;;  %11613 = vst [vmem:[#allocation36_spill] sm:$0xff] %v8274_v28  ;;  %v5104_v41 = vsub.f32 %v8187_v35, %v8209_v39  ;;  %v1379_v56 = vadd.f32 %v1378_v8, %v11615_v62  ;;  %v11616_v63 = vand.u32 4294901760, %v7651_v61  ;;  %v8287_v18 = vmul.f32 0.70710677, %v8126_v21  ;;  %4559 = vrot.lane.b32.xlu0 %v8274_v28, %s6401_s29 }
 0x270   : > { %v2263_v59 = vsel %vm2225_vm3, %v11614_v17, %v2262_v10  ;;  %v1869_v22 = vadd.f32 %v1837_v47, %v1804_v44  ;;  %v8290_v5 = vsel %vm1615_vm1, 0.0, %v1642_v1  ;;  %v8294_v2 = vadd.f32 %v3113_v20, %v2963_v52 }
 0x271   : > { %5679 = vmatpush.msra.mxu2 %v11616_v63  ;;  %11617 = vst [vmem:[#allocation46_spill] sm:$0xff] %v8287_v18  ;;  %v2352_v24 = vadd.f32 %v2263_v59, %v2110_v33  ;;  %v11620_v35 = vrot.slane %v8138_v14, 1  ;;  %v11621_v4 = vrot.slane %v8142_v3, 1  ;;  %v5105_v16 = vand.u32 4294901760, %v5104_v41  ;;  %5269 = vmatpush.msra.mxu0 %v5104_v41 }
 0x272   : > { %11618 = vst [vmem:[#allocation62_spill] sm:$0xff] %v8290_v5  ;;  %v8301_v0 = vadd.f32 %v1527_v9, %v1379_v56  ;;  %v11622_v44 = vand.u32 4294901760, %v7978_v48  ;;  %v8307_v53 = vmul.f32 %v7083_v36, %v8219_v58  ;;  %v11623_v45 = vrot.slane %v8148_v43, 2  ;;  %4561 = vrot.lane.b32.xlu1 %v8294_v2, %s6401_s29  ;;  %v8321_v48 = vpop.eup %6182 }
 0x273   : > { %11619 = vst [vmem:[#allocation77_spill] sm:$0xff] %v8294_v2  ;;  %v2023_v61 = vsel %vm1983_vm2, %v11621_v4, %v11620_v35  ;;  %v8314_v14 = vmul.f32 %v7165_v38, %v8219_v58  ;;  %v8319_v3 = vsel %vm1615_vm1, %v1642_v1, %v1643_v27  ;;  %v8324_v46 = vsel %vm1615_vm1, %v1643_v27, 0.0  ;;  %v11625_v4 = vld [vmem:[#allocation29_spill] sm:$0xff] }
 0x274   : > { %5683 = vmatpush.msra.mxu2 %v11622_v44  ;;  %v2265_v6 = vsel %vm2225_vm3, %v2262_v10, %v11623_v45  ;;  %11624 = vst [vmem:[#allocation51_spill] sm:$0xff] %v8321_v48  ;;  %v5106_v8 = vsub.f32 %v5104_v41, %v5105_v16  ;;  %v1772_v43 = vmul.f32 %v7125_v55, %v8301_v0  ;;  %v8331_v33 = vand.u32 2147483647, %v8287_v18  ;;  %v1382_v45 = vpop.f32.mrf.mxu0  ;;  %v11631_v18 = vld [vmem:[#allocation13_spill] sm:$0xff] }
 0x275   : > { %v1914_v10 = vmul.f32 %v7083_v36, %v8290_v5  ;;  %v2111_v7 = vadd.f32 %v2023_v61, %v1869_v22  ;;  %v8335_v1 = vmul.f32 %v7101_v12, %v8219_v58  ;;  %v8339_v34 = vmul.f32 %v7128_v49, %v8193_v37 }
 0x276   : > { %5687 = vmatpush.msra.mxu2 %v5105_v16  ;;  %v5107_v23 = vand.u32 4294901760, %v5106_v8  ;;  %v1807_v42 = vadd.f32 %v7816_v19, %v1772_v43  ;;  %v1840_v47 = vmul.f32 %v7128_v49, %v8290_v5  ;;  %v1915_v52 = vmul.f32 %v7083_v36, %v8319_v3 }
 0x277   : > { %v2570_v9 = vrot.slane %v8314_v14, 2  ;;  %v1916_v58 = vmul.f32 %v7083_v36, %v8324_v46  ;;  %v8352_v17 = vmul.f32 %v7101_v12, %v8324_v46  ;;  %v2029_v20 = vrot.slane %v1914_v10, 1 }
 0x278   : > { %5108 = vmatpush.msrb.mxu3 %v5107_v23  ;;  %v1872_v59 = vadd.f32 %v1840_v47, %v1807_v42  ;;  %v2030_v41 = vrot.slane %v1915_v52, 1  ;;  %v2156_v62 = vmul.f32 %v7101_v12, %v8290_v5  ;;  %v8358_v56 = vmul.f32 %v7125_v55, %v8221_v30  ;;  %v11626_v23 = vld [vmem:[#allocation34_spill] sm:$0xff] }
 0x279   : > { %v8362_v63 = vmul.f32 %v7083_v36, %v8193_v37  ;;  %v8366_v22 = vmul.f32 %v7083_v36, %v8205_v31  ;;  %v2157_v35 = vmul.f32 %v7101_v12, %v8319_v3  ;;  %v8372_v61 = vmul.f32 0.3275911, %v8331_v33 }
 0x27a   : > { %5826 = vmatpush.msra.mxu3 %v11625_v4  ;;  %v2353_v16 = vadd.f32 %v2265_v6, %v2111_v7  ;;  %v2031_v30 = vsel %vm1983_vm2, %v2029_v20, %v2030_v41  ;;  %v2271_v44 = vrot.slane %v2156_v62, 2  ;;  %v2385_v43 = vmul.f32 %v7182_v15, %v8193_v37  ;;  %v11628_v4 = vld [vmem:[#allocation44_spill] sm:$0xff] }
 0x27b   : > { %v2114_v14 = vadd.f32 %v2031_v30, %v1872_v59  ;;  %v2272_v8 = vrot.slane %v2157_v35, 2  ;;  %v2457_v10 = vmul.f32 %v7165_v38, %v8193_v37  ;;  %v2032_v42 = vrot.slane %v1916_v58, 1  ;;  %v11627_v59 = vld [vmem:[#allocation10_spill] sm:$0xff] }
 0x27c   : > { %5828 = vmatpush.msra.mxu3 %v11626_v23  ;;  %v2274_v47 = vrot.slane %v8352_v17, 2  ;;  %v2458_v6 = vmul.f32 %v7165_v38, %v8205_v31  ;;  %v2763_v7 = vmul.f32 %v7269_v26, %v8290_v5  ;;  %v1383_v20 = vadd.f32 %v1382_v45, %v11627_v59  ;;  %v1531_v45 = vpop.f32.mrf.mxu1 }
 0x27d   : > { %v2273_v52 = vsel %vm2225_vm3, %v2271_v44, %v2272_v8  ;;  %v2417_v62 = vadd.f32 %v2385_v43, %v2352_v24  ;;  %v2764_v35 = vmul.f32 %v7269_v26, %v8319_v3  ;;  %v2567_v58 = vrot.slane %v2457_v10, 2  ;;  %v11630_v43 = vld [vmem:[#allocation59_spill] sm:$0xff] }
 0x27e   : > { %5830 = vmatpush.msra.mxu3 %v11628_v4  ;;  %v8390_v30 = vadd.f32 %v2273_v52, %v2114_v14  ;;  %v2568_v17 = vrot.slane %v2458_v6, 2  ;;  %v3005_v23 = vmul.f32 %v8081_v57, %v8319_v3  ;;  %v2691_v27 = vmul.f32 %v7201_v29, %v8290_v5 }
 0x27f   : > { %v2874_v21 = vrot.slane %v2764_v35, 1  ;;  %v3004_v44 = vmul.f32 %v8081_v57, %v8290_v5  ;;  %v2386_v24 = vmul.f32 %v7182_v15, %v8205_v31  ;;  %v2873_v10 = vrot.slane %v2763_v7, 1 }
 0x280   : > { %11629 = vst [vmem:[#allocation29_spill] sm:$0xff] %v8390_v30  ;;  %5832 = vmatpush.msra.mxu3 %v11630_v43  ;;  %v2569_v14 = vsel %vm2225_vm3, %v2567_v58, %v2568_v17  ;;  %v2692_v6 = vmul.f32 %v7201_v29, %v8319_v3  ;;  %v2765_v52 = vmul.f32 %v7269_v26, %v8324_v46  ;;  %v3115_v35 = vrot.slane %v3005_v23, 2 }
 0x281   : > { %v2658_v59 = vadd.f32 %v2569_v14, %v2417_v62  ;;  %v2418_v4 = vadd.f32 %v2386_v24, %v2353_v16  ;;  %v3006_v51 = vmul.f32 %v8081_v57, %v8324_v46  ;;  %v2875_v48 = vsel %vm1983_vm2, %v2873_v10, %v2874_v21 }
 0x282   : > { %5834 = vmatpush.msra.mxu3 %v11631_v18  ;;  %v2571_v43 = vsel %vm2225_vm3, %v2568_v17, %v2570_v9  ;;  %v2876_v58 = vrot.slane %v2765_v52, 1  ;;  %v8411_v7 = vadd.f32 %v1531_v45, %v1383_v20  ;;  %v3114_v30 = vrot.slane %v3004_v44, 2 }
 0x283   : > { %v2723_v25 = vadd.f32 %v2691_v27, %v2658_v59  ;;  %v2659_v5 = vadd.f32 %v2571_v43, %v2418_v4  ;;  %v2033_v29 = vsel %vm1983_vm2, %v2030_v41, %v2032_v42  ;;  %v3117_v62 = vrot.slane %v3006_v51, 2 }
 0x284   : > { %5836 = vmatpush.msra.mxu3 %v7600_v54  ;;  %v2877_v16 = vsel %vm1983_vm2, %v2874_v21, %v2876_v58  ;;  %v1773_v18 = vmul.f32 %v7125_v55, %v8411_v7  ;;  %v2275_v23 = vsel %vm2225_vm3, %v2272_v8, %v2274_v47  ;;  %v4226_v9 = vsub.f32 0.0, %v8331_v33 }
 0x285   : > { %v8421_v20 = vmul.f32 0.70710677, %v8161_v50  ;;  %v2964_v27 = vadd.f32 %v2875_v48, %v2723_v25  ;;  %v2724_v17 = vadd.f32 %v2692_v6, %v2659_v5  ;;  %v1771_v54 = vmul.f32 %v7125_v55, %v8260_v32 }
 0x286   : > { %5838 = vmatpush.msra.mxu3 %v7908_v11  ;;  %v3116_v21 = vsel %vm2225_vm3, %v3114_v30, %v3115_v35  ;;  %v1808_v51 = vadd.f32 %v7816_v19, %v1773_v18  ;;  %v1841_v41 = vmul.f32 %v7128_v49, %v8319_v3  ;;  %v1805_v8 = vadd.f32 %v7816_v19, %v8358_v56 }
 0x287   : > { %11632 = vst [vmem:[#allocation34_spill] sm:$0xff] %v8421_v20  ;;  %v8433_v42 = vmul.f32 0.70710677, %v8274_v28  ;;  %v8435_v25 = vadd.f32 %v3116_v21, %v2964_v27  ;;  %v2965_v5 = vadd.f32 %v2877_v16, %v2724_v17  ;;  %v2269_v11 = vrot.slane %v8335_v1, 2  ;;  %v11685_v28 = vld [vmem:[#allocation33_spill] sm:$0xff] }
 0x288   : > { %5840 = vmatpush.msra.mxu3 %v8209_v39  ;;  %v2153_v32 = vmul.f32 %v7101_v12, %v8193_v37  ;;  %v3118_v48 = vsel %vm2225_vm3, %v3115_v35, %v3117_v62  ;;  %v1873_v47 = vadd.f32 %v1841_v41, %v1808_v51  ;;  %v3361_v30 = vand.u32 2147483647, %v8421_v20 }
 0x289   : > { %11633 = vst [vmem:[#allocation10_spill] sm:$0xff] %v8433_v42  ;;  %v2024_v56 = vrot.slane %v8362_v63, 1  ;;  %v2025_v44 = vrot.slane %v8366_v22, 1  ;;  %4563 = vrot.lane.b32.xlu2 %v8435_v25, %s6401_s29  ;;  %v8447_v24 = vadd.f32 %v3118_v48, %v2965_v5  ;;  %v8450_v39 = vadd.f32 1.0, %v8372_v61 }
 0x28a   : > { %11634 = vst [vmem:[#allocation44_spill] sm:$0xff] %v8435_v25  ;;  %v1806_v1 = vadd.f32 %v7816_v19, %v1771_v54  ;;  %v2115_v37 = vadd.f32 %v2033_v29, %v1873_v47  ;;  %v3448_v45 = vmul.f32 %v7839_v13, %v7736_v40  ;;  %v8456_v14 = vmul.f32 %v4226_v9, %v8331_v33 }
 0x28b   : > { %11635 = vst [vmem:[#allocation59_spill] sm:$0xff] %v8447_v24  ;;  %v1870_v63 = vadd.f32 %v8339_v34, %v1805_v8  ;;  %v2154_v22 = vmul.f32 %v7101_v12, %v8205_v31  ;;  %v3363_v10 = vand.u32 2147483647, %v8433_v42  ;;  %4565 = vrot.lane.b32.xlu0 %v8447_v24, %s6401_s29  ;;  %v8465_v61 = vmul.f32 0.70710677, %v8294_v2 }
 0x28c   : > { %11636 = vst [vmem:[#allocation13_spill] sm:$0xff] %v8450_v39  ;;  %v1839_v29 = vmul.f32 %v7128_v49, %v8205_v31  ;;  %v8469_v19 = vadd.f32 %v2275_v23, %v2115_v37  ;;  %v3449_v33 = vsub.f32 1.0, %v3448_v45  ;;  %v3393_v6 = vmul.f32 0.3275911, %v3361_v30 }
 0x28d   : > { %11637 = vst [vmem:[#allocation86_spill] sm:$0xff] %v8456_v14  ;;  %v2026_v34 = vsel %vm1983_vm2, %v2024_v56, %v2025_v44  ;;  %v2266_v52 = vrot.slane %v2153_v32, 2  ;;  %v3458_v59 = vand.u32 2147483648, %v7736_v40  ;;  %vm3453_vm4 = vweird.f32 %v7839_v13 }
 0x28e   : > { %11638 = vst [vmem:[#allocation87_spill] sm:$0xff] %v8465_v61  ;;  %v1871_v35 = vadd.f32 %v1839_v29, %v1806_v1  ;;  %v3450_v4 = vmul.f32 %v7839_v13, %v3449_v33  ;;  %v3456_v43 = vand.u32 2147483647, %v7736_v40  ;;  %6184 = vrcp.f32 %v8450_v39 }
 0x28f   : > { %v4225_v58 = vsub.f32 0.0, %v3361_v30  ;;  %v2267_v31 = vrot.slane %v2154_v22, 2  ;;  %v3395_v16 = vmul.f32 0.3275911, %v3363_v10  ;;  %v2112_v62 = vadd.f32 %v2026_v34, %v1870_v63 }
 0x290   : > { %v3364_v18 = vand.u32 2147483647, %v8465_v61  ;;  %v3451_v23 = vadd.f32 %v7839_v13, %v3450_v4  ;;  %vm3452_vm5 = vweird.f32 %v7736_v40  ;;  %v8480_v9 = vadd.f32 1.0, %v3393_v6 }
 0x291   : > { %v11640_v27 = vrot.slane %v8307_v53, 1  ;;  %v8487_v54 = vmul.f32 %v7165_v38, %v8324_v46  ;;  %vm3454_vm6 = vmor %vm3452_vm5, %vm3453_vm4  ;;  %v3459_v21 = vor.u32 1.1754944e-38, %v3458_v59  ;;  %v1646_v41 = vrot.slane %v8411_v7, 7  ;;  %v11649_v59 = vld [vmem:[#allocation11_spill] sm:$0xff] }
 0x292   : > { %11639 = vst [vmem:[#allocation88_spill] sm:$0xff] %v8480_v9  ;;  %v3455_v8 = vsel %vm3454_vm6, %v7839_v13, %v3451_v23  ;;  %vm3457_vm7 = vcmp.eq.f32.partialorder %v3456_v43, 8.507059e+37  ;;  %v8491_v5 = vadd.f32 1.0, %v3395_v16  ;;  %v4227_v40 = vsub.f32 0.0, %v3363_v10  ;;  %v11653_v23 = vld [vmem:[#allocation15_spill] sm:$0xff] }
 0x293   : > { %v2028_v17 = vsel %vm1983_vm2, %v2025_v44, %v11640_v27  ;;  %v1645_v32 = vrot.slane %v8301_v0, 7  ;;  %v8494_v53 = vsel %vm3457_vm7, %v3459_v21, %v3455_v8  ;;  %v2268_v48 = vsel %vm2225_vm3, %v2266_v52, %v2267_v31  ;;  %v11648_v52 = vld [vmem:[#allocation61_spill] sm:$0xff] }
 0x294   : > { %v2113_v51 = vadd.f32 %v2028_v17, %v1871_v35  ;;  %11641 = vst [vmem:[#allocation89_spill] sm:$0xff] %v8491_v5  ;;  %v3396_v47 = vmul.f32 0.3275911, %v3364_v18  ;;  %v4228_v46 = vsub.f32 0.0, %v3364_v18  ;;  %v3927_v56 = vmul.f32 1.0614054, %v8494_v53  ;;  %v8498_v44 = vpop.eup %6184 }
 0x295   : > { %11642 = vst [vmem:[#allocation90_spill] sm:$0xff] %v8498_v44  ;;  %6186 = vrcp.f32 %v8480_v9  ;;  %v8501_v7 = vmul.f32 %v4225_v58, %v3361_v30  ;;  %v8503_v13 = vadd.f32 %v2268_v48, %v2112_v62  ;;  %v2270_v1 = vsel %vm2225_vm3, %v2267_v31, %v2269_v11  ;;  %v11645_v30 = vld [vmem:[#allocation56_spill] sm:$0xff]  ;;  %v11654_v17 = vld [vmem:[#allocation45_spill] sm:$0xff] }
 0x296   : > { %v8506_v37 = vadd.f32 %v2270_v1, %v2113_v51  ;;  %v2575_v0 = vrot.slane %v8487_v54, 2  ;;  %v8510_v45 = vsel %vm1615_vm1, %v1646_v41, 0.0  ;;  %v3959_v63 = vadd.f32 -1.4531521, %v3927_v56 }
 0x297   : > { %11643 = vst [vmem:[#allocation91_spill] sm:$0xff] %v8501_v7  ;;  %6188 = vrcp.f32 %v8491_v5  ;;  %v8513_v22 = vmul.f32 %v4227_v40, %v3363_v10  ;;  %v8516_v29 = vsel %vm1615_vm1, 0.0, %v1645_v32  ;;  %v3463_v33 = vmul.f32 %v11645_v30, %v7781_v60 }
 0x298   : > { %v8520_v6 = vadd.f32 1.0, %v3396_v47  ;;  %v8522_v11 = vmul.f32 %v4228_v46, %v3364_v18  ;;  %v3991_v34 = vmul.f32 %v3959_v63, %v8494_v53  ;;  %v3508_v35 = vmul.f32 %v11649_v59, %v11648_v52  ;;  %v11656_v63 = vld [vmem:[#allocation40_spill] sm:$0xff] }
 0x299   : > { %11644 = vst [vmem:[#allocation92_spill] sm:$0xff] %v8513_v22  ;;  %v8528_v4 = vsel %vm1615_vm1, %v1645_v32, %v1646_v41  ;;  %v8532_v10 = vmul.f32 %v7083_v36, %v8510_v45  ;;  %v8536_v43 = vmul.f32 %v7101_v12, %v8510_v45  ;;  %v8539_v58 = vmul.f32 0.70710677, %v8435_v25 }
 0x29a   : > { %11646 = vst [vmem:[#allocation56_spill] sm:$0xff] %v8520_v6  ;;  %v8543_v31 = vmul.f32 %v7165_v38, %v8510_v45  ;;  %v4023_v16 = vadd.f32 1.4214138, %v3991_v34  ;;  %v3509_v62 = vsub.f32 1.0, %v3508_v35  ;;  %v8548_v27 = vmul.f32 0.5, %v11653_v23 }
 0x29b   : > { %11647 = vst [vmem:[#allocation93_spill] sm:$0xff] %v8522_v11  ;;  %v8545_v18 = vpop.eup %6186  ;;  %v4279_v21 = vmul.f32 1.442695, %v11654_v17  ;;  %v3516_v51 = vand.u32 2147483647, %v11648_v52  ;;  %v3464_v41 = vsub.f32 1.0, %v3463_v33  ;;  %vm3468_vm8 = vweird.f32 %v11645_v30 }
 0x29c   : > { %11650 = vst [vmem:[#allocation61_spill] sm:$0xff] %v8536_v43  ;;  %v4055_v8 = vmul.f32 %v4023_v16, %v8494_v53  ;;  %v3518_v40 = vand.u32 2147483648, %v11648_v52  ;;  %v3473_v32 = vand.u32 2147483648, %v7781_v60  ;;  %v3510_v47 = vmul.f32 %v11649_v59, %v3509_v62 }
 0x29d   : > { %11651 = vst [vmem:[#allocation11_spill] sm:$0xff] %v8539_v58  ;;  %v8556_v48 = vpop.eup %6188  ;;  %vm3513_vm9 = vweird.f32 %v11649_v59  ;;  %v3465_v46 = vmul.f32 %v11645_v30, %v3464_v41  ;;  %v3471_v56 = vand.u32 2147483647, %v7781_v60  ;;  %vm3287_vm10 = vcmp.ge.f32.partialorder %v11656_v63, 0.0  ;;  %v11658_v63 = vld [vmem:[#allocation54_spill] sm:$0xff] }
 0x29e   : > { %11652 = vst [vmem:[#allocation94_spill] sm:$0xff] %v8545_v18  ;;  %v4087_v33 = vadd.f32 -0.28449672, %v4055_v8  ;;  %vm3467_vm11 = vweird.f32 %v7781_v60  ;;  %6190 = vpow2.f32 %v4279_v21  ;;  %v3511_v34 = vadd.f32 %v11649_v59, %v3510_v47 }
 0x29f   : > { %11655 = vst [vmem:[#allocation15_spill] sm:$0xff] %v8556_v48  ;;  %vm3512_vm12 = vweird.f32 %v11648_v52  ;;  %v3466_v35 = vadd.f32 %v11645_v30, %v3465_v46  ;;  %vm3469_vm13 = vmor %vm3467_vm11, %vm3468_vm8  ;;  %v8571_v16 = vand.u32 2147483647, %v8539_v58  ;;  %v3519_v23 = vor.u32 1.1754944e-38, %v3518_v40 }
 0x2a0   : > { %v4119_v62 = vmul.f32 %v4087_v33, %v8494_v53  ;;  %vm3514_vm14 = vmor %vm3512_vm12, %vm3513_vm9  ;;  %v3474_v17 = vor.u32 1.1754944e-38, %v3473_v32  ;;  %vm3517_vm15 = vcmp.eq.f32.partialorder %v3516_v51, 8.507059e+37  ;;  %vm3472_vm4 = vcmp.eq.f32.partialorder %v3471_v56, 8.507059e+37 }
 0x2a1   : > { %v3515_v60 = vsel %vm3514_vm14, %v11649_v59, %v3511_v34  ;;  %v3470_v21 = vsel %vm3469_vm13, %v11645_v30, %v3466_v35  ;;  %v8582_v46 = vmul.f32 0.70710677, %v8447_v24  ;;  %v11255_v40 = vmov -1.0  }
 0x2a2   : > { %v4151_v41 = vadd.f32 0.2548296, %v4119_v62  ;;  %v8577_v8 = vsel %vm3517_vm15, %v3519_v23, %v3515_v60  ;;  %v8579_v47 = vsel %vm3472_vm4, %v3474_v17, %v3470_v21  ;;  %v3319_v59 = vsel %vm3287_vm10, 1.0, %v11255_v40 }
 0x2a3   : > { %11657 = vst [vmem:[#allocation45_spill] sm:$0xff] %v8582_v46  ;;  %v3928_v30 = vmul.f32 1.0614054, %v8579_v47  ;;  %v3397_v51 = vmul.f32 0.3275911, %v8571_v16  ;;  %v2388_v56 = vmul.f32 %v7182_v15, %v8319_v3  ;;  %v2461_v34 = vmul.f32 %v7165_v38, %v8319_v3  ;;  %v11659_v3 = vld [vmem:[#allocation76_spill] sm:$0xff] }
 0x2a4   : > { %v4183_v32 = vmul.f32 %v4151_v41, %v8494_v53  ;;  %v6191_v35 = vpop.eup %6190  ;;  %6192 = vrcp.f32 %v8520_v6  ;;  %v3931_v62 = vmul.f32 1.0614054, %v8577_v8  ;;  %v4281_v17 = vmul.f32 1.442695, %v11658_v63 }
 0x2a5   : > { %v3960_v23 = vadd.f32 -1.4531521, %v3928_v30  ;;  %v2420_v21 = vadd.f32 %v2388_v56, %v8506_v37  ;;  %v2573_v52 = vrot.slane %v2461_v34, 2  ;;  %v2767_v53 = vmul.f32 %v7269_v26, %v8528_v4 }
 0x2a6   : > { %v4343_v60 = vmul.f32 %v6191_v35, %v4183_v32  ;;  %vm4675_vm5 = vcmask 523264   ;;  %v2694_v1 = vmul.f32 %v11659_v3, %v8528_v4  ;;  %v2768_v33 = vmul.f32 %v7269_v26, %v8510_v45 }
 0x2a7   : > { %v3992_v41 = vmul.f32 %v3960_v23, %v8579_v47  ;;  %v8608_v30 = vmul.f32 %v8081_v57, %v8528_v4  ;;  %v2576_v37 = vsel %vm2225_vm3, %v2573_v52, %v2575_v0  ;;  %v2879_v56 = vrot.slane %v2767_v53, 1 }
 0x2a8   : > { %v4375_v32 = vsub.f32 1.0, %v4343_v60  ;;  %v3009_v34 = vmul.f32 %v8081_v57, %v8510_v45  ;;  %v3963_v35 = vadd.f32 -1.4531521, %v3931_v62  ;;  %v2661_v63 = vadd.f32 %v2576_v37, %v2420_v21  ;;  %v11661_v62 = vld [vmem:[#allocation41_spill] sm:$0xff]  ;;  %v4536_v21 = vpop.permute.xlu0 %4535 }
 0x2a9   : > { %v4024_v23 = vadd.f32 1.4214138, %v3992_v41  ;;  %v2881_v40 = vrot.slane %v2768_v33, 1  ;;  %v4229_v24 = vsub.f32 0.0, %v8571_v16  ;;  %v3120_v61 = vrot.slane %v8608_v30, 2  ;;  %v11662_v33 = vld [vmem:[#allocation62_spill] sm:$0xff] }
 0x2aa   : > { %v4407_v2 = vmul.f32 %v4375_v32, %v3319_v59  ;;  %v3122_v11 = vrot.slane %v3009_v34, 2  ;;  %v8617_v22 = vpop.eup %6192  ;;  %v3366_v54 = vand.u32 2147483647, %v8582_v46  ;;  %v2726_v60 = vadd.f32 %v2694_v1, %v2661_v63 }
 0x2ab   : > { %11660 = vst [vmem:[#allocation40_spill] sm:$0xff] %v8617_v22  ;;  %v4056_v0 = vmul.f32 %v4024_v23, %v8579_v47  ;;  %v2882_v53 = vsel %vm1983_vm2, %v2879_v56, %v2881_v40  ;;  %v8623_v41 = vmul.f32 0.5, %v11661_v62  ;;  %6194 = vpow2.f32 %v4281_v17 }
 0x2ac   : > { %v4439_v45 = vadd.f32 1.0, %v4407_v2  ;;  %v2460_v59 = vmul.f32 %v7165_v38, %v11662_v33  ;;  %v3995_v30 = vmul.f32 %v3963_v35, %v8577_v8  ;;  %v2967_v37 = vadd.f32 %v2882_v53, %v2726_v60  ;;  %v1386_v53 = vpop.f32.mrf.mxu0 }
 0x2ad   : > { %v4088_v32 = vadd.f32 -0.28449672, %v4056_v0  ;;  %v2387_v34 = vmul.f32 %v7182_v15, %v11662_v33  ;;  %v3123_v40 = vsel %vm2225_vm3, %v3120_v61, %v3122_v11  ;;  %v2766_v23 = vmul.f32 %v7269_v26, %v8516_v29 }
 0x2ae   : > { %v4471_v1 = vmul.f32 %v4439_v45, %v8548_v27  ;;  %v2572_v2 = vrot.slane %v2460_v59, 2  ;;  %v8634_v17 = vadd.f32 1.0, %v3397_v51  ;;  %v8637_v63 = vmul.f32 %v4229_v24, %v8571_v16 }
 0x2af   : > { %v4120_v35 = vmul.f32 %v4088_v32, %v8579_v47  ;;  %v8640_v0 = vadd.f32 %v3123_v40, %v2967_v37  ;;  %v2419_v62 = vadd.f32 %v2387_v34, %v8503_v13  ;;  %v2693_v11 = vmul.f32 %v11659_v3, %v8516_v29  ;;  %v1535_v13 = vpop.f32.mrf.mxu1  ;;  %v11667_v34 = vld [vmem:[#allocation52_spill] sm:$0xff] }
 0x2b0   : > { %11663 = vst [vmem:[#allocation54_spill] sm:$0xff] %v8634_v17  ;;  %v4631_v60 = vmul.f32 %v4536_v21, %v4471_v1  ;;  %v2574_v27 = vsel %vm2225_vm3, %v2572_v2, %v2573_v52  ;;  %v4027_v45 = vadd.f32 1.4214138, %v3995_v30  ;;  %v2878_v24 = vrot.slane %v2766_v23, 1  ;;  %v11668_v40 = vld [vmem:[#allocation12_spill] sm:$0xff] }
 0x2b1   : > { %11664 = vst [vmem:[#allocation76_spill] sm:$0xff] %v8637_v63  ;;  %v4152_v33 = vadd.f32 0.2548296, %v4120_v35  ;;  %4569 = vrot.lane.b32.xlu2 %v8640_v0, %s6401_s29  ;;  %v3007_v16 = vmul.f32 %v8081_v57, %v8516_v29  ;;  %v6195_v51 = vpop.eup %6194  ;;  %v3398_v59 = vmul.f32 0.3275911, %v3366_v54  ;;  %v4230_v21 = vsub.f32 0.0, %v3366_v54 }
 0x2b2   : > { %11665 = vst [vmem:[#allocation41_spill] sm:$0xff] %v8640_v0  ;;  %v4677_v32 = vsel %vm4675_vm5, %v4631_v60, 0  ;;  %v2660_v37 = vadd.f32 %v2574_v27, %v2419_v62  ;;  %vm3291_vm6 = vcmp.ge.f32.partialorder %v11667_v34, 0.0  ;;  %v2880_v1 = vsel %vm1983_vm2, %v2878_v24, %v2879_v56  ;;  %v11669_v57 = vld [vmem:[#allocation14_spill] sm:$0xff]  ;;  %v11670_v56 = vld [vmem:[#allocation24_spill] sm:$0xff] }
 0x2b3   : > { %v8651_v52 = vand.u32 4294901760, %v4677_v32  ;;  %v4184_v30 = vmul.f32 %v4152_v33, %v8579_v47  ;;  %6196 = vrcp.f32 %v8634_v17  ;;  %v1387_v2 = vadd.f32 %v1386_v53, %v11668_v40 }
 0x2b4   : > { %vm3288_vm7 = vcmp.ge.f32.partialorder %v11669_v57, 0.0  ;;  %v2725_v23 = vadd.f32 %v2693_v11, %v2660_v37  ;;  %v4059_v60 = vmul.f32 %v4027_v45, %v8577_v8  ;;  %v3119_v27 = vrot.slane %v3007_v16, 2  ;;  %v11676_v57 = vld [vmem:[#allocation17_spill] sm:$0xff] }
 0x2b5   : > { %11666 = vst [vmem:[#allocation62_spill] sm:$0xff] %v8651_v52  ;;  %v4797_v35 = vsub.f32 %v4677_v32, %v8651_v52  ;;  %5110 = vmatmul.f32.vlgmr.msrb.gmra.mxu3 %v8651_v52  ;;  %v4344_v62 = vmul.f32 %v6195_v51, %v4184_v30  ;;  %v8662_v46 = vadd.f32 %v1535_v13, %v1387_v2  ;;  %v4287_v33 = vmul.f32 1.442695, %v11670_v56  ;;  %v11677_v56 = vld [vmem:[#allocation60_spill] sm:$0xff] }
 0x2b6   : > { %v8666_v47 = vmul.f32 %v7083_v36, %v8528_v4  ;;  %v2966_v53 = vadd.f32 %v2880_v1, %v2725_v23  ;;  %v8669_v24 = vadd.f32 1.0, %v3398_v59  ;;  %v3121_v37 = vsel %vm2225_vm3, %v3119_v27, %v3120_v61  ;;  %v11681_v2 = vld [vmem:[#allocation28_spill] sm:$0xff] }
 0x2b7   : > { %v4798_v11 = vand.u32 4294901760, %v4797_v35  ;;  %5272 = vmatmul.f32.vlgmr.msra.gmra.mxu0 %v4797_v35  ;;  %v4376_v32 = vsub.f32 1.0, %v4344_v62  ;;  %v8672_v40 = vmul.f32 %v4230_v21, %v3366_v54  ;;  %v1917_v45 = vmul.f32 %v7083_v36, %v8516_v29  ;;  %v1390_v62 = vpop.f32.mrf.mxu0 }
 0x2b8   : > { %11671 = vst [vmem:[#allocation52_spill] sm:$0xff] %v8669_v24  ;;  %v11673_v16 = vmov -1.0   ;;  %v8679_v13 = vadd.f32 %v3121_v37, %v2966_v53  ;;  %v4091_v30 = vadd.f32 -0.28449672, %v4059_v60  ;;  %v1774_v21 = vmul.f32 %v7125_v55, %v8662_v46  ;;  %v1539_v37 = vpop.f32.mrf.mxu1 }
 0x2b9   : > { %11672 = vst [vmem:[#allocation12_spill] sm:$0xff] %v8672_v40  ;;  %v3320_v51 = vsel %vm3288_vm7, 1.0, %v11673_v16  ;;  %v8684_v59 = vsel %vm3291_vm6, 1.0, %v11673_v16  ;;  %5458 = vmatmul.f32.vlgmr.msra.gmra.mxu1 %v4798_v11  ;;  %v4799_v61 = vsub.f32 %v4797_v35, %v4798_v11  ;;  %v8686_v54 = vpop.eup %6196  ;;  %6198 = vpow2.f32 %v4287_v33 }
 0x2ba   : > { %11674 = vst [vmem:[#allocation14_spill] sm:$0xff] %v8679_v13  ;;  %v4408_v1 = vmul.f32 %v4376_v32, %v3320_v51  ;;  %v3224_v23 = vmul.f32 0.5, %v11676_v57  ;;  %4567 = vrot.lane.b32.xlu1 %v8679_v13, %s6401_s29  ;;  %v1648_v34 = vrot.slane %v8662_v46, 7  ;;  %v8696_v35 = vmul.f32 0.5, %v11677_v56  ;;  %v4538_v32 = vpop.permute.xlu0 %4537  ;;  %v11678_v51 = vld [vmem:[#allocation53_spill] sm:$0xff] }
 0x2bb   : > { %11675 = vst [vmem:[#allocation24_spill] sm:$0xff] %v8686_v54  ;;  %v4800_v27 = vand.u32 4294901760, %v4799_v61  ;;  %v1842_v53 = vmul.f32 %v7128_v49, %v8516_v29  ;;  %v2034_v11 = vrot.slane %v1917_v45, 1  ;;  %v8702_v33 = vmul.f32 %v7101_v12, %v8516_v29  ;;  %v11680_v56 = vld [vmem:[#allocation25_spill] sm:$0xff] }
 0x2bc   : > { %v4440_v60 = vadd.f32 1.0, %v4408_v1  ;;  %vm3292_vm8 = vcmp.ge.f32.partialorder %v11678_v51, 0.0  ;;  %v4123_v57 = vmul.f32 %v4091_v30, %v8577_v8  ;;  %v11679_v1 = vld [vmem:[#allocation19_spill] sm:$0xff]  ;;  %v3523_v52 = vmul.f32 %v11681_v2, %v11680_v56  ;;  %v8712_v45 = vld [vmem:[%s11136_s4] ss:$0 sm:$0xff] }
 0x2bd   : > { %v1391_v61 = vadd.f32 %v1390_v62, %v11679_v1  ;;  %4801 = vmatmul.f32.vlgmr.msrb.gmra.mxu2 %v4800_v27  ;;  %v1809_v40 = vadd.f32 %v8712_v45, %v1774_v21  ;;  %v11682_v22 = vrot.slane %v8666_v47, 1  ;;  %v8722_v30 = vmul.f32 %v7101_v12, %v8528_v4 }
 0x2be   : > { %v4472_v46 = vmul.f32 %v4440_v60, %v3224_v23  ;;  %v3533_v23 = vand.u32 2147483648, %v11680_v56  ;;  %v8726_v62 = vsel %vm1615_vm1, 0.0, %v1648_v34  ;;  %v3524_v1 = vsub.f32 1.0, %v3523_v52 }
 0x2bf   : > { %v8718_v6 = vsel %vm1983_vm2, %v2034_v11, %v11682_v22  ;;  %11683 = vst [vmem:[#allocation17_spill] sm:$0xff] %v8726_v62  ;;  %v1540_v27 = vadd.f32 %v1539_v37, %v1391_v61  ;;  %v6199_v42 = vpop.eup %6198  ;;  %v8731_v21 = vsel %vm3292_vm8, 1.0, %v11673_v16  ;;  %vm3527_vm9 = vweird.f32 %v11680_v56  ;;  %v11684_v11 = vld [vmem:[#allocation22_spill] sm:$0xff]  ;;  %v1394_v54 = vpop.f32.mrf.mxu0 }
 0x2c0   : > { %v4632_v60 = vmul.f32 %v4538_v32, %v4472_v46  ;;  %v3531_v22 = vand.u32 2147483647, %v11680_v56  ;;  %v3478_v25 = vmul.f32 %v11685_v28, %v11684_v11  ;;  %v4155_v58 = vadd.f32 0.2548296, %v4123_v57 }
 0x2c1   : > { %v3525_v32 = vmul.f32 %v11681_v2, %v3524_v1  ;;  %vm3528_vm10 = vweird.f32 %v11681_v2  ;;  %v8740_v52 = vadd.f32 %v1842_v53, %v1809_v40  ;;  %v3534_v51 = vor.u32 1.1754944e-38, %v3533_v23  ;;  %v11688_v1 = vld [vmem:[#allocation26_spill] sm:$0xff] }
 0x2c2   : > { %v4680_v63 = vsel %vm4675_vm5, %v4632_v60, 0  ;;  %v3479_v46 = vsub.f32 1.0, %v3478_v25  ;;  %v8745_v61 = vmul.f32 0.70710677, %v8640_v0  ;;  %v1649_v48 = vrot.slane %v1540_v27, 7  ;;  %vm3529_vm12 = vmor %vm3527_vm9, %vm3528_vm10 }
 0x2c3   : > { %v8742_v37 = vand.u32 4294901760, %v4680_v63  ;;  %v3526_v5 = vadd.f32 %v11681_v2, %v3525_v32  ;;  %vm3483_vm11 = vweird.f32 %v11685_v28  ;;  %v3486_v53 = vand.u32 2147483647, %v11684_v11 }
 0x2c4   : > { %11687 = vst [vmem:[#allocation53_spill] sm:$0xff] %v8745_v61  ;;  %v3480_v40 = vmul.f32 %v11685_v28, %v3479_v46  ;;  %v3488_v25 = vand.u32 2147483648, %v11684_v11  ;;  %v4187_v23 = vmul.f32 %v4155_v58, %v8577_v8  ;;  %vm3532_vm13 = vcmp.eq.f32.partialorder %v3531_v22, 8.507059e+37  ;;  %v11690_v8 = vld [vmem:[#allocation50_spill] sm:$0xff] }
 0x2c5   : > { %11686 = vst [vmem:[#allocation60_spill] sm:$0xff] %v8742_v37  ;;  %v4805_v57 = vsub.f32 %v4680_v63, %v8742_v37  ;;  %5114 = vmatmul.f32.gmra.mxu3 %v8742_v37  ;;  %v3530_v60 = vsel %vm3529_vm12, %v11681_v2, %v3526_v5  ;;  %v4289_v32 = vmul.f32 1.442695, %v11688_v1  ;;  %v11689_v63 = vld [vmem:[#allocation35_spill] sm:$0xff]  ;;  %vm3482_vm14 = vweird.f32 %v11684_v11 }
 0x2c6   : > { %v8759_v0 = vsel %vm3532_vm13, %v3534_v51, %v3530_v60  ;;  %v8762_v37 = vmul.f32 0.5, %v11689_v63  ;;  %v3481_v56 = vadd.f32 %v11685_v28, %v3480_v40  ;;  %v8767_v46 = vand.u32 2147483647, %v8745_v61  ;;  %vm3484_vm15 = vmor %vm3482_vm14, %vm3483_vm11  ;;  %v11691_v2 = vld [vmem:[#allocation31_spill] sm:$0xff] }
 0x2c7   : > { %5277 = vmatmul.f32.gmra.mxu0 %v4805_v57  ;;  %v3932_v58 = vmul.f32 1.0614054, %v8759_v0  ;;  %v3489_v5 = vor.u32 1.1754944e-38, %v3488_v25  ;;  %v3493_v22 = vmul.f32 %v11691_v2, %v11690_v8  ;;  %v8775_v51 = vsel %vm1615_vm1, %v1648_v34, %v1649_v48 }
 0x2c8   : > { %v8778_v60 = vsel %vm1615_vm1, %v1649_v48, 0.0  ;;  %v3485_v11 = vsel %vm3484_vm15, %v11685_v28, %v3481_v56  ;;  %vm3487_vm4 = vcmp.eq.f32.partialorder %v3486_v53, 8.507059e+37  ;;  %v8781_v40 = vmul.f32 %v6199_v42, %v4187_v23  ;;  %v1543_v53 = vpop.f32.mrf.mxu1  ;;  %v11692_v56 = vld [vmem:[#allocation37_spill] sm:$0xff] }
 0x2c9   : > { %v8784_v1 = vmul.f32 %v7125_v55, %v1540_v27  ;;  %v3964_v63 = vadd.f32 -1.4531521, %v3932_v58  ;;  %v8786_v61 = vsel %vm3487_vm4, %v3489_v5, %v3485_v11  ;;  %v3494_v7 = vsub.f32 1.0, %v3493_v22 }
 0x2ca   : > { %v3929_v25 = vmul.f32 1.0614054, %v8786_v61  ;;  %vm3498_vm6 = vweird.f32 %v11691_v2  ;;  %v3501_v34 = vand.u32 2147483647, %v11690_v8  ;;  %v4806_v28 = vand.u32 4294901760, %v4805_v57 }
 0x2cb   : > { %v3996_v48 = vmul.f32 %v3964_v63, %v8759_v0  ;;  %v1920_v42 = vmul.f32 %v7083_v36, %v8726_v62  ;;  %v3503_v27 = vand.u32 2147483648, %v11690_v8  ;;  %v1395_v58 = vadd.f32 %v1394_v54, %v11692_v56 }
 0x2cc   : > { %v3961_v23 = vadd.f32 -1.4531521, %v3929_v25  ;;  %v8798_v5 = vmul.f32 %v7083_v36, %v8775_v51  ;;  %v2162_v22 = vmul.f32 %v7101_v12, %v8726_v62  ;;  %5464 = vmatmul.f32.gmra.mxu1 %v4806_v28  ;;  %v4807_v63 = vsub.f32 %v4805_v57, %v4806_v28  ;;  %v11694_v28 = vld [vmem:[#allocation64_spill] sm:$0xff] }
 0x2cd   : > { %v4028_v11 = vadd.f32 1.4214138, %v3996_v48  ;;  %v2039_v17 = vrot.slane %v1920_v42, 1  ;;  %v8804_v20 = vmul.f32 %v7101_v12, %v8775_v51  ;;  %v8807_v25 = vadd.f32 %v1543_v53, %v1395_v58 }
 0x2ce   : > { %v3993_v50 = vmul.f32 %v3961_v23, %v8786_v61  ;;  %v11290_v54 = vrot.slane %v8798_v5, 1  ;;  %v2281_v56 = vrot.slane %v2162_v22, 2  ;;  %v4808_v9 = vand.u32 4294901760, %v4807_v63  ;;  %v11695_v63 = vld [vmem:[#allocation48_spill] sm:$0xff] }
 0x2cf   : > { %11693 = vst [vmem:[#allocation19_spill] sm:$0xff] %v8807_v25  ;;  %v4060_v18 = vmul.f32 %v4028_v11, %v8759_v0  ;;  %v11289_v14 = vrot.slane %v8804_v20, 2  ;;  %v3495_v48 = vmul.f32 %v11691_v2, %v3494_v7  ;;  %v4283_v42 = vmul.f32 1.442695, %v11694_v28 }
 0x2d0   : > { %v4025_v57 = vadd.f32 1.4214138, %v3993_v50  ;;  %v1776_v44 = vmul.f32 %v7125_v55, %v8807_v25  ;;  %v2041_v53 = vsel %vm1983_vm2, %v2039_v17, %v11290_v54  ;;  %4809 = vmatmul.f32.gmra.mxu2 %v4808_v9  ;;  %vm3497_vm7 = vweird.f32 %v11690_v8 }
 0x2d1   : > { %v4092_v23 = vadd.f32 -0.28449672, %v4060_v18  ;;  %v2283_v58 = vsel %vm2225_vm3, %v2281_v56, %v11289_v14  ;;  %v3496_v22 = vadd.f32 %v11691_v2, %v3495_v48  ;;  %v1844_v11 = vmul.f32 %v7128_v49, %v8726_v62  ;;  %vm3499_vm8 = vmor %vm3497_vm7, %vm3498_vm6 }
 0x2d2   : > { %v4057_v50 = vmul.f32 %v4025_v57, %v8786_v61  ;;  %v1811_v7 = vadd.f32 %v8712_v45, %v1776_v44  ;;  %v3504_v18 = vor.u32 1.1754944e-38, %v3503_v27  ;;  %6200 = vpow2.f32 %v4289_v32 }
 0x2d3   : > { %v4124_v9 = vmul.f32 %v4092_v23, %v8759_v0  ;;  %v3500_v17 = vsel %vm3499_vm8, %v11691_v2, %v3496_v22  ;;  %vm3502_vm9 = vcmp.eq.f32.partialorder %v3501_v34, 8.507059e+37  ;;  %vm3289_vm10 = vcmp.ge.f32.partialorder %v11695_v63, 0.0 }
 0x2d4   : > { %v4089_v8 = vadd.f32 -0.28449672, %v4057_v50  ;;  %v1876_v56 = vadd.f32 %v1844_v11, %v1811_v7  ;;  %v8833_v48 = vsel %vm3502_vm9, %v3504_v18, %v3500_v17  ;;  %v4379_v44 = vsub.f32 1.0, %v8781_v40  ;;  %v11697_v11 = vld [vmem:[#allocation32_spill] sm:$0xff]  ;;  %v11698_v17 = vld [vmem:[#allocation29_spill] sm:$0xff] }
 0x2d5   : > { %v8838_v57 = vmul.f32 %v7083_v36, %v8778_v60  ;;  %6202 = vpow2.f32 %v4283_v42  ;;  %v3930_v27 = vmul.f32 1.0614054, %v8833_v48  ;;  %v2389_v2 = vmul.f32 %v7182_v15, %v8516_v29 }
 0x2d6   : > { %v4121_v32 = vmul.f32 %v4089_v8, %v8786_v61  ;;  %v2118_v28 = vadd.f32 %v2041_v53, %v1876_v56  ;;  %v2463_v34 = vmul.f32 %v7165_v38, %v8516_v29  ;;  %v4156_v23 = vadd.f32 0.2548296, %v4124_v9 }
 0x2d7   : > { %v3321_v22 = vsel %vm3289_vm10, 1.0, %v11673_v16  ;;  %v3962_v40 = vadd.f32 -1.4531521, %v3930_v27  ;;  %v2464_v50 = vmul.f32 %v7165_v38, %v8528_v4  ;;  %v4285_v18 = vmul.f32 1.442695, %v11697_v11  ;;  %v1398_v11 = vpop.f32.mrf.mxu0  ;;  %v11699_v38 = vld [vmem:[#allocation39_spill] sm:$0xff] }
 0x2d8   : > { %v4153_v7 = vadd.f32 0.2548296, %v4121_v32  ;;  %v8849_v42 = vadd.f32 %v2283_v58, %v2118_v28  ;;  %v2421_v53 = vadd.f32 %v2389_v2, %v11698_v17  ;;  %v6201_v63 = vpop.eup %6200  ;;  %v2577_v56 = vrot.slane %v2463_v34, 2  ;;  %v8864_v32 = vld [vmem:[%s11135_s3 + $0x8] ss:$0 sm:$0xff] }
 0x2d9   : > { %v3994_v8 = vmul.f32 %v3962_v40, %v8833_v48  ;;  %v2578_v14 = vrot.slane %v2464_v50, 2  ;;  %v2695_v29 = vmul.f32 %v11659_v3, %v8726_v62  ;;  %v2769_v27 = vmul.f32 %v7269_v26, %v8726_v62 }
 0x2da   : > { %11696 = vst [vmem:[#allocation25_spill] sm:$0xff] %v8849_v42  ;;  %v4185_v9 = vmul.f32 %v4153_v7, %v8786_v61  ;;  %v2770_v58 = vmul.f32 %v7269_v26, %v8775_v51  ;;  %v3010_v28 = vmul.f32 %v8864_v32, %v8726_v62  ;;  %v4188_v34 = vmul.f32 %v4156_v23, %v8759_v0 }
 0x2db   : > { %v6203_v2 = vpop.eup %6202  ;;  %v4026_v40 = vadd.f32 1.4214138, %v3994_v8  ;;  %v2579_v61 = vsel %vm2225_vm3, %v2577_v56, %v2578_v14  ;;  %v3011_v50 = vmul.f32 %v8864_v32, %v8775_v51  ;;  %v2883_v54 = vrot.slane %v2769_v27, 1 }
 0x2dc   : > { %v4345_v7 = vmul.f32 %v6203_v2, %v4185_v9  ;;  %v2662_v17 = vadd.f32 %v2579_v61, %v2421_v53  ;;  %v2884_v42 = vrot.slane %v2770_v58, 1  ;;  %6204 = vpow2.f32 %v4285_v18 }
 0x2dd   : > { %v4058_v39 = vmul.f32 %v4026_v40, %v8833_v48  ;;  %v3124_v36 = vrot.slane %v3010_v28, 2  ;;  %v3125_v25 = vrot.slane %v3011_v50, 2  ;;  %v2390_v23 = vmul.f32 %v7182_v15, %v8528_v4  ;;  %v1547_v28 = vpop.f32.mrf.mxu1 }
 0x2de   : > { %v4377_v62 = vsub.f32 1.0, %v4345_v7  ;;  %v2727_v43 = vadd.f32 %v2695_v29, %v2662_v17  ;;  %v2885_v0 = vsel %vm1983_vm2, %v2883_v54, %v2884_v42  ;;  %v4348_v8 = vmul.f32 %v6201_v63, %v4188_v34  ;;  %v4540_v34 = vpop.permute.xlu1 %4539 }
 0x2df   : > { %v4090_v56 = vadd.f32 -0.28449672, %v4058_v39  ;;  %v1399_v9 = vadd.f32 %v1398_v11, %v11699_v38  ;;  %v3126_v53 = vsel %vm2225_vm3, %v3124_v36, %v3125_v25  ;;  %v2422_v2 = vadd.f32 %v2390_v23, %v8469_v19  ;;  %v4544_v11 = vpop.permute.xlu2 %4543 }
 0x2e0   : > { %v4409_v27 = vmul.f32 %v4377_v62, %v3321_v22  ;;  %v2968_v58 = vadd.f32 %v2885_v0, %v2727_v43  ;;  %v2696_v18 = vmul.f32 %v11659_v3, %v8775_v51  ;;  %v11700_v54 = vrot.slane %v8543_v31, 2 }
 0x2e1   : > { %v4122_v29 = vmul.f32 %v4090_v56, %v8833_v48  ;;  %v2771_v39 = vmul.f32 %v7269_v26, %v8778_v60  ;;  %v3012_v36 = vmul.f32 %v8864_v32, %v8778_v60  ;;  %v4411_v38 = vmul.f32 %v4379_v44, %v8684_v59 }
 0x2e2   : > { %v2581_v40 = vsel %vm2225_vm3, %v2578_v14, %v11700_v54  ;;  %v4441_v43 = vadd.f32 1.0, %v4409_v27  ;;  %v8890_v19 = vadd.f32 %v3126_v53, %v2968_v58  ;;  %v6205_v22 = vpop.eup %6204  ;;  %v2164_v63 = vmul.f32 %v7101_v12, %v8778_v60  ;;  %v11703_v58 = vld [vmem:[#allocation49_spill] sm:$0xff] }
 0x2e3   : > { %v2663_v62 = vadd.f32 %v2581_v40, %v2422_v2  ;;  %v4154_v31 = vadd.f32 0.2548296, %v4122_v29  ;;  %v2886_v61 = vrot.slane %v2771_v39, 1  ;;  %v8894_v14 = vadd.f32 %v1547_v28, %v1399_v9 }
 0x2e4   : > { %11701 = vst [vmem:[#allocation28_spill] sm:$0xff] %v8890_v19  ;;  %v4380_v50 = vsub.f32 1.0, %v4348_v8  ;;  %v4473_v7 = vmul.f32 %v4441_v43, %v8762_v37  ;;  %4571 = vrot.lane.b32.xlu0 %v8890_v19, %s6401_s29  ;;  %v3127_v44 = vrot.slane %v3012_v36, 2  ;;  %v3400_v17 = vmul.f32 0.3275911, %v8767_v46 }
 0x2e5   : > { %v2728_v59 = vadd.f32 %v2696_v18, %v2663_v62  ;;  %v1810_v0 = vadd.f32 %v8712_v45, %v8784_v1  ;;  %v4186_v23 = vmul.f32 %v4154_v31, %v8833_v48  ;;  %v2887_v56 = vsel %vm1983_vm2, %v2884_v42, %v2886_v61  ;;  %v11707_v61 = vld [vmem:[#allocation38_spill] sm:$0xff] }
 0x2e6   : > { %v4443_v9 = vadd.f32 1.0, %v4411_v38  ;;  %v8905_v8 = vmul.f32 0.70710677, %v8679_v13  ;;  %v4633_v37 = vmul.f32 %v4540_v34, %v4473_v7  ;;  %v2042_v27 = vrot.slane %v8838_v57, 1 }
 0x2e7   : > { %v2969_v53 = vadd.f32 %v2887_v56, %v2728_v59  ;;  %vm3290_vm11 = vcmp.ge.f32.partialorder %v11703_v58, 0.0  ;;  %v4346_v2 = vmul.f32 %v6205_v22, %v4186_v23  ;;  %v1777_v18 = vmul.f32 %v7125_v55, %v8894_v14 }
 0x2e8   : > { %11702 = vst [vmem:[#allocation22_spill] sm:$0xff] %v8905_v8  ;;  %v2284_v28 = vrot.slane %v2164_v63, 2  ;;  %v4412_v1 = vmul.f32 %v4380_v50, %v8731_v21  ;;  %v4683_v48 = vsel %vm4675_vm5, %v4633_v37, 0  ;;  %v3128_v42 = vsel %vm2225_vm3, %v3125_v25, %v3127_v44 }
 0x2e9   : > { %v8914_v29 = vand.u32 4294901760, %v4683_v48  ;;  %v4378_v54 = vsub.f32 1.0, %v4346_v2  ;;  %v8916_v40 = vadd.f32 %v3128_v42, %v2969_v53  ;;  %v1812_v57 = vadd.f32 %v8712_v45, %v1777_v18 }
 0x2ea   : > { %v4475_v39 = vmul.f32 %v4443_v9, %v8623_v41  ;;  %v1843_v36 = vmul.f32 %v7128_v49, %v8528_v4  ;;  %v3322_v38 = vsel %vm3290_vm11, 1.0, %v11673_v16  ;;  %v1845_v21 = vmul.f32 %v7128_v49, %v8775_v51 }
 0x2eb   : > { %11704 = vst [vmem:[#allocation33_spill] sm:$0xff] %v8914_v29  ;;  %v3367_v43 = vand.u32 2147483647, %v8905_v8  ;;  %v4813_v25 = vsub.f32 %v4683_v48, %v8914_v29  ;;  %5118 = vmatmul.f32.gmra.mxu3 %v8914_v29  ;;  %v4410_v62 = vmul.f32 %v4378_v54, %v3322_v38  ;;  %4573 = vrot.lane.b32.xlu1 %v8916_v40, %s6401_s29  ;;  %v11706_v41 = vrot.slane %v8798_v5, 1 }
 0x2ec   : > { %11705 = vst [vmem:[#allocation26_spill] sm:$0xff] %v8916_v40  ;;  %v4635_v4 = vmul.f32 %v4544_v11, %v4475_v39  ;;  %v1875_v63 = vadd.f32 %v1843_v36, %v1810_v0  ;;  %v4444_v34 = vadd.f32 1.0, %v4412_v1  ;;  %v1877_v31 = vadd.f32 %v1845_v21, %v1812_v57  ;;  %v4542_v11 = vpop.permute.xlu1 %4541  ;;  %v11712_v57 = vld [vmem:[#allocation74_spill] sm:$0xff]  ;;  %v11715_v21 = vld [vmem:[#allocation61_spill] sm:$0xff] }
 0x2ed   : > { %v2043_v22 = vsel %vm1983_vm2, %v11706_v41, %v2042_v27  ;;  %5282 = vmatmul.f32.gmra.mxu0 %v4813_v25  ;;  %v3226_v50 = vmul.f32 0.5, %v11707_v61  ;;  %v4442_v7 = vadd.f32 1.0, %v4410_v62  ;;  %v4814_v59 = vand.u32 4294901760, %v4813_v25  ;;  %v4546_v27 = vpop.permute.xlu2 %4545 }
 0x2ee   : > { %v11708_v44 = vrot.slane %v8804_v20, 2  ;;  %v2116_v56 = vadd.f32 %v8718_v6, %v8740_v52  ;;  %v2276_v5 = vrot.slane %v8702_v33, 2  ;;  %v2277_v9 = vrot.slane %v8722_v30, 2 }
 0x2ef   : > { %v2119_v0 = vadd.f32 %v2043_v22, %v1877_v31  ;;  %v4232_v37 = vsub.f32 0.0, %v8767_v46  ;;  %v3399_v53 = vmul.f32 0.3275911, %v3367_v43  ;;  %v4474_v58 = vmul.f32 %v4442_v7, %v3226_v50  ;;  %5470 = vmatmul.f32.gmra.mxu1 %v4814_v59  ;;  %v11720_v31 = vld [vmem:[#allocation19_spill] sm:$0xff]  ;;  %v11721_v7 = vld [vmem:[#allocation84_spill] sm:$0xff] }
 0x2f0   : > { %v2285_v23 = vsel %vm2225_vm3, %v11708_v44, %v2284_v28  ;;  %v4815_v2 = vsub.f32 %v4813_v25, %v4814_v59  ;;  %v4689_v20 = vsel %vm4675_vm5, %v4635_v4, 0  ;;  %v11709_v18 = vrot.slane %v8532_v10, 1 }
 0x2f1   : > { %v11710_v28 = vrot.slane %v8666_v47, 1  ;;  %v4476_v33 = vmul.f32 %v4444_v34, %v8696_v35  ;;  %v8949_v30 = vadd.f32 %v2285_v23, %v2119_v0  ;;  %v8951_v52 = vadd.f32 1.0, %v3400_v17 }
 0x2f2   : > { %v4634_v48 = vmul.f32 %v4542_v11, %v4474_v58  ;;  %v4816_v42 = vand.u32 4294901760, %v4815_v2  ;;  %6206 = vrcp.f32 %v8669_v24  ;;  %v2278_v54 = vsel %vm2225_vm3, %v2276_v5, %v2277_v9  ;;  %v11726_v58 = vld [vmem:[#allocation69_spill] sm:$0xff]  ;;  %v11727_v2 = vld [vmem:[#allocation80_spill] sm:$0xff] }
 0x2f3   : > { %v2038_v6 = vsel %vm1983_vm2, %v11710_v28, %v11709_v18  ;;  %11711 = vst [vmem:[#allocation35_spill] sm:$0xff] %v8951_v52  ;;  %v8957_v10 = vmul.f32 %v11712_v57, %v8778_v60  ;;  %v4636_v47 = vmul.f32 %v4546_v27, %v4476_v33  ;;  %v8959_v39 = vand.u32 4294901760, %v4689_v20 }
 0x2f4   : > { %v2117_v1 = vadd.f32 %v2038_v6, %v1875_v63  ;;  %v8961_v36 = vadd.f32 1.0, %v3399_v53  ;;  %v4231_v35 = vsub.f32 0.0, %v3367_v43  ;;  %v4686_v17 = vsel %vm4675_vm5, %v4634_v48, 0  ;;  %4817 = vmatmul.f32.gmra.mxu2 %v4816_v42  ;;  %v11730_v48 = vld [vmem:[#allocation65_spill] sm:$0xff] }
 0x2f5   : > { %11713 = vst [vmem:[#allocation50_spill] sm:$0xff] %v8959_v39  ;;  %v8964_v38 = vadd.f32 %v2278_v54, %v2116_v56  ;;  %v11716_v25 = vrot.slane %v11715_v21, 2  ;;  %v8969_v41 = vand.u32 4294901760, %v4686_v17  ;;  %v1652_v60 = vrot.slane %v8894_v14, 7  ;;  %v11722_v14 = vld [vmem:[#allocation9_spill] sm:$0xff]  ;;  %v8994_v56 = vpop.f32.mrf.mxu0 }
 0x2f6   : > { %11714 = vst [vmem:[#allocation31_spill] sm:$0xff] %v8961_v36  ;;  %6208 = vrcp.f32 %v8951_v52  ;;  %v8974_v22 = vmul.f32 %v4232_v37, %v8767_v46  ;;  %v8979_v63 = vmul.f32 0.70710677, %v8890_v19  ;;  %v4692_v34 = vsel %vm4675_vm5, %v4636_v47, 0 }
 0x2f7   : > { %v2280_v62 = vsel %vm2225_vm3, %v2277_v9, %v11716_v25  ;;  %11717 = vst [vmem:[#allocation37_spill] sm:$0xff] %v8969_v41  ;;  %v1651_v61 = vrot.slane %v11720_v31, 7  ;;  %v4821_v50 = vsub.f32 %v4686_v17, %v8969_v41  ;;  %5122 = vmatmul.f32.gmra.mxu3 %v8969_v41  ;;  %v3568_v59 = vmul.f32 %v11722_v14, %v11721_v7  ;;  %v9032_v17 = vpop.f32.mrf.mxu1 }
 0x2f8   : > { %11718 = vst [vmem:[#allocation64_spill] sm:$0xff] %v8974_v22  ;;  %v8976_v4 = vadd.f32 %v2280_v62, %v2117_v1  ;;  %v8988_v44 = vsub.f32 %v4689_v20, %v8959_v39  ;;  %6210 = vrcp.f32 %v8961_v36  ;;  %v8991_v46 = vmul.f32 %v4231_v35, %v3367_v43  ;;  %v8996_v5 = vpop.eup %6206 }
 0x2f9   : > { %11719 = vst [vmem:[#allocation48_spill] sm:$0xff] %v8979_v63  ;;  %v8999_v9 = vsel %vm1615_vm1, %v1651_v61, %v1652_v60  ;;  %v9002_v11 = vsel %vm1615_vm1, %v1652_v60, 0.0  ;;  %5287 = vmatmul.f32.gmra.mxu0 %v4821_v50  ;;  %v4822_v0 = vand.u32 4294901760, %v4821_v50  ;;  %v3569_v37 = vsub.f32 1.0, %v3568_v59 }
 0x2fa   : > { %11723 = vst [vmem:[#allocation32_spill] sm:$0xff] %v8991_v46  ;;  %v9004_v53 = vand.u32 4294901760, %v4692_v34  ;;  %v9007_v43 = vand.u32 2147483647, %v8979_v63  ;;  %v3578_v27 = vand.u32 2147483648, %v11721_v7  ;;  %v3538_v20 = vmul.f32 %v11727_v2, %v11726_v58 }
 0x2fb   : > { %11724 = vst [vmem:[#allocation29_spill] sm:$0xff] %v8996_v5  ;;  %5476 = vmatmul.f32.gmra.mxu1 %v4822_v0  ;;  %v4823_v18 = vsub.f32 %v4821_v50, %v4822_v0  ;;  %v3570_v28 = vmul.f32 %v11722_v14, %v3569_v37  ;;  %vm3573_vm12 = vweird.f32 %v11722_v14  ;;  %v3576_v6 = vand.u32 2147483647, %v11721_v7  ;;  %v11732_v37 = vld [vmem:[#allocation85_spill] sm:$0xff] }
 0x2fc   : > { %11725 = vst [vmem:[#allocation39_spill] sm:$0xff] %v9004_v53  ;;  %v9015_v33 = vpop.eup %6208  ;;  %v9018_v1 = vmul.f32 0.70710677, %v8916_v40  ;;  %v9022_v42 = vmul.f32 %v11730_v48, %v9002_v11  ;;  %v9026_v54 = vmul.f32 %v7101_v12, %v9002_v11  ;;  %v9030_v47 = vmul.f32 %v11730_v48, %v8999_v9 }
 0x2fd   : > { %11728 = vst [vmem:[#allocation49_spill] sm:$0xff] %v9015_v33  ;;  %v4824_v35 = vand.u32 4294901760, %v4823_v18  ;;  %v9036_v21 = vmul.f32 %v7101_v12, %v8999_v9  ;;  %v3571_v25 = vadd.f32 %v11722_v14, %v3570_v28  ;;  %vm3572_vm13 = vweird.f32 %v11721_v7  ;;  %v11734_v28 = vld [vmem:[#allocation21_spill] sm:$0xff] }
 0x2fe   : > { %11729 = vst [vmem:[#allocation38_spill] sm:$0xff] %v9018_v1  ;;  %v9040_v62 = vpop.eup %6210  ;;  %v9043_v60 = vsub.f32 %v4692_v34, %v9004_v53  ;;  %v9046_v31 = vsel %vm1615_vm1, 0.0, %v1651_v61  ;;  %vm3574_vm14 = vmor %vm3572_vm13, %vm3573_vm12  ;;  %v3579_v50 = vor.u32 1.1754944e-38, %v3578_v27  ;;  %v3539_v59 = vsub.f32 1.0, %v3538_v20 }
 0x2ff   : > { %11731 = vst [vmem:[#allocation74_spill] sm:$0xff] %v9040_v62  ;;  %v9051_v0 = vmul.f32 0.3275911, %v9007_v43  ;;  %4825 = vmatmul.f32.gmra.mxu2 %v4824_v35  ;;  %5126 = vmatmul.f32.gmra.mxu3 %v8959_v39  ;;  %v3575_v7 = vsel %vm3574_vm14, %v11722_v14, %v3571_v25  ;;  %vm3577_vm15 = vcmp.eq.f32.partialorder %v3576_v6, 8.507059e+37  ;;  %v9057_v34 = vand.u32 2147483647, %v9018_v1  ;;  %v1406_v14 = vpop.f32.mrf.mxu0 }
 0x300   : > { %v9061_v27 = vsel %vm3577_vm15, %v3579_v50, %v3575_v7  ;;  %v9067_v23 = vmul.f32 1.442695, %v11732_v37  ;;  %v4830_v6 = vand.u32 4294901760, %v8988_v44  ;;  %v11733_v25 = vld [vmem:[#allocation17_spill] sm:$0xff]  ;;  %v2467_v50 = vmul.f32 %v11712_v57, %v8775_v51 }
 0x301   : > { %v3935_v35 = vmul.f32 1.0614054, %v9061_v27  ;;  %5292 = vmatmul.f32.gmra.mxu0 %v8988_v44  ;;  %v2466_v61 = vmul.f32 %v11712_v57, %v11733_v25  ;;  %v3540_v7 = vmul.f32 %v11727_v2, %v3539_v59  ;;  %v1407_v20 = vadd.f32 %v1406_v14, %v11734_v28 }
 0x302   : > { %v2391_v37 = vmul.f32 %v7182_v15, %v11733_v25  ;;  %v2772_v39 = vmul.f32 %v7269_v26, %v9046_v31  ;;  %v2583_v29 = vrot.slane %v2467_v50, 2  ;;  %v2697_v40 = vmul.f32 %v11659_v3, %v9046_v31 }
 0x303   : > { %v3967_v18 = vadd.f32 -1.4531521, %v3935_v35  ;;  %5482 = vmatmul.f32.gmra.mxu1 %v4830_v6  ;;  %v2582_v41 = vrot.slane %v2466_v61, 2  ;;  %v2773_v1 = vmul.f32 %v7269_v26, %v8999_v9  ;;  %v3013_v28 = vmul.f32 %v8864_v32, %v9046_v31 }
 0x304   : > { %v2423_v35 = vadd.f32 %v2391_v37, %v8964_v38  ;;  %v3014_v14 = vmul.f32 %v8864_v32, %v8999_v9  ;;  %v2888_v61 = vrot.slane %v2772_v39, 1  ;;  %v2392_v19 = vmul.f32 %v7182_v15, %v8775_v51  ;;  %v1555_v37 = vpop.f32.mrf.mxu1 }
 0x305   : > { %v3999_v59 = vmul.f32 %v3967_v18, %v9061_v27  ;;  %v2584_v25 = vsel %vm2225_vm3, %v2582_v41, %v2583_v29  ;;  %v2889_v50 = vrot.slane %v2773_v1, 1  ;;  %v11735_v18 = vrot.slane %v8957_v10, 2 }
 0x306   : > { %v2664_v13 = vadd.f32 %v2584_v25, %v2423_v35  ;;  %v3130_v46 = vrot.slane %v3014_v14, 2  ;;  %v2424_v62 = vadd.f32 %v2392_v19, %v8976_v4  ;;  %v2698_v39 = vmul.f32 %v11659_v3, %v8999_v9 }
 0x307   : > { %v4031_v63 = vadd.f32 1.4214138, %v3999_v59  ;;  %v2586_v38 = vsel %vm2225_vm3, %v2583_v29, %v11735_v18  ;;  %5130 = vmatmul.f32.gmra.mxu3 %v9004_v53  ;;  %v2890_v8 = vsel %vm1983_vm2, %v2888_v61, %v2889_v50  ;;  %v2774_v51 = vmul.f32 %v7269_v26, %v9002_v11  ;;  %v11736_v59 = vld [vmem:[#allocation55_spill] sm:$0xff] }
 0x308   : > { %vm3542_vm4 = vweird.f32 %v11726_v58  ;;  %v2729_v10 = vadd.f32 %v2697_v40, %v2664_v13  ;;  %v3129_v1 = vrot.slane %v3013_v28, 2  ;;  %v3015_v29 = vmul.f32 %v8864_v32, %v9002_v11 }
 0x309   : > { %v4063_v41 = vmul.f32 %v4031_v63, %v9061_v27  ;;  %vm3293_vm6 = vcmp.ge.f32.partialorder %v11736_v59, 0.0  ;;  %5297 = vmatmul.f32.gmra.mxu0 %v9043_v60  ;;  %v2665_v19 = vadd.f32 %v2586_v38, %v2424_v62  ;;  %v2891_v4 = vrot.slane %v2774_v51, 1 }
 0x30a   : > { %v4831_v35 = vsub.f32 %v8988_v44, %v4830_v6  ;;  %v9111_v14 = vadd.f32 %v1555_v37, %v1407_v20  ;;  %v2970_v61 = vadd.f32 %v2890_v8, %v2729_v10  ;;  %v3132_v18 = vrot.slane %v3015_v29, 2  ;;  %v11743_v29 = vld [vmem:[#allocation78_spill] sm:$0xff] }
 0x30b   : > { %v4095_v25 = vadd.f32 -0.28449672, %v4063_v41  ;;  %vm3543_vm7 = vweird.f32 %v11727_v2  ;;  %v3131_v13 = vsel %vm2225_vm3, %v3129_v1, %v3130_v46  ;;  %v2730_v40 = vadd.f32 %v2698_v39, %v2665_v19  ;;  %v11744_v19 = vld [vmem:[#allocation73_spill] sm:$0xff] }
 0x30c   : > { %v2892_v63 = vsel %vm1983_vm2, %v2889_v50, %v2891_v4  ;;  %v4832_v28 = vand.u32 4294901760, %v4831_v35  ;;  %v9117_v36 = vadd.f32 %v3131_v13, %v2970_v61  ;;  %v1779_v44 = vmul.f32 %v7125_v55, %v9111_v14  ;;  %vm3544_vm8 = vmor %vm3542_vm4, %vm3543_vm7 }
 0x30d   : > { %v4127_v53 = vmul.f32 %v4095_v25, %v9061_v27  ;;  %v3546_v62 = vand.u32 2147483647, %v11726_v58  ;;  %v2971_v20 = vadd.f32 %v2892_v63, %v2730_v40  ;;  %v11738_v8 = vrot.slane %v9022_v42, 1  ;;  %v11746_v25 = vld [vmem:[#allocation57_spill] sm:$0xff] }
 0x30e   : > { %11737 = vst [vmem:[#allocation61_spill] sm:$0xff] %v9117_v36  ;;  %4833 = vmatmul.f32.gmra.mxu2 %v4832_v28  ;;  %v11739_v6 = vrot.slane %v9030_v47, 1  ;;  %v3541_v50 = vadd.f32 %v11727_v2, %v3540_v7  ;;  %v3548_v37 = vand.u32 2147483648, %v11726_v58  ;;  %4575 = vrot.lane.b32.xlu2 %v9117_v36, %s6401_s29  ;;  %v3133_v51 = vsel %vm2225_vm3, %v3130_v46, %v3132_v18 }
 0x30f   : > { %v4159_v39 = vadd.f32 0.2548296, %v4127_v53  ;;  %v1814_v41 = vadd.f32 %v8712_v45, %v1779_v44  ;;  %v1847_v10 = vmul.f32 %v7128_v49, %v8999_v9  ;;  %6212 = vpow2.f32 %v9067_v23 }
 0x310   : > { %v2048_v38 = vsel %vm1983_vm2, %v11739_v6, %v11738_v8  ;;  %v9136_v42 = vadd.f32 %v3133_v51, %v2971_v20  ;;  %v11741_v1 = vrot.slane %v9026_v54, 2  ;;  %v11742_v7 = vrot.slane %v9036_v21, 2 }
 0x311   : > { %v3553_v4 = vmul.f32 %v11744_v19, %v11743_v29  ;;  %v9146_v46 = vadd.f32 1.0, %v9051_v0  ;;  %v9150_v35 = vmul.f32 %v11712_v57, %v9002_v11  ;;  %v1403_v23 = vadd.f32 %v8994_v56, %v11746_v25  ;;  %v11747_v0 = vld [vmem:[#allocation20_spill] sm:$0xff] }
 0x312   : > { %11740 = vst [vmem:[#allocation19_spill] sm:$0xff] %v9136_v42  ;;  %v2290_v53 = vsel %vm2225_vm3, %v11742_v7, %v11741_v1  ;;  %v1879_v61 = vadd.f32 %v1847_v10, %v1814_v41  ;;  %v3402_v54 = vmul.f32 0.3275911, %v9057_v34  ;;  %4577 = vrot.lane.b32.xlu0 %v9136_v42, %s6401_s29  ;;  %v9162_v18 = vmul.f32 0.5, %v11747_v0 }
 0x313   : > { %11745 = vst [vmem:[#allocation84_spill] sm:$0xff] %v9146_v46  ;;  %v3545_v11 = vsel %vm3544_vm8, %v11727_v2, %v3541_v50  ;;  %v3549_v13 = vor.u32 1.1754944e-38, %v3548_v37  ;;  %v9166_v40 = vadd.f32 %v9032_v17, %v1403_v23  ;;  %v4191_v56 = vmul.f32 %v4159_v39, %v9061_v27  ;;  %v11768_v27 = vld [vmem:[#allocation51_spill] sm:$0xff] }
 0x314   : > { %v2121_v63 = vadd.f32 %v2048_v38, %v1879_v61  ;;  %vm3547_vm9 = vcmp.eq.f32.partialorder %v3546_v62, 8.507059e+37  ;;  %v11748_v58 = vsub.f32 0.0, %v9007_v43  ;;  %v9177_v44 = vsel %vm3293_vm6, 1.0, %v11673_v16 }
 0x315   : > { %v9179_v20 = vsel %vm3547_vm9, %v3549_v13, %v3545_v11  ;;  %v3554_v2 = vsub.f32 1.0, %v3553_v4  ;;  %6214 = vrcp.f32 %v9146_v46  ;;  %v4234_v17 = vsub.f32 0.0, %v9057_v34  ;;  %v6213_v8 = vpop.eup %6212  ;;  %v11788_v46 = vld [vmem:[#allocation43_spill] sm:$0xff] }
 0x316   : > { %v9172_v28 = vmul.f32 %v11748_v58, %v9007_v43  ;;  %v9184_v62 = vadd.f32 %v2290_v53, %v2121_v63  ;;  %v3933_v43 = vmul.f32 1.0614054, %v9179_v20  ;;  %vm3558_vm10 = vweird.f32 %v11744_v19  ;;  %v11754_v58 = vld [vmem:[#allocation70_spill] sm:$0xff] }
 0x317   : > { %v3555_v6 = vmul.f32 %v11744_v19, %v3554_v2  ;;  %v3561_v59 = vand.u32 2147483647, %v11743_v29  ;;  %v9190_v38 = vadd.f32 1.0, %v3402_v54  ;;  %v1778_v50 = vmul.f32 %v7125_v55, %v9166_v40  ;;  %v11753_v54 = vld [vmem:[#allocation81_spill] sm:$0xff] }
 0x318   : > { %11749 = vst [vmem:[#allocation9_spill] sm:$0xff] %v9172_v28  ;;  %v4351_v37 = vmul.f32 %v6213_v8, %v4191_v56  ;;  %v3563_v39 = vand.u32 2147483648, %v11743_v29  ;;  %v1654_v51 = vrot.slane %v9166_v40, 7  ;;  %v3965_v41 = vadd.f32 -1.4531521, %v3933_v43 }
 0x319   : > { %11750 = vst [vmem:[#allocation69_spill] sm:$0xff] %v9190_v38  ;;  %v3556_v10 = vadd.f32 %v11744_v19, %v3555_v6  ;;  %vm3557_vm11 = vweird.f32 %v11743_v29  ;;  %v9199_v1 = vmul.f32 %v4234_v17, %v9057_v34  ;;  %v1846_v7 = vmul.f32 %v7128_v49, %v9046_v31 }
 0x31a   : > { %v1923_v53 = vmul.f32 %v11730_v48, %v9046_v31  ;;  %vm3559_vm12 = vmor %vm3557_vm11, %vm3558_vm10  ;;  %v3564_v4 = vor.u32 1.1754944e-38, %v3563_v39  ;;  %v2165_v25 = vmul.f32 %v7101_v12, %v9046_v31  ;;  %v3997_v23 = vmul.f32 %v3965_v41, %v9179_v20 }
 0x31b   : > { %11751 = vst [vmem:[#allocation80_spill] sm:$0xff] %v9199_v1  ;;  %v3560_v61 = vsel %vm3559_vm12, %v11744_v19, %v3556_v10  ;;  %vm3562_vm13 = vcmp.eq.f32.partialorder %v3561_v59, 8.507059e+37  ;;  %v9209_v29 = vpop.eup %6214  ;;  %v1813_v34 = vadd.f32 %v8712_v45, %v1778_v50  ;;  %vm3295_vm14 = vcmp.ge.f32.partialorder %v11753_v54, 0.0  ;;  %v11755_v50 = vld [vmem:[#allocation67_spill] sm:$0xff] }
 0x31c   : > { %11752 = vst [vmem:[#allocation65_spill] sm:$0xff] %v9209_v29  ;;  %v4383_v0 = vsub.f32 1.0, %v4351_v37  ;;  %v9213_v11 = vsel %vm3562_vm13, %v3564_v4, %v3560_v61  ;;  %6216 = vrcp.f32 %v9190_v38  ;;  %v9217_v13 = vsel %vm1615_vm1, 0.0, %v1654_v51  ;;  %v11757_v4 = vld [vmem:[#allocation68_spill] sm:$0xff] }
 0x31d   : > { %v4029_v40 = vadd.f32 1.4214138, %v3997_v23  ;;  %v3934_v56 = vmul.f32 1.0614054, %v9213_v11  ;;  %v2044_v63 = vrot.slane %v1923_v53, 1  ;;  %v1655_v19 = vrot.slane %v9111_v14, 7 }
 0x31e   : > { %v4291_v2 = vmul.f32 1.442695, %v11754_v58  ;;  %v4838_v45 = vand.u32 4294901760, %v9043_v60  ;;  %v2286_v17 = vrot.slane %v2165_v25, 2  ;;  %v3327_v8 = vsel %vm3295_vm14, 1.0, %v11673_v16 }
 0x31f   : > { %v4061_v43 = vmul.f32 %v4029_v40, %v9179_v20  ;;  %v3966_v6 = vadd.f32 -1.4531521, %v3934_v56  ;;  %v1878_v59 = vadd.f32 %v1846_v7, %v1813_v34  ;;  %v3231_v37 = vmul.f32 0.5, %v11755_v50  ;;  %v11761_v40 = vld [vmem:[#allocation79_spill] sm:$0xff] }
 0x320   : > { %v4415_v39 = vmul.f32 %v4383_v0, %v3327_v8  ;;  %5488 = vmatmul.f32.gmra.mxu1 %v4838_v45  ;;  %v4839_v41 = vsub.f32 %v9043_v60, %v4838_v45  ;;  %v11756_v10 = vrot.slane %v9030_v47, 1  ;;  %vm3294_vm15 = vcmp.ge.f32.partialorder %v11757_v4, 0.0  ;;  %v11762_v45 = vld [vmem:[#allocation58_spill] sm:$0xff] }
 0x321   : > { %v4093_v53 = vadd.f32 -0.28449672, %v4061_v43  ;;  %v3998_v25 = vmul.f32 %v3966_v6, %v9213_v11  ;;  %v9233_v23 = vmul.f32 0.70710677, %v9117_v36  ;;  %v9236_v7 = vsel %vm1615_vm1, %v1655_v19, 0.0  ;;  %v11764_v43 = vld [vmem:[#allocation90_spill] sm:$0xff] }
 0x322   : > { %v2046_v14 = vsel %vm1983_vm2, %v2044_v63, %v11756_v10  ;;  %6218 = vpow2.f32 %v4291_v2  ;;  %v4840_v61 = vand.u32 4294901760, %v4839_v41  ;;  %v9238_v34 = vpop.eup %6216  ;;  %v11760_v60 = vrot.slane %v9036_v21, 2  ;;  %v11763_v2 = vld [vmem:[#allocation13_spill] sm:$0xff] }
 0x323   : > { %11758 = vst [vmem:[#allocation85_spill] sm:$0xff] %v9233_v23  ;;  %v4125_v54 = vmul.f32 %v4093_v53, %v9179_v20  ;;  %v4030_v0 = vadd.f32 1.4214138, %v3998_v25  ;;  %v4293_v56 = vmul.f32 1.442695, %v11761_v40  ;;  %v9247_v63 = vadd.f32 %v2046_v14, %v1878_v59  ;;  %v4552_v53 = vpop.permute.xlu2 %4551 }
 0x324   : > { %11759 = vst [vmem:[#allocation17_spill] sm:$0xff] %v9238_v34  ;;  %v9243_v47 = vsel %vm2225_vm3, %v2286_v17, %v11760_v60  ;;  %v4447_v58 = vadd.f32 1.0, %v4415_v39  ;;  %v9250_v8 = vmul.f32 0.5, %v11762_v45  ;;  %4841 = vmatmul.f32.gmra.mxu2 %v4840_v61  ;;  %v3613_v6 = vmul.f32 %v11764_v43, %v11763_v2 }
 0x325   : > { %v9256_v21 = vmul.f32 %v11730_v48, %v9236_v7  ;;  %v4157_v17 = vadd.f32 0.2548296, %v4125_v54  ;;  %v3326_v50 = vsel %vm3294_vm15, 1.0, %v11673_v16  ;;  %v4062_v59 = vmul.f32 %v4030_v0, %v9213_v11 }
 0x326   : > { %v9263_v39 = vand.u32 2147483647, %v9233_v23  ;;  %v9266_v41 = vsel %vm1615_vm1, %v1654_v51, %v1655_v19  ;;  %v9270_v10 = vmul.f32 %v7101_v12, %v9236_v7  ;;  %v3614_v14 = vsub.f32 1.0, %v3613_v6  ;;  %v1559_v19 = vpop.f32.mrf.mxu1 }
 0x327   : > { %v4189_v25 = vmul.f32 %v4157_v17, %v9179_v20  ;;  %v4094_v61 = vadd.f32 -0.28449672, %v4062_v59  ;;  %6220 = vpow2.f32 %v4293_v56  ;;  %v3623_v4 = vand.u32 2147483648, %v11763_v2  ;;  %v1410_v56 = vpop.f32.mrf.mxu0 }
 0x328   : > { %v6219_v60 = vpop.eup %6218  ;;  %v4479_v54 = vmul.f32 %v4447_v58, %v3231_v37  ;;  %v3615_v0 = vmul.f32 %v11764_v43, %v3614_v14  ;;  %vm3618_vm4 = vweird.f32 %v11764_v43  ;;  %v3621_v51 = vand.u32 2147483647, %v11763_v2 }
 0x329   : > { %v9280_v40 = vmul.f32 %v11712_v57, %v9236_v7  ;;  %v4349_v45 = vmul.f32 %v6219_v60, %v4189_v25  ;;  %v4126_v20 = vmul.f32 %v4094_v61, %v9213_v11  ;;  %v9284_v17 = vmul.f32 0.70710677, %v9136_v42 }
 0x32a   : > { %v4639_v6 = vmul.f32 %v4552_v53, %v4479_v54  ;;  %v3616_v37 = vadd.f32 %v11764_v43, %v3615_v0  ;;  %vm3617_vm6 = vweird.f32 %v11763_v2  ;;  %v3624_v25 = vor.u32 1.1754944e-38, %v3623_v4  ;;  %v11766_v53 = vld [vmem:[#allocation42_spill] sm:$0xff] }
 0x32b   : > { %11765 = vst [vmem:[#allocation21_spill] sm:$0xff] %v9284_v17  ;;  %v4381_v59 = vsub.f32 1.0, %v4349_v45  ;;  %v4158_v14 = vadd.f32 0.2548296, %v4126_v20  ;;  %vm3619_vm7 = vmor %vm3617_vm6, %vm3618_vm4  ;;  %v9292_v61 = vmul.f32 0.3275911, %v9263_v39  ;;  %v1411_v60 = vadd.f32 %v1410_v56, %v11766_v53 }
 0x32c   : > { %v3620_v54 = vsel %vm3619_vm7, %v11764_v43, %v3616_v37  ;;  %vm3622_vm8 = vcmp.eq.f32.partialorder %v3621_v51, 8.507059e+37  ;;  %v11767_v20 = vld [vmem:[#allocation75_spill] sm:$0xff]  ;;  %v9305_v4 = vsel %vm4675_vm5, %v4639_v6, 0  ;;  %v9311_v43 = vmul.f32 %v11730_v48, %v9266_v41 }
 0x32d   : > { %v6221_v0 = vpop.eup %6220  ;;  %v4413_v2 = vmul.f32 %v4381_v59, %v9177_v44  ;;  %v4190_v58 = vmul.f32 %v4158_v14, %v9213_v11  ;;  %v9298_v45 = vsel %vm3622_vm8, %v3624_v25, %v3620_v54  ;;  %v9302_v42 = vmul.f32 %v11768_v27, %v11767_v20  ;;  %v4548_v59 = vpop.permute.xlu0 %4547 }
 0x32e   : > { %v9307_v36 = vadd.f32 %v1559_v19, %v1411_v60  ;;  %v3938_v51 = vmul.f32 1.0614054, %v9298_v45  ;;  %v2394_v11 = vmul.f32 %v7182_v15, %v8999_v9  ;;  %v2470_v37 = vmul.f32 %v11712_v57, %v8999_v9 }
 0x32f   : > { %v4445_v44 = vadd.f32 1.0, %v4413_v2  ;;  %v4350_v56 = vmul.f32 %v6221_v0, %v4190_v58  ;;  %v9320_v6 = vmul.f32 %v7101_v12, %v9266_v41  ;;  %v2700_v14 = vmul.f32 %v11659_v3, %v9266_v41 }
 0x330   : > { %v3970_v19 = vadd.f32 -1.4531521, %v3938_v51  ;;  %v2776_v25 = vmul.f32 %v7269_v26, %v9266_v41  ;;  %v2426_v60 = vadd.f32 %v2394_v11, %v8949_v30  ;;  %v2588_v54 = vrot.slane %v2470_v37, 2 }
 0x331   : > { %v4477_v58 = vmul.f32 %v4445_v44, %v9162_v18  ;;  %v4382_v53 = vsub.f32 1.0, %v4350_v56  ;;  %v2777_v0 = vmul.f32 %v7269_v26, %v9236_v7  ;;  %v9333_v51 = vmul.f32 %v8864_v32, %v9266_v41  ;;  %v1414_v56 = vpop.f32.mrf.mxu0 }
 0x332   : > { %v4002_v9 = vmul.f32 %v3970_v19, %v9298_v45  ;;  %v2894_v2 = vrot.slane %v2776_v25, 1  ;;  %v11769_v23 = vrot.slane %v9150_v35, 2  ;;  %v3018_v30 = vmul.f32 %v8864_v32, %v9236_v7  ;;  %v4550_v35 = vpop.permute.xlu1 %4549 }
 0x333   : > { %v4637_v1 = vmul.f32 %v4548_v59, %v4477_v58  ;;  %v4414_v28 = vmul.f32 %v4382_v53, %v3326_v50  ;;  %v2896_v37 = vrot.slane %v2777_v0, 1  ;;  %v3135_v19 = vrot.slane %v9333_v51, 2 }
 0x334   : > { %v2591_v18 = vsel %vm2225_vm3, %v2588_v54, %v11769_v23  ;;  %v4034_v44 = vadd.f32 1.4214138, %v4002_v9  ;;  %v3137_v38 = vrot.slane %v3018_v30, 2  ;;  %v3584_v59 = vsub.f32 1.0, %v9302_v42 }
 0x335   : > { %v2667_v11 = vadd.f32 %v2591_v18, %v2426_v60  ;;  %v4695_v25 = vsel %vm4675_vm5, %v4637_v1, 0  ;;  %v4446_v34 = vadd.f32 1.0, %v4414_v28  ;;  %v2897_v7 = vsel %vm1983_vm2, %v2894_v2, %v2896_v37  ;;  %v11771_v60 = vld [vmem:[#allocation16_spill] sm:$0xff]  ;;  %v1563_v18 = vpop.f32.mrf.mxu1 }
 0x336   : > { %v9343_v50 = vand.u32 4294901760, %v4695_v25  ;;  %v4066_v23 = vmul.f32 %v4034_v44, %v9298_v45  ;;  %v1415_v9 = vadd.f32 %v1414_v56, %v11771_v60  ;;  %v2393_v0 = vmul.f32 %v7182_v15, %v9046_v31  ;;  %v11772_v44 = vld [vmem:[#allocation25_spill] sm:$0xff] }
 0x337   : > { %v2732_v58 = vadd.f32 %v2700_v14, %v2667_v11  ;;  %v4478_v53 = vmul.f32 %v4446_v34, %v9250_v8  ;;  %v2469_v28 = vmul.f32 %v11712_v57, %v9046_v31  ;;  %v3138_v14 = vsel %vm2225_vm3, %v3135_v19, %v3137_v38 }
 0x338   : > { %11770 = vst [vmem:[#allocation55_spill] sm:$0xff] %v9343_v50  ;;  %v4845_v42 = vsub.f32 %v4695_v25, %v9343_v50  ;;  %5134 = vmatmul.f32.gmra.mxu3 %v9343_v50  ;;  %v4098_v1 = vadd.f32 -0.28449672, %v4066_v23  ;;  %v2425_v34 = vadd.f32 %v2393_v0, %v11772_v44  ;;  %v2775_v56 = vmul.f32 %v7269_v26, %v9217_v13 }
 0x339   : > { %v2973_v51 = vadd.f32 %v2897_v7, %v2732_v58  ;;  %v4638_v30 = vmul.f32 %v4550_v35, %v4478_v53  ;;  %v2587_v8 = vrot.slane %v2469_v28, 2  ;;  %v2699_v31 = vmul.f32 %v11659_v3, %v9217_v13 }
 0x33a   : > { %5302 = vmatmul.f32.gmra.mxu0 %v4845_v42  ;;  %v4846_v11 = vand.u32 4294901760, %v4845_v42  ;;  %v3016_v25 = vmul.f32 %v8864_v32, %v9217_v13  ;;  %v2893_v23 = vrot.slane %v2775_v56, 1  ;;  %v1564_v58 = vadd.f32 %v1563_v18, %v1415_v9 }
 0x33b   : > { %v9359_v37 = vadd.f32 %v3138_v14, %v2973_v51  ;;  %v4698_v38 = vsel %vm4675_vm5, %v4638_v30, 0  ;;  %v2589_v35 = vsel %vm2225_vm3, %v2587_v8, %v2588_v54  ;;  %v4130_v53 = vmul.f32 %v4098_v1, %v9298_v45  ;;  %v11775_v14 = vld [vmem:[#allocation86_spill] sm:$0xff] }
 0x33c   : > { %v9367_v7 = vand.u32 4294901760, %v4698_v38  ;;  %5494 = vmatmul.f32.gmra.mxu1 %v4846_v11  ;;  %v2666_v60 = vadd.f32 %v2589_v35, %v2425_v34  ;;  %v3585_v0 = vmul.f32 %v11768_v27, %v3584_v59  ;;  %v1657_v28 = vrot.slane %v9307_v36, 7 }
 0x33d   : > { %11773 = vst [vmem:[#allocation78_spill] sm:$0xff] %v9359_v37  ;;  %4581 = vrot.lane.b32.xlu2 %v9359_v37, %s6401_s29  ;;  %v11328_v32 = vrot.slane %v9311_v43, 1  ;;  %v2895_v51 = vsel %vm1983_vm2, %v2893_v23, %v2894_v2  ;;  %v4847_v54 = vsub.f32 %v4845_v42, %v4846_v11  ;;  %v11327_v9 = vrot.slane %v9320_v6, 2  ;;  %v9388_v11 = vld [vmem:[%s11136_s4] ss:$0 sm:$0xff] }
 0x33e   : > { %11774 = vst [vmem:[#allocation73_spill] sm:$0xff] %v9367_v7  ;;  %v4301_v18 = vmul.f32 1.442695, %v11775_v14  ;;  %v2731_v30 = vadd.f32 %v2699_v31, %v2666_v60  ;;  %vm3588_vm9 = vweird.f32 %v11768_v27  ;;  %v3134_v1 = vrot.slane %v3016_v25, 2 }
 0x33f   : > { %v4848_v44 = vand.u32 4294901760, %v4847_v54  ;;  %v1781_v34 = vmul.f32 %v7125_v55, %v1564_v58  ;;  %v3593_v59 = vand.u32 2147483648, %v11767_v20  ;;  %v4853_v8 = vsub.f32 %v4698_v38, %v9367_v7 }
 0x340   : > { %v4162_v56 = vadd.f32 0.2548296, %v4130_v53  ;;  %v2972_v35 = vadd.f32 %v2895_v51, %v2731_v30  ;;  %5138 = vmatmul.f32.gmra.mxu3 %v9367_v7  ;;  %v3586_v2 = vadd.f32 %v11768_v27, %v3585_v0  ;;  %v3136_v42 = vsel %vm2225_vm3, %v3134_v1, %v3135_v19 }
 0x341   : > { %4849 = vmatmul.f32.gmra.mxu2 %v4848_v44  ;;  %v1816_v31 = vadd.f32 %v9388_v11, %v1781_v34  ;;  %v1849_v25 = vmul.f32 %v7128_v49, %v9266_v41  ;;  %v11776_v38 = vrot.slane %v9256_v21, 1  ;;  %6222 = vpow2.f32 %v4301_v18 }
 0x342   : > { %v9398_v53 = vadd.f32 %v3136_v42, %v2972_v35  ;;  %v1658_v19 = vrot.slane %v1564_v58, 7  ;;  %v3591_v60 = vand.u32 2147483647, %v11767_v20  ;;  %5307 = vmatmul.f32.gmra.mxu0 %v4853_v8  ;;  %v4235_v0 = vsub.f32 0.0, %v9263_v39 }
 0x343   : > { %v2053_v23 = vsel %vm1983_vm2, %v11328_v32, %v11776_v38  ;;  %v1881_v51 = vadd.f32 %v1849_v25, %v1816_v31  ;;  %v11778_v54 = vrot.slane %v9270_v10, 2  ;;  %vm3587_vm10 = vweird.f32 %v11767_v20  ;;  %v1418_v31 = vpop.f32.mrf.mxu0 }
 0x344   : > { %11777 = vst [vmem:[#allocation57_spill] sm:$0xff] %v9398_v53  ;;  %v9410_v14 = vadd.f32 %v9243_v47, %v9247_v63  ;;  %v9413_v58 = vand.u32 4294901760, %v9305_v4  ;;  %v9416_v18 = vand.u32 2147483647, %v9284_v17  ;;  %4579 = vrot.lane.b32.xlu1 %v9398_v53, %s6401_s29  ;;  %vm3589_vm11 = vmor %vm3587_vm10, %vm3588_vm9  ;;  %v4194_v10 = vmul.f32 %v4162_v56, %v9298_v45 }
 0x345   : > { %v2295_v21 = vsel %vm2225_vm3, %v11327_v9, %v11778_v54  ;;  %v2123_v20 = vadd.f32 %v2053_v23, %v1881_v51  ;;  %v3590_v47 = vsel %vm3589_vm11, %v11768_v27, %v3586_v2  ;;  %v3594_v63 = vor.u32 1.1754944e-38, %v3593_v59  ;;  %v1567_v54 = vpop.f32.mrf.mxu1 }
 0x346   : > { %11779 = vst [vmem:[#allocation20_spill] sm:$0xff] %v9413_v58  ;;  %v9426_v1 = vadd.f32 1.0, %v9292_v61  ;;  %v9429_v44 = vsel %vm1615_vm1, 0.0, %v1657_v28  ;;  %v9432_v34 = vsel %vm1615_vm1, %v1657_v28, %v1658_v19  ;;  %vm3592_vm12 = vcmp.eq.f32.partialorder %v3591_v60, 8.507059e+37  ;;  %v11783_v28 = vld [vmem:[#allocation46_spill] sm:$0xff] }
 0x347   : > { %11780 = vst [vmem:[#allocation81_spill] sm:$0xff] %v9429_v44  ;;  %v9435_v35 = vmul.f32 %v4235_v0, %v9263_v39  ;;  %v9438_v42 = vsel %vm1615_vm1, %v1658_v19, 0.0  ;;  %v9440_v45 = vadd.f32 %v2295_v21, %v2123_v20  ;;  %v9442_v27 = vsel %vm3592_vm12, %v3594_v63, %v3590_v47  ;;  %v6223_v59 = vpop.eup %6222  ;;  %v11784_v0 = vld [vmem:[#allocation30_spill] sm:$0xff]  ;;  %v11785_v21 = vld [vmem:[#allocation23_spill] sm:$0xff] }
 0x348   : > { %v9446_v61 = vsub.f32 %v9305_v4, %v9413_v58  ;;  %v9449_v56 = vmul.f32 0.3275911, %v9416_v18  ;;  %vm3298_vm13 = vcmp.ge.f32.partialorder %v11783_v28, 0.0  ;;  %v3936_v39 = vmul.f32 1.0614054, %v9442_v27  ;;  %5142 = vmatmul.f32.gmra.mxu3 %v9413_v58  ;;  %v11787_v28 = vld [vmem:[#allocation72_spill] sm:$0xff] }
 0x349   : > { %11781 = vst [vmem:[#allocation70_spill] sm:$0xff] %v9435_v35  ;;  %v9454_v2 = vmul.f32 %v6223_v59, %v4194_v10  ;;  %v4854_v25 = vand.u32 4294901760, %v4853_v8  ;;  %v1929_v38 = vmul.f32 %v11730_v48, %v9429_v44  ;;  %v9460_v4 = vmul.f32 %v11730_v48, %v9432_v34 }
 0x34a   : > { %11782 = vst [vmem:[#allocation67_spill] sm:$0xff] %v9440_v45  ;;  %v9464_v23 = vmul.f32 %v11730_v48, %v9438_v42  ;;  %v9468_v19 = vmul.f32 %v7101_v12, %v9438_v42  ;;  %v3968_v60 = vadd.f32 -1.4531521, %v3936_v39  ;;  %v4297_v51 = vmul.f32 1.442695, %v11784_v0  ;;  %5312 = vmatmul.f32.gmra.mxu0 %v9446_v61 }
 0x34b   : > { %v1419_v10 = vadd.f32 %v1418_v31, %v11785_v21  ;;  %5500 = vmatmul.f32.gmra.mxu1 %v4854_v25  ;;  %v4855_v20 = vsub.f32 %v4853_v8, %v4854_v25  ;;  %v2054_v47 = vrot.slane %v1929_v38, 1  ;;  %v11329_v63 = vrot.slane %v9460_v4, 1  ;;  %v1422_v7 = vpop.f32.mrf.mxu0 }
 0x34c   : > { %v9476_v59 = vmul.f32 %v7125_v55, %v9307_v36  ;;  %v9481_v39 = vsel %vm3298_vm13, 1.0, %v11673_v16  ;;  %v4000_v0 = vmul.f32 %v3968_v60, %v9442_v27  ;;  %v2171_v9 = vmul.f32 %v7101_v12, %v9429_v44 }
 0x34d   : > { %v4856_v8 = vand.u32 4294901760, %v4855_v20  ;;  %v9487_v25 = vadd.f32 %v1567_v54, %v1419_v10  ;;  %v2056_v36 = vsel %vm1983_vm2, %v2054_v47, %v11329_v63  ;;  %v9496_v60 = vmul.f32 %v7101_v12, %v9432_v34 }
 0x34e   : > { %v4032_v21 = vadd.f32 1.4214138, %v4000_v0  ;;  %6224 = vpow2.f32 %v4297_v51  ;;  %v2296_v54 = vrot.slane %v2171_v9, 2  ;;  %v2395_v10 = vmul.f32 %v7182_v15, %v9217_v13 }
 0x34f   : > { %11786 = vst [vmem:[#allocation68_spill] sm:$0xff] %v9487_v25  ;;  %4857 = vmatmul.f32.gmra.mxu2 %v4856_v8  ;;  %v1782_v20 = vmul.f32 %v7125_v55, %v9487_v25  ;;  %v2297_v32 = vrot.slane %v9496_v60, 2  ;;  %v2472_v0 = vmul.f32 %v11712_v57, %v9217_v13  ;;  %v2473_v31 = vmul.f32 %v11712_v57, %v9266_v41  ;;  %v1571_v25 = vpop.f32.mrf.mxu1 }
 0x350   : > { %v4064_v47 = vmul.f32 %v4032_v21, %v9442_v27  ;;  %vm3296_vm14 = vcmp.ge.f32.partialorder %v11787_v28, 0.0  ;;  %v1850_v9 = vmul.f32 %v7128_v49, %v9429_v44  ;;  %v4862_v8 = vand.u32 4294901760, %v9446_v61 }
 0x351   : > { %v1817_v51 = vadd.f32 %v9388_v11, %v1782_v20  ;;  %v2427_v63 = vadd.f32 %v2395_v10, %v9410_v14  ;;  %v2298_v60 = vsel %vm2225_vm3, %v2296_v54, %v2297_v32  ;;  %v2592_v38 = vrot.slane %v2472_v0, 2  ;;  %v9525_v14 = vld [vmem:[%s11135_s3 + $0x8] ss:$0 sm:$0xff] }
 0x352   : > { %v4096_v21 = vadd.f32 -0.28449672, %v4064_v47  ;;  %v2701_v30 = vmul.f32 %v11659_v3, %v9429_v44  ;;  %v2593_v50 = vrot.slane %v2473_v31, 2  ;;  %v2778_v20 = vmul.f32 %v7269_v26, %v9429_v44 }
 0x353   : > { %v1882_v58 = vadd.f32 %v1850_v9, %v1817_v51  ;;  %5506 = vmatmul.f32.gmra.mxu1 %v4862_v8  ;;  %v2779_v17 = vmul.f32 %v7269_v26, %v9432_v34  ;;  %v3019_v54 = vmul.f32 %v9525_v14, %v9429_v44  ;;  %v3020_v10 = vmul.f32 %v9525_v14, %v9432_v34 }
 0x354   : > { %v4128_v35 = vmul.f32 %v4096_v21, %v9442_v27  ;;  %v2396_v31 = vmul.f32 %v7182_v15, %v9266_v41  ;;  %v6225_v47 = vpop.eup %6224  ;;  %v2594_v51 = vsel %vm2225_vm3, %v2592_v38, %v2593_v50  ;;  %v2898_v9 = vrot.slane %v2778_v20, 1 }
 0x355   : > { %v2124_v0 = vadd.f32 %v2056_v36, %v1882_v58  ;;  %v2899_v21 = vrot.slane %v2779_v17, 1  ;;  %v1423_v22 = vadd.f32 %v1422_v7, %v11788_v46  ;;  %v2668_v33 = vadd.f32 %v2594_v51, %v2427_v63 }
 0x356   : > { %v4160_v29 = vadd.f32 0.2548296, %v4128_v35  ;;  %v3140_v52 = vrot.slane %v3020_v10, 2  ;;  %v3139_v45 = vrot.slane %v3019_v54, 2  ;;  %v2428_v44 = vadd.f32 %v2396_v31, %v9184_v62 }
 0x357   : > { %v9535_v5 = vadd.f32 %v2298_v60, %v2124_v0  ;;  %v2900_v24 = vsel %vm1983_vm2, %v2898_v9, %v2899_v21  ;;  %v2733_v58 = vadd.f32 %v2701_v30, %v2668_v33  ;;  %v11789_v36 = vrot.slane %v9280_v40, 2 }
 0x358   : > { %v4192_v41 = vmul.f32 %v4160_v29, %v9442_v27  ;;  %v2702_v46 = vmul.f32 %v11659_v3, %v9432_v34  ;;  %v2780_v35 = vmul.f32 %v7269_v26, %v9438_v42  ;;  %v3021_v63 = vmul.f32 %v9525_v14, %v9438_v42 }
 0x359   : > { %v2596_v17 = vsel %vm2225_vm3, %v2593_v50, %v11789_v36  ;;  %v4863_v62 = vsub.f32 %v9446_v61, %v4862_v8  ;;  %v2974_v60 = vadd.f32 %v2900_v24, %v2733_v58  ;;  %v3141_v33 = vsel %vm2225_vm3, %v3139_v45, %v3140_v52 }
 0x35a   : > { %v2669_v7 = vadd.f32 %v2596_v17, %v2428_v44  ;;  %v4352_v38 = vmul.f32 %v6225_v47, %v4192_v41  ;;  %v9551_v29 = vadd.f32 %v1571_v25, %v1423_v22  ;;  %v2901_v50 = vrot.slane %v2780_v35, 1 }
 0x35b   : > { %v3142_v30 = vrot.slane %v3021_v63, 2  ;;  %v4864_v27 = vand.u32 4294901760, %v4863_v62  ;;  %v3328_v44 = vsel %vm3296_vm14, 1.0, %v11673_v16  ;;  %v9556_v54 = vadd.f32 %v3141_v33, %v2974_v60 }
 0x35c   : > { %v2734_v40 = vadd.f32 %v2702_v46, %v2669_v7  ;;  %v4384_v20 = vsub.f32 1.0, %v4352_v38  ;;  %v1783_v61 = vmul.f32 %v7125_v55, %v9551_v29  ;;  %v9561_v24 = vmul.f32 0.70710677, %v9359_v37  ;;  %v4554_v7 = vpop.permute.xlu0 %4553 }
 0x35d   : > { %11790 = vst [vmem:[#allocation79_spill] sm:$0xff] %v9556_v54  ;;  %v2902_v22 = vsel %vm1983_vm2, %v2899_v21, %v2901_v50  ;;  %4865 = vmatmul.f32.gmra.mxu2 %v4864_v27  ;;  %v11792_v45 = vrot.slane %v9464_v23, 1  ;;  %v11793_v25 = vrot.slane %v9460_v4, 1  ;;  %v11794_v28 = vrot.slane %v9468_v19, 2  ;;  %4583 = vrot.lane.b32.xlu0 %v9556_v54, %s6401_s29  ;;  %v11797_v21 = vld [vmem:[#allocation94_spill] sm:$0xff] }
 0x35e   : > { %11791 = vst [vmem:[#allocation58_spill] sm:$0xff] %v9561_v24  ;;  %v1926_v31 = vmul.f32 %v11730_v48, %v9217_v13  ;;  %v11795_v47 = vsub.f32 1.0, %v9454_v2  ;;  %v4416_v51 = vmul.f32 %v4384_v20, %v3328_v44  ;;  %v2975_v23 = vadd.f32 %v2902_v22, %v2734_v40  ;;  %v11798_v2 = vld [vmem:[#allocation27_spill] sm:$0xff]  ;;  %v11802_v50 = vld [vmem:[#allocation82_spill] sm:$0xff] }
 0x35f   : > { %v2058_v8 = vsel %vm1983_vm2, %v11793_v25, %v11792_v45  ;;  %v2300_v10 = vsel %vm2225_vm3, %v2297_v32, %v11794_v28  ;;  %v3143_v4 = vsel %vm2225_vm3, %v3140_v52, %v3142_v30  ;;  %v1818_v9 = vadd.f32 %v9388_v11, %v1783_v61  ;;  %v11796_v32 = vld [vmem:[#allocation88_spill] sm:$0xff] }
 0x360   : > { %v4418_v0 = vmul.f32 %v11795_v47, %v9481_v39  ;;  %v1851_v19 = vmul.f32 %v7128_v49, %v9432_v34  ;;  %v3598_v41 = vmul.f32 %v11797_v21, %v11796_v32  ;;  %v1815_v58 = vadd.f32 %v9388_v11, %v9476_v59  ;;  %v4558_v47 = vpop.permute.xlu2 %4557 }
 0x361   : > { %v3232_v39 = vmul.f32 0.5, %v11798_v2  ;;  %v4448_v36 = vadd.f32 1.0, %v4416_v51  ;;  %v9588_v17 = vadd.f32 %v3143_v4, %v2975_v23  ;;  %v1848_v46 = vmul.f32 %v7128_v49, %v9217_v13 }
 0x362   : > { %v3374_v52 = vand.u32 2147483647, %v9561_v24  ;;  %v1883_v35 = vadd.f32 %v1851_v19, %v1818_v9  ;;  %v3599_v63 = vsub.f32 1.0, %v3598_v41  ;;  %v2049_v62 = vrot.slane %v1926_v31, 1 }
 0x363   : > { %11799 = vst [vmem:[#allocation13_spill] sm:$0xff] %v9588_v17  ;;  %v4450_v38 = vadd.f32 1.0, %v4418_v0  ;;  %v9594_v60 = vmul.f32 0.70710677, %v9398_v53  ;;  %v4480_v33 = vmul.f32 %v4448_v36, %v3232_v39  ;;  %4585 = vrot.lane.b32.xlu1 %v9588_v17, %s6401_s29  ;;  %v9599_v59 = vadd.f32 1.0, %v9449_v56 }
 0x364   : > { %v4236_v40 = vsub.f32 0.0, %v9416_v18  ;;  %v3234_v30 = vmul.f32 0.5, %v11802_v50  ;;  %v2125_v27 = vadd.f32 %v2058_v8, %v1883_v35  ;;  %v1880_v44 = vadd.f32 %v1848_v46, %v1815_v58 }
 0x365   : > { %11800 = vst [vmem:[#allocation90_spill] sm:$0xff] %v9594_v60  ;;  %v11803_v20 = vrot.slane %v9311_v43, 1  ;;  %v2168_v22 = vmul.f32 %v7101_v12, %v9217_v13  ;;  %v4640_v45 = vmul.f32 %v4554_v7, %v4480_v33  ;;  %v3406_v25 = vmul.f32 0.3275911, %v3374_v52 }
 0x366   : > { %11801 = vst [vmem:[#allocation42_spill] sm:$0xff] %v9599_v59  ;;  %v9608_v28 = vadd.f32 %v2300_v10, %v2125_v27  ;;  %v3600_v56 = vmul.f32 %v11797_v21, %v3599_v63  ;;  %vm3603_vm15 = vweird.f32 %v11797_v21  ;;  %v4482_v31 = vmul.f32 %v4450_v38, %v3234_v30 }
 0x367   : > { %v2051_v61 = vsel %vm1983_vm2, %v2049_v62, %v11803_v20  ;;  %v3373_v8 = vand.u32 2147483647, %v9594_v60  ;;  %v4704_v0 = vsel %vm4675_vm5, %v4640_v45, 0  ;;  %vm3602_vm4 = vweird.f32 %v11796_v32  ;;  %v11812_v45 = vld [vmem:[#allocation54_spill] sm:$0xff] }
 0x368   : > { %v9615_v43 = vand.u32 4294901760, %v4704_v0  ;;  %v3601_v13 = vadd.f32 %v11797_v21, %v3600_v56  ;;  %v3606_v51 = vand.u32 2147483647, %v11796_v32  ;;  %v3608_v10 = vand.u32 2147483648, %v11796_v32  ;;  %vm3604_vm6 = vmor %vm3602_vm4, %vm3603_vm15 }
 0x369   : > { %6226 = vrcp.f32 %v9426_v1  ;;  %v2122_v23 = vadd.f32 %v2051_v61, %v1880_v44  ;;  %v2291_v4 = vrot.slane %v2168_v22, 2  ;;  %v4238_v9 = vsub.f32 0.0, %v3374_v52  ;;  %v11810_v44 = vld [vmem:[#allocation83_spill] sm:$0xff]  ;;  %v11811_v61 = vld [vmem:[#allocation34_spill] sm:$0xff] }
 0x36a   : > { %11804 = vst [vmem:[#allocation75_spill] sm:$0xff] %v9615_v43  ;;  %v4642_v19 = vmul.f32 %v4558_v47, %v4482_v31  ;;  %v4869_v41 = vsub.f32 %v4704_v0, %v9615_v43  ;;  %5146 = vmatmul.f32.gmra.mxu3 %v9615_v43  ;;  %v3605_v58 = vsel %vm3604_vm6, %v11797_v21, %v3601_v13  ;;  %v3609_v2 = vor.u32 1.1754944e-38, %v3608_v10  ;;  %v11816_v47 = vld [vmem:[#allocation68_spill] sm:$0xff] }
 0x36b   : > { %v9624_v39 = vadd.f32 1.0, %v3406_v25  ;;  %v3405_v36 = vmul.f32 0.3275911, %v3373_v8  ;;  %v9628_v32 = vmul.f32 %v11712_v57, %v9438_v42  ;;  %vm3607_vm7 = vcmp.eq.f32.partialorder %v3606_v51, 8.507059e+37  ;;  %v11813_v25 = vld [vmem:[#allocation24_spill] sm:$0xff] }
 0x36c   : > { %6228 = vrcp.f32 %v9599_v59  ;;  %v9632_v46 = vmul.f32 %v4236_v40, %v9416_v18  ;;  %v11806_v7 = vrot.slane %v9320_v6, 2  ;;  %v9637_v63 = vsel %vm3607_vm7, %v3609_v2, %v3605_v58  ;;  %5317 = vmatmul.f32.gmra.mxu0 %v4869_v41  ;;  %v11819_v58 = vld [vmem:[#allocation91_spill] sm:$0xff] }
 0x36d   : > { %v9641_v62 = vmul.f32 %v4238_v9, %v3374_v52  ;;  %v4237_v38 = vsub.f32 0.0, %v3373_v8  ;;  %v3937_v42 = vmul.f32 1.0614054, %v9637_v63  ;;  %v4710_v33 = vsel %vm4675_vm5, %v4642_v19, 0  ;;  %v11821_v52 = vld [vmem:[#allocation81_spill] sm:$0xff] }
 0x36e   : > { %11805 = vst [vmem:[#allocation51_spill] sm:$0xff] %v9632_v46  ;;  %v2293_v35 = vsel %vm2225_vm3, %v2291_v4, %v11806_v7  ;;  %v9646_v50 = vmul.f32 0.70710677, %v9556_v54  ;;  %v1661_v18 = vrot.slane %v9551_v29, 7  ;;  %v4870_v6 = vand.u32 4294901760, %v4869_v41 }
 0x36f   : > { %v9639_v21 = vadd.f32 %v2293_v35, %v2122_v23  ;;  %11807 = vst [vmem:[#allocation16_spill] sm:$0xff] %v9641_v62  ;;  %v9649_v40 = vpop.eup %6226  ;;  %6230 = vrcp.f32 %v9624_v39  ;;  %v9652_v30 = vadd.f32 1.0, %v3405_v36  ;;  %v3969_v27 = vadd.f32 -1.4531521, %v3937_v42 }
 0x370   : > { %11808 = vst [vmem:[#allocation25_spill] sm:$0xff] %v9646_v50  ;;  %v9656_v20 = vmul.f32 0.5, %v11810_v44  ;;  %vm3297_vm8 = vcmp.ge.f32.partialorder %v11811_v61, 0.0  ;;  %5512 = vmatmul.f32.gmra.mxu1 %v4870_v6  ;;  %v4871_v22 = vsub.f32 %v4869_v41, %v4870_v6  ;;  %v3658_v29 = vmul.f32 %v11813_v25, %v11812_v45 }
 0x371   : > { %11809 = vst [vmem:[#allocation86_spill] sm:$0xff] %v9652_v30  ;;  %v9661_v56 = vand.u32 4294901760, %v4710_v33  ;;  %v9663_v31 = vmul.f32 %v4237_v38, %v3373_v8  ;;  %v1660_v0 = vrot.slane %v11816_v47, 7  ;;  %v4001_v13 = vmul.f32 %v3969_v27, %v9637_v63 }
 0x372   : > { %v9667_v51 = vpop.eup %6228  ;;  %v9670_v10 = vand.u32 2147483647, %v9646_v50  ;;  %v9673_v23 = vsel %vm1615_vm1, %v1661_v18, 0.0  ;;  %v4872_v4 = vand.u32 4294901760, %v4871_v22  ;;  %v3659_v9 = vsub.f32 1.0, %v3658_v29 }
 0x373   : > { %11814 = vst [vmem:[#allocation46_spill] sm:$0xff] %v9661_v56  ;;  %6232 = vrcp.f32 %v9652_v30  ;;  %v9677_v19 = vmul.f32 0.70710677, %v9588_v17  ;;  %v4033_v8 = vadd.f32 1.4214138, %v4001_v13  ;;  %v3668_v41 = vand.u32 2147483648, %v11812_v45 }
 0x374   : > { %11815 = vst [vmem:[#allocation30_spill] sm:$0xff] %v9663_v31  ;;  %v4299_v2 = vmul.f32 1.442695, %v11819_v58  ;;  %4873 = vmatmul.f32.gmra.mxu2 %v4872_v4  ;;  %v3660_v36 = vmul.f32 %v11813_v25, %v3659_v9  ;;  %vm3663_vm9 = vweird.f32 %v11813_v25  ;;  %v3666_v7 = vand.u32 2147483647, %v11812_v45  ;;  %v11823_v31 = vld [vmem:[#allocation67_spill] sm:$0xff] }
 0x375   : > { %11817 = vst [vmem:[#allocation23_spill] sm:$0xff] %v9667_v51  ;;  %v9684_v35 = vpop.eup %6230  ;;  %v9687_v38 = vsub.f32 %v4710_v33, %v9661_v56  ;;  %v9690_v42 = vsel %vm1615_vm1, 0.0, %v1660_v0  ;;  %v9694_v6 = vmul.f32 %v11730_v48, %v9673_v23  ;;  %v4065_v27 = vmul.f32 %v4033_v8, %v9637_v63 }
 0x376   : > { %11818 = vst [vmem:[#allocation72_spill] sm:$0xff] %v9677_v19  ;;  %v9699_v44 = vmul.f32 %v7101_v12, %v9673_v23  ;;  %v9703_v22 = vmul.f32 %v11712_v57, %v9673_v23  ;;  %v3661_v33 = vadd.f32 %v11813_v25, %v3660_v36  ;;  %vm3662_vm10 = vweird.f32 %v11812_v45 }
 0x377   : > { %v3407_v29 = vmul.f32 0.3275911, %v9670_v10  ;;  %v9709_v47 = vsel %vm1615_vm1, %v1660_v0, %v1661_v18  ;;  %v4097_v13 = vadd.f32 -0.28449672, %v4065_v27  ;;  %vm3664_vm11 = vmor %vm3662_vm10, %vm3663_vm9  ;;  %v3669_v4 = vor.u32 1.1754944e-38, %v3668_v41  ;;  %v1426_v0 = vpop.f32.mrf.mxu0 }
 0x378   : > { %v9712_v9 = vand.u32 2147483647, %v9677_v19  ;;  %6234 = vpow2.f32 %v4299_v2  ;;  %v3665_v8 = vsel %vm3664_vm11, %v11813_v25, %v3661_v33  ;;  %vm3667_vm12 = vcmp.eq.f32.partialorder %v3666_v7, 8.507059e+37 }
 0x379   : > { %v9715_v58 = vpop.eup %6232  ;;  %v3329_v45 = vsel %vm3297_vm8, 1.0, %v11673_v16  ;;  %v4129_v18 = vmul.f32 %v4097_v13, %v9637_v63  ;;  %v9722_v27 = vsel %vm3667_vm12, %v3669_v4, %v3665_v8  ;;  %v9728_v33 = vadd.f32 1.0, %v3407_v29  ;;  %v11822_v8 = vld [vmem:[#allocation18_spill] sm:$0xff] }
 0x37a   : > { %11820 = vst [vmem:[#allocation43_spill] sm:$0xff] %v9715_v58  ;;  %v3941_v7 = vmul.f32 1.0614054, %v9722_v27  ;;  %v2397_v61 = vmul.f32 %v7182_v15, %v11821_v52  ;;  %v2475_v13 = vmul.f32 %v11712_v57, %v11821_v52  ;;  %v9735_v4 = vmul.f32 0.3275911, %v9712_v9 }
 0x37b   : > { %v4161_v36 = vadd.f32 0.2548296, %v4129_v18  ;;  %v1427_v41 = vadd.f32 %v1426_v0, %v11822_v8  ;;  %v2476_v2 = vmul.f32 %v11712_v57, %v9432_v34  ;;  %v2703_v18 = vmul.f32 %v11659_v3, %v9690_v42 }
 0x37c   : > { %v3973_v43 = vadd.f32 -1.4531521, %v3941_v7  ;;  %v2429_v29 = vadd.f32 %v2397_v61, %v9639_v21  ;;  %v2781_v17 = vmul.f32 %v7269_v26, %v9690_v42  ;;  %v2597_v54 = vrot.slane %v2475_v13, 2  ;;  %v1575_v61 = vpop.f32.mrf.mxu1 }
 0x37d   : > { %v4193_v25 = vmul.f32 %v4161_v36, %v9637_v63  ;;  %v2598_v50 = vrot.slane %v2476_v2, 2  ;;  %v2782_v0 = vmul.f32 %v7269_v26, %v9709_v47  ;;  %v3022_v63 = vmul.f32 %v9525_v14, %v9690_v42 }
 0x37e   : > { %v6235_v52 = vpop.eup %6234  ;;  %v4005_v19 = vmul.f32 %v3973_v43, %v9722_v27  ;;  %v3023_v21 = vmul.f32 %v9525_v14, %v9709_v47  ;;  %v2398_v36 = vmul.f32 %v7182_v15, %v9432_v34  ;;  %v2903_v43 = vrot.slane %v2781_v17, 1 }
 0x37f   : > { %v4353_v7 = vmul.f32 %v6235_v52, %v4193_v25  ;;  %v2599_v53 = vsel %vm2225_vm3, %v2597_v54, %v2598_v50  ;;  %v2904_v13 = vrot.slane %v2782_v0, 1  ;;  %v11824_v46 = vrot.slane %v9628_v32, 2 }
 0x380   : > { %v4037_v8 = vadd.f32 1.4214138, %v4005_v19  ;;  %v2670_v60 = vadd.f32 %v2599_v53, %v2429_v29  ;;  %v3145_v37 = vrot.slane %v3023_v21, 2  ;;  %v2430_v25 = vadd.f32 %v2398_v36, %v11823_v31 }
 0x381   : > { %v4385_v2 = vsub.f32 1.0, %v4353_v7  ;;  %v2905_v24 = vsel %vm1983_vm2, %v2903_v43, %v2904_v13  ;;  %v2601_v58 = vsel %vm2225_vm3, %v2598_v50, %v11824_v46  ;;  %v2704_v34 = vmul.f32 %v11659_v3, %v9709_v47  ;;  %v11825_v46 = vld [vmem:[#allocation89_spill] sm:$0xff]  ;;  %v11826_v50 = vld [vmem:[#allocation15_spill] sm:$0xff]  ;;  %v4556_v43 = vpop.permute.xlu1 %4555 }
 0x382   : > { %v4069_v52 = vmul.f32 %v4037_v8, %v9722_v27  ;;  %v9764_v54 = vadd.f32 %v1575_v61, %v1427_v41  ;;  %v2735_v17 = vadd.f32 %v2703_v18, %v2670_v60  ;;  %v2671_v0 = vadd.f32 %v2601_v58, %v2430_v25  ;;  %v11827_v61 = vld [vmem:[#allocation76_spill] sm:$0xff] }
 0x383   : > { %v4417_v19 = vmul.f32 %v4385_v2, %v3329_v45  ;;  %v3144_v29 = vrot.slane %v3022_v63, 2  ;;  %v2783_v31 = vmul.f32 %v7269_v26, %v9673_v23  ;;  %v3024_v7 = vmul.f32 %v9525_v14, %v9673_v23 }
 0x384   : > { %v4101_v53 = vadd.f32 -0.28449672, %v4069_v52  ;;  %v2976_v32 = vadd.f32 %v2905_v24, %v2735_v17  ;;  %v2736_v36 = vadd.f32 %v2704_v34, %v2671_v0  ;;  %v3628_v8 = vmul.f32 %v11826_v50, %v11825_v46  ;;  %v11829_v52 = vld [vmem:[#allocation11_spill] sm:$0xff]  ;;  %v1430_v34 = vpop.f32.mrf.mxu0 }
 0x385   : > { %v4449_v21 = vadd.f32 1.0, %v4417_v19  ;;  %v3146_v60 = vsel %vm2225_vm3, %v3144_v29, %v3145_v37  ;;  %v2906_v58 = vrot.slane %v2783_v31, 1  ;;  %v3147_v41 = vrot.slane %v3024_v7, 2  ;;  %v1579_v7 = vpop.f32.mrf.mxu1 }
 0x386   : > { %v4133_v45 = vmul.f32 %v4101_v53, %v9722_v27  ;;  %v4307_v2 = vmul.f32 1.442695, %v11827_v61  ;;  %v9777_v23 = vadd.f32 %v3146_v60, %v2976_v32  ;;  %v1932_v24 = vmul.f32 %v11730_v48, %v9690_v42  ;;  %v11830_v32 = vld [vmem:[#allocation47_spill] sm:$0xff] }
 0x387   : > { %v4481_v63 = vmul.f32 %v4449_v21, %v9656_v20  ;;  %v9783_v25 = vmul.f32 %v11730_v48, %v9709_v47  ;;  %vm3301_vm13 = vcmp.ge.f32.partialorder %v11829_v52, 0.0  ;;  %v2907_v19 = vsel %vm1983_vm2, %v2904_v13, %v2906_v58 }
 0x388   : > { %11828 = vst [vmem:[#allocation88_spill] sm:$0xff] %v9777_v23  ;;  %v1784_v20 = vmul.f32 %v7125_v55, %v9764_v54  ;;  %v9791_v0 = vmul.f32 %v7101_v12, %v9709_v47  ;;  %4587 = vrot.lane.b32.xlu2 %v9777_v23, %s6401_s29  ;;  %v2977_v53 = vadd.f32 %v2907_v19, %v2736_v36  ;;  %v1663_v48 = vrot.slane %v9764_v54, 7 }
 0x389   : > { %v4641_v17 = vmul.f32 %v4556_v43, %v4481_v63  ;;  %v4165_v29 = vadd.f32 0.2548296, %v4133_v45  ;;  %v3148_v31 = vsel %vm2225_vm3, %v3145_v37, %v3147_v41  ;;  %v3629_v21 = vsub.f32 1.0, %v3628_v8  ;;  %v11832_v63 = vld [vmem:[#allocation44_spill] sm:$0xff] }
 0x38a   : > { %6236 = vpow2.f32 %v4307_v2  ;;  %v1431_v43 = vadd.f32 %v1430_v34, %v11830_v32  ;;  %v9799_v60 = vadd.f32 %v3148_v31, %v2977_v53  ;;  %v9804_v61 = vmul.f32 0.5, %v11832_v63  ;;  %v11833_v37 = vld [vmem:[#allocation36_spill] sm:$0xff]  ;;  %v11834_v32 = vld [vmem:[#allocation10_spill] sm:$0xff] }
 0x38b   : > { %v4707_v13 = vsel %vm4675_vm5, %v4641_v17, 0  ;;  %v9809_v54 = vsel %vm3301_vm13, 1.0, %v11673_v16  ;;  %v9812_v36 = vmul.f32 0.5, %v11833_v37  ;;  %v1819_v8 = vadd.f32 %v9388_v11, %v1784_v20 }
 0x38c   : > { %v9801_v58 = vand.u32 4294901760, %v4707_v13  ;;  %v1852_v45 = vmul.f32 %v7128_v49, %v9690_v42  ;;  %v2174_v41 = vmul.f32 %v7101_v12, %v9690_v42  ;;  %4589 = vrot.lane.b32.xlu0 %v9799_v60, %s6401_s29  ;;  %v1580_v2 = vadd.f32 %v1579_v7, %v1431_v43 }
 0x38d   : > { %v9824_v52 = vsel %vm1615_vm1, 0.0, %v1663_v48  ;;  %v4197_v19 = vmul.f32 %v4165_v29, %v9722_v27  ;;  %v3630_v17 = vmul.f32 %v11826_v50, %v3629_v21  ;;  %v2059_v20 = vrot.slane %v1932_v24, 1 }
 0x38e   : > { %11831 = vst [vmem:[#allocation94_spill] sm:$0xff] %v9801_v58  ;;  %v4877_v34 = vsub.f32 %v4707_v13, %v9801_v58  ;;  %5150 = vmatmul.f32.gmra.mxu3 %v9801_v58  ;;  %v2060_v53 = vrot.slane %v9783_v25, 1  ;;  %v11364_v12 = vrot.slane %v9791_v0, 2  ;;  %v3638_v31 = vand.u32 2147483648, %v11825_v46 }
 0x38f   : > { %vm3299_vm14 = vcmp.ge.f32.partialorder %v11834_v32, 0.0  ;;  %vm3633_vm15 = vweird.f32 %v11826_v50  ;;  %v3636_v13 = vand.u32 2147483647, %v11825_v46  ;;  %v1884_v63 = vadd.f32 %v1852_v45, %v1819_v8 }
 0x390   : > { %5322 = vmatmul.f32.gmra.mxu0 %v4877_v34  ;;  %v4878_v7 = vand.u32 4294901760, %v4877_v34  ;;  %v6237_v43 = vpop.eup %6236  ;;  %v2301_v27 = vrot.slane %v2174_v41, 2  ;;  %v9836_v24 = vmul.f32 %v11712_v57, %v9824_v52  ;;  %v1664_v25 = vrot.slane %v1580_v2, 7 }
 0x391   : > { %v4357_v29 = vmul.f32 %v6237_v43, %v4197_v19  ;;  %v3631_v37 = vadd.f32 %v11826_v50, %v3630_v17  ;;  %vm3632_vm4 = vweird.f32 %v11825_v46  ;;  %v2061_v32 = vsel %vm1983_vm2, %v2059_v20, %v2060_v53  ;;  %v11836_v43 = vld [vmem:[#allocation40_spill] sm:$0xff] }
 0x392   : > { %5518 = vmatmul.f32.gmra.mxu1 %v4878_v7  ;;  %v4879_v21 = vsub.f32 %v4877_v34, %v4878_v7  ;;  %v2303_v18 = vsel %vm2225_vm3, %v2301_v27, %v11364_v12  ;;  %v9845_v8 = vsel %vm3299_vm14, 1.0, %v11673_v16  ;;  %vm3634_vm6 = vmor %vm3632_vm4, %vm3633_vm15  ;;  %v3639_v45 = vor.u32 1.1754944e-38, %v3638_v31  ;;  %v11835_v7 = vld [vmem:[#allocation56_spill] sm:$0xff] }
 0x393   : > { %v1785_v34 = vmul.f32 %v7125_v55, %v1580_v2  ;;  %v3635_v19 = vsel %vm3634_vm6, %v11826_v50, %v3631_v37  ;;  %vm3637_vm7 = vcmp.eq.f32.partialorder %v3636_v13, 8.507059e+37  ;;  %v2126_v46 = vadd.f32 %v2061_v32, %v1884_v63  ;;  %v11838_v2 = vld [vmem:[#allocation92_spill] sm:$0xff] }
 0x394   : > { %v4880_v41 = vand.u32 4294901760, %v4879_v21  ;;  %v9852_v17 = vsel %vm1615_vm1, %v1663_v48, %v1664_v25  ;;  %v9854_v20 = vsel %vm3637_vm7, %v3639_v45, %v3635_v19  ;;  %v3643_v27 = vmul.f32 %v11836_v43, %v11835_v7 }
 0x395   : > { %v9860_v12 = vmul.f32 %v7182_v15, %v9824_v52  ;;  %v4389_v21 = vsub.f32 1.0, %v4357_v29  ;;  %v3939_v55 = vmul.f32 1.0614054, %v9854_v20  ;;  %v9866_v50 = vmul.f32 0.70710677, %v9777_v23 }
 0x396   : > { %4881 = vmatmul.f32.gmra.mxu2 %v4880_v41  ;;  %5154 = vmatmul.f32.gmra.mxu3 %v9661_v56  ;;  %v9869_v48 = vsel %vm1615_vm1, %v1664_v25, 0.0  ;;  %v4303_v13 = vmul.f32 1.442695, %v11838_v2  ;;  %v3644_v63 = vsub.f32 1.0, %v3643_v27  ;;  %v1820_v37 = vadd.f32 %v9388_v11, %v1785_v34 }
 0x397   : > { %11837 = vst [vmem:[#allocation27_spill] sm:$0xff] %v9866_v50  ;;  %v9875_v32 = vmul.f32 %v11712_v57, %v9852_v17  ;;  %v3971_v29 = vadd.f32 -1.4531521, %v3939_v55  ;;  %v3653_v45 = vand.u32 2147483648, %v11835_v7  ;;  %v9879_v41 = vadd.f32 %v2303_v18, %v2126_v46 }
 0x398   : > { %5327 = vmatmul.f32.gmra.mxu0 %v9687_v38  ;;  %v3645_v19 = vmul.f32 %v11836_v43, %v3644_v63  ;;  %vm3648_vm1 = vweird.f32 %v11836_v43  ;;  %v3651_v25 = vand.u32 2147483647, %v11835_v7  ;;  %v4421_v27 = vmul.f32 %v4389_v21, %v9809_v54 }
 0x399   : > { %v1853_v11 = vmul.f32 %v7128_v49, %v9709_v47  ;;  %v9889_v34 = vmul.f32 %v7269_v26, %v9869_v48  ;;  %v4003_v55 = vmul.f32 %v3971_v29, %v9854_v20  ;;  %v9893_v18 = vand.u32 2147483647, %v9866_v50 }
 0x39a   : > { %v11839_v46 = vrot.slane %v9694_v6, 1  ;;  %v3646_v63 = vadd.f32 %v11836_v43, %v3645_v19  ;;  %vm3647_vm8 = vweird.f32 %v11835_v7  ;;  %v3654_v31 = vor.u32 1.1754944e-38, %v3653_v45 }
 0x39b   : > { %v9902_v54 = vadd.f32 %v1853_v11, %v1820_v37  ;;  %v4035_v21 = vadd.f32 1.4214138, %v4003_v55  ;;  %vm3649_vm9 = vmor %vm3647_vm8, %vm3648_vm1  ;;  %v9907_v29 = vmul.f32 %v9525_v14, %v9869_v48  ;;  %vm3652_vm10 = vcmp.eq.f32.partialorder %v3651_v25, 8.507059e+37  ;;  %v11842_v55 = vld [vmem:[#allocation35_spill] sm:$0xff]  ;;  %v11843_v25 = vld [vmem:[#allocation49_spill] sm:$0xff] }
 0x39c   : > { %v9898_v2 = vsel %vm1983_vm2, %v2060_v53, %v11839_v46  ;;  %v3650_v6 = vsel %vm3649_vm9, %v11836_v43, %v3646_v63  ;;  %v11840_v53 = vld [vmem:[#allocation52_spill] sm:$0xff]  ;;  %v11841_v46 = vld [vmem:[#allocation29_spill] sm:$0xff]  ;;  %v4453_v19 = vadd.f32 1.0, %v4421_v27  ;;  %6238 = vpow2.f32 %v4303_v13 }
 0x39d   : > { %v3673_v56 = vmul.f32 %v11841_v46, %v11840_v53  ;;  %v4067_v37 = vmul.f32 %v4035_v21, %v9854_v20  ;;  %v9914_v11 = vsel %vm3652_vm10, %v3654_v31, %v3650_v6  ;;  %v3711_v49 = vand.u32 2147483647, %v11842_v55 }
 0x39e   : > { %v3940_v45 = vmul.f32 1.0614054, %v9914_v11  ;;  %v4886_v43 = vand.u32 4294901760, %v9687_v38  ;;  %v3703_v63 = vmul.f32 %v11843_v25, %v11842_v55  ;;  %vm3678_vm11 = vweird.f32 %v11841_v46 }
 0x39f   : > { %v3674_v58 = vsub.f32 1.0, %v3673_v56  ;;  %v4099_v23 = vadd.f32 -0.28449672, %v4067_v37  ;;  %v3681_v31 = vand.u32 2147483647, %v11840_v53  ;;  %v3683_v13 = vand.u32 2147483648, %v11840_v53 }
 0x3a0   : > { %v3972_v27 = vadd.f32 -1.4531521, %v3940_v45  ;;  %5524 = vmatmul.f32.gmra.mxu1 %v4886_v43  ;;  %v4887_v56 = vsub.f32 %v9687_v38, %v4886_v43  ;;  %v3704_v6 = vsub.f32 1.0, %v3703_v63  ;;  %v3713_v37 = vand.u32 2147483648, %v11842_v55  ;;  %v11844_v63 = vld [vmem:[#allocation93_spill] sm:$0xff] }
 0x3a1   : > { %v3675_v7 = vmul.f32 %v11841_v46, %v3674_v58  ;;  %v4131_v21 = vmul.f32 %v4099_v23, %v9854_v20  ;;  %vm3708_vm12 = vweird.f32 %v11843_v25  ;;  %vm3677_vm13 = vweird.f32 %v11840_v53 }
 0x3a2   : > { %v4004_v50 = vmul.f32 %v3972_v27, %v9914_v11  ;;  %v4888_v30 = vand.u32 4294901760, %v4887_v56  ;;  %v3705_v62 = vmul.f32 %v11843_v25, %v3704_v6  ;;  %vm3679_vm14 = vmor %vm3677_vm13, %vm3678_vm11  ;;  %v3684_v23 = vor.u32 1.1754944e-38, %v3683_v13  ;;  %v6239_v38 = vpop.eup %6238 }
 0x3a3   : > { %v3676_v45 = vadd.f32 %v11841_v46, %v3675_v7  ;;  %v4163_v58 = vadd.f32 0.2548296, %v4131_v21  ;;  %v4305_v51 = vmul.f32 1.442695, %v11844_v63  ;;  %vm3682_vm15 = vcmp.eq.f32.partialorder %v3681_v31, 8.507059e+37  ;;  %v11845_v21 = vld [vmem:[#allocation87_spill] sm:$0xff] }
 0x3a4   : > { %v4036_v43 = vadd.f32 1.4214138, %v4004_v50  ;;  %4889 = vmatmul.f32.gmra.mxu2 %v4888_v30  ;;  %v3706_v53 = vadd.f32 %v11843_v25, %v3705_v62  ;;  %vm3707_vm4 = vweird.f32 %v11842_v55  ;;  %vm3300_vm6 = vcmp.ge.f32.partialorder %v11845_v21, 0.0  ;;  %v11846_v55 = vld [vmem:[#allocation77_spill] sm:$0xff] }
 0x3a5   : > { %v3680_v27 = vsel %vm3679_vm14, %v11841_v46, %v3676_v45  ;;  %v4195_v59 = vmul.f32 %v4163_v58, %v9854_v20  ;;  %vm3709_vm7 = vmor %vm3707_vm4, %vm3708_vm12  ;;  %v3714_v50 = vor.u32 1.1754944e-38, %v3713_v37  ;;  %v3152_v31 = vrot.slane %v9907_v29, 2 }
 0x3a6   : > { %v9940_v7 = vsel %vm3682_vm15, %v3684_v23, %v3680_v27  ;;  %v4068_v13 = vmul.f32 %v4036_v43, %v9914_v11  ;;  %v3710_v30 = vsel %vm3709_vm7, %v11843_v25, %v3706_v53  ;;  %vm3712_vm1 = vcmp.eq.f32.partialorder %v3711_v49, 8.507059e+37 }
 0x3a7   : > { %v3942_v46 = vmul.f32 1.0614054, %v9940_v7  ;;  %v4355_v20 = vmul.f32 %v6239_v38, %v4195_v59  ;;  %v4485_v62 = vmul.f32 %v4453_v19, %v9804_v61  ;;  %v9951_v56 = vmul.f32 0.5, %v11846_v55 }
 0x3a8   : > { %v4100_v6 = vadd.f32 -0.28449672, %v4068_v13  ;;  %v9953_v45 = vsel %vm3712_vm1, %v3714_v50, %v3710_v30  ;;  %v3332_v23 = vsel %vm3300_vm6, 1.0, %v11673_v16  ;;  %6240 = vpow2.f32 %v4305_v51  ;;  %v4560_v50 = vpop.permute.xlu0 %4559 }
 0x3a9   : > { %v4387_v58 = vsub.f32 1.0, %v4355_v20  ;;  %v3944_v37 = vmul.f32 1.0614054, %v9953_v45  ;;  %v2400_v59 = vmul.f32 %v7182_v15, %v9709_v47  ;;  %v2479_v61 = vmul.f32 %v11712_v57, %v9709_v47 }
 0x3aa   : > { %v4132_v29 = vmul.f32 %v4100_v6, %v9914_v11  ;;  %v3974_v49 = vadd.f32 -1.4531521, %v3942_v46  ;;  %v2785_v38 = vmul.f32 %v7269_v26, %v9852_v17  ;;  %v3026_v51 = vmul.f32 %v9525_v14, %v9852_v17 }
 0x3ab   : > { %v4419_v19 = vmul.f32 %v4387_v58, %v9845_v8  ;;  %v3976_v25 = vadd.f32 -1.4531521, %v3944_v37  ;;  %v2432_v63 = vadd.f32 %v2400_v59, %v9608_v28  ;;  %v2603_v27 = vrot.slane %v2479_v61, 2 }
 0x3ac   : > { %v4164_v43 = vadd.f32 0.2548296, %v4132_v29  ;;  %v2706_v53 = vmul.f32 %v11659_v3, %v9852_v17  ;;  %v2909_v13 = vrot.slane %v2785_v38, 1  ;;  %v2399_v8 = vmul.f32 %v7182_v15, %v9690_v42 }
 0x3ad   : > { %v4451_v21 = vadd.f32 1.0, %v4419_v19  ;;  %v4008_v47 = vmul.f32 %v3976_v25, %v9953_v45  ;;  %v11847_v20 = vrot.slane %v9703_v22, 2  ;;  %v3150_v55 = vrot.slane %v3026_v51, 2 }
 0x3ae   : > { %v4196_v46 = vmul.f32 %v4164_v43, %v9914_v11  ;;  %v2478_v28 = vmul.f32 %v11712_v57, %v9690_v42  ;;  %v6241_v6 = vpop.eup %6240  ;;  %v2431_v59 = vadd.f32 %v2399_v8, %v9535_v5  ;;  %v11848_v19 = vrot.slane %v9889_v34, 1  ;;  %v4564_v43 = vpop.permute.xlu2 %4563 }
 0x3af   : > { %v2606_v30 = vsel %vm2225_vm3, %v2603_v27, %v11847_v20  ;;  %v4483_v58 = vmul.f32 %v4451_v21, %v9812_v36  ;;  %v4040_v37 = vadd.f32 1.4214138, %v4008_v47  ;;  %v2705_v22 = vmul.f32 %v11659_v3, %v9824_v52 }
 0x3b0   : > { %v2673_v29 = vadd.f32 %v2606_v30, %v2432_v63  ;;  %v4356_v61 = vmul.f32 %v6241_v6, %v4196_v46  ;;  %v2912_v11 = vsel %vm1983_vm2, %v2909_v13, %v11848_v19  ;;  %v2602_v25 = vrot.slane %v2478_v28, 2 }
 0x3b1   : > { %v4643_v38 = vmul.f32 %v4560_v50, %v4483_v58  ;;  %v4072_v51 = vmul.f32 %v4040_v37, %v9953_v45  ;;  %v2784_v36 = vmul.f32 %v7269_v26, %v9824_v52  ;;  %v3025_v34 = vmul.f32 %v9525_v14, %v9824_v52 }
 0x3b2   : > { %v2738_v42 = vadd.f32 %v2706_v53, %v2673_v29  ;;  %v4388_v63 = vsub.f32 1.0, %v4356_v61  ;;  %v2604_v5 = vsel %vm2225_vm3, %v2602_v25, %v2603_v27  ;;  %v4006_v21 = vmul.f32 %v3974_v49, %v9940_v7 }
 0x3b3   : > { %v4713_v47 = vsel %vm4675_vm5, %v4643_v38, 0  ;;  %v4104_v8 = vadd.f32 -0.28449672, %v4072_v51  ;;  %v2672_v50 = vadd.f32 %v2604_v5, %v2431_v59  ;;  %v3153_v30 = vsel %vm2225_vm3, %v3150_v55, %v3152_v31  ;;  %v4562_v59 = vpop.permute.xlu1 %4561 }
 0x3b4   : > { %v2979_v46 = vadd.f32 %v2912_v11, %v2738_v42  ;;  %v9994_v20 = vand.u32 4294901760, %v4713_v47  ;;  %v4420_v53 = vmul.f32 %v4388_v63, %v3332_v23  ;;  %v2908_v28 = vrot.slane %v2784_v36, 1  ;;  %v11849_v23 = vld [vmem:[#allocation12_spill] sm:$0xff] }
 0x3b5   : > { %v4645_v6 = vmul.f32 %v4564_v43, %v4485_v62  ;;  %v2737_v27 = vadd.f32 %v2705_v22, %v2672_v50  ;;  %v4038_v37 = vadd.f32 1.4214138, %v4006_v21  ;;  %v3149_v61 = vrot.slane %v3025_v34, 2  ;;  %v11852_v36 = vld [vmem:[#allocation64_spill] sm:$0xff] }
 0x3b6   : > { %v9997_v58 = vadd.f32 %v3153_v30, %v2979_v46  ;;  %v4893_v52 = vsub.f32 %v4713_v47, %v9994_v20  ;;  %v4452_v29 = vadd.f32 1.0, %v4420_v53  ;;  %5158 = vmatmul.f32.gmra.mxu3 %v9994_v20  ;;  %v2910_v49 = vsel %vm1983_vm2, %v2908_v28, %v2909_v13 }
 0x3b7   : > { %v4136_v19 = vmul.f32 %v4104_v8, %v9953_v45  ;;  %v2978_v31 = vadd.f32 %v2910_v49, %v2737_v27  ;;  %v4070_v62 = vmul.f32 %v4038_v37, %v9940_v7  ;;  %v4309_v11 = vmul.f32 1.442695, %v11849_v23 }
 0x3b8   : > { %4593 = vrot.lane.b32.xlu2 %v9997_v58, %s6401_s29  ;;  %v4484_v25 = vmul.f32 %v4452_v29, %v9951_v56  ;;  %5332 = vmatmul.f32.gmra.mxu0 %v4893_v52  ;;  %v4894_v22 = vand.u32 4294901760, %v4893_v52  ;;  %v3151_v38 = vsel %vm2225_vm3, %v3149_v61, %v3150_v55  ;;  %v11850_v13 = vrot.slane %v9875_v32, 2 }
 0x3b9   : > { %v11851_v51 = vrot.slane %v9836_v24, 2  ;;  %v4313_v43 = vmul.f32 1.442695, %v11852_v36  ;;  %v10015_v63 = vadd.f32 %v3151_v38, %v2978_v31  ;;  %v4102_v5 = vadd.f32 -0.28449672, %v4070_v62 }
 0x3ba   : > { %v2433_v34 = vadd.f32 %v9860_v12, %v9879_v41  ;;  %v2127_v56 = vadd.f32 %v9898_v2, %v9902_v54  ;;  %v2483_v55 = vmul.f32 %v11712_v57, %v9869_v48  ;;  %v4644_v21 = vmul.f32 %v4562_v59, %v4484_v25  ;;  %5530 = vmatmul.f32.gmra.mxu1 %v4894_v22  ;;  %v11853_v2 = vld [vmem:[#allocation66_spill] sm:$0xff] }
 0x3bb   : > { %v2609_v42 = vsel %vm2225_vm3, %v11851_v51, %v11850_v13  ;;  %v4895_v47 = vsub.f32 %v4893_v52, %v4894_v22  ;;  %v4719_v24 = vsel %vm4675_vm5, %v4645_v6, 0  ;;  %v4168_v8 = vadd.f32 0.2548296, %v4136_v19  ;;  %4591 = vrot.lane.b32.xlu1 %v10015_v63, %s6401_s29  ;;  %v11856_v52 = vld [vmem:[#allocation63_spill] sm:$0xff] }
 0x3bc   : > { %6242 = vpow2.f32 %v4309_v11  ;;  %v2674_v46 = vadd.f32 %v2609_v42, %v2433_v34  ;;  %v4716_v50 = vsel %vm4675_vm5, %v4644_v21, 0  ;;  %v4134_v41 = vmul.f32 %v4102_v5, %v9940_v7  ;;  %v11857_v11 = vld [vmem:[#allocation45_spill] sm:$0xff]  ;;  %v11858_v34 = vld [vmem:[#allocation31_spill] sm:$0xff] }
 0x3bd   : > { %v4896_v12 = vand.u32 4294901760, %v4895_v47  ;;  %v2707_v54 = vmul.f32 %v11659_v3, %v11853_v2  ;;  %v10031_v57 = vmul.f32 0.3275911, %v9893_v18  ;;  %v11854_v48 = vrot.slane %v9699_v44, 2 }
 0x3be   : > { %v11855_v53 = vrot.slane %v9791_v0, 2  ;;  %v10038_v28 = vand.u32 4294901760, %v4716_v50  ;;  %6244 = vpow2.f32 %v4313_v43  ;;  %v10040_v6 = vand.u32 4294901760, %v4719_v24 }
 0x3bf   : > { %4897 = vmatmul.f32.gmra.mxu2 %v4896_v12  ;;  %v4166_v27 = vadd.f32 0.2548296, %v4134_v41  ;;  %v2787_v37 = vmul.f32 %v7269_v26, %v11853_v2  ;;  %v2788_v29 = vmul.f32 %v7269_v26, %v11856_v52  ;;  %v2610_v61 = vrot.slane %v2483_v55, 2 }
 0x3c0   : > { %v2305_v30 = vsel %vm2225_vm3, %v11855_v53, %v11854_v48  ;;  %v4901_v44 = vsub.f32 %v4716_v50, %v10038_v28  ;;  %5162 = vmatmul.f32.gmra.mxu3 %v10038_v28  ;;  %v3028_v0 = vmul.f32 %v9525_v14, %v11853_v2  ;;  %v4200_v59 = vmul.f32 %v4168_v8, %v9953_v45  ;;  %v11861_v2 = vld [vmem:[#allocation71_spill] sm:$0xff]  ;;  %v6299_v48 = vld [vmem:[%s11135_s3 + $0x8] ss:$0 sm:$0xff] }
 0x3c1   : > { %v2369_v49 = vadd.f32 %v2305_v30, %v2127_v56  ;;  %v4198_v19 = vmul.f32 %v4166_v27, %v9940_v7  ;;  %v2739_v31 = vadd.f32 %v2707_v54, %v2674_v46  ;;  %v2913_v62 = vrot.slane %v2787_v37, 1  ;;  %v11859_v56 = vld [vmem:[#allocation74_spill] sm:$0xff]  ;;  %v11862_v30 = vld [vmem:[#allocation53_spill] sm:$0xff] }
 0x3c2   : > { %v6243_v23 = vpop.eup %6242  ;;  %vm3302_vm8 = vcmp.ge.f32.partialorder %v11857_v11, 0.0  ;;  %5337 = vmatmul.f32.gmra.mxu0 %v4901_v44  ;;  %v2914_v25 = vrot.slane %v2788_v29, 1  ;;  %v3029_v22 = vmul.f32 %v9525_v14, %v11856_v52  ;;  %v3154_v38 = vrot.slane %v3028_v0, 2 }
 0x3c3   : > { %v4909_v13 = vsub.f32 %v4719_v24, %v10040_v6  ;;  %v10057_v51 = vmul.f32 0.70710677, %v9799_v60  ;;  %v4358_v42 = vmul.f32 %v6243_v23, %v4198_v19  ;;  %v4902_v45 = vand.u32 4294901760, %v4901_v44 }
 0x3c4   : > { %v6245_v36 = vpop.eup %6244  ;;  %v2915_v7 = vsel %vm1983_vm2, %v2913_v62, %v2914_v25  ;;  %v3155_v43 = vrot.slane %v3029_v22, 2  ;;  %v2402_v5 = vmul.f32 %v7182_v15, %v9852_v17  ;;  %v3688_v55 = vmul.f32 %v11859_v56, %v11858_v34 }
 0x3c5   : > { %v4360_v21 = vmul.f32 %v6245_v36, %v4200_v59  ;;  %v3334_v14 = vsel %vm3302_vm8, 1.0, %v11673_v16  ;;  %v4390_v47 = vsub.f32 1.0, %v4358_v42  ;;  %v2980_v24 = vadd.f32 %v2915_v7, %v2739_v31  ;;  %5536 = vmatmul.f32.gmra.mxu1 %v4902_v45 }
 0x3c6   : > { %v3156_v8 = vsel %vm2225_vm3, %v3154_v38, %v3155_v43  ;;  %v2434_v46 = vadd.f32 %v2402_v5, %v2369_v49  ;;  %v11860_v50 = vrot.slane %v9875_v32, 2  ;;  %v2708_v41 = vmul.f32 %v11659_v3, %v11856_v52  ;;  %v11863_v52 = vld [vmem:[#allocation59_spill] sm:$0xff] }
 0x3c7   : > { %v4422_v15 = vmul.f32 %v4390_v47, %v3334_v14  ;;  %v10071_v17 = vadd.f32 %v3156_v8, %v2980_v24  ;;  %v2789_v54 = vmul.f32 %v7269_v26, %v11861_v2  ;;  %v3030_v53 = vmul.f32 %v6299_v48, %v11861_v2 }
 0x3c8   : > { %v2611_v12 = vsel %vm2225_vm3, %v11860_v50, %v2610_v61  ;;  %vm3304_vm9 = vcmp.ge.f32.partialorder %v11862_v30, 0.0  ;;  %v4903_v27 = vsub.f32 %v4901_v44, %v4902_v45  ;;  %5166 = vmatmul.f32.gmra.mxu3 %v10040_v6  ;;  %v3689_v37 = vsub.f32 1.0, %v3688_v55  ;;  %v4566_v61 = vpop.permute.xlu0 %4565 }
 0x3c9   : > { %v2675_v32 = vadd.f32 %v2611_v12, %v2434_v46  ;;  %v4392_v3 = vsub.f32 1.0, %v4360_v21  ;;  %v3238_v29 = vmul.f32 0.5, %v11863_v52  ;;  %v4454_v49 = vadd.f32 1.0, %v4422_v15  ;;  %4595 = vrot.lane.b32.xlu0 %v10071_v17, %s6401_s29 }
 0x3ca   : > { %v2916_v26 = vrot.slane %v2789_v54, 1  ;;  %v3157_v59 = vrot.slane %v3030_v53, 2  ;;  %v4904_v19 = vand.u32 4294901760, %v4903_v27  ;;  %5342 = vmatmul.f32.gmra.mxu0 %v4909_v13  ;;  %v4910_v31 = vand.u32 4294901760, %v4909_v13  ;;  %v11866_v53 = vld [vmem:[#allocation41_spill] sm:$0xff] }
 0x3cb   : > { %v2740_v0 = vadd.f32 %v2708_v41, %v2675_v32  ;;  %v4486_v62 = vmul.f32 %v4454_v49, %v3238_v29  ;;  %vm3693_vm10 = vweird.f32 %v11859_v56  ;;  %v3698_v23 = vand.u32 2147483648, %v11858_v34 }
 0x3cc   : > { %v2917_v44 = vsel %vm1983_vm2, %v2914_v25, %v2916_v26  ;;  %v3158_v22 = vsel %vm2225_vm3, %v3155_v43, %v3157_v59  ;;  %4905 = vmatmul.f32.gmra.mxu2 %v4904_v19  ;;  %v3690_v38 = vmul.f32 %v11859_v56, %v3689_v37  ;;  %v3696_v42 = vand.u32 2147483647, %v11858_v34  ;;  %v11867_v59 = vld [vmem:[#allocation22_spill] sm:$0xff] }
 0x3cd   : > { %v2981_v11 = vadd.f32 %v2917_v44, %v2740_v0  ;;  %v10091_v45 = vand.u32 2147483647, %v10057_v51  ;;  %v3336_v36 = vsel %vm3304_vm9, 1.0, %v11673_v16  ;;  %v4646_v25 = vmul.f32 %v4566_v61, %v4486_v62  ;;  %5542 = vmatmul.f32.gmra.mxu1 %v4910_v31  ;;  %v11869_v62 = vld [vmem:[#allocation65_spill] sm:$0xff] }
 0x3ce   : > { %vm3692_vm2 = vweird.f32 %v11858_v34  ;;  %v4424_v7 = vmul.f32 %v4392_v3, %v3336_v36  ;;  %v4911_v43 = vsub.f32 %v4909_v13, %v4910_v31  ;;  %v3691_v55 = vadd.f32 %v11859_v56, %v3690_v38  ;;  %v11868_v31 = vld [vmem:[#allocation84_spill] sm:$0xff] }
 0x3cf   : > { %v10097_v5 = vadd.f32 %v3158_v22, %v2981_v11  ;;  %v10101_v21 = vadd.f32 1.0, %v9735_v4  ;;  %v4241_v14 = vsub.f32 0.0, %v9893_v18  ;;  %v4722_v47 = vsel %vm4675_vm5, %v4646_v25, 0  ;;  %vm3694_vm3 = vmor %vm3692_vm2, %vm3693_vm10  ;;  %v11870_v38 = vld [vmem:[#allocation32_spill] sm:$0xff] }
 0x3d0   : > { %v3699_v24 = vor.u32 1.1754944e-38, %v3698_v23  ;;  %v10108_v8 = vadd.f32 1.0, %v10031_v57  ;;  %v10110_v34 = vand.u32 4294901760, %v4722_v47  ;;  %v3695_v13 = vsel %vm3694_vm3, %v11859_v56, %v3691_v55 }
 0x3d1   : > { %4597 = vrot.lane.b32.xlu1 %v10097_v5, %s6401_s29  ;;  %vm3697_vm11 = vcmp.eq.f32.partialorder %v3696_v42, 8.507059e+37  ;;  %6246 = vrcp.f32 %v9728_v33  ;;  %v11864_v4 = vsub.f32 0.0, %v9670_v10  ;;  %v3410_v50 = vmul.f32 0.3275911, %v10091_v45 }
 0x3d2   : > { %v10122_v12 = vsel %vm3697_vm11, %v3699_v24, %v3695_v13  ;;  %v4456_v57 = vadd.f32 1.0, %v4424_v7  ;;  %v4917_v41 = vsub.f32 %v4722_v47, %v10110_v34  ;;  %v4912_v15 = vand.u32 4294901760, %v4911_v43  ;;  %5170 = vmatmul.f32.gmra.mxu3 %v10110_v34 }
 0x3d3   : > { %v10119_v46 = vmul.f32 %v11864_v4, %v9670_v10  ;;  %v3943_v56 = vmul.f32 1.0614054, %v10122_v12  ;;  %6248 = vrcp.f32 %v10101_v21  ;;  %v11865_v2 = vsub.f32 0.0, %v9712_v9 }
 0x3d4   : > { %v10134_v10 = vmul.f32 %v4241_v14, %v9893_v18  ;;  %v3748_v48 = vmul.f32 %v9649_v40, %v9426_v1  ;;  %6250 = vrcp.f32 %v10108_v8  ;;  %v3240_v30 = vmul.f32 0.5, %v11866_v53  ;;  %4913 = vmatmul.f32.gmra.mxu2 %v4912_v15  ;;  %5347 = vmatmul.f32.gmra.mxu0 %v4917_v41 }
 0x3d5   : > { %v10131_v54 = vmul.f32 %v11865_v2, %v9712_v9  ;;  %v3975_v32 = vadd.f32 -1.4531521, %v3943_v56  ;;  %v4918_v27 = vand.u32 4294901760, %v4917_v41  ;;  %v10140_v37 = vadd.f32 1.0, %v3410_v50  ;;  %v4570_v9 = vpop.permute.xlu2 %4569 }
 0x3d6   : > { %v3749_v52 = vsub.f32 1.0, %v3748_v48  ;;  %v3756_v18 = vand.u32 2147483647, %v9426_v1  ;;  %v4488_v29 = vmul.f32 %v4456_v57, %v3240_v30  ;;  %v3758_v61 = vand.u32 2147483648, %v9426_v1  ;;  %v11873_v48 = vld [vmem:[#allocation14_spill] sm:$0xff] }
 0x3d7   : > { %v4007_v49 = vmul.f32 %v3975_v32, %v10122_v12  ;;  %5548 = vmatmul.f32.gmra.mxu1 %v4918_v27  ;;  %v4919_v26 = vsub.f32 %v4917_v41, %v4918_v27  ;;  %v10146_v0 = vpop.eup %6246  ;;  %vm3303_vm12 = vcmp.ge.f32.partialorder %v11867_v59, 0.0  ;;  %vm3753_vm13 = vweird.f32 %v9649_v40  ;;  %v11874_v27 = vld [vmem:[#allocation69_spill] sm:$0xff] }
 0x3d8   : > { %v3750_v19 = vmul.f32 %v9649_v40, %v3749_v52  ;;  %v3718_v44 = vmul.f32 %v11869_v62, %v11868_v31  ;;  %v4648_v23 = vmul.f32 %v4570_v9, %v4488_v29  ;;  %v10154_v11 = vmul.f32 0.70710677, %v9997_v58  ;;  %v11875_v9 = vld [vmem:[#allocation17_spill] sm:$0xff] }
 0x3d9   : > { %v4039_v22 = vadd.f32 1.4214138, %v4007_v49  ;;  %v4311_v42 = vmul.f32 1.442695, %v11870_v38  ;;  %v10157_v36 = vpop.eup %6248  ;;  %vm3752_vm14 = vweird.f32 %v9426_v1  ;;  %vm10161_vm15 = vcmp.eq.f32.partialorder %v3756_v18, 8.507059e+37 }
 0x3da   : > { %v3751_v25 = vadd.f32 %v9649_v40, %v3750_v19  ;;  %v3719_v43 = vsub.f32 1.0, %v3718_v44  ;;  %v10165_v55 = vpop.eup %6250  ;;  %v4920_v47 = vand.u32 4294901760, %v4919_v26  ;;  %vm3754_vm4 = vmor %vm3752_vm14, %vm3753_vm13  ;;  %v3759_v24 = vor.u32 1.1754944e-38, %v3758_v61 }
 0x3db   : > { %v4071_v14 = vmul.f32 %v4039_v22, %v10122_v12  ;;  %v3728_v13 = vand.u32 2147483648, %v11868_v31  ;;  %vm3723_vm6 = vweird.f32 %v11869_v62  ;;  %v3726_v1 = vand.u32 2147483647, %v11868_v31  ;;  %v10202_v22 = vpop.f32.mrf.mxu3 }
 0x3dc   : > { %v3755_v4 = vsel %vm3754_vm4, %v9649_v40, %v3751_v25  ;;  %v3720_v50 = vmul.f32 %v11869_v62, %v3719_v43  ;;  %v4728_v57 = vsel %vm4675_vm5, %v4648_v23, 0  ;;  %v10175_v41 = vand.u32 2147483647, %v10154_v11  ;;  %4921 = vmatmul.f32.gmra.mxu2 %v4920_v47 }
 0x3dd   : > { %v4103_v15 = vadd.f32 -0.28449672, %v4071_v14  ;;  %v10179_v56 = vsel %vm10161_vm15, %v3759_v24, %v3755_v4  ;;  %6252 = vpow2.f32 %v4311_v42  ;;  %vm3722_vm7 = vweird.f32 %v11868_v31  ;;  %v11876_v4 = vld [vmem:[#allocation70_spill] sm:$0xff] }
 0x3de   : > { %v3947_v40 = vmul.f32 1.0614054, %v10179_v56  ;;  %v3721_v2 = vadd.f32 %v11869_v62, %v3720_v50  ;;  %v10185_v53 = vmul.f32 0.5, %v11873_v48  ;;  %vm3724_vm1 = vmor %vm3722_vm7, %vm3723_vm6  ;;  %v3729_v32 = vor.u32 1.1754944e-38, %v3728_v13  ;;  %v11878_v48 = vld [vmem:[#allocation9_spill] sm:$0xff] }
 0x3df   : > { %v4135_v30 = vmul.f32 %v4103_v15, %v10122_v12  ;;  %v3733_v52 = vmul.f32 %v11875_v9, %v11874_v27  ;;  %v10190_v18 = vand.u32 4294901760, %v4728_v57  ;;  %vm3727_vm8 = vcmp.eq.f32.partialorder %v3726_v1, 8.507059e+37  ;;  %v11877_v1 = vld [vmem:[#allocation85_spill] sm:$0xff] }
 0x3e0   : > { %v3979_v29 = vadd.f32 -1.4531521, %v3947_v40  ;;  %v3725_v49 = vsel %vm3724_vm1, %v11869_v62, %v3721_v2  ;;  %v3335_v26 = vsel %vm3303_vm12, 1.0, %v11673_v16  ;;  %v10199_v44 = vmul.f32 0.3275911, %v10175_v41 }
 0x3e1   : > { %v4167_v61 = vadd.f32 0.2548296, %v4135_v30  ;;  %v10196_v19 = vsel %vm3727_vm8, %v3729_v32, %v3725_v49  ;;  %v3734_v31 = vsub.f32 1.0, %v3733_v52  ;;  %v3743_v62 = vand.u32 2147483648, %v11874_v27 }
 0x3e2   : > { %v4011_v23 = vmul.f32 %v3979_v29, %v10179_v56  ;;  %v3945_v38 = vmul.f32 1.0614054, %v10196_v19  ;;  %vm3738_vm9 = vweird.f32 %v11875_v9  ;;  %v3741_v25 = vand.u32 2147483647, %v11874_v27 }
 0x3e3   : > { %v4199_v42 = vmul.f32 %v4167_v61, %v10122_v12  ;;  %v3735_v59 = vmul.f32 %v11875_v9, %v3734_v31  ;;  %v6253_v7 = vpop.eup %6252  ;;  %v10211_v43 = vsub.f32 %v4728_v57, %v10190_v18  ;;  %v10214_v14 = vmul.f32 0.70710677, %v10015_v63 }
 0x3e4   : > { %v4043_v47 = vadd.f32 1.4214138, %v4011_v23  ;;  %v3977_v24 = vadd.f32 -1.4531521, %v3945_v38  ;;  %v4319_v50 = vmul.f32 1.442695, %v11876_v4  ;;  %vm3737_vm10 = vweird.f32 %v11874_v27 }
 0x3e5   : > { %v4359_v13 = vmul.f32 %v6253_v7, %v4199_v42  ;;  %v3736_v12 = vadd.f32 %v11875_v9, %v3735_v59  ;;  %vm3307_vm2 = vcmp.ge.f32.partialorder %v11877_v1, 0.0  ;;  %vm3739_vm3 = vmor %vm3737_vm10, %vm3738_vm9  ;;  %v3744_v57 = vor.u32 1.1754944e-38, %v3743_v62 }
 0x3e6   : > { %v4075_v15 = vmul.f32 %v4043_v47, %v10179_v56  ;;  %v4009_v40 = vmul.f32 %v3977_v24, %v10196_v19  ;;  %v4315_v30 = vmul.f32 1.442695, %v11878_v48  ;;  %vm3742_vm11 = vcmp.eq.f32.partialorder %v3741_v25, 8.507059e+37  ;;  %v4568_v25 = vpop.permute.xlu1 %4567  ;;  %v11879_v47 = vld [vmem:[#allocation80_spill] sm:$0xff]  ;;  %v11884_v48 = vld [vmem:[#allocation23_spill] sm:$0xff] }
 0x3e7   : > { %v4391_v2 = vsub.f32 1.0, %v4359_v13  ;;  %v3740_v32 = vsel %vm3739_vm3, %v11875_v9, %v3736_v12  ;;  %v3801_v27 = vand.u32 2147483647, %v9624_v39  ;;  %v3339_v31 = vsel %vm3307_vm2, 1.0, %v11673_v16  ;;  %v11880_v13 = vld [vmem:[#allocation48_spill] sm:$0xff]  ;;  %v10238_v12 = vpop.f32.mrf.mxu3 }
 0x3e8   : > { %v4107_v52 = vadd.f32 -0.28449672, %v4075_v15  ;;  %v4041_v29 = vadd.f32 1.4214138, %v4009_v40  ;;  %v10224_v49 = vsel %vm3742_vm11, %v3744_v57, %v3740_v32  ;;  %6254 = vpow2.f32 %v4319_v50  ;;  %v10236_v50 = vpop.f32.mrf.mxu2 }
 0x3e9   : > { %v4423_v61 = vmul.f32 %v4391_v2, %v3335_v26  ;;  %v3946_v23 = vmul.f32 1.0614054, %v10224_v49  ;;  %v3793_v9 = vmul.f32 %v9684_v35, %v9624_v39  ;;  %v3803_v42 = vand.u32 2147483648, %v9624_v39  ;;  %v11883_v2 = vld [vmem:[#allocation42_spill] sm:$0xff] }
 0x3ea   : > { %v4139_v38 = vmul.f32 %v4107_v52, %v10179_v56  ;;  %v4073_v62 = vmul.f32 %v4041_v29, %v10196_v19  ;;  %6256 = vpow2.f32 %v4315_v30  ;;  %v4317_v26 = vmul.f32 1.442695, %v11879_v47 }
 0x3eb   : > { %v4455_v59 = vadd.f32 1.0, %v4423_v61  ;;  %v3978_v7 = vadd.f32 -1.4531521, %v3946_v23  ;;  %vm3305_vm12 = vcmp.ge.f32.partialorder %v11880_v13, 0.0  ;;  %vm3797_vm13 = vweird.f32 %v9624_v39 }
 0x3ec   : > { %v4171_v24 = vadd.f32 0.2548296, %v4139_v38  ;;  %v4105_v4 = vadd.f32 -0.28449672, %v4073_v62  ;;  %vm10241_vm14 = vcmp.eq.f32.partialorder %v3801_v27, 8.507059e+37  ;;  %v3794_v57 = vsub.f32 1.0, %v3793_v9 }
 0x3ed   : > { %v4487_v15 = vmul.f32 %v4455_v59, %v10185_v53  ;;  %v4010_v40 = vmul.f32 %v3978_v7, %v10224_v49  ;;  %v3763_v30 = vmul.f32 %v11884_v48, %v11883_v2  ;;  %vm3798_vm15 = vweird.f32 %v9684_v35 }
 0x3ee   : > { %v4203_v32 = vmul.f32 %v4171_v24, %v10179_v56  ;;  %v4137_v52 = vmul.f32 %v4105_v4, %v10196_v19  ;;  %v3804_v29 = vor.u32 1.1754944e-38, %v3803_v42  ;;  %v6255_v61 = vpop.eup %6254  ;;  %v3795_v38 = vmul.f32 %v9684_v35, %v3794_v57  ;;  %vm3799_vm7 = vmor %vm3797_vm13, %vm3798_vm15 }
 0x3ef   : > { %v4647_v27 = vmul.f32 %v4568_v25, %v4487_v15  ;;  %v4042_v23 = vadd.f32 1.4214138, %v4010_v40  ;;  %v3764_v62 = vsub.f32 1.0, %v3763_v30  ;;  %vm3767_vm4 = vweird.f32 %v11883_v2 }
 0x3f0   : > { %v4363_v53 = vmul.f32 %v6255_v61, %v4203_v32  ;;  %v4169_v59 = vadd.f32 0.2548296, %v4137_v52  ;;  %vm3768_vm6 = vweird.f32 %v11884_v48  ;;  %v6257_v9 = vpop.eup %6256  ;;  %v3796_v47 = vadd.f32 %v9684_v35, %v3795_v38 }
 0x3f1   : > { %v4725_v56 = vsel %vm4675_vm5, %v4647_v27, 0  ;;  %v4074_v7 = vmul.f32 %v4042_v23, %v10224_v49  ;;  %v3765_v42 = vmul.f32 %v11884_v48, %v3764_v62  ;;  %v3771_v15 = vand.u32 2147483647, %v11883_v2  ;;  %vm10280_vm1 = vmor %vm3767_vm4, %vm3768_vm6 }
 0x3f2   : > { %v10259_v25 = vand.u32 4294901760, %v4725_v56  ;;  %v4395_v24 = vsub.f32 1.0, %v4363_v53  ;;  %v4201_v4 = vmul.f32 %v4169_v59, %v10196_v19  ;;  %v3800_v57 = vsel %vm3799_vm7, %v9684_v35, %v3796_v47  ;;  %v11887_v35 = vld [vmem:[#allocation28_spill] sm:$0xff]  ;;  %v10290_v53 = vpop.f32.mrf.mxu2 }
 0x3f3   : > { %v4106_v40 = vadd.f32 -0.28449672, %v4074_v7  ;;  %v3766_v30 = vadd.f32 %v11884_v48, %v3765_v42  ;;  %v3773_v32 = vand.u32 2147483648, %v11883_v2  ;;  %6258 = vpow2.f32 %v4317_v26  ;;  %v10292_v2 = vpop.f32.mrf.mxu3 }
 0x3f4   : > { %v4925_v52 = vsub.f32 %v4725_v56, %v10259_v25  ;;  %5174 = vmatmul.f32.gmra.mxu3 %v10259_v25  ;;  %v4361_v61 = vmul.f32 %v6257_v9, %v4201_v4  ;;  %v10274_v19 = vsel %vm10241_vm14, %v3804_v29, %v3800_v57  ;;  %v3241_v27 = vmul.f32 0.5, %v11887_v35 }
 0x3f5   : > { %v4138_v23 = vmul.f32 %v4106_v40, %v10224_v49  ;;  %v3950_v38 = vmul.f32 1.0614054, %v10274_v19  ;;  %v3770_v26 = vsel %vm10280_vm1, %v11884_v48, %v3766_v30  ;;  %v4427_v1 = vmul.f32 %v4395_v24, %v3339_v31  ;;  %v11888_v48 = vld [vmem:[#allocation38_spill] sm:$0xff]  ;;  %v11889_v40 = vld [vmem:[#allocation16_spill] sm:$0xff] }
 0x3f6   : > { %5352 = vmatmul.f32.gmra.mxu0 %v4925_v52  ;;  %v4926_v29 = vand.u32 4294901760, %v4925_v52  ;;  %v4393_v62 = vsub.f32 1.0, %v4361_v61  ;;  %v3774_v59 = vor.u32 1.1754944e-38, %v3773_v32  ;;  %v3337_v9 = vsel %vm3305_vm12, 1.0, %v11673_v16 }
 0x3f7   : > { %v4170_v56 = vadd.f32 0.2548296, %v4138_v23  ;;  %v3982_v7 = vadd.f32 -1.4531521, %v3950_v38  ;;  %vm3772_vm8 = vcmp.eq.f32.partialorder %v3771_v15, 8.507059e+37  ;;  %vm3306_vm9 = vcmp.ge.f32.partialorder %v11888_v48, 0.0  ;;  %v4572_v23 = vpop.permute.xlu0 %4571 }
 0x3f8   : > { %5554 = vmatmul.f32.gmra.mxu1 %v4926_v29  ;;  %v4927_v47 = vsub.f32 %v4925_v52, %v4926_v29  ;;  %v4425_v42 = vmul.f32 %v4393_v62, %v3337_v9  ;;  %v10298_v31 = vsel %vm3772_vm8, %v3774_v59, %v3770_v26  ;;  %v4325_v57 = vmul.f32 1.442695, %v11889_v40  ;;  %v11890_v52 = vld [vmem:[#allocation61_spill] sm:$0xff]  ;;  %v11891_v62 = vld [vmem:[#allocation26_spill] sm:$0xff] }
 0x3f9   : > { %v4202_v24 = vmul.f32 %v4170_v56, %v10224_v49  ;;  %v4014_v4 = vmul.f32 %v3982_v7, %v10274_v19  ;;  %v3948_v30 = vmul.f32 1.0614054, %v10298_v31  ;;  %v6259_v13 = vpop.eup %6258  ;;  %v4459_v32 = vadd.f32 1.0, %v4427_v1  ;;  %v11892_v9 = vld [vmem:[#allocation86_spill] sm:$0xff]  ;;  %v11893_v56 = vld [vmem:[#allocation43_spill] sm:$0xff] }
 0x3fa   : > { %v4928_v61 = vand.u32 4294901760, %v4927_v47  ;;  %v4457_v39 = vadd.f32 1.0, %v4425_v42  ;;  %v4934_v15 = vand.u32 4294901760, %v10211_v43  ;;  %v3243_v35 = vmul.f32 0.5, %v11890_v52  ;;  %v4576_v47 = vpop.permute.xlu2 %4575  ;;  %v11894_v52 = vld [vmem:[#allocation51_spill] sm:$0xff] }
 0x3fb   : > { %v4362_v38 = vmul.f32 %v6259_v13, %v4202_v24  ;;  %v4046_v26 = vadd.f32 1.4214138, %v4014_v4  ;;  %v3980_v29 = vadd.f32 -1.4531521, %v3948_v30  ;;  %v3242_v59 = vmul.f32 0.5, %v11891_v62 }
 0x3fc   : > { %4929 = vmatmul.f32.gmra.mxu2 %v4928_v61  ;;  %5178 = vmatmul.f32.gmra.mxu3 %v10190_v18  ;;  %v4489_v49 = vmul.f32 %v4457_v39, %v3241_v27  ;;  %v3338_v1 = vsel %vm3306_vm9, 1.0, %v11673_v16  ;;  %v3778_v7 = vmul.f32 %v11893_v56, %v11892_v9  ;;  %6260 = vpow2.f32 %v4325_v57  ;;  %v10321_v57 = vpop.f32.mrf.mxu3 }
 0x3fd   : > { %v4394_v42 = vsub.f32 1.0, %v4362_v38  ;;  %v4078_v40 = vmul.f32 %v4046_v26, %v10274_v19  ;;  %v4012_v24 = vmul.f32 %v3980_v29, %v10298_v31  ;;  %v4491_v4 = vmul.f32 %v4459_v32, %v3243_v35  ;;  %v10319_v26 = vpop.f32.mrf.mxu2  ;;  %11895 = vst [vmem:[#allocation82_spill] sm:$0xff] %v10321_v57 }
 0x3fe   : > { %v4649_v30 = vmul.f32 %v4572_v23, %v4489_v49  ;;  %5357 = vmatmul.f32.gmra.mxu0 %v10211_v43  ;;  %v4935_v27 = vsub.f32 %v10211_v43, %v4934_v15  ;;  %v3779_v13 = vsub.f32 1.0, %v3778_v7  ;;  %v4321_v62 = vmul.f32 1.442695, %v11894_v52  ;;  %v4574_v49 = vpop.permute.xlu1 %4573 }
 0x3ff   : > { %v4426_v61 = vmul.f32 %v4394_v42, %v3338_v1  ;;  %v4110_v48 = vadd.f32 -0.28449672, %v4078_v40  ;;  %v4044_v39 = vadd.f32 1.4214138, %v4012_v24  ;;  %v4651_v3 = vmul.f32 %v4576_v47, %v4491_v4 }
 0x400   : > { %v4731_v38 = vsel %vm4675_vm5, %v4649_v30, 0  ;;  %5560 = vmatmul.f32.gmra.mxu1 %v4934_v15  ;;  %v3780_v32 = vmul.f32 %v11893_v56, %v3779_v13  ;;  %vm3783_vm10 = vweird.f32 %v11893_v56  ;;  %v4936_v1 = vand.u32 4294901760, %v4935_v27 }
 0x401   : > { %v10325_v35 = vand.u32 4294901760, %v4731_v38  ;;  %v4458_v43 = vadd.f32 1.0, %v4426_v61  ;;  %v4142_v23 = vmul.f32 %v4110_v48, %v10274_v19  ;;  %v4076_v29 = vmul.f32 %v4044_v39, %v10298_v31 }
 0x402   : > { %v3781_v7 = vadd.f32 %v11893_v56, %v3780_v32  ;;  %vm3782_vm2 = vweird.f32 %v11892_v9  ;;  %v3786_v15 = vand.u32 2147483647, %v11892_v9  ;;  %v6261_v47 = vpop.eup %6260  ;;  %v4737_v27 = vsel %vm4675_vm5, %v4651_v3, 0 }
 0x403   : > { %v4941_v42 = vsub.f32 %v4731_v38, %v10325_v35  ;;  %v4490_v40 = vmul.f32 %v4458_v43, %v3242_v59  ;;  %v4174_v24 = vadd.f32 0.2548296, %v4142_v23  ;;  %v4108_v4 = vadd.f32 -0.28449672, %v4076_v29  ;;  %vm10335_vm3 = vmor %vm3782_vm2, %vm3783_vm10 }
 0x404   : > { %4937 = vmatmul.f32.gmra.mxu2 %v4936_v1  ;;  %5182 = vmatmul.f32.gmra.mxu3 %v10325_v35  ;;  %6262 = vpow2.f32 %v4321_v62  ;;  %v3785_v13 = vsel %vm10335_vm3, %v11893_v56, %v3781_v7  ;;  %v3788_v59 = vand.u32 2147483648, %v11892_v9  ;;  %v11898_v38 = vsub.f32 0.0, %v10091_v45  ;;  %v10373_v30 = vpop.f32.mrf.mxu3 }
 0x405   : > { %v4650_v61 = vmul.f32 %v4574_v49, %v4490_v40  ;;  %v4206_v48 = vmul.f32 %v4174_v24, %v10274_v19  ;;  %v4942_v39 = vand.u32 4294901760, %v4941_v42  ;;  %v4140_v52 = vmul.f32 %v4108_v4, %v10298_v31  ;;  %v10371_v4 = vpop.f32.mrf.mxu2  ;;  %11902 = vst [vmem:[#allocation54_spill] sm:$0xff] %v10373_v30 }
 0x406   : > { %v10350_v3 = vmul.f32 %v11898_v38, %v10091_v45  ;;  %v10353_v32 = vadd.f32 1.0, %v10199_v44  ;;  %v10356_v62 = vand.u32 2147483647, %v10214_v14  ;;  %5362 = vmatmul.f32.gmra.mxu0 %v4941_v42  ;;  %v3789_v56 = vor.u32 1.1754944e-38, %v3788_v59  ;;  %v11900_v45 = vld [vmem:[#allocation21_spill] sm:$0xff]  ;;  %11901 = vst [vmem:[#allocation34_spill] sm:$0xff] %v10371_v4 }
 0x407   : > { %v4734_v9 = vsel %vm4675_vm5, %v4650_v61, 0  ;;  %v4943_v43 = vsub.f32 %v4941_v42, %v4942_v39  ;;  %v4172_v19 = vadd.f32 0.2548296, %v4140_v52  ;;  %vm3787_vm11 = vcmp.eq.f32.partialorder %v3786_v15, 8.507059e+37  ;;  %v11903_v59 = vld [vmem:[#allocation58_spill] sm:$0xff] }
 0x408   : > { %v10359_v23 = vand.u32 4294901760, %v4737_v27  ;;  %v10361_v29 = vand.u32 4294901760, %v4734_v9  ;;  %5566 = vmatmul.f32.gmra.mxu1 %v4942_v39  ;;  %vm3308_vm12 = vcmp.ge.f32.partialorder %v11900_v45, 0.0  ;;  %v10364_v49 = vsel %vm3787_vm11, %v3789_v56, %v3785_v13 }
 0x409   : > { %v4366_v44 = vmul.f32 %v6261_v47, %v4206_v48  ;;  %v4944_v1 = vand.u32 4294901760, %v4943_v43  ;;  %v4204_v7 = vmul.f32 %v4172_v19, %v10298_v31  ;;  %v3949_v40 = vmul.f32 1.0614054, %v10364_v49 }
 0x40a   : > { %11899 = vst [vmem:[#allocation83_spill] sm:$0xff] %v10361_v29  ;;  %v6263_v24 = vpop.eup %6262  ;;  %6264 = vrcp.f32 %v10353_v32  ;;  %v4949_v42 = vsub.f32 %v4734_v9, %v10361_v29  ;;  %v3838_v13 = vmul.f32 %v10165_v55, %v10108_v8  ;;  %v3411_v47 = vmul.f32 0.3275911, %v10356_v62 }
 0x40b   : > { %vm3310_vm13 = vcmp.ge.f32.partialorder %v11903_v59, 0.0  ;;  %v4364_v31 = vmul.f32 %v6263_v24, %v4204_v7  ;;  %v3981_v61 = vadd.f32 -1.4531521, %v3949_v40  ;;  %v4957_v48 = vsub.f32 %v4737_v27, %v10359_v23 }
 0x40c   : > { %4945 = vmatmul.f32.gmra.mxu2 %v4944_v1  ;;  %5186 = vmatmul.f32.gmra.mxu3 %v10361_v29  ;;  %v3340_v39 = vsel %vm3308_vm12, 1.0, %v11673_v16  ;;  %v4950_v52 = vand.u32 4294901760, %v4949_v42  ;;  %v3839_v38 = vsub.f32 1.0, %v3838_v13  ;;  %v4398_v56 = vsub.f32 1.0, %v4366_v44 }
 0x40d   : > { %v4396_v9 = vsub.f32 1.0, %v4364_v31  ;;  %v4013_v43 = vmul.f32 %v3981_v61, %v10364_v49  ;;  %vm3843_vm14 = vweird.f32 %v10165_v55  ;;  %v3846_v27 = vand.u32 2147483647, %v10108_v8  ;;  %v11904_v31 = vld [vmem:[#allocation19_spill] sm:$0xff] }
 0x40e   : > { %5367 = vmatmul.f32.gmra.mxu0 %v4949_v42  ;;  %v4951_v19 = vsub.f32 %v4949_v42, %v4950_v52  ;;  %v3840_v7 = vmul.f32 %v10165_v55, %v3839_v38  ;;  %v3848_v1 = vand.u32 2147483648, %v10108_v8  ;;  %v10390_v40 = vmul.f32 0.70710677, %v10071_v17  ;;  %v11905_v42 = vld [vmem:[#allocation30_spill] sm:$0xff] }
 0x40f   : > { %v3342_v45 = vsel %vm3310_vm13, 1.0, %v11673_v16  ;;  %v4428_v44 = vmul.f32 %v4396_v9, %v3340_v39  ;;  %v4045_v24 = vadd.f32 1.4214138, %v4013_v43  ;;  %v3244_v61 = vmul.f32 0.5, %v11904_v31  ;;  %v4578_v9 = vpop.permute.xlu0 %4577 }
 0x410   : > { %v10395_v13 = vpop.eup %6264  ;;  %5572 = vmatmul.f32.gmra.mxu1 %v4950_v52  ;;  %v4323_v38 = vmul.f32 1.442695, %v11905_v42  ;;  %v3841_v15 = vadd.f32 %v10165_v55, %v3840_v7  ;;  %vm3842_vm15 = vweird.f32 %v10108_v8  ;;  %v4958_v57 = vand.u32 4294901760, %v4957_v48 }
 0x411   : > { %v4460_v30 = vadd.f32 1.0, %v4428_v44  ;;  %v4077_v29 = vmul.f32 %v4045_v24, %v10364_v49  ;;  %vm3844_vm4 = vmor %vm3842_vm15, %vm3843_vm14  ;;  %v3849_v59 = vor.u32 1.1754944e-38, %v3848_v1  ;;  %v4430_v39 = vmul.f32 %v4398_v56, %v3342_v45  ;;  %v10413_v1 = vpop.f32.mrf.mxu2  ;;  %v10415_v56 = vpop.f32.mrf.mxu3  ;;  %v11908_v44 = vld [vmem:[#allocation90_spill] sm:$0xff] }
 0x412   : > { %v4952_v43 = vand.u32 4294901760, %v4951_v19  ;;  %v3845_v31 = vsel %vm3844_vm4, %v10165_v55, %v3841_v15  ;;  %vm3847_vm6 = vcmp.eq.f32.partialorder %v3846_v27, 8.507059e+37  ;;  %v10405_v52 = vadd.f32 1.0, %v3411_v47  ;;  %11906 = vst [vmem:[#allocation24_spill] sm:$0xff] %v10415_v56 }
 0x413   : > { %v4492_v42 = vmul.f32 %v4460_v30, %v3244_v61  ;;  %v4109_v7 = vadd.f32 -0.28449672, %v4077_v29  ;;  %v10407_v4 = vsel %vm3847_vm6, %v3849_v59, %v3845_v31  ;;  %v10410_v8 = vand.u32 2147483647, %v10390_v40  ;;  %v11907_v30 = vld [vmem:[#allocation78_spill] sm:$0xff] }
 0x414   : > { %4953 = vmatmul.f32.gmra.mxu2 %v4952_v43  ;;  %5190 = vmatmul.f32.gmra.mxu3 %v10359_v23  ;;  %6266 = vpow2.f32 %v4323_v38  ;;  %v3953_v55 = vmul.f32 1.0614054, %v10407_v4  ;;  %v3808_v15 = vmul.f32 %v10146_v0, %v9728_v33  ;;  %v3246_v29 = vmul.f32 0.5, %v11907_v30 }
 0x415   : > { %v4652_v47 = vmul.f32 %v4578_v9, %v4492_v42  ;;  %v4959_v19 = vsub.f32 %v4957_v48, %v4958_v57  ;;  %v4141_v27 = vmul.f32 %v4109_v7, %v10364_v49  ;;  %v4462_v45 = vadd.f32 1.0, %v4430_v39 }
 0x416   : > { %5372 = vmatmul.f32.gmra.mxu0 %v4957_v48  ;;  %vm3309_vm7 = vcmp.ge.f32.partialorder %v11908_v44, 0.0  ;;  %v3985_v24 = vadd.f32 -1.4531521, %v3953_v55  ;;  %v3809_v61 = vsub.f32 1.0, %v3808_v15  ;;  %vm3813_vm1 = vweird.f32 %v10146_v0 }
 0x417   : > { %v4740_v38 = vsel %vm4675_vm5, %v4652_v47, 0  ;;  %v4173_v59 = vadd.f32 0.2548296, %v4141_v27  ;;  %v3818_v43 = vand.u32 2147483648, %v9728_v33  ;;  %v3816_v48 = vand.u32 2147483647, %v9728_v33  ;;  %v4582_v47 = vpop.permute.xlu2 %4581 }
 0x418   : > { %v10426_v31 = vand.u32 4294901760, %v4740_v38  ;;  %5578 = vmatmul.f32.gmra.mxu1 %v4958_v57  ;;  %v4017_v9 = vmul.f32 %v3985_v24, %v10407_v4  ;;  %v3810_v42 = vmul.f32 %v10146_v0, %v3809_v61  ;;  %v4960_v39 = vand.u32 4294901760, %v4959_v19 }
 0x419   : > { %v3341_v7 = vsel %vm3309_vm7, 1.0, %v11673_v16  ;;  %v4205_v55 = vmul.f32 %v4173_v59, %v10364_v49  ;;  %v4331_v15 = vmul.f32 1.442695, %v10134_v10  ;;  %vm3812_vm8 = vweird.f32 %v9728_v33 }
 0x41a   : > { %11909 = vst [vmem:[#allocation68_spill] sm:$0xff] %v10426_v31  ;;  %v6267_v30 = vpop.eup %6266  ;;  %v4965_v27 = vsub.f32 %v4740_v38, %v10426_v31  ;;  %v4049_v44 = vadd.f32 1.4214138, %v4017_v9  ;;  %v3811_v57 = vadd.f32 %v10146_v0, %v3810_v42  ;;  %v4494_v24 = vmul.f32 %v4462_v45, %v3246_v29  ;;  %vm3814_vm9 = vmor %vm3812_vm8, %vm3813_vm1 }
 0x41b   : > { %v4365_v61 = vmul.f32 %v6267_v30, %v4205_v55  ;;  %v3819_v19 = vor.u32 1.1754944e-38, %v3818_v43  ;;  %v3823_v49 = vmul.f32 %v10157_v36, %v10101_v21  ;;  %vm3817_vm10 = vcmp.eq.f32.partialorder %v3816_v48, 8.507059e+37  ;;  %v10446_v55 = vpop.f32.mrf.mxu2  ;;  %v10448_v30 = vpop.f32.mrf.mxu3 }
 0x41c   : > { %4961 = vmatmul.f32.gmra.mxu2 %v4960_v39  ;;  %5194 = vmatmul.f32.gmra.mxu3 %v10426_v31  ;;  %v4966_v10 = vand.u32 4294901760, %v4965_v27  ;;  %v4081_v38 = vmul.f32 %v4049_v44, %v10407_v4  ;;  %v3815_v59 = vsel %vm3814_vm9, %v10146_v0, %v3811_v57  ;;  %v4654_v9 = vmul.f32 %v4582_v47, %v4494_v24  ;;  %v11912_v24 = vld [vmem:[#allocation57_spill] sm:$0xff] }
 0x41d   : > { %v4397_v33 = vsub.f32 1.0, %v4365_v61  ;;  %v10444_v29 = vsel %vm3817_vm10, %v3819_v19, %v3815_v59  ;;  %v3824_v45 = vsub.f32 1.0, %v3823_v49  ;;  %11910 = vst [vmem:[#allocation91_spill] sm:$0xff] %v10446_v55  ;;  %vm3828_vm2 = vweird.f32 %v10157_v36 }
 0x41e   : > { %5377 = vmatmul.f32.gmra.mxu0 %v4965_v27  ;;  %v4967_v42 = vsub.f32 %v4965_v27, %v4966_v10  ;;  %v4113_v43 = vadd.f32 -0.28449672, %v4081_v38  ;;  %11911 = vst [vmem:[#allocation81_spill] sm:$0xff] %v10448_v30  ;;  %v3951_v39 = vmul.f32 1.0614054, %v10444_v29  ;;  %v3833_v47 = vand.u32 2147483648, %v10101_v21 }
 0x41f   : > { %v4429_v44 = vmul.f32 %v4397_v33, %v3341_v7  ;;  %v3825_v0 = vmul.f32 %v10157_v36, %v3824_v45  ;;  %v3831_v48 = vand.u32 2147483647, %v10101_v21  ;;  %v3413_v57 = vmul.f32 0.3275911, %v10410_v8  ;;  %v4580_v7 = vpop.permute.xlu1 %4579 }
 0x420   : > { %v3245_v27 = vmul.f32 0.5, %v11912_v24  ;;  %5584 = vmatmul.f32.gmra.mxu1 %v4966_v10  ;;  %v4145_v61 = vmul.f32 %v4113_v43, %v10407_v4  ;;  %v3983_v19 = vadd.f32 -1.4531521, %v3951_v39  ;;  %v4746_v49 = vsel %vm4675_vm5, %v4654_v9, 0 }
 0x421   : > { %v4461_v38 = vadd.f32 1.0, %v4429_v44  ;;  %v3826_v59 = vadd.f32 %v10157_v36, %v3825_v0  ;;  %vm3827_vm3 = vweird.f32 %v10101_v21  ;;  %v4968_v33 = vand.u32 4294901760, %v4967_v42 }
 0x422   : > { %v4177_v45 = vadd.f32 0.2548296, %v4145_v61  ;;  %v4015_v30 = vmul.f32 %v3983_v19, %v10444_v29  ;;  %vm3829_vm11 = vmor %vm3827_vm3, %vm3828_vm2  ;;  %v3834_v24 = vor.u32 1.1754944e-38, %v3833_v47  ;;  %6268 = vpow2.f32 %v4331_v15 }
 0x423   : > { %v4493_v10 = vmul.f32 %v4461_v38, %v3245_v27  ;;  %v3830_v43 = vsel %vm3829_vm11, %v10157_v36, %v3826_v59  ;;  %vm3832_vm12 = vcmp.eq.f32.partialorder %v3831_v48, 8.507059e+37  ;;  %6270 = vrcp.f32 %v10140_v37 }
 0x424   : > { %v10467_v9 = vmul.f32 0.70710677, %v10097_v5  ;;  %4969 = vmatmul.f32.gmra.mxu2 %v4968_v33  ;;  %v4047_v21 = vadd.f32 1.4214138, %v4015_v30  ;;  %v10469_v42 = vsel %vm3832_vm12, %v3834_v24, %v3830_v43  ;;  %v10471_v39 = vand.u32 4294901760, %v4746_v49  ;;  %v10496_v33 = vpop.f32.mrf.mxu3 }
 0x425   : > { %v4653_v44 = vmul.f32 %v4580_v7, %v4493_v10  ;;  %v4327_v0 = vmul.f32 1.442695, %v10119_v46  ;;  %v3952_v47 = vmul.f32 1.0614054, %v10469_v42  ;;  %v11913_v36 = vsub.f32 0.0, %v10175_v41  ;;  %v10494_v7 = vpop.f32.mrf.mxu2  ;;  %11917 = vst [vmem:[#allocation89_spill] sm:$0xff] %v10496_v33 }
 0x426   : > { %v4209_v48 = vmul.f32 %v4177_v45, %v10407_v4  ;;  %v4079_v27 = vmul.f32 %v4047_v21, %v10444_v29  ;;  %v3883_v30 = vmul.f32 %v10395_v13, %v10353_v32  ;;  %6272 = vrcp.f32 %v10405_v52  ;;  %11916 = vst [vmem:[#allocation67_spill] sm:$0xff] %v10494_v7 }
 0x427   : > { %v10478_v15 = vmul.f32 %v11913_v36, %v10175_v41  ;;  %v10485_v61 = vadd.f32 1.0, %v3413_v57  ;;  %v4743_v46 = vsel %vm4675_vm5, %v4653_v44, 0  ;;  %v3984_v19 = vadd.f32 -1.4531521, %v3952_v47  ;;  %v11915_v41 = vld [vmem:[#allocation27_spill] sm:$0xff] }
 0x428   : > { %v10489_v38 = vand.u32 2147483647, %v10467_v9  ;;  %v10491_v59 = vand.u32 4294901760, %v4743_v46  ;;  %vm3313_vm13 = vcmp.ge.f32.partialorder %v11915_v41, 0.0  ;;  %v4111_v4 = vadd.f32 -0.28449672, %v4079_v27  ;;  %v6269_v45 = vpop.eup %6268 }
 0x429   : > { %v10499_v24 = vsub.f32 %v4746_v49, %v10471_v39  ;;  %6274 = vpow2.f32 %v4327_v0  ;;  %v4016_v57 = vmul.f32 %v3984_v19, %v10469_v42  ;;  %v3884_v10 = vsub.f32 1.0, %v3883_v30  ;;  %v10502_v43 = vpop.eup %6270  ;;  %v11918_v30 = vld [vmem:[#allocation25_spill] sm:$0xff] }
 0x42a   : > { %11914 = vst [vmem:[#allocation18_spill] sm:$0xff] %v10491_v59  ;;  %v4973_v21 = vsub.f32 %v4743_v46, %v10491_v59  ;;  %5198 = vmatmul.f32.gmra.mxu3 %v10491_v59  ;;  %v4369_v44 = vmul.f32 %v6269_v45, %v4209_v48  ;;  %v4143_v47 = vmul.f32 %v4111_v4, %v10444_v29  ;;  %v3893_v36 = vand.u32 2147483648, %v10353_v32 }
 0x42b   : > { %v4048_v27 = vadd.f32 1.4214138, %v4016_v57  ;;  %v3885_v33 = vmul.f32 %v10395_v13, %v3884_v10  ;;  %vm3888_vm14 = vweird.f32 %v10395_v13  ;;  %v3891_v49 = vand.u32 2147483647, %v10353_v32 }
 0x42c   : > { %5382 = vmatmul.f32.gmra.mxu0 %v4973_v21  ;;  %v4974_v0 = vand.u32 4294901760, %v4973_v21  ;;  %vm3311_vm15 = vcmp.ge.f32.partialorder %v11918_v30, 0.0  ;;  %v4175_v19 = vadd.f32 0.2548296, %v4143_v47  ;;  %v4329_v46 = vmul.f32 1.442695, %v10131_v54  ;;  %v10513_v59 = vpop.eup %6272  ;;  %v10539_v41 = vpop.f32.mrf.mxu3 }
 0x42d   : > { %v4080_v48 = vmul.f32 %v4048_v27, %v10469_v42  ;;  %v4982_v4 = vand.u32 4294901760, %v10499_v24  ;;  %v3886_v45 = vadd.f32 %v10395_v13, %v3885_v33  ;;  %vm3887_vm4 = vweird.f32 %v10353_v32  ;;  %11920 = vst [vmem:[#allocation15_spill] sm:$0xff] %v10539_v41 }
 0x42e   : > { %v4401_v57 = vsub.f32 1.0, %v4369_v44  ;;  %5590 = vmatmul.f32.gmra.mxu1 %v4974_v0  ;;  %v4975_v10 = vsub.f32 %v4973_v21, %v4974_v0  ;;  %v4207_v7 = vmul.f32 %v4175_v19, %v10444_v29  ;;  %vm3889_vm6 = vmor %vm3887_vm4, %vm3888_vm14  ;;  %v3894_v47 = vor.u32 1.1754944e-38, %v3893_v36  ;;  %v11919_v0 = vld [vmem:[#allocation88_spill] sm:$0xff]  ;;  %v10537_v19 = vpop.f32.mrf.mxu2 }
 0x42f   : > { %v6275_v54 = vpop.eup %6274  ;;  %v4112_v56 = vadd.f32 -0.28449672, %v4080_v48  ;;  %v3890_v31 = vsel %vm3889_vm6, %v10395_v13, %v3886_v45  ;;  %vm3892_vm7 = vcmp.eq.f32.partialorder %v3891_v49, 8.507059e+37  ;;  %v3853_v27 = vmul.f32 %v10502_v43, %v10140_v37 }
 0x430   : > { %v4976_v33 = vand.u32 4294901760, %v4975_v10  ;;  %v4367_v55 = vmul.f32 %v6275_v54, %v4207_v7  ;;  %6276 = vpow2.f32 %v4329_v46  ;;  %v10525_v32 = vsel %vm3892_vm7, %v3894_v47, %v3890_v31  ;;  %v11922_v54 = vld [vmem:[#allocation72_spill] sm:$0xff] }
 0x431   : > { %v3345_v29 = vsel %vm3313_vm13, 1.0, %v11673_v16  ;;  %v4144_v21 = vmul.f32 %v4112_v56, %v10469_v42  ;;  %v3956_v44 = vmul.f32 1.0614054, %v10525_v32  ;;  %v3854_v36 = vsub.f32 1.0, %v3853_v27 }
 0x432   : > { %v3249_v13 = vmul.f32 0.5, %v11919_v0  ;;  %v4433_v49 = vmul.f32 %v4401_v57, %v3345_v29  ;;  %4977 = vmatmul.f32.gmra.mxu2 %v4976_v33  ;;  %5202 = vmatmul.f32.gmra.mxu3 %v10471_v39  ;;  %v3343_v31 = vsel %vm3311_vm15, 1.0, %v11673_v16  ;;  %v4399_v7 = vsub.f32 1.0, %v4367_v55  ;;  %v11921_v55 = vld [vmem:[#allocation79_spill] sm:$0xff] }
 0x433   : > { %v4176_v46 = vadd.f32 0.2548296, %v4144_v21  ;;  %v4983_v56 = vsub.f32 %v10499_v24, %v4982_v4  ;;  %v3988_v48 = vadd.f32 -1.4531521, %v3956_v44  ;;  %v3863_v45 = vand.u32 2147483648, %v10140_v37 }
 0x434   : > { %v4431_v10 = vmul.f32 %v4399_v7, %v3343_v31  ;;  %5387 = vmatmul.f32.gmra.mxu0 %v10499_v24  ;;  %v3855_v57 = vmul.f32 %v10502_v43, %v3854_v36  ;;  %vm3858_vm1 = vweird.f32 %v10502_v43  ;;  %v3861_v30 = vand.u32 2147483647, %v10140_v37  ;;  %v4584_v36 = vpop.permute.xlu0 %4583 }
 0x435   : > { %v3247_v47 = vmul.f32 0.5, %v11921_v55  ;;  %vm3312_vm8 = vcmp.ge.f32.partialorder %v11922_v54, 0.0  ;;  %v4208_v27 = vmul.f32 %v4176_v46, %v10469_v42  ;;  %v4020_v33 = vmul.f32 %v3988_v48, %v10525_v32  ;;  %v10575_v54 = vpop.f32.mrf.mxu3 }
 0x436   : > { %v6277_v29 = vpop.eup %6276  ;;  %v4465_v21 = vadd.f32 1.0, %v4433_v49  ;;  %v4463_v44 = vadd.f32 1.0, %v4431_v10  ;;  %5596 = vmatmul.f32.gmra.mxu1 %v4982_v4  ;;  %v3856_v24 = vadd.f32 %v10502_v43, %v3855_v57  ;;  %vm3857_vm9 = vweird.f32 %v10140_v37  ;;  %v10558_v4 = vpop.f32.mrf.mxu0  ;;  %11923 = vst [vmem:[#allocation76_spill] sm:$0xff] %v10575_v54 }
 0x437   : > { %v4368_v0 = vmul.f32 %v6277_v29, %v4208_v27  ;;  %v4052_v31 = vadd.f32 1.4214138, %v4020_v33  ;;  %vm3859_vm10 = vmor %vm3857_vm9, %vm3858_vm1  ;;  %v3864_v7 = vor.u32 1.1754944e-38, %v3863_v45  ;;  %v3868_v42 = vmul.f32 %v10513_v59, %v10405_v52  ;;  %v4588_v10 = vpop.permute.xlu2 %4587 }
 0x438   : > { %v4495_v46 = vmul.f32 %v4463_v44, %v3247_v47  ;;  %v4984_v48 = vand.u32 4294901760, %v4983_v56  ;;  %v3860_v49 = vsel %vm3859_vm10, %v10502_v43, %v3856_v24  ;;  %vm3862_vm2 = vcmp.eq.f32.partialorder %v3861_v30, 8.507059e+37  ;;  %v10568_v43 = vpop.f32.mrf.mxu1 }
 0x439   : > { %v4400_v57 = vsub.f32 1.0, %v4368_v0  ;;  %v4084_v37 = vmul.f32 %v4052_v31, %v10525_v32  ;;  %v10561_v55 = vsel %vm3862_vm2, %v3864_v7, %v3860_v49  ;;  %v3869_v27 = vsub.f32 1.0, %v3868_v42  ;;  %v11924_v7 = vld [vmem:[#allocation13_spill] sm:$0xff] }
 0x43a   : > { %v4497_v33 = vmul.f32 %v4465_v21, %v3249_v13  ;;  %v4655_v29 = vmul.f32 %v4584_v36, %v4495_v46  ;;  %v3344_v45 = vsel %vm3312_vm8, 1.0, %v11673_v16  ;;  %4985 = vmatmul.f32.gmra.mxu2 %v4984_v48  ;;  %v3954_v56 = vmul.f32 1.0614054, %v10561_v55  ;;  %v10573_v36 = vpop.f32.mrf.mxu2  ;;  %v4586_v48 = vpop.permute.xlu1 %4585 }
 0x43b   : > { %6278 = vrcp.f32 %v10485_v61  ;;  %v4432_v30 = vmul.f32 %v4400_v57, %v3344_v45  ;;  %v4116_v47 = vadd.f32 -0.28449672, %v4084_v37  ;;  %v3870_v44 = vmul.f32 %v10513_v59, %v3869_v27 }
 0x43c   : > { %v3414_v24 = vmul.f32 0.3275911, %v10489_v38  ;;  %v4657_v0 = vmul.f32 %v4588_v10, %v4497_v33  ;;  %v4749_v13 = vsel %vm4675_vm5, %v4655_v29, 0  ;;  %v3986_v21 = vadd.f32 -1.4531521, %v3954_v56 }
 0x43d   : > { %v10577_v31 = vand.u32 4294901760, %v4749_v13  ;;  %v3248_v42 = vmul.f32 0.5, %v11924_v7  ;;  %v4464_v46 = vadd.f32 1.0, %v4432_v30  ;;  %vm3873_vm3 = vweird.f32 %v10513_v59 }
 0x43e   : > { %v4148_v49 = vmul.f32 %v4116_v47, %v10525_v32  ;;  %v4337_v57 = vmul.f32 1.442695, %v10478_v15  ;;  %v4018_v10 = vmul.f32 %v3986_v21, %v10561_v55  ;;  %v3871_v37 = vadd.f32 %v10513_v59, %v3870_v44  ;;  %v10605_v41 = vpop.f32.mrf.mxu0 }
 0x43f   : > { %v4989_v27 = vsub.f32 %v4749_v13, %v10577_v31  ;;  %v4496_v33 = vmul.f32 %v4464_v46, %v3248_v42  ;;  %5206 = vmatmul.f32.gmra.mxu3 %v10577_v31  ;;  %vm3872_vm11 = vweird.f32 %v10405_v52  ;;  %v3876_v29 = vand.u32 2147483647, %v10405_v52 }
 0x440   : > { %v4243_v45 = vsub.f32 0.0, %v10356_v62  ;;  %v4755_v56 = vsel %vm4675_vm5, %v4657_v0, 0  ;;  %v4050_v30 = vadd.f32 1.4214138, %v4018_v10  ;;  %vm10591_vm12 = vmor %vm3872_vm11, %vm3873_vm3  ;;  %v3878_v47 = vand.u32 2147483648, %v10405_v52 }
 0x441   : > { %v10596_v44 = vpop.eup %6278  ;;  %v4656_v13 = vmul.f32 %v4586_v48, %v4496_v33  ;;  %5392 = vmatmul.f32.gmra.mxu0 %v4989_v27  ;;  %v4990_v21 = vand.u32 4294901760, %v4989_v27  ;;  %v4333_v7 = vmul.f32 1.442695, %v10350_v3  ;;  %v3875_v42 = vsel %vm10591_vm12, %v10513_v59, %v3871_v37 }
 0x442   : > { %v10602_v46 = vadd.f32 1.0, %v3414_v24  ;;  %v4180_v0 = vadd.f32 0.2548296, %v4148_v49  ;;  %v4082_v10 = vmul.f32 %v4050_v30, %v10561_v55  ;;  %v3879_v54 = vor.u32 1.1754944e-38, %v3878_v47  ;;  %v10614_v24 = vpop.f32.mrf.mxu1  ;;  %v10623_v47 = vpop.f32.mrf.mxu2 }
 0x443   : > { %v4752_v52 = vsel %vm4675_vm5, %v4656_v13, 0  ;;  %6280 = vpow2.f32 %v4337_v57  ;;  %5602 = vmatmul.f32.gmra.mxu1 %v4990_v21  ;;  %v4991_v48 = vsub.f32 %v4989_v27, %v4990_v21  ;;  %vm3877_vm13 = vcmp.eq.f32.partialorder %v3876_v29, 8.507059e+37  ;;  %11928 = vst [vmem:[#allocation47_spill] sm:$0xff] %v10623_v47 }
 0x444   : > { %v10608_v33 = vand.u32 4294901760, %v4755_v56  ;;  %v10610_v3 = vand.u32 4294901760, %v4752_v52  ;;  %v4114_v15 = vadd.f32 -0.28449672, %v4082_v10  ;;  %v10612_v59 = vsel %vm3877_vm13, %v3879_v54, %v3875_v42  ;;  %v10625_v54 = vpop.f32.mrf.mxu3 }
 0x445   : > { %v4992_v49 = vand.u32 4294901760, %v4991_v48  ;;  %6282 = vpow2.f32 %v4333_v7  ;;  %v3955_v37 = vmul.f32 1.0614054, %v10612_v59  ;;  %v3898_v30 = vmul.f32 %v10596_v44, %v10485_v61  ;;  %11929 = vst [vmem:[#allocation44_spill] sm:$0xff] %v10625_v54 }
 0x446   : > { %11927 = vst [vmem:[#allocation11_spill] sm:$0xff] %v10610_v3  ;;  %6284 = vrcp.f32 %v10602_v46  ;;  %v4997_v57 = vsub.f32 %v4752_v52, %v10610_v3  ;;  %v4212_v27 = vmul.f32 %v4180_v0, %v10525_v32  ;;  %v4146_v29 = vmul.f32 %v4114_v15, %v10561_v55 }
 0x447   : > { %v4275_v13 = vmul.f32 %v4243_v45, %v10356_v62  ;;  %v4245_v21 = vsub.f32 0.0, %v10410_v8  ;;  %4993 = vmatmul.f32.gmra.mxu2 %v4992_v49  ;;  %5210 = vmatmul.f32.gmra.mxu3 %v10610_v3  ;;  %v3987_v7 = vadd.f32 -1.4531521, %v3955_v37  ;;  %v3899_v42 = vsub.f32 1.0, %v3898_v30 }
 0x448   : > { %v5005_v10 = vsub.f32 %v4755_v56, %v10608_v33  ;;  %v4178_v52 = vadd.f32 0.2548296, %v4146_v29  ;;  %v4998_v48 = vand.u32 4294901760, %v4997_v57  ;;  %v3908_v32 = vand.u32 2147483648, %v10485_v61 }
 0x449   : > { %v6281_v0 = vpop.eup %6280  ;;  %5397 = vmatmul.f32.gmra.mxu0 %v4997_v57  ;;  %v4019_v15 = vmul.f32 %v3987_v7, %v10612_v59  ;;  %v3900_v54 = vmul.f32 %v10596_v44, %v3899_v42  ;;  %vm3903_vm14 = vweird.f32 %v10596_v44  ;;  %v3906_v62 = vand.u32 2147483647, %v10485_v61 }
 0x44a   : > { %vm3316_vm15 = vcmp.ge.f32.partialorder %v10154_v11, 0.0  ;;  %v4372_v45 = vmul.f32 %v6281_v0, %v4212_v27  ;;  %v4210_v49 = vmul.f32 %v4178_v52, %v10561_v55  ;;  %v4999_v56 = vsub.f32 %v4997_v57, %v4998_v48  ;;  %v10645_v55 = vpop.f32.mrf.mxu0 }
 0x44b   : > { %v6283_v37 = vpop.eup %6282  ;;  %vm3314_vm4 = vcmp.ge.f32.partialorder %v10057_v51, 0.0  ;;  %5608 = vmatmul.f32.gmra.mxu1 %v4998_v48  ;;  %v4051_v30 = vadd.f32 1.4214138, %v4019_v15  ;;  %v3901_v29 = vadd.f32 %v10596_v44, %v3900_v54  ;;  %vm3902_vm6 = vweird.f32 %v10485_v61 }
 0x44c   : > { %v10641_v7 = vpop.eup %6284  ;;  %v4370_v42 = vmul.f32 %v6283_v37, %v4210_v49  ;;  %v5006_v3 = vand.u32 4294901760, %v5005_v10  ;;  %v4335_v47 = vmul.f32 1.442695, %v4275_v13  ;;  %vm3904_vm7 = vmor %vm3902_vm6, %vm3903_vm14  ;;  %v3909_v27 = vor.u32 1.1754944e-38, %v3908_v32  ;;  %v10652_v49 = vpop.f32.mrf.mxu1 }
 0x44d   : > { %v5000_v57 = vand.u32 4294901760, %v4999_v56  ;;  %v4083_v52 = vmul.f32 %v4051_v30, %v10612_v59  ;;  %v3905_v48 = vsel %vm3904_vm7, %v10596_v44, %v3901_v29  ;;  %vm3907_vm1 = vcmp.eq.f32.partialorder %v3906_v62, 8.507059e+37  ;;  %v10666_v51 = vpop.f32.mrf.mxu3 }
 0x44e   : > { %v4277_v54 = vmul.f32 %v4245_v21, %v10410_v8  ;;  %v4404_v61 = vsub.f32 1.0, %v4372_v45  ;;  %v4402_v0 = vsub.f32 1.0, %v4370_v42  ;;  %v10650_v15 = vsel %vm3907_vm1, %v3909_v27, %v3905_v48  ;;  %v10664_v45 = vpop.f32.mrf.mxu2 }
 0x44f   : > { %v3346_v13 = vsel %vm3314_vm4, 1.0, %v11673_v16  ;;  %5001 = vmatmul.f32.gmra.mxu2 %v5000_v57  ;;  %5214 = vmatmul.f32.gmra.mxu3 %v10608_v33  ;;  %v4115_v32 = vadd.f32 -0.28449672, %v4083_v52  ;;  %v3957_v56 = vmul.f32 1.0614054, %v10650_v15  ;;  %v3913_v44 = vmul.f32 %v10641_v7, %v10602_v46  ;;  %v4590_v52 = vpop.permute.xlu0 %4589 }
 0x450   : > { %v3348_v8 = vsel %vm3316_vm15, 1.0, %v11673_v16  ;;  %v4434_v21 = vmul.f32 %v4402_v0, %v3346_v13  ;;  %v5007_v62 = vsub.f32 %v5005_v10, %v5006_v3  ;;  %6286 = vpow2.f32 %v4335_v47 }
 0x451   : > { %v3250_v37 = vmul.f32 0.5, %v9799_v60  ;;  %5402 = vmatmul.f32.gmra.mxu0 %v5005_v10  ;;  %v4147_v30 = vmul.f32 %v4115_v32, %v10612_v59  ;;  %v3989_v29 = vadd.f32 -1.4531521, %v3957_v56  ;;  %v3914_v42 = vsub.f32 1.0, %v3913_v44 }
 0x452   : > { %v4436_v27 = vmul.f32 %v4404_v61, %v3348_v8  ;;  %v4466_v57 = vadd.f32 1.0, %v4434_v21  ;;  %vm3918_vm8 = vweird.f32 %v10641_v7  ;;  %v3923_v11 = vand.u32 2147483648, %v10602_v46 }
 0x453   : > { %5614 = vmatmul.f32.gmra.mxu1 %v5006_v3  ;;  %v4179_v47 = vadd.f32 0.2548296, %v4147_v30  ;;  %v4021_v48 = vmul.f32 %v3989_v29, %v10650_v15  ;;  %v3915_v0 = vmul.f32 %v10641_v7, %v3914_v42  ;;  %v3921_v60 = vand.u32 2147483647, %v10602_v46  ;;  %v10681_v29 = vpop.f32.mrf.mxu0 }
 0x454   : > { %v4498_v10 = vmul.f32 %v4466_v57, %v3250_v37  ;;  %v5008_v13 = vand.u32 4294901760, %v5007_v62  ;;  %vm3315_vm9 = vcmp.ge.f32.partialorder %v10214_v14, 0.0  ;;  %vm3917_vm10 = vweird.f32 %v10602_v46  ;;  %v10690_v57 = vpop.f32.mrf.mxu1 }
 0x455   : > { %v4211_v61 = vmul.f32 %v4179_v47, %v10612_v59  ;;  %v4053_v32 = vadd.f32 1.4214138, %v4021_v48  ;;  %v3916_v56 = vadd.f32 %v10641_v7, %v3915_v0  ;;  %v4468_v3 = vadd.f32 1.0, %v4436_v27  ;;  %vm3919_vm2 = vmor %vm3917_vm10, %vm3918_vm8 }
 0x456   : > { %v6287_v44 = vpop.eup %6286  ;;  %v4658_v8 = vmul.f32 %v4590_v52, %v4498_v10  ;;  %v4339_v21 = vmul.f32 1.442695, %v4277_v54  ;;  %v3924_v30 = vor.u32 1.1754944e-38, %v3923_v11  ;;  %vm3922_vm3 = vcmp.eq.f32.partialorder %v3921_v60, 8.507059e+37  ;;  %v4594_v11 = vpop.permute.xlu2 %4593 }
 0x457   : > { %5009 = vmatmul.f32.gmra.mxu2 %v5008_v13  ;;  %v4371_v62 = vmul.f32 %v6287_v44, %v4211_v61  ;;  %v4085_v37 = vmul.f32 %v4053_v32, %v10650_v15  ;;  %v3920_v59 = vsel %vm3919_vm2, %v10641_v7, %v3916_v56  ;;  %v4246_v42 = vsub.f32 0.0, %v10489_v38  ;;  %v10700_v60 = vpop.f32.mrf.mxu3 }
 0x458   : > { %v3252_v46 = vmul.f32 0.5, %v9997_v58  ;;  %v4758_v27 = vsel %vm4675_vm5, %v4658_v8, 0  ;;  %v10688_v54 = vsel %vm3922_vm3, %v3924_v30, %v3920_v59  ;;  %v3347_v7 = vsel %vm3315_vm9, 1.0, %v11673_v16  ;;  %v10698_v58 = vpop.f32.mrf.mxu2 }
 0x459   : > { %v10692_v52 = vand.u32 4294901760, %v4758_v27  ;;  %v4403_v47 = vsub.f32 1.0, %v4371_v62  ;;  %v4117_v48 = vadd.f32 -0.28449672, %v4085_v37  ;;  %v3958_v0 = vmul.f32 1.0614054, %v10688_v54  ;;  %v4592_v37 = vpop.permute.xlu1 %4591 }
 0x45a   : > { %v4500_v10 = vmul.f32 %v4468_v3, %v3252_v46  ;;  %6288 = vpow2.f32 %v4339_v21  ;;  %v4278_v44 = vmul.f32 %v4246_v42, %v10489_v38  ;;  %v3251_v8 = vmul.f32 0.5, %v10015_v63 }
 0x45b   : > { %v5013_v13 = vsub.f32 %v4758_v27, %v10692_v52  ;;  %5218 = vmatmul.f32.gmra.mxu3 %v10692_v52  ;;  %v4435_v61 = vmul.f32 %v4403_v47, %v3347_v7  ;;  %v4149_v32 = vmul.f32 %v4117_v48, %v10650_v15  ;;  %v3990_v56 = vadd.f32 -1.4531521, %v3958_v0  ;;  %v10711_v63 = vpop.f32.mrf.mxu0 }
 0x45c   : > { %v4660_v3 = vmul.f32 %v4594_v11, %v4500_v10  ;;  %vm3317_vm11 = vcmp.ge.f32.partialorder %v10390_v40, 0.0  ;;  %v4341_v38 = vmul.f32 1.442695, %v4278_v44  ;;  %vm3318_vm12 = vcmp.ge.f32.partialorder %v10467_v9, 0.0 }
 0x45d   : > { %v4467_v14 = vadd.f32 1.0, %v4435_v61  ;;  %5407 = vmatmul.f32.gmra.mxu0 %v5013_v13  ;;  %v5014_v21 = vand.u32 4294901760, %v5013_v13  ;;  %v4181_v30 = vadd.f32 0.2548296, %v4149_v32  ;;  %v4022_v62 = vmul.f32 %v3990_v56, %v10688_v54 }
 0x45e   : > { %v4764_v0 = vsel %vm4675_vm5, %v4660_v3, 0  ;;  %6290 = vpow2.f32 %v4341_v38 }
 0x45f   : > { %v4499_v59 = vmul.f32 %v4467_v14, %v3251_v8  ;;  %5620 = vmatmul.f32.gmra.mxu1 %v5014_v21  ;;  %v4213_v46 = vmul.f32 %v4181_v30, %v10650_v15  ;;  %v5015_v27 = vsub.f32 %v5013_v13, %v5014_v21  ;;  %v4054_v47 = vadd.f32 1.4214138, %v4022_v62  ;;  %v10716_v32 = vpop.f32.mrf.mxu3  ;;  %v10718_v15 = vpop.f32.mrf.mxu1 }
 0x460   : > { %v6289_v48 = vpop.eup %6288  ;;  %v10714_v61 = vpop.f32.mrf.mxu2  ;;  %v10721_v8 = vand.u32 4294901760, %v4764_v0  ;;  %v3349_v14 = vsel %vm3317_vm11, 1.0, %v11673_v16 }
 0x461   : > { %v4659_v42 = vmul.f32 %v4592_v37, %v4499_v59  ;;  %v4373_v11 = vmul.f32 %v6289_v48, %v4213_v46  ;;  %v5016_v10 = vand.u32 4294901760, %v5015_v27  ;;  %v4086_v7 = vmul.f32 %v4054_v47, %v10688_v54  ;;  %v4596_v47 = vpop.permute.xlu0 %4595 }
 0x462   : > { %v3253_v37 = vmul.f32 0.5, %v10071_v17  ;;  %v5029_v27 = vsub.f32 %v4764_v0, %v10721_v8 }
 0x463   : > { %v4761_v13 = vsel %vm4675_vm5, %v4659_v42, 0  ;;  %v4405_v56 = vsub.f32 1.0, %v4373_v11  ;;  %5017 = vmatmul.f32.gmra.mxu2 %v5016_v10  ;;  %v4118_v3 = vadd.f32 -0.28449672, %v4086_v7 }
 0x464   : > { %v10723_v44 = vand.u32 4294901760, %v4761_v13  ;;  %v6291_v38 = vpop.eup %6290 }
 0x465   : > { %v4437_v21 = vmul.f32 %v4405_v56, %v3349_v14  ;;  %v4150_v30 = vmul.f32 %v4118_v3, %v10688_v54  ;;  %v10739_v56 = vpop.f32.mrf.mxu0  ;;  %v5030_v3 = vand.u32 4294901760, %v5029_v27 }
 0x466   : > { %v5021_v62 = vsub.f32 %v4761_v13, %v10723_v44  ;;  %5222 = vmatmul.f32.gmra.mxu3 %v10723_v44 }
 0x467   : > { %v4469_v59 = vadd.f32 1.0, %v4437_v21  ;;  %v4182_v46 = vadd.f32 0.2548296, %v4150_v30  ;;  %v10736_v7 = vpop.f32.mrf.mxu3  ;;  %v10741_v14 = vpop.f32.mrf.mxu1 }
 0x468   : > { %5412 = vmatmul.f32.gmra.mxu0 %v5021_v62  ;;  %v5022_v48 = vand.u32 4294901760, %v5021_v62  ;;  %v10734_v10 = vpop.f32.mrf.mxu2 }
 0x469   : > { %v4501_v42 = vmul.f32 %v4469_v59, %v3253_v37  ;;  %v4214_v40 = vmul.f32 %v4182_v46, %v10688_v54  ;;  %v5031_v59 = vsub.f32 %v5029_v27, %v5030_v3  ;;  %v3254_v46 = vmul.f32 0.5, %v10097_v5 }
 0x46a   : > { %5626 = vmatmul.f32.gmra.mxu1 %v5022_v48  ;;  %v5023_v11 = vsub.f32 %v5021_v62, %v5022_v48  ;;  %v3350_v62 = vsel %vm3318_vm12, 1.0, %v11673_v16  ;;  %v4598_v48 = vpop.permute.xlu1 %4597 }
 0x46b   : > { %v4661_v13 = vmul.f32 %v4596_v47, %v4501_v42  ;;  %v4374_v17 = vmul.f32 %v6291_v38, %v4214_v40 }
 0x46c   : > { %v5024_v0 = vand.u32 4294901760, %v5023_v11  ;;  %v5032_v11 = vand.u32 4294901760, %v5031_v59 }
 0x46d   : > { %v4767_v21 = vsel %vm4675_vm5, %v4661_v13, 0  ;;  %v4406_v54 = vsub.f32 1.0, %v4374_v17  ;;  %v10754_v17 = vpop.f32.mrf.mxu0 }
 0x46e   : > { %v10744_v30 = vand.u32 4294901760, %v4767_v21  ;;  %5025 = vmatmul.f32.gmra.mxu2 %v5024_v0  ;;  %5226 = vmatmul.f32.gmra.mxu3 %v10721_v8 }
 0x46f   : > { %v4438_v37 = vmul.f32 %v4406_v54, %v3350_v62  ;;  %v10752_v40 = vpop.f32.mrf.mxu3  ;;  %v10757_v0 = vpop.f32.mrf.mxu1 }
 0x470   : > { %v5037_v9 = vsub.f32 %v4767_v21, %v10744_v30  ;;  %5417 = vmatmul.f32.gmra.mxu0 %v5029_v27  ;;  %v10750_v42 = vpop.f32.mrf.mxu2 }
 0x471   : > { %v4470_v47 = vadd.f32 1.0, %v4438_v37 }
 0x472   : > { %5632 = vmatmul.f32.gmra.mxu1 %v5030_v3  ;;  %v5038_v16 = vand.u32 4294901760, %v5037_v9 }
 0x473   : > { %v4502_v38 = vmul.f32 %v4470_v47, %v3254_v46 }
 0x474   : > { %v5039_v3 = vsub.f32 %v5037_v9, %v5038_v16 }
 0x475   : > { %v4662_v13 = vmul.f32 %v4598_v48, %v4502_v38  ;;  %v10768_v46 = vpop.f32.mrf.mxu0 }
 0x476   : > { %5033 = vmatmul.f32.gmra.mxu2 %v5032_v11  ;;  %5230 = vmatmul.f32.gmra.mxu3 %v10744_v30  ;;  %v5040_v37 = vand.u32 4294901760, %v5039_v3  ;;  %v11936_v3 = vld [vmem:[#allocation60_spill] sm:$0xff] }
 0x477   : > { %v4770_v5 = vsel %vm4675_vm5, %v4662_v13, 0  ;;  %v10765_v62 = vpop.f32.mrf.mxu3  ;;  %v10770_v48 = vpop.f32.mrf.mxu1 }
 0x478   : > { %v10760_v27 = vand.u32 4294901760, %v4770_v5  ;;  %5422 = vmatmul.f32.gmra.mxu0 %v5037_v9  ;;  %v10763_v54 = vpop.f32.mrf.mxu2  ;;  %11930 = vst [vmem:[#allocation36_spill] sm:$0xff] %v10765_v62 }
 0x47a   : > { %v5045_v21 = vsub.f32 %v4770_v5, %v10760_v27  ;;  %5638 = vmatmul.f32.gmra.mxu1 %v5038_v16  ;;  %v11933_v16 = vld [vmem:[#allocation62_spill] sm:$0xff] }
 0x47c   : > { %v5046_v59 = vand.u32 4294901760, %v5045_v21 }
 0x47e   : > { %5041 = vmatmul.f32.gmra.mxu2 %v5040_v37  ;;  %5234 = vmatmul.f32.gmra.mxu3 %v10760_v27  ;;  %v5047_v47 = vsub.f32 %v5045_v21, %v5046_v59 }
 0x47f   : > { %v10774_v38 = vpop.f32.mrf.mxu3 }
 0x480   : > { %5427 = vmatmul.f32.gmra.mxu0 %v5045_v21  ;;  %v10772_v9 = vpop.f32.mrf.mxu2  ;;  %11932 = vst [vmem:[#allocation56_spill] sm:$0xff] %v10774_v38  ;;  %v5048_v11 = vand.u32 4294901760, %v5047_v47  ;;  %v11942_v38 = vld [vmem:[#allocation37_spill] sm:$0xff] }
 0x481   : > { %11931 = vst [vmem:[#allocation10_spill] sm:$0xff] %v10772_v9 }
 0x482   : > { %5644 = vmatmul.f32.gmra.mxu1 %v5046_v59  ;;  %v11939_v59 = vld [vmem:[#allocation33_spill] sm:$0xff] }
 0x486   : > { %5049 = vmatmul.f32.gmra.mxu2 %v5048_v11  ;;  %5842 = vmatmul.f32.vlgmr.msra.gmra.mxu3 %v11933_v16 }
 0x487   : > { %v10779_v5 = vpop.f32.mrf.mxu3 }
 0x488   : > { %v10777_v13 = vpop.f32.mrf.mxu2  ;;  %11935 = vst [vmem:[#allocation92_spill] sm:$0xff] %v10779_v5 }
 0x489   : > { %11934 = vst [vmem:[#allocation40_spill] sm:$0xff] %v10777_v13 }
 0x48e   : > { %5689 = vmatmul.f32.vlgmr.msra.gmra.mxu2 %v11933_v16  ;;  %5846 = vmatmul.f32.gmra.mxu3 %v11936_v3 }
 0x48f   : > { %v10785_v37 = vpop.f32.mrf.mxu3 }
 0x490   : > { %v10783_v21 = vpop.f32.mrf.mxu2  ;;  %11938 = vst [vmem:[#allocation29_spill] sm:$0xff] %v10785_v37 }
 0x491   : > { %11937 = vst [vmem:[#allocation52_spill] sm:$0xff] %v10783_v21  ;;  %v11945_v21 = vld [vmem:[#allocation50_spill] sm:$0xff] }
 0x496   : > { %5693 = vmatmul.f32.gmra.mxu2 %v11936_v3  ;;  %5850 = vmatmul.f32.gmra.mxu3 %v11939_v59  ;;  %v11947_v3 = vld [vmem:[#allocation39_spill] sm:$0xff] }
 0x497   : > { %v10791_v11 = vpop.f32.mrf.mxu3 }
 0x498   : > { %v10789_v47 = vpop.f32.mrf.mxu2  ;;  %11941 = vst [vmem:[#allocation49_spill] sm:$0xff] %v10791_v11 }
 0x499   : > { %11940 = vst [vmem:[#allocation35_spill] sm:$0xff] %v10789_v47 }
 0x49e   : > { %5697 = vmatmul.f32.gmra.mxu2 %v11939_v59  ;;  %5854 = vmatmul.f32.gmra.mxu3 %v11942_v38  ;;  %v11949_v59 = vld [vmem:[#allocation55_spill] sm:$0xff] }
 0x49f   : > { %v10797_v16 = vpop.f32.mrf.mxu3 }
 0x4a0   : > { %v10795_v5 = vpop.f32.mrf.mxu2  ;;  %11944 = vst [vmem:[#allocation87_spill] sm:$0xff] %v10797_v16 }
 0x4a1   : > { %11943 = vst [vmem:[#allocation93_spill] sm:$0xff] %v10795_v5 }
 0x4a6   : > { %5701 = vmatmul.f32.gmra.mxu2 %v11942_v38  ;;  %5858 = vmatmul.f32.gmra.mxu3 %v11945_v21  ;;  %v11952_v38 = vld [vmem:[#allocation73_spill] sm:$0xff] }
 0x4a8   : > { %v10801_v37 = vpop.f32.mrf.mxu2 }
 0x4a9   : > { %11946 = vst [vmem:[#allocation77_spill] sm:$0xff] %v10801_v37 }
 0x4ad   : > { %v10805_v47 = vpop.f32.mrf.mxu3 }
 0x4ae   : > { %5705 = vmatmul.f32.gmra.mxu2 %v11945_v21  ;;  %5862 = vmatmul.f32.gmra.mxu3 %v11947_v3  ;;  %11948 = vst [vmem:[#allocation12_spill] sm:$0xff] %v10805_v47  ;;  %v11955_v21 = vld [vmem:[#allocation20_spill] sm:$0xff] }
 0x4b5   : > { %v10809_v11 = vpop.f32.mrf.mxu2  ;;  %v10811_v5 = vpop.f32.mrf.mxu3 }
 0x4b6   : > { %5709 = vmatmul.f32.gmra.mxu2 %v11947_v3  ;;  %5866 = vmatmul.f32.gmra.mxu3 %v11949_v59  ;;  %11950 = vst [vmem:[#allocation64_spill] sm:$0xff] %v10809_v11  ;;  %v11958_v11 = vld [vmem:[#allocation75_spill] sm:$0xff] }
 0x4b7   : > { %11951 = vst [vmem:[#allocation66_spill] sm:$0xff] %v10811_v5 }
 0x4bd   : > { %v10815_v16 = vpop.f32.mrf.mxu2 }
 0x4be   : > { %5713 = vmatmul.f32.gmra.mxu2 %v11949_v59  ;;  %5870 = vmatmul.f32.gmra.mxu3 %v11952_v38  ;;  %11953 = vst [vmem:[#allocation63_spill] sm:$0xff] %v10815_v16  ;;  %v11961_v16 = vld [vmem:[#allocation94_spill] sm:$0xff] }
 0x4c2   : > { %v10817_v37 = vpop.f32.mrf.mxu3 }
 0x4c3   : > { %11954 = vst [vmem:[#allocation45_spill] sm:$0xff] %v10817_v37 }
 0x4c6   : > { %5717 = vmatmul.f32.gmra.mxu2 %v11952_v38  ;;  %5874 = vmatmul.f32.gmra.mxu3 %v11955_v21  ;;  %v11963_v38 = vld [vmem:[#allocation46_spill] sm:$0xff] }
 0x4ca   : > { %v10821_v47 = vpop.f32.mrf.mxu2  ;;  %v10823_v3 = vpop.f32.mrf.mxu3 }
 0x4cb   : > { %11956 = vst [vmem:[#allocation31_spill] sm:$0xff] %v10821_v47 }
 0x4cc   : > { %11957 = vst [vmem:[#allocation74_spill] sm:$0xff] %v10823_v3 }
 0x4ce   : > { %5721 = vmatmul.f32.gmra.mxu2 %v11955_v21  ;;  %5878 = vmatmul.f32.gmra.mxu3 %v11958_v11  ;;  %v10840_v21 = vld [vmem:[%s11138_s6] ss:$0 sm:$0xff] }
 0x4d2   : > { %v10827_v5 = vpop.f32.mrf.mxu2  ;;  %v10829_v59 = vpop.f32.mrf.mxu3 }
 0x4d3   : > { %11959 = vst [vmem:[#allocation71_spill] sm:$0xff] %v10827_v5 }
 0x4d4   : > { %11960 = vst [vmem:[#allocation53_spill] sm:$0xff] %v10829_v59 }
 0x4d6   : > { %5725 = vmatmul.f32.gmra.mxu2 %v11958_v11  ;;  %5882 = vmatmul.f32.gmra.mxu3 %v11961_v16 }
 0x4da   : > { %v10833_v37 = vpop.f32.mrf.mxu2 }
 0x4db   : > { %11962 = vst [vmem:[#allocation59_spill] sm:$0xff] %v10833_v37 }
 0x4de   : > { %5729 = vmatmul.f32.gmra.mxu2 %v11961_v16  ;;  %5886 = vmatmul.f32.gmra.mxu3 %v11963_v38  ;;  %v5219_v47 = vpop.f32.mrf.mxu3 }
 0x4e6   : > { %5733 = vmatmul.f32.gmra.mxu2 %v11963_v38  ;;  %5890 = vmatmul.f32.gmra.mxu3 %v9994_v20  ;;  %v5018_v59 = vpop.f32.mrf.mxu2 }
 0x4e7   : > { %v5019_v11 = vadd.f32 %v10840_v21, %v5018_v59 }
 0x4e9   : > { %v10845_v3 = vadd.f32 %v5219_v47, %v5019_v11  ;;  %v5223_v37 = vpop.f32.mrf.mxu3 }
 0x4ee   : > { %5737 = vmatmul.f32.gmra.mxu2 %v9994_v20  ;;  %5894 = vmatmul.f32.gmra.mxu3 %v10038_v28 }
 0x4f1   : > { %v5026_v16 = vpop.f32.mrf.mxu2  ;;  %v5227_v5 = vpop.f32.mrf.mxu3 }
 0x4f2   : > { %v5027_v13 = vadd.f32 %v10840_v21, %v5026_v16 }
 0x4f4   : > { %v10850_v62 = vadd.f32 %v5223_v37, %v5027_v13  ;;  %v4803_v13 = vadd.f32 %v10840_v21, %v10236_v50 }
 0x4f6   : > { %5741 = vmatmul.f32.gmra.mxu2 %v10038_v28  ;;  %5898 = vmatmul.f32.gmra.mxu3 %v10040_v6 }
 0x4f9   : > { %v5034_v38 = vpop.f32.mrf.mxu2  ;;  %v5231_v9 = vpop.f32.mrf.mxu3 }
 0x4fa   : > { %v5035_v47 = vadd.f32 %v10840_v21, %v5034_v38 }
 0x4fc   : > { %v10855_v59 = vadd.f32 %v5227_v5, %v5035_v47  ;;  %v5112_v5 = vadd.f32 %v10202_v22, %v4803_v13  ;;  %v4811_v47 = vadd.f32 %v10840_v21, %v10290_v53 }
 0x4fe   : > { %5745 = vmatmul.f32.gmra.mxu2 %v10040_v6  ;;  %5902 = vmatmul.f32.gmra.mxu3 %v10110_v34  ;;  %v5274_v50 = vadd.f32 %v10558_v4, %v5112_v5  ;;  %v10892_v5 = vpop.f32.mrf.mxu0 }
 0x500   : > { %v5460_v22 = vadd.f32 %v10568_v43, %v5274_v50 }
 0x501   : > { %v5042_v20 = vpop.f32.mrf.mxu2  ;;  %v5235_v11 = vpop.f32.mrf.mxu3 }
 0x502   : > { %v5043_v16 = vadd.f32 %v10840_v21, %v5042_v20 }
 0x504   : > { %v10862_v28 = vadd.f32 %v5231_v9, %v5043_v16 }
 0x506   : > { %11964 = vst [vmem:[#allocation41_spill] sm:$0xff] %v10862_v28  ;;  %5749 = vmatmul.f32.gmra.mxu2 %v10110_v34  ;;  %5906 = vmatmul.f32.gmra.mxu3 %v10259_v25  ;;  %v5116_v34 = vadd.f32 %v10238_v12, %v4811_v47 }
 0x508   : > { %v5279_v53 = vadd.f32 %v10605_v41, %v5116_v34 }
 0x509   : > { %v5050_v37 = vpop.f32.mrf.mxu2  ;;  %v5843_v6 = vpop.f32.mrf.mxu3 }
 0x50a   : > { %v5051_v38 = vadd.f32 %v10840_v21, %v5050_v37  ;;  %v4819_v37 = vadd.f32 %v10840_v21, %v10319_v26 }
 0x50c   : > { %v10870_v20 = vadd.f32 %v5235_v11, %v5051_v38  ;;  %v5120_v12 = vadd.f32 %v10292_v2, %v4819_v37  ;;  %v11965_v11 = vld [vmem:[#allocation34_spill] sm:$0xff]  ;;  %v10900_v38 = vpop.f32.mrf.mxu1 }
 0x50d   : > { %v4827_v41 = vadd.f32 %v10840_v21, %v11965_v11  ;;  %v11967_v2 = vld [vmem:[#allocation82_spill] sm:$0xff]  ;;  %v11970_v11 = vld [vmem:[#allocation68_spill] sm:$0xff] }
 0x50e   : > { %5753 = vmatmul.f32.gmra.mxu2 %v10259_v25  ;;  %5910 = vmatmul.f32.gmra.mxu3 %v10190_v18  ;;  %v5466_v25 = vadd.f32 %v10614_v24, %v5279_v53 }
 0x50f   : > { %v5124_v24 = vadd.f32 %v11967_v2, %v4827_v41  ;;  %v11971_v41 = vld [vmem:[#allocation24_spill] sm:$0xff] }
 0x511   : > { %v5690_v9 = vpop.f32.mrf.mxu2  ;;  %v5847_v16 = vpop.f32.mrf.mxu3 }
 0x512   : > { %v5691_v13 = vadd.f32 %v5690_v9, %v5460_v22  ;;  %v4835_v9 = vadd.f32 %v10840_v21, %v10413_v1 }
 0x514   : > { %v5844_v28 = vadd.f32 %v5843_v6, %v5691_v13  ;;  %v10906_v13 = vpop.f32.mrf.mxu0 }
 0x516   : > { %5970 = vst.msk [vmem:[%s10882_s16] sm:$0xff] %vm339_vm0, %v5844_v28  ;;  %5757 = vmatmul.f32.gmra.mxu2 %v10190_v18  ;;  %5914 = vmatmul.f32.gmra.mxu3 %v10325_v35  ;;  %v5284_v28 = vadd.f32 %v10645_v55, %v5120_v12  ;;  %v11966_v18 = vld [vmem:[#allocation83_spill] sm:$0xff] }
 0x518   : > { %v5472_v47 = vadd.f32 %v10652_v49, %v5284_v28 }
 0x519   : > { %v5694_v4 = vpop.f32.mrf.mxu2  ;;  %v5851_v26 = vpop.f32.mrf.mxu3 }
 0x51a   : > { %v5695_v43 = vadd.f32 %v5694_v4, %v5466_v25  ;;  %v10914_v25 = vpop.f32.mrf.mxu1  ;;  %v11969_v4 = vld [vmem:[#allocation91_spill] sm:$0xff] }
 0x51c   : > { %v5848_v6 = vadd.f32 %v5847_v16, %v5695_v43  ;;  %v5289_v16 = vadd.f32 %v10681_v29, %v5124_v24  ;;  %v4843_v29 = vadd.f32 %v10840_v21, %v11969_v4 }
 0x51e   : > { %5971 = vst.msk [vmem:[%s10882_s16 + $0x8] sm:$0xff] %vm339_vm0, %v5848_v6  ;;  %5761 = vmatmul.f32.gmra.mxu2 %v10325_v35  ;;  %5918 = vmatmul.f32.gmra.mxu3 %v11966_v18  ;;  %v11968_v35 = vld [vmem:[#allocation54_spill] sm:$0xff]  ;;  %v5478_v37 = vadd.f32 %v10690_v57, %v5289_v16  ;;  %v5132_v57 = vadd.f32 %v11971_v41, %v4843_v29  ;;  %v10924_v6 = vpop.f32.mrf.mxu0 }
 0x51f   : > { %v5128_v49 = vadd.f32 %v11968_v35, %v4835_v9  ;;  %v11974_v9 = vld [vmem:[#allocation81_spill] sm:$0xff] }
 0x521   : > { %v5698_v50 = vpop.f32.mrf.mxu2  ;;  %v5855_v34 = vpop.f32.mrf.mxu3  ;;  %v5294_v43 = vadd.f32 %v10711_v63, %v5128_v49 }
 0x522   : > { %v5699_v22 = vadd.f32 %v5698_v50, %v5472_v47  ;;  %v11972_v47 = vld [vmem:[#allocation67_spill] sm:$0xff] }
 0x523   : > { %v5484_v28 = vadd.f32 %v10718_v15, %v5294_v43  ;;  %v4851_v50 = vadd.f32 %v10840_v21, %v11972_v47 }
 0x524   : > { %v5852_v55 = vadd.f32 %v5851_v26, %v5699_v22  ;;  %v11973_v22 = vld [vmem:[#allocation18_spill] sm:$0xff] }
 0x525   : > { %v5136_v15 = vadd.f32 %v11974_v9, %v4851_v50  ;;  %v11977_v50 = vld [vmem:[#allocation47_spill] sm:$0xff]  ;;  %v11979_v9 = vld [vmem:[#allocation76_spill] sm:$0xff] }
 0x526   : > { %5972 = vst.msk [vmem:[%s10882_s16 + $0x10] sm:$0xff] %vm339_vm0, %v5852_v55  ;;  %5765 = vmatmul.f32.gmra.mxu2 %v11966_v18  ;;  %5922 = vmatmul.f32.gmra.mxu3 %v10359_v23  ;;  %v10938_v49 = vpop.f32.mrf.mxu0 }
 0x529   : > { %v5702_v53 = vpop.f32.mrf.mxu2  ;;  %v5859_v12 = vpop.f32.mrf.mxu3 }
 0x52a   : > { %v5703_v1 = vadd.f32 %v5702_v53, %v5478_v37  ;;  %v4859_v53 = vadd.f32 %v10840_v21, %v10537_v19  ;;  %v4867_v19 = vadd.f32 %v10840_v21, %v10573_v36 }
 0x52c   : > { %v5856_v26 = vadd.f32 %v5855_v34, %v5703_v1  ;;  %v10929_v34 = vpop.f32.mrf.mxu1 }
 0x52e   : > { %5973 = vst.msk [vmem:[%s10882_s16 + $0x18] sm:$0xff] %vm339_vm0, %v5856_v26  ;;  %5769 = vmatmul.f32.gmra.mxu2 %v10359_v23  ;;  %5926 = vmatmul.f32.gmra.mxu3 %v11970_v11  ;;  %v5299_v23 = vadd.f32 %v10739_v56, %v5132_v57  ;;  %v10953_v41 = vpop.f32.mrf.mxu0 }
 0x530   : > { %v5490_v55 = vadd.f32 %v10741_v14, %v5299_v23  ;;  %v11975_v14 = vld [vmem:[#allocation89_spill] sm:$0xff] }
 0x531   : > { %v5706_v18 = vpop.f32.mrf.mxu2  ;;  %v5863_v2 = vpop.f32.mrf.mxu3  ;;  %v5140_v4 = vadd.f32 %v11975_v14, %v4859_v53  ;;  %v4883_v53 = vadd.f32 %v10840_v21, %v10664_v45  ;;  %v4891_v45 = vadd.f32 %v10840_v21, %v10698_v58  ;;  %v4899_v58 = vadd.f32 %v10840_v21, %v10714_v61 }
 0x532   : > { %v5707_v24 = vadd.f32 %v5706_v18, %v5484_v28  ;;  %v11976_v28 = vld [vmem:[#allocation15_spill] sm:$0xff]  ;;  %v4907_v61 = vadd.f32 %v10840_v21, %v10734_v10  ;;  %v4915_v10 = vadd.f32 %v10840_v21, %v10750_v42  ;;  %v4923_v42 = vadd.f32 %v10840_v21, %v10763_v54 }
 0x533   : > { %v5309_v57 = vadd.f32 %v10768_v46, %v5140_v4 }
 0x534   : > { %v5860_v63 = vadd.f32 %v5859_v12, %v5707_v24  ;;  %v5304_v12 = vadd.f32 %v10754_v17, %v5136_v15  ;;  %v10943_v1 = vpop.f32.mrf.mxu1 }
 0x536   : > { %5974 = vst.msk [vmem:[%s10882_s16 + $0x20] sm:$0xff] %vm339_vm0, %v5860_v63  ;;  %5773 = vmatmul.f32.gmra.mxu2 %v11970_v11  ;;  %5930 = vmatmul.f32.gmra.mxu3 %v11973_v22  ;;  %v5496_v29 = vadd.f32 %v10757_v0, %v5304_v12  ;;  %v5144_v0 = vadd.f32 %v11976_v28, %v4867_v19 }
 0x537   : > { %v4875_v63 = vadd.f32 %v10840_v21, %v11977_v50  ;;  %v5156_v19 = vadd.f32 %v10666_v51, %v4891_v45 }
 0x538   : > { %v5314_v23 = vadd.f32 %v10892_v5, %v5144_v0 }
 0x539   : > { %v5710_v16 = vpop.f32.mrf.mxu2  ;;  %v5867_v35 = vpop.f32.mrf.mxu3  ;;  %v5148_v15 = vadd.f32 %v11979_v9, %v4875_v63 }
 0x53a   : > { %v5711_v37 = vadd.f32 %v5710_v16, %v5490_v55 }
 0x53c   : > { %v5864_v56 = vadd.f32 %v5863_v2, %v5711_v37  ;;  %v10961_v18 = vpop.f32.mrf.mxu1  ;;  %v5502_v2 = vadd.f32 %v10770_v48, %v5309_v57  ;;  %v5508_v48 = vadd.f32 %v10900_v38, %v5314_v23 }
 0x53e   : > { %5975 = vst.msk [vmem:[%s10882_s16 + $0x28] sm:$0xff] %vm339_vm0, %v5864_v56  ;;  %5777 = vmatmul.f32.gmra.mxu2 %v11973_v22  ;;  %5934 = vmatmul.f32.gmra.mxu3 %v10471_v39  ;;  %v5338_v22 = vpop.f32.mrf.mxu0  ;;  %v5319_v56 = vadd.f32 %v10906_v13, %v5148_v15 }
 0x540   : > { %v5514_v14 = vadd.f32 %v10914_v25, %v5319_v56 }
 0x541   : > { %v5714_v26 = vpop.f32.mrf.mxu2  ;;  %v5871_v43 = vpop.f32.mrf.mxu3 }
 0x542   : > { %v5715_v11 = vadd.f32 %v5714_v26, %v5496_v29 }
 0x544   : > { %v5868_v17 = vadd.f32 %v5867_v35, %v5715_v11  ;;  %v5537_v35 = vpop.f32.mrf.mxu1 }
 0x546   : > { %5976 = vst.msk [vmem:[%s10882_s16 + $0x30] sm:$0xff] %vm339_vm0, %v5868_v17  ;;  %5781 = vmatmul.f32.gmra.mxu2 %v10471_v39  ;;  %5938 = vmatmul.f32.gmra.mxu3 %v10577_v31  ;;  %v11978_v39 = vld [vmem:[#allocation11_spill] sm:$0xff]  ;;  %v5343_v38 = vpop.f32.mrf.mxu0 }
 0x549   : > { %v5718_v24 = vpop.f32.mrf.mxu2  ;;  %v5875_v36 = vpop.f32.mrf.mxu3 }
 0x54a   : > { %v5719_v47 = vadd.f32 %v5718_v24, %v5502_v2 }
 0x54c   : > { %v5872_v46 = vadd.f32 %v5871_v43, %v5719_v47  ;;  %v5543_v43 = vpop.f32.mrf.mxu1 }
 0x54e   : > { %5977 = vst.msk [vmem:[%s10882_s16 + $0x38] sm:$0xff] %vm339_vm0, %v5872_v46  ;;  %5785 = vmatmul.f32.gmra.mxu2 %v10577_v31  ;;  %5942 = vmatmul.f32.gmra.mxu3 %v11978_v39  ;;  %v11980_v31 = vld [vmem:[#allocation44_spill] sm:$0xff]  ;;  %v5348_v28 = vpop.f32.mrf.mxu0 }
 0x54f   : > { %v5152_v12 = vadd.f32 %v11980_v31, %v4883_v53  ;;  %v11981_v31 = vld [vmem:[#allocation10_spill] sm:$0xff] }
 0x551   : > { %v5722_v55 = vpop.f32.mrf.mxu2  ;;  %v5879_v16 = vpop.f32.mrf.mxu3  ;;  %v5324_v11 = vadd.f32 %v10924_v6, %v5152_v12  ;;  %v5329_v6 = vadd.f32 %v10938_v49, %v5156_v19  ;;  %v4931_v12 = vadd.f32 %v10840_v21, %v11981_v31  ;;  %v11991_v31 = vld [vmem:[#allocation77_spill] sm:$0xff] }
 0x552   : > { %v5723_v37 = vadd.f32 %v5722_v55, %v5508_v48 }
 0x553   : > { %v5520_v25 = vadd.f32 %v10929_v34, %v5324_v11  ;;  %v5526_v51 = vadd.f32 %v10943_v1, %v5329_v6  ;;  %v11985_v6 = vld [vmem:[#allocation52_spill] sm:$0xff] }
 0x554   : > { %v5876_v5 = vadd.f32 %v5875_v36, %v5723_v37  ;;  %v5549_v24 = vpop.f32.mrf.mxu1 }
 0x556   : > { %5978 = vst.msk [vmem:[%s10882_s16 + $0x40] sm:$0xff] %vm339_vm0, %v5876_v5  ;;  %5789 = vmatmul.f32.gmra.mxu2 %v11978_v39  ;;  %5946 = vmatmul.f32.gmra.mxu3 %v10608_v33  ;;  %v5353_v50 = vpop.f32.mrf.mxu0 }
 0x559   : > { %v5726_v4 = vpop.f32.mrf.mxu2  ;;  %v5883_v29 = vpop.f32.mrf.mxu3 }
 0x55a   : > { %v5727_v26 = vadd.f32 %v5726_v4, %v5514_v14 }
 0x55c   : > { %v5880_v13 = vadd.f32 %v5879_v16, %v5727_v26 }
 0x55e   : > { %5979 = vst.msk [vmem:[%s10882_s16 + $0x48] sm:$0xff] %vm339_vm0, %v5880_v13  ;;  %5793 = vmatmul.f32.gmra.mxu2 %v10608_v33  ;;  %5950 = vmatmul.f32.gmra.mxu3 %v10692_v52  ;;  %v5160_v33 = vadd.f32 %v10700_v60, %v4899_v58  ;;  %v5555_v60 = vpop.f32.mrf.mxu1  ;;  %v5358_v15 = vpop.f32.mrf.mxu0  ;;  %v11983_v13 = vld [vmem:[#allocation40_spill] sm:$0xff] }
 0x55f   : > { %v4939_v11 = vadd.f32 %v10840_v21, %v11983_v13 }
 0x560   : > { %v5334_v63 = vadd.f32 %v10953_v41, %v5160_v33 }
 0x561   : > { %v5730_v17 = vpop.f32.mrf.mxu2  ;;  %v5887_v57 = vpop.f32.mrf.mxu3 }
 0x562   : > { %v5731_v0 = vadd.f32 %v5730_v17, %v5520_v25  ;;  %v5532_v1 = vadd.f32 %v10961_v18, %v5334_v63 }
 0x564   : > { %v5884_v2 = vadd.f32 %v5883_v29, %v5731_v0 }
 0x566   : > { %5980 = vst.msk [vmem:[%s10882_s16 + $0x50] sm:$0xff] %vm339_vm0, %v5884_v2  ;;  %5797 = vmatmul.f32.gmra.mxu2 %v10692_v52  ;;  %5954 = vmatmul.f32.gmra.mxu3 %v10723_v44  ;;  %v5164_v52 = vadd.f32 %v10716_v32, %v4907_v61  ;;  %v5168_v32 = vadd.f32 %v10736_v7, %v4915_v10  ;;  %v5561_v55 = vpop.f32.mrf.mxu1  ;;  %v5363_v7 = vpop.f32.mrf.mxu0  ;;  %v11988_v10 = vld [vmem:[#allocation29_spill] sm:$0xff] }
 0x568   : > { %v5339_v41 = vadd.f32 %v5338_v22, %v5164_v52  ;;  %v5344_v22 = vadd.f32 %v5343_v38, %v5168_v32 }
 0x569   : > { %v5734_v34 = vpop.f32.mrf.mxu2  ;;  %v5891_v36 = vpop.f32.mrf.mxu3 }
 0x56a   : > { %v5735_v47 = vadd.f32 %v5734_v34, %v5526_v51 }
 0x56c   : > { %v5888_v49 = vadd.f32 %v5887_v57, %v5735_v47  ;;  %v11984_v57 = vld [vmem:[#allocation56_spill] sm:$0xff] }
 0x56e   : > { %5981 = vst.msk [vmem:[%s10882_s16 + $0x58] sm:$0xff] %vm339_vm0, %v5888_v49  ;;  %5801 = vmatmul.f32.gmra.mxu2 %v10723_v44  ;;  %5958 = vmatmul.f32.gmra.mxu3 %v10721_v8  ;;  %v5538_v44 = vadd.f32 %v5537_v35, %v5339_v41  ;;  %v5544_v35 = vadd.f32 %v5543_v43, %v5344_v22  ;;  %v5567_v54 = vpop.f32.mrf.mxu1  ;;  %v5368_v45 = vpop.f32.mrf.mxu0 }
 0x571   : > { %v5738_v46 = vpop.f32.mrf.mxu2  ;;  %v5895_v23 = vpop.f32.mrf.mxu3 }
 0x572   : > { %v5739_v39 = vadd.f32 %v5738_v46, %v5532_v1 }
 0x574   : > { %v5892_v9 = vadd.f32 %v5891_v36, %v5739_v39  ;;  %v11986_v36 = vld [vmem:[#allocation92_spill] sm:$0xff] }
 0x576   : > { %5982 = vst.msk [vmem:[%s10882_s16 + $0x60] sm:$0xff] %vm339_vm0, %v5892_v9  ;;  %5805 = vmatmul.f32.gmra.mxu2 %v10721_v8  ;;  %5962 = vmatmul.f32.gmra.mxu3 %v10744_v30  ;;  %v5172_v8 = vadd.f32 %v10752_v40, %v4923_v42  ;;  %v5573_v17 = vpop.f32.mrf.mxu1  ;;  %v5373_v33 = vpop.f32.mrf.mxu0 }
 0x578   : > { %v5349_v38 = vadd.f32 %v5348_v28, %v5172_v8  ;;  %v5180_v28 = vadd.f32 %v11984_v57, %v4939_v11 }
 0x579   : > { %v5742_v18 = vpop.f32.mrf.mxu2  ;;  %v5899_v48 = vpop.f32.mrf.mxu3 }
 0x57a   : > { %v5743_v16 = vadd.f32 %v5742_v18, %v5538_v44  ;;  %v5550_v29 = vadd.f32 %v5549_v24, %v5349_v38  ;;  %v4947_v24 = vadd.f32 %v10840_v21, %v11985_v6  ;;  %v5359_v34 = vadd.f32 %v5358_v15, %v5180_v28  ;;  %v11992_v38 = vld [vmem:[#allocation87_spill] sm:$0xff] }
 0x57b   : > { %v11995_v6 = vld [vmem:[#allocation63_spill] sm:$0xff] }
 0x57c   : > { %v5896_v37 = vadd.f32 %v5895_v23, %v5743_v16  ;;  %v5184_v47 = vadd.f32 %v11986_v36, %v4947_v24  ;;  %v4987_v24 = vadd.f32 %v10840_v21, %v11995_v6  ;;  %v11996_v36 = vld [vmem:[#allocation66_spill] sm:$0xff] }
 0x57e   : > { %5983 = vst.msk [vmem:[%s10882_s16 + $0x68] sm:$0xff] %vm339_vm0, %v5896_v37  ;;  %5809 = vmatmul.f32.gmra.mxu2 %v10744_v30  ;;  %5966 = vmatmul.f32.gmra.mxu3 %v10760_v27  ;;  %v11982_v30 = vld [vmem:[#allocation36_spill] sm:$0xff]  ;;  %v5579_v61 = vpop.f32.mrf.mxu1  ;;  %v5364_v23 = vadd.f32 %v5363_v7, %v5184_v47  ;;  %v5378_v39 = vpop.f32.mrf.mxu0  ;;  %v11990_v37 = vld [vmem:[#allocation49_spill] sm:$0xff]  ;;  %v5204_v47 = vadd.f32 %v11996_v36, %v4987_v24 }
 0x57f   : > { %v5176_v4 = vadd.f32 %v11982_v30, %v4931_v12  ;;  %v4971_v12 = vadd.f32 %v10840_v21, %v11991_v31 }
 0x580   : > { %v5568_v41 = vadd.f32 %v5567_v54, %v5364_v23 }
 0x581   : > { %v5746_v53 = vpop.f32.mrf.mxu2  ;;  %v5903_v5 = vpop.f32.mrf.mxu3  ;;  %v5354_v25 = vadd.f32 %v5353_v50, %v5176_v4  ;;  %v5562_v50 = vadd.f32 %v5561_v55, %v5359_v34  ;;  %v5196_v30 = vadd.f32 %v11992_v38, %v4971_v12 }
 0x582   : > { %v5747_v56 = vadd.f32 %v5746_v53, %v5544_v35 }
 0x583   : > { %v5556_v0 = vadd.f32 %v5555_v60, %v5354_v25  ;;  %v11987_v60 = vld [vmem:[#allocation35_spill] sm:$0xff] }
 0x584   : > { %v5900_v14 = vadd.f32 %v5899_v48, %v5747_v56  ;;  %v4955_v1 = vadd.f32 %v10840_v21, %v11987_v60  ;;  %v11989_v48 = vld [vmem:[#allocation93_spill] sm:$0xff] }
 0x585   : > { %v4963_v55 = vadd.f32 %v10840_v21, %v11989_v48 }
 0x586   : > { %5984 = vst.msk [vmem:[%s10882_s16 + $0x70] sm:$0xff] %vm339_vm0, %v5900_v14  ;;  %5813 = vmatmul.f32.gmra.mxu2 %v10760_v27  ;;  %v5188_v9 = vadd.f32 %v11988_v10, %v4955_v1  ;;  %v5585_v44 = vpop.f32.mrf.mxu1  ;;  %v5383_v8 = vpop.f32.mrf.mxu0 }
 0x587   : > { %v5192_v22 = vadd.f32 %v11990_v37, %v4963_v55  ;;  %v12000_v37 = vld [vmem:[#allocation74_spill] sm:$0xff] }
 0x588   : > { %v5369_v42 = vadd.f32 %v5368_v45, %v5188_v9 }
 0x589   : > { %v5750_v40 = vpop.f32.mrf.mxu2  ;;  %v5907_v26 = vpop.f32.mrf.mxu3  ;;  %v5374_v14 = vadd.f32 %v5373_v33, %v5192_v22 }
 0x58a   : > { %v5751_v43 = vadd.f32 %v5750_v40, %v5550_v29  ;;  %v5574_v7 = vadd.f32 %v5573_v17, %v5369_v42  ;;  %v11994_v17 = vld [vmem:[#allocation12_spill] sm:$0xff] }
 0x58b   : > { %v5580_v4 = vadd.f32 %v5579_v61, %v5374_v14  ;;  %v12002_v14 = vld [vmem:[#allocation53_spill] sm:$0xff] }
 0x58c   : > { %v5904_v19 = vadd.f32 %v5903_v5, %v5751_v43  ;;  %v11993_v43 = vld [vmem:[#allocation64_spill] sm:$0xff] }
 0x58d   : > { %v4979_v13 = vadd.f32 %v10840_v21, %v11993_v43 }
 0x58e   : > { %5985 = vst.msk [vmem:[%s10882_s16 + $0x78] sm:$0xff] %vm339_vm0, %v5904_v19  ;;  %v5591_v56 = vpop.f32.mrf.mxu1  ;;  %v5379_v19 = vadd.f32 %v5378_v39, %v5196_v30  ;;  %v11998_v39 = vld [vmem:[#allocation45_spill] sm:$0xff] }
 0x58f   : > { %v5200_v57 = vadd.f32 %v11994_v17, %v4979_v13 }
 0x590   : > { %v5586_v28 = vadd.f32 %v5585_v44, %v5379_v19 }
 0x591   : > { %v5754_v27 = vpop.f32.mrf.mxu2  ;;  %v5911_v58 = vpop.f32.mrf.mxu3 }
 0x592   : > { %v5755_v2 = vadd.f32 %v5754_v27, %v5556_v0 }
 0x594   : > { %v5908_v51 = vadd.f32 %v5907_v26, %v5755_v2  ;;  %v5388_v26 = vpop.f32.mrf.mxu0 }
 0x596   : > { %5986 = vst.msk [vmem:[%s10882_s16 + $0x80] sm:$0xff] %vm339_vm0, %v5908_v51  ;;  %v5597_v25 = vpop.f32.mrf.mxu1  ;;  %v5384_v51 = vadd.f32 %v5383_v8, %v5200_v57 }
 0x598   : > { %v5592_v61 = vadd.f32 %v5591_v56, %v5384_v51 }
 0x599   : > { %v5758_v49 = vpop.f32.mrf.mxu2  ;;  %v5915_v63 = vpop.f32.mrf.mxu3 }
 0x59a   : > { %v5759_v52 = vadd.f32 %v5758_v49, %v5562_v50 }
 0x59c   : > { %v5912_v46 = vadd.f32 %v5911_v58, %v5759_v52  ;;  %v5393_v2 = vpop.f32.mrf.mxu0  ;;  %v11997_v52 = vld [vmem:[#allocation31_spill] sm:$0xff] }
 0x59d   : > { %v4995_v60 = vadd.f32 %v10840_v21, %v11997_v52 }
 0x59e   : > { %5987 = vst.msk [vmem:[%s10882_s16 + $0x88] sm:$0xff] %vm339_vm0, %v5912_v46  ;;  %v5603_v34 = vpop.f32.mrf.mxu1  ;;  %v5389_v46 = vadd.f32 %v5388_v26, %v5204_v47 }
 0x59f   : > { %v5208_v10 = vadd.f32 %v11998_v39, %v4995_v60 }
 0x5a0   : > { %v5598_v9 = vadd.f32 %v5597_v25, %v5389_v46  ;;  %v12003_v46 = vld [vmem:[#allocation41_spill] sm:$0xff] }
 0x5a1   : > { %v5762_v15 = vpop.f32.mrf.mxu2  ;;  %v5919_v32 = vpop.f32.mrf.mxu3 }
 0x5a2   : > { %v5763_v18 = vadd.f32 %v5762_v15, %v5568_v41 }
 0x5a4   : > { %v5916_v16 = vadd.f32 %v5915_v63, %v5763_v18  ;;  %v5398_v23 = vpop.f32.mrf.mxu0  ;;  %v11999_v18 = vld [vmem:[#allocation71_spill] sm:$0xff] }
 0x5a5   : > { %v5003_v48 = vadd.f32 %v10840_v21, %v11999_v18 }
 0x5a6   : > { %5988 = vst.msk [vmem:[%s10882_s16 + $0x90] sm:$0xff] %vm339_vm0, %v5916_v16  ;;  %v5609_v44 = vpop.f32.mrf.mxu1  ;;  %v5394_v16 = vadd.f32 %v5393_v2, %v5208_v10 }
 0x5a7   : > { %v5212_v22 = vadd.f32 %v12000_v37, %v5003_v48 }
 0x5a8   : > { %v5604_v8 = vadd.f32 %v5603_v34, %v5394_v16 }
 0x5a9   : > { %v5766_v35 = vpop.f32.mrf.mxu2  ;;  %v5923_v53 = vpop.f32.mrf.mxu3  ;;  %v5399_v12 = vadd.f32 %v5398_v23, %v5212_v22 }
 0x5aa   : > { %v5767_v5 = vadd.f32 %v5766_v35, %v5574_v7 }
 0x5ab   : > { %v5610_v30 = vadd.f32 %v5609_v44, %v5399_v12 }
 0x5ac   : > { %v5920_v54 = vadd.f32 %v5919_v32, %v5767_v5  ;;  %v5403_v42 = vpop.f32.mrf.mxu0  ;;  %v12001_v5 = vld [vmem:[#allocation59_spill] sm:$0xff] }
 0x5ad   : > { %v5011_v56 = vadd.f32 %v10840_v21, %v12001_v5 }
 0x5ae   : > { %5989 = vst.msk [vmem:[%s10882_s16 + $0x98] sm:$0xff] %vm339_vm0, %v5920_v54  ;;  %v5615_v54 = vpop.f32.mrf.mxu1 }
 0x5af   : > { %v5216_v38 = vadd.f32 %v12002_v14, %v5011_v56 }
 0x5b1   : > { %v5770_v29 = vpop.f32.mrf.mxu2  ;;  %v5927_v40 = vpop.f32.mrf.mxu3  ;;  %v5404_v43 = vadd.f32 %v5403_v42, %v5216_v38 }
 0x5b2   : > { %v5771_v45 = vadd.f32 %v5770_v29, %v5580_v4 }
 0x5b3   : > { %v5616_v21 = vadd.f32 %v5615_v54, %v5404_v43 }
 0x5b4   : > { %v5924_v11 = vadd.f32 %v5923_v53, %v5771_v45  ;;  %v5408_v26 = vpop.f32.mrf.mxu0 }
 0x5b5   : > { %v5409_v57 = vadd.f32 %v5408_v26, %v10845_v3 }
 0x5b6   : > { %5990 = vst.msk [vmem:[%s10882_s16 + $0xa0] sm:$0xff] %vm339_vm0, %v5924_v11  ;;  %v5621_v13 = vpop.f32.mrf.mxu1 }
 0x5b9   : > { %v5774_v0 = vpop.f32.mrf.mxu2  ;;  %v5931_v27 = vpop.f32.mrf.mxu3 }
 0x5ba   : > { %v5775_v58 = vadd.f32 %v5774_v0, %v5586_v28  ;;  %v5622_v0 = vadd.f32 %v5621_v13, %v5409_v57 }
 0x5bc   : > { %v5928_v33 = vadd.f32 %v5927_v40, %v5775_v58  ;;  %v5413_v28 = vpop.f32.mrf.mxu0 }
 0x5bd   : > { %v5414_v24 = vadd.f32 %v5413_v28, %v10850_v62 }
 0x5be   : > { %5991 = vst.msk [vmem:[%s10882_s16 + $0xa8] sm:$0xff] %vm339_vm0, %v5928_v33 }
 0x5c1   : > { %v5778_v50 = vpop.f32.mrf.mxu2  ;;  %v5935_v49 = vpop.f32.mrf.mxu3 }
 0x5c2   : > { %v5779_v63 = vadd.f32 %v5778_v50, %v5592_v61 }
 0x5c4   : > { %v5932_v1 = vadd.f32 %v5931_v27, %v5779_v63  ;;  %v5627_v27 = vpop.f32.mrf.mxu1  ;;  %v5418_v51 = vpop.f32.mrf.mxu0 }
 0x5c5   : > { %v5628_v34 = vadd.f32 %v5627_v27, %v5414_v24  ;;  %v5419_v50 = vadd.f32 %v5418_v51, %v10855_v59 }
 0x5c6   : > { %5992 = vst.msk [vmem:[%s10882_s16 + $0xb0] sm:$0xff] %vm339_vm0, %v5932_v1 }
 0x5c9   : > { %v5782_v41 = vpop.f32.mrf.mxu2  ;;  %v5939_v15 = vpop.f32.mrf.mxu3 }
 0x5ca   : > { %v5783_v32 = vadd.f32 %v5782_v41, %v5598_v9 }
 0x5cc   : > { %v5936_v55 = vadd.f32 %v5935_v49, %v5783_v32  ;;  %v5633_v3 = vpop.f32.mrf.mxu1  ;;  %v5423_v52 = vpop.f32.mrf.mxu0 }
 0x5cd   : > { %v5634_v63 = vadd.f32 %v5633_v3, %v5419_v50  ;;  %v5424_v23 = vadd.f32 %v5423_v52, %v12003_v46 }
 0x5ce   : > { %5993 = vst.msk [vmem:[%s10882_s16 + $0xb8] sm:$0xff] %vm339_vm0, %v5936_v55 }
 0x5d1   : > { %v5786_v7 = vpop.f32.mrf.mxu2  ;;  %v5943_v35 = vpop.f32.mrf.mxu3 }
 0x5d2   : > { %v5787_v53 = vadd.f32 %v5786_v7, %v5604_v8 }
 0x5d4   : > { %v5940_v31 = vadd.f32 %v5939_v15, %v5787_v53  ;;  %v5639_v39 = vpop.f32.mrf.mxu1  ;;  %v5428_v59 = vpop.f32.mrf.mxu0 }
 0x5d5   : > { %v5640_v10 = vadd.f32 %v5639_v39, %v5424_v23  ;;  %v5429_v44 = vadd.f32 %v5428_v59, %v10870_v20 }
 0x5d6   : > { %5994 = vst.msk [vmem:[%s10882_s16 + $0xc0] sm:$0xff] %vm339_vm0, %v5940_v31 }
 0x5d9   : > { %v5790_v4 = vpop.f32.mrf.mxu2  ;;  %v5947_v29 = vpop.f32.mrf.mxu3 }
 0x5da   : > { %v5791_v40 = vadd.f32 %v5790_v4, %v5610_v30 }
 0x5dc   : > { %v5944_v45 = vadd.f32 %v5943_v35, %v5791_v40  ;;  %v5645_v18 = vpop.f32.mrf.mxu1 }
 0x5dd   : > { %v5646_v48 = vadd.f32 %v5645_v18, %v5429_v44 }
 0x5de   : > { %5995 = vst.msk [vmem:[%s10882_s16 + $0xc8] sm:$0xff] %vm339_vm0, %v5944_v45 }
 0x5e1   : > { %v5794_v11 = vpop.f32.mrf.mxu2  ;;  %v5951_v25 = vpop.f32.mrf.mxu3 }
 0x5e2   : > { %v5795_v19 = vadd.f32 %v5794_v11, %v5616_v21 }
 0x5e4   : > { %v5948_v17 = vadd.f32 %v5947_v29, %v5795_v19 }
 0x5e6   : > { %5996 = vst.msk [vmem:[%s10882_s16 + $0xd0] sm:$0xff] %vm339_vm0, %v5948_v17 }
 0x5e9   : > { %v5798_v58 = vpop.f32.mrf.mxu2  ;;  %v5955_v33 = vpop.f32.mrf.mxu3 }
 0x5ea   : > { %v5799_v2 = vadd.f32 %v5798_v58, %v5622_v0 }
 0x5ec   : > { %v5952_v6 = vadd.f32 %v5951_v25, %v5799_v2 }
 0x5ee   : > { %5997 = vst.msk [vmem:[%s10882_s16 + $0xd8] sm:$0xff] %vm339_vm0, %v5952_v6 }
 0x5f1   : > { %v5802_v36 = vpop.f32.mrf.mxu2  ;;  %v5959_v49 = vpop.f32.mrf.mxu3 }
 0x5f2   : > { %v5803_v47 = vadd.f32 %v5802_v36, %v5628_v34 }
 0x5f4   : > { %v5956_v61 = vadd.f32 %v5955_v33, %v5803_v47 }
 0x5f6   : > { %5998 = vst.msk [vmem:[%s10882_s16 + $0xe0] sm:$0xff] %vm339_vm0, %v5956_v61 }
 0x5f9   : > { %v5806_v62 = vpop.f32.mrf.mxu2  ;;  %v5963_v9 = vpop.f32.mrf.mxu3 }
 0x5fa   : > { %v5807_v60 = vadd.f32 %v5806_v62, %v5634_v63 }
 0x5fc   : > { %v5960_v1 = vadd.f32 %v5959_v49, %v5807_v60 }
 0x5fe   : > { %5999 = vst.msk [vmem:[%s10882_s16 + $0xe8] sm:$0xff] %vm339_vm0, %v5960_v1 }
 0x601   : > { %v5810_v41 = vpop.f32.mrf.mxu2  ;;  %v5967_v42 = vpop.f32.mrf.mxu3 }
 0x602   : > { %v5811_v15 = vadd.f32 %v5810_v41, %v5640_v10 }
 0x604   : > { %v5964_v32 = vadd.f32 %v5963_v9, %v5811_v15 }
 0x606   : > { %6000 = vst.msk [vmem:[%s10882_s16 + $0xf0] sm:$0xff] %vm339_vm0, %v5964_v32 }
 0x609   : > { %v5814_v55 = vpop.f32.mrf.mxu2 }
 0x60a   : > { %v5815_v16 = vadd.f32 %v5814_v55, %v5646_v48 }
 0x60c   : > { %v5968_v37 = vadd.f32 %v5967_v42, %v5815_v16 }
 0x60e   : > { %6001 = vst.msk [vmem:[%s10882_s16 + $0xf8] sm:$0xff] %vm339_vm0, %v5968_v37 }
 0x60f   : > { %6357 = shalt.err (!%p6354_p4)
}
 0x610   : > { %s6403_s22 = smov 128   ;;  %s6404_s16 = smov 8  }
 0x611   : > { %6109 = dma.vmem_to_hbm [thread:$0]  (%p6495_p11), %s6016_s17, 4096, %s6018_s11, %s6003_s28, %s6403_s22, %s6403_s22, %s6404_s16  }
 0x612 PF: > { %s6032_s10 = sand.u32 1, %s6384_s24   ;;  %p12004_p7 = scmp.ge.s32.totalorder %s6396_s27, 2 }
 0x613   : > { %s6033_s21 = scalar_lea.sflag [#allocation4], %s6032_s10 }
 0x614   : > { %p6116_p5 = pnand %p12004_p7, %p6499_p12 }
 0x616   : > { %p6117_p8 = pneg %p6116_p5 }
 0x618   : > { %6379 = dma.done.wait (%p6117_p8), %s6033_s21, 4096  }
 0x619   : > { %6381 = vsyncadd (%p6117_p8), %s6033_s21, 4294963200  ;;  %s12005_s23 = sld [smem:[#allocation8_spill]]  ;;  %p20_p10 = scmp.ge.s32.totalorder %s6470_s30, 4  }
 0x61a   : > { %s12006_s24 = smov %s6388_s25  ;;  %s12007_s25 = smov %s6392_s26 }
 0x61b   : > { %s12009_s27 = smov %s6470_s30  ;;  %22 = sbr.rel (!%p20_p10) target bundleno = 5 (0x5), region = 93 }
 0x61f   : > { %s12008_s26 = smov %s12005_s23 }
 0x620   :  { %6039 = vsyncpa [#allocation3], 1 }
 0x621   :  { %6041 = vsyncpa [#allocation3 + $0x1], 1 }
 0x622   :  { %6042 = vsyncpa [#allocation4], 1 }
 0x623   :  { %6044 = vsyncpa [#allocation4 + $0x1], 1 }

</bundles_post_ra>
